<compile_context>
chip_gen: v7x
topology: tpu7x:2x2x1
jax: 0.10.0
libtpu: 0.0.40
codegen_flags: <defaults>
</compile_context>

<pallas_src>
import functools

import jax
import jax.numpy as jnp
import numpy as np
from jax import lax
from jax.experimental import pallas as pl
from jax.experimental.pallas import tpu as pltpu


# ----------------------------- math helpers -----------------------------

def _layernorm(x, gamma, beta, eps=1e-5):
    mean = jnp.mean(x, axis=-1, keepdims=True)
    var = jnp.mean((x - mean) ** 2, axis=-1, keepdims=True)
    return (x - mean) * lax.rsqrt(var + eps) * gamma + beta


def _gelu_exact(x):
    # PyTorch nn.GELU() default (approximate='none')
    return 0.5 * x * (1.0 + lax.erf(x * (1.0 / np.sqrt(2.0))))


# ------------------------------- kernel ---------------------------------

def decoder_kernel(
    z_ref, c_ref,
    wz_ref, wc_ref, bf_ref, ln1g_ref, ln1b_ref,
    wih0_ref, b0_ref, whh0_ref, w1_ref, b1_ref,
    wp1_ref, bp1_ref, ln2g_ref, ln2b_ref,
    wp2_ref, bp2_ref,
    out_ref,
    hbuf_ref,
):
    f32 = jnp.float32
    Bp = z_ref.shape[0]                  # padded batch (multiple of 8)
    Hp = whh0_ref.shape[0]               # lane-padded hidden size (multiple of 128)
    seq_len = out_ref.shape[0] // Bp

    # ---- condition_fusion (once): Linear(cat(z,cond)) -> LN -> GELU -> Dropout(eval)
    # concat folded into two matmuls: [z|c] @ W == z @ Wz + c @ Wc
    fused = (
        jnp.dot(z_ref[...], wz_ref[...], preferred_element_type=f32)
        + jnp.dot(c_ref[...], wc_ref[...], preferred_element_type=f32)
        + bf_ref[...]
    )
    fused = _gelu_exact(_layernorm(fused, ln1g_ref[...], ln1b_ref[...]))   # (Bp, H)

    # ---- hoisted, loop-invariant layer-0 input gates (bias folded in)
    x_gates0 = (
        jnp.dot(fused, wih0_ref[...], preferred_element_type=f32) + b0_ref[...]
    )                                                                      # (Bp, 4Hp)

    # ---- hoisted layer-1 bias broadcast (JAX does not CSE broadcasts in loops)
    b1_full = jnp.broadcast_to(b1_ref[...], (Bp, 4 * Hp))

    def gates_to_hc(gates, c_prev):
        # Gate blocks are lane-tile aligned at offsets 0/Hp/2Hp/3Hp -> no XLU.
        i = jax.nn.sigmoid(gates[:, 0 * Hp:1 * Hp])
        f = jax.nn.sigmoid(gates[:, 1 * Hp:2 * Hp])
        g = jnp.tanh(gates[:, 2 * Hp:3 * Hp])
        o = jax.nn.sigmoid(gates[:, 3 * Hp:4 * Hp])
        c_new = f * c_prev + i * g
        return o * jnp.tanh(c_new), c_new

    zeros = jnp.zeros((Bp, Hp), f32)
    h0, c0, h1, c1 = zeros, zeros, zeros, zeros

    # Fully static unroll of the short, fixed-length recurrence.
    for t in range(seq_len):
        # layer 0: only the recurrent matmul remains inside the loop
        g0 = x_gates0 + jnp.dot(h0, whh0_ref[...], preferred_element_type=f32)
        h0, c0 = gates_to_hc(g0, c0)

        # layer 1: fused input+recurrent matmul (Bp, 2Hp) x (2Hp, 4Hp)
        x1 = jnp.concatenate([h0, h1], axis=-1)
        g1 = jnp.dot(x1, w1_ref[...], preferred_element_type=f32) + b1_full
        h1, c1 = gates_to_hc(g1, c1)

        # stash h1; full sublane-tile, statically-indexed store
        hbuf_ref[pl.ds(t * Bp, Bp), :] = h1

    # ---- output_proj (once, batched over all seq_len*Bp rows)
    y = jnp.dot(hbuf_ref[...], wp1_ref[...], preferred_element_type=f32) + bp1_ref[...]
    y = _gelu_exact(_layernorm(y, ln2g_ref[...], ln2b_ref[...]))
    y = jnp.tanh(jnp.dot(y, wp2_ref[...], preferred_element_type=f32) + bp2_ref[...])
    out_ref[...] = y                      # single dense slab store (T*Bp, OD)


# ------------------------------- wrapper ---------------------------------

def enhanced_decoder_forward(z, cond, params, *, seq_len, num_joints, output_dim):
    f32 = jnp.float32
    B = z.shape[0]
    H = params["whh0"].shape[0]                      # real hidden size
    Hp = ((H + 127) // 128) * 128                    # lane-padded hidden size
    Bp = ((B + 7) // 8) * 8                          # sublane-padded batch

    def pad_rows(w, kp):
        if w.shape[0] == kp:
            return w
        return jnp.zeros((kp,) + w.shape[1:], w.dtype).at[: w.shape[0]].set(w)

    def pad_gate_cols(w):
        # (K, 4H) -> (K, 4Hp): each H-wide gate block placed at lane offset g*Hp,
        # padded lanes are zero (so padded hidden lanes stay exactly 0).
        if Hp == H:
            return w
        k = w.shape[0]
        w4 = w.reshape(k, 4, H)
        return jnp.zeros((k, 4, Hp), w.dtype).at[:, :, :H].set(w4).reshape(k, 4 * Hp)

    # padded batch inputs (extra rows are zeros, discarded after the call)
    z_p = pad_rows(z.astype(f32), Bp)
    c_p = pad_rows(cond.astype(f32), Bp)

    # padded / packed weights (one-time parameter packing)
    wih0_gp = pad_gate_cols(params["wih0"])                          # (H, 4Hp)
    b0_gp = pad_gate_cols(params["b0"])                              # (1, 4Hp)
    whh0_p = pad_rows(pad_gate_cols(params["whh0"]), Hp)             # (Hp, 4Hp)
    w1_p = jnp.concatenate(
        [pad_rows(pad_gate_cols(params["wih1"]), Hp),
         pad_rows(pad_gate_cols(params["whh1"]), Hp)], axis=0)       # (2Hp, 4Hp)
    b1_gp = pad_gate_cols(params["b1"])                              # (1, 4Hp)
    wp1_p = pad_rows(params["wp1"], Hp)                              # (Hp, H//2)

    args = (
        z_p, c_p,
        params["wz"], params["wc"], params["bf"], params["ln1_g"], params["ln1_b"],
        wih0_gp, b0_gp, whh0_p, w1_p, b1_gp,
        wp1_p, params["bp1"], params["ln2_g"], params["ln2_b"],
        params["wp2"], params["bp2"],
    )

    out = pl.pallas_call(
        decoder_kernel,
        out_shape=jax.ShapeDtypeStruct((seq_len * Bp, output_dim), jnp.float32),
        scratch_shapes=[pltpu.VMEM((seq_len * Bp, Hp), jnp.float32)],
    )(*args)

    # (T*Bp, OD) -> (B, T, num_joints, OD // num_joints); drop padded batch rows
    out = out.reshape(seq_len, Bp, output_dim)[:, :B]
    out = jnp.transpose(out, (1, 0, 2))
    return out.reshape(B, seq_len, num_joints, output_dim // num_joints)


# --------------------------- pure-JAX reference ---------------------------

def reference_forward(z, cond, params, *, seq_len, num_joints, output_dim):
    fused = z @ params["wz"] + cond @ params["wc"] + params["bf"]
    fused = _gelu_exact(_layernorm(fused, params["ln1_g"], params["ln1_b"]))

    B = z.shape[0]
    H = params["whh0"].shape[0]

    def cell(x, h, c, wih, whh, b):
        gates = x @ wih + h @ whh + b
        i = jax.nn.sigmoid(gates[:, :H])
        f = jax.nn.sigmoid(gates[:, H:2 * H])
        g = jnp.tanh(gates[:, 2 * H:3 * H])
        o = jax.nn.sigmoid(gates[:, 3 * H:])
        c = f * c + i * g
        h = o * jnp.tanh(c)
        return h, c

    h0 = c0 = h1 = c1 = jnp.zeros((B, H), jnp.float32)
    outs = []
    for _ in range(seq_len):
        h0, c0 = cell(fused, h0, c0, params["wih0"], params["whh0"], params["b0"])
        h1, c1 = cell(h0, h1, c1, params["wih1"], params["whh1"], params["b1"])
        y = h1 @ params["wp1"] + params["bp1"]
        y = _gelu_exact(_layernorm(y, params["ln2_g"], params["ln2_b"]))
        y = jnp.tanh(y @ params["wp2"] + params["bp2"])
        outs.append(y)
    out = jnp.stack(outs, axis=1)  # (B, T, OD)
    return out.reshape(B, seq_len, num_joints, output_dim // num_joints)


# --------------------------------- main -----------------------------------

if __name__ == "__main__":
    # small, module-consistent shapes
    B = 2
    latent_dim = 16
    cond_dim = 8
    hidden_dim = 32
    num_joints = 4
    output_dim = 12        # -> per-joint dim 3
    seq_len = 8

    key = jax.random.PRNGKey(0)
    ks = jax.random.split(key, 20)

    def nrm(k, shape, scale=0.1):
        return (scale * jax.random.normal(k, shape)).astype(jnp.float32)

    H = hidden_dim
    params = {
        # condition_fusion Linear(latent+cond -> H), split into z/cond halves
        "wz": nrm(ks[0], (latent_dim, H)),
        "wc": nrm(ks[1], (cond_dim, H)),
        "bf": nrm(ks[2], (1, H)),
        "ln1_g": jnp.ones((1, H), jnp.float32),
        "ln1_b": jnp.zeros((1, H), jnp.float32),
        # LSTM layer 0 (weights stored transposed: (in, 4H)); b = b_ih + b_hh
        "wih0": nrm(ks[3], (H, 4 * H)),
        "whh0": nrm(ks[4], (H, 4 * H)),
        "b0": nrm(ks[5], (1, 4 * H)),
        # LSTM layer 1
        "wih1": nrm(ks[6], (H, 4 * H)),
        "whh1": nrm(ks[7], (H, 4 * H)),
        "b1": nrm(ks[8], (1, 4 * H)),
        # output_proj
        "wp1": nrm(ks[9], (H, H // 2)),
        "bp1": nrm(ks[10], (1, H // 2)),
        "ln2_g": jnp.ones((1, H // 2), jnp.float32),
        "ln2_b": jnp.zeros((1, H // 2), jnp.float32),
        "wp2": nrm(ks[11], (H // 2, output_dim)),
        "bp2": nrm(ks[12], (1, output_dim)),
    }

    z = jax.random.normal(ks[13], (B, latent_dim), jnp.float32)
    cond = jax.random.normal(ks[14], (B, cond_dim), jnp.float32)

    fwd = functools.partial(
        enhanced_decoder_forward,
        seq_len=seq_len, num_joints=num_joints, output_dim=output_dim,
    )
    out = jax.jit(lambda a, b: fwd(a, b, params))(z, cond)
    out = jax.block_until_ready(out)

    assert out.shape == (B, seq_len, num_joints, output_dim // num_joints)

    ref = reference_forward(
        z, cond, params,
        seq_len=seq_len, num_joints=num_joints, output_dim=output_dim,
    )
    np.testing.assert_allclose(np.asarray(out), np.asarray(ref), rtol=2e-3, atol=2e-3)

    print("KERNEL_OK")
</pallas_src>

<mosaic_0001>
module attributes {stable_mosaic.version = 11 : i64} {
  func.func @decoder_kernel(%arg0: memref<8x16xf32, #tpu.memory_space<vmem>>, %arg1: memref<8x8xf32, #tpu.memory_space<vmem>>, %arg2: memref<16x32xf32, #tpu.memory_space<vmem>>, %arg3: memref<8x32xf32, #tpu.memory_space<vmem>>, %arg4: memref<1x32xf32, #tpu.memory_space<vmem>>, %arg5: memref<1x32xf32, #tpu.memory_space<vmem>>, %arg6: memref<1x32xf32, #tpu.memory_space<vmem>>, %arg7: memref<32x512xf32, #tpu.memory_space<vmem>>, %arg8: memref<1x512xf32, #tpu.memory_space<vmem>>, %arg9: memref<128x512xf32, #tpu.memory_space<vmem>>, %arg10: memref<256x512xf32, #tpu.memory_space<vmem>>, %arg11: memref<1x512xf32, #tpu.memory_space<vmem>>, %arg12: memref<128x16xf32, #tpu.memory_space<vmem>>, %arg13: memref<1x16xf32, #tpu.memory_space<vmem>>, %arg14: memref<1x16xf32, #tpu.memory_space<vmem>>, %arg15: memref<1x16xf32, #tpu.memory_space<vmem>>, %arg16: memref<16x12xf32, #tpu.memory_space<vmem>>, %arg17: memref<1x12xf32, #tpu.memory_space<vmem>>, %arg18: memref<64x12xf32, #tpu.memory_space<vmem>>, %arg19: memref<64x128xf32, #tpu.memory_space<vmem>>) attributes {dimension_semantics = [], scalar_prefetch = 0 : i64, scratch_operands = 1 : i64, tpu.core_type = #tpu.core_type<tc>} {
    %c0 = arith.constant 0 : index
    %c0_0 = arith.constant 0 : index
    %0 = vector.load %arg0[%c0, %c0_0] : memref<8x16xf32, #tpu.memory_space<vmem>>, vector<8x16xf32>
    %c0_1 = arith.constant 0 : index
    %c0_2 = arith.constant 0 : index
    %1 = vector.load %arg2[%c0_1, %c0_2] : memref<16x32xf32, #tpu.memory_space<vmem>>, vector<16x32xf32>
    %cst = arith.constant dense<0.000000e+00> : vector<8x32xf32>
    %2 = tpu.matmul %0, %1, %cst {dimension_numbers = #tpu.dot_dimension_numbers<[1], [0], [0], [1], [0, 0, 1, 1], [], []>} : vector<8x16xf32>, vector<16x32xf32>, vector<8x32xf32> -> vector<8x32xf32>
    %c0_3 = arith.constant 0 : index
    %c0_4 = arith.constant 0 : index
    %3 = vector.load %arg1[%c0_3, %c0_4] : memref<8x8xf32, #tpu.memory_space<vmem>>, vector<8x8xf32>
    %c0_5 = arith.constant 0 : index
    %c0_6 = arith.constant 0 : index
    %4 = vector.load %arg3[%c0_5, %c0_6] : memref<8x32xf32, #tpu.memory_space<vmem>>, vector<8x32xf32>
    %cst_7 = arith.constant dense<0.000000e+00> : vector<8x32xf32>
    %5 = tpu.matmul %3, %4, %cst_7 {dimension_numbers = #tpu.dot_dimension_numbers<[1], [0], [0], [1], [0, 0, 1, 1], [], []>} : vector<8x8xf32>, vector<8x32xf32>, vector<8x32xf32> -> vector<8x32xf32>
    %6 = arith.addf %2, %5 : vector<8x32xf32>
    %c0_8 = arith.constant 0 : index
    %c0_9 = arith.constant 0 : index
    %7 = vector.load %arg4[%c0_8, %c0_9] : memref<1x32xf32, #tpu.memory_space<vmem>>, vector<1x32xf32>
    %8 = vector.broadcast %7 : vector<1x32xf32> to vector<8x32xf32>
    %9 = arith.addf %6, %8 : vector<8x32xf32>
    %c0_10 = arith.constant 0 : index
    %c0_11 = arith.constant 0 : index
    %10 = vector.load %arg5[%c0_10, %c0_11] : memref<1x32xf32, #tpu.memory_space<vmem>>, vector<1x32xf32>
    %c0_12 = arith.constant 0 : index
    %c0_13 = arith.constant 0 : index
    %11 = vector.load %arg6[%c0_12, %c0_13] : memref<1x32xf32, #tpu.memory_space<vmem>>, vector<1x32xf32>
    %cst_14 = arith.constant dense<0.000000e+00> : vector<8xf32>
    %12 = vector.multi_reduction <add>, %9, %cst_14 [1] : vector<8x32xf32> to vector<8xf32>
    %13 = vector.shape_cast %12 : vector<8xf32> to vector<8x1xf32>
    %cst_15 = arith.constant 3.200000e+01 : f32
    %14 = vector.broadcast %cst_15 : f32 to vector<8x1xf32>
    %15 = arith.divf %13, %14 : vector<8x1xf32>
    %16 = vector.broadcast %15 : vector<8x1xf32> to vector<8x32xf32>
    %17 = arith.subf %9, %16 : vector<8x32xf32>
    %18 = arith.mulf %17, %17 : vector<8x32xf32>
    %cst_16 = arith.constant dense<0.000000e+00> : vector<8xf32>
    %19 = vector.multi_reduction <add>, %18, %cst_16 [1] : vector<8x32xf32> to vector<8xf32>
    %20 = vector.shape_cast %19 : vector<8xf32> to vector<8x1xf32>
    %cst_17 = arith.constant 3.200000e+01 : f32
    %21 = vector.broadcast %cst_17 : f32 to vector<8x1xf32>
    %22 = arith.divf %20, %21 : vector<8x1xf32>
    %23 = vector.broadcast %15 : vector<8x1xf32> to vector<8x32xf32>
    %24 = arith.subf %9, %23 : vector<8x32xf32>
    %cst_18 = arith.constant 9.99999974E-6 : f32
    %25 = vector.broadcast %cst_18 : f32 to vector<8x1xf32>
    %26 = arith.addf %22, %25 : vector<8x1xf32>
    %27 = math.rsqrt %26 : vector<8x1xf32>
    %28 = vector.broadcast %27 : vector<8x1xf32> to vector<8x32xf32>
    %29 = arith.mulf %24, %28 : vector<8x32xf32>
    %30 = vector.broadcast %10 : vector<1x32xf32> to vector<8x32xf32>
    %31 = arith.mulf %29, %30 : vector<8x32xf32>
    %32 = vector.broadcast %11 : vector<1x32xf32> to vector<8x32xf32>
    %33 = arith.addf %31, %32 : vector<8x32xf32>
    %cst_19 = arith.constant 5.000000e-01 : f32
    %34 = vector.broadcast %cst_19 : f32 to vector<8x32xf32>
    %35 = arith.mulf %34, %33 : vector<8x32xf32>
    %cst_20 = arith.constant 0.707106769 : f32
    %36 = vector.broadcast %cst_20 : f32 to vector<8x32xf32>
    %37 = arith.mulf %33, %36 : vector<8x32xf32>
    %38 = math.erf %37 : vector<8x32xf32>
    %cst_21 = arith.constant 1.000000e+00 : f32
    %39 = vector.broadcast %cst_21 : f32 to vector<8x32xf32>
    %40 = arith.addf %39, %38 : vector<8x32xf32>
    %41 = arith.mulf %35, %40 : vector<8x32xf32>
    %c0_22 = arith.constant 0 : index
    %c0_23 = arith.constant 0 : index
    %42 = vector.load %arg7[%c0_22, %c0_23] : memref<32x512xf32, #tpu.memory_space<vmem>>, vector<32x512xf32>
    %cst_24 = arith.constant dense<0.000000e+00> : vector<8x512xf32>
    %43 = tpu.matmul %41, %42, %cst_24 {dimension_numbers = #tpu.dot_dimension_numbers<[1], [0], [0], [1], [0, 0, 1, 1], [], []>} : vector<8x32xf32>, vector<32x512xf32>, vector<8x512xf32> -> vector<8x512xf32>
    %c0_25 = arith.constant 0 : index
    %c0_26 = arith.constant 0 : index
    %44 = vector.load %arg8[%c0_25, %c0_26] : memref<1x512xf32, #tpu.memory_space<vmem>>, vector<1x512xf32>
    %45 = vector.broadcast %44 : vector<1x512xf32> to vector<8x512xf32>
    %46 = arith.addf %43, %45 : vector<8x512xf32>
    %c0_27 = arith.constant 0 : index
    %c0_28 = arith.constant 0 : index
    %47 = vector.load %arg11[%c0_27, %c0_28] : memref<1x512xf32, #tpu.memory_space<vmem>>, vector<1x512xf32>
    %48 = vector.shape_cast %47 : vector<1x512xf32> to vector<1x512xf32>
    %49 = vector.broadcast %48 : vector<1x512xf32> to vector<8x512xf32>
    %cst_29 = arith.constant 0.000000e+00 : f32
    %50 = vector.broadcast %cst_29 : f32 to vector<8x128xf32>
    %c0_30 = arith.constant 0 : index
    %c0_31 = arith.constant 0 : index
    %51 = vector.load %arg9[%c0_30, %c0_31] : memref<128x512xf32, #tpu.memory_space<vmem>>, vector<128x512xf32>
    %cst_32 = arith.constant dense<0.000000e+00> : vector<8x512xf32>
    %52 = tpu.matmul %50, %51, %cst_32 {dimension_numbers = #tpu.dot_dimension_numbers<[1], [0], [0], [1], [0, 0, 1, 1], [], []>} : vector<8x128xf32>, vector<128x512xf32>, vector<8x512xf32> -> vector<8x512xf32>
    %53 = arith.addf %46, %52 : vector<8x512xf32>
    %54 = vector.extract_strided_slice %53 {offsets = [0, 0], sizes = [8, 128], strides = [1, 1]} : vector<8x512xf32> to vector<8x128xf32>
    %55 = arith.negf %54 : vector<8x128xf32>
    %56 = math.exp %55 : vector<8x128xf32>
    %cst_33 = arith.constant 1.000000e+00 : f32
    %57 = vector.broadcast %cst_33 : f32 to vector<8x128xf32>
    %58 = arith.addf %57, %56 : vector<8x128xf32>
    %59 = arith.divf %57, %58 : vector<8x128xf32>
    %60 = vector.extract_strided_slice %53 {offsets = [0, 128], sizes = [8, 128], strides = [1, 1]} : vector<8x512xf32> to vector<8x128xf32>
    %61 = arith.negf %60 : vector<8x128xf32>
    %62 = math.exp %61 : vector<8x128xf32>
    %cst_34 = arith.constant 1.000000e+00 : f32
    %63 = vector.broadcast %cst_34 : f32 to vector<8x128xf32>
    %64 = arith.addf %63, %62 : vector<8x128xf32>
    %65 = arith.divf %63, %64 : vector<8x128xf32>
    %66 = vector.extract_strided_slice %53 {offsets = [0, 256], sizes = [8, 128], strides = [1, 1]} : vector<8x512xf32> to vector<8x128xf32>
    %67 = math.tanh %66 : vector<8x128xf32>
    %68 = vector.extract_strided_slice %53 {offsets = [0, 384], sizes = [8, 128], strides = [1, 1]} : vector<8x512xf32> to vector<8x128xf32>
    %69 = arith.negf %68 : vector<8x128xf32>
    %70 = math.exp %69 : vector<8x128xf32>
    %cst_35 = arith.constant 1.000000e+00 : f32
    %71 = vector.broadcast %cst_35 : f32 to vector<8x128xf32>
    %72 = arith.addf %71, %70 : vector<8x128xf32>
    %73 = arith.divf %71, %72 : vector<8x128xf32>
    %74 = arith.mulf %65, %50 : vector<8x128xf32>
    %75 = arith.mulf %59, %67 : vector<8x128xf32>
    %76 = arith.addf %74, %75 : vector<8x128xf32>
    %77 = math.tanh %76 : vector<8x128xf32>
    %78 = arith.mulf %73, %77 : vector<8x128xf32>
    %79 = tpu.concatenate %78, %50 in 1 : vector<8x128xf32>, vector<8x128xf32> -> vector<8x256xf32>
    %c0_36 = arith.constant 0 : index
    %c0_37 = arith.constant 0 : index
    %80 = vector.load %arg10[%c0_36, %c0_37] : memref<256x512xf32, #tpu.memory_space<vmem>>, vector<256x512xf32>
    %cst_38 = arith.constant dense<0.000000e+00> : vector<8x512xf32>
    %81 = tpu.matmul %79, %80, %cst_38 {dimension_numbers = #tpu.dot_dimension_numbers<[1], [0], [0], [1], [0, 0, 1, 1], [], []>} : vector<8x256xf32>, vector<256x512xf32>, vector<8x512xf32> -> vector<8x512xf32>
    %82 = arith.addf %81, %49 : vector<8x512xf32>
    %83 = vector.extract_strided_slice %82 {offsets = [0, 0], sizes = [8, 128], strides = [1, 1]} : vector<8x512xf32> to vector<8x128xf32>
    %84 = arith.negf %83 : vector<8x128xf32>
    %85 = math.exp %84 : vector<8x128xf32>
    %cst_39 = arith.constant 1.000000e+00 : f32
    %86 = vector.broadcast %cst_39 : f32 to vector<8x128xf32>
    %87 = arith.addf %86, %85 : vector<8x128xf32>
    %88 = arith.divf %86, %87 : vector<8x128xf32>
    %89 = vector.extract_strided_slice %82 {offsets = [0, 128], sizes = [8, 128], strides = [1, 1]} : vector<8x512xf32> to vector<8x128xf32>
    %90 = arith.negf %89 : vector<8x128xf32>
    %91 = math.exp %90 : vector<8x128xf32>
    %cst_40 = arith.constant 1.000000e+00 : f32
    %92 = vector.broadcast %cst_40 : f32 to vector<8x128xf32>
    %93 = arith.addf %92, %91 : vector<8x128xf32>
    %94 = arith.divf %92, %93 : vector<8x128xf32>
    %95 = vector.extract_strided_slice %82 {offsets = [0, 256], sizes = [8, 128], strides = [1, 1]} : vector<8x512xf32> to vector<8x128xf32>
    %96 = math.tanh %95 : vector<8x128xf32>
    %97 = vector.extract_strided_slice %82 {offsets = [0, 384], sizes = [8, 128], strides = [1, 1]} : vector<8x512xf32> to vector<8x128xf32>
    %98 = arith.negf %97 : vector<8x128xf32>
    %99 = math.exp %98 : vector<8x128xf32>
    %cst_41 = arith.constant 1.000000e+00 : f32
    %100 = vector.broadcast %cst_41 : f32 to vector<8x128xf32>
    %101 = arith.addf %100, %99 : vector<8x128xf32>
    %102 = arith.divf %100, %101 : vector<8x128xf32>
    %103 = arith.mulf %94, %50 : vector<8x128xf32>
    %104 = arith.mulf %88, %96 : vector<8x128xf32>
    %105 = arith.addf %103, %104 : vector<8x128xf32>
    %106 = math.tanh %105 : vector<8x128xf32>
    %107 = arith.mulf %102, %106 : vector<8x128xf32>
    %c0_42 = arith.constant 0 : index
    %c0_43 = arith.constant 0 : index
    %108 = vector.load %arg19[%c0_42, %c0_43] : memref<64x128xf32, #tpu.memory_space<vmem>>, vector<8x128xf32>
    tpu.vector_store %arg19[%c0_42, %c0_43], %107 {strides = array<i32>} : memref<64x128xf32, #tpu.memory_space<vmem>>, vector<8x128xf32>,
    %c0_44 = arith.constant 0 : index
    %c0_45 = arith.constant 0 : index
    %109 = vector.load %arg9[%c0_44, %c0_45] : memref<128x512xf32, #tpu.memory_space<vmem>>, vector<128x512xf32>
    %cst_46 = arith.constant dense<0.000000e+00> : vector<8x512xf32>
    %110 = tpu.matmul %78, %109, %cst_46 {dimension_numbers = #tpu.dot_dimension_numbers<[1], [0], [0], [1], [0, 0, 1, 1], [], []>} : vector<8x128xf32>, vector<128x512xf32>, vector<8x512xf32> -> vector<8x512xf32>
    %111 = arith.addf %46, %110 : vector<8x512xf32>
    %112 = vector.extract_strided_slice %111 {offsets = [0, 0], sizes = [8, 128], strides = [1, 1]} : vector<8x512xf32> to vector<8x128xf32>
    %113 = arith.negf %112 : vector<8x128xf32>
    %114 = math.exp %113 : vector<8x128xf32>
    %cst_47 = arith.constant 1.000000e+00 : f32
    %115 = vector.broadcast %cst_47 : f32 to vector<8x128xf32>
    %116 = arith.addf %115, %114 : vector<8x128xf32>
    %117 = arith.divf %115, %116 : vector<8x128xf32>
    %118 = vector.extract_strided_slice %111 {offsets = [0, 128], sizes = [8, 128], strides = [1, 1]} : vector<8x512xf32> to vector<8x128xf32>
    %119 = arith.negf %118 : vector<8x128xf32>
    %120 = math.exp %119 : vector<8x128xf32>
    %cst_48 = arith.constant 1.000000e+00 : f32
    %121 = vector.broadcast %cst_48 : f32 to vector<8x128xf32>
    %122 = arith.addf %121, %120 : vector<8x128xf32>
    %123 = arith.divf %121, %122 : vector<8x128xf32>
    %124 = vector.extract_strided_slice %111 {offsets = [0, 256], sizes = [8, 128], strides = [1, 1]} : vector<8x512xf32> to vector<8x128xf32>
    %125 = math.tanh %124 : vector<8x128xf32>
    %126 = vector.extract_strided_slice %111 {offsets = [0, 384], sizes = [8, 128], strides = [1, 1]} : vector<8x512xf32> to vector<8x128xf32>
    %127 = arith.negf %126 : vector<8x128xf32>
    %128 = math.exp %127 : vector<8x128xf32>
    %cst_49 = arith.constant 1.000000e+00 : f32
    %129 = vector.broadcast %cst_49 : f32 to vector<8x128xf32>
    %130 = arith.addf %129, %128 : vector<8x128xf32>
    %131 = arith.divf %129, %130 : vector<8x128xf32>
    %132 = arith.mulf %123, %76 : vector<8x128xf32>
    %133 = arith.mulf %117, %125 : vector<8x128xf32>
    %134 = arith.addf %132, %133 : vector<8x128xf32>
    %135 = math.tanh %134 : vector<8x128xf32>
    %136 = arith.mulf %131, %135 : vector<8x128xf32>
    %137 = tpu.concatenate %136, %107 in 1 : vector<8x128xf32>, vector<8x128xf32> -> vector<8x256xf32>
    %c0_50 = arith.constant 0 : index
    %c0_51 = arith.constant 0 : index
    %138 = vector.load %arg10[%c0_50, %c0_51] : memref<256x512xf32, #tpu.memory_space<vmem>>, vector<256x512xf32>
    %cst_52 = arith.constant dense<0.000000e+00> : vector<8x512xf32>
    %139 = tpu.matmul %137, %138, %cst_52 {dimension_numbers = #tpu.dot_dimension_numbers<[1], [0], [0], [1], [0, 0, 1, 1], [], []>} : vector<8x256xf32>, vector<256x512xf32>, vector<8x512xf32> -> vector<8x512xf32>
    %140 = arith.addf %139, %49 : vector<8x512xf32>
    %141 = vector.extract_strided_slice %140 {offsets = [0, 0], sizes = [8, 128], strides = [1, 1]} : vector<8x512xf32> to vector<8x128xf32>
    %142 = arith.negf %141 : vector<8x128xf32>
    %143 = math.exp %142 : vector<8x128xf32>
    %cst_53 = arith.constant 1.000000e+00 : f32
    %144 = vector.broadcast %cst_53 : f32 to vector<8x128xf32>
    %145 = arith.addf %144, %143 : vector<8x128xf32>
    %146 = arith.divf %144, %145 : vector<8x128xf32>
    %147 = vector.extract_strided_slice %140 {offsets = [0, 128], sizes = [8, 128], strides = [1, 1]} : vector<8x512xf32> to vector<8x128xf32>
    %148 = arith.negf %147 : vector<8x128xf32>
    %149 = math.exp %148 : vector<8x128xf32>
    %cst_54 = arith.constant 1.000000e+00 : f32
    %150 = vector.broadcast %cst_54 : f32 to vector<8x128xf32>
    %151 = arith.addf %150, %149 : vector<8x128xf32>
    %152 = arith.divf %150, %151 : vector<8x128xf32>
    %153 = vector.extract_strided_slice %140 {offsets = [0, 256], sizes = [8, 128], strides = [1, 1]} : vector<8x512xf32> to vector<8x128xf32>
    %154 = math.tanh %153 : vector<8x128xf32>
    %155 = vector.extract_strided_slice %140 {offsets = [0, 384], sizes = [8, 128], strides = [1, 1]} : vector<8x512xf32> to vector<8x128xf32>
    %156 = arith.negf %155 : vector<8x128xf32>
    %157 = math.exp %156 : vector<8x128xf32>
    %cst_55 = arith.constant 1.000000e+00 : f32
    %158 = vector.broadcast %cst_55 : f32 to vector<8x128xf32>
    %159 = arith.addf %158, %157 : vector<8x128xf32>
    %160 = arith.divf %158, %159 : vector<8x128xf32>
    %161 = arith.mulf %152, %105 : vector<8x128xf32>
    %162 = arith.mulf %146, %154 : vector<8x128xf32>
    %163 = arith.addf %161, %162 : vector<8x128xf32>
    %164 = math.tanh %163 : vector<8x128xf32>
    %165 = arith.mulf %160, %164 : vector<8x128xf32>
    %c8 = arith.constant 8 : index
    %c0_56 = arith.constant 0 : index
    %166 = vector.load %arg19[%c8, %c0_56] : memref<64x128xf32, #tpu.memory_space<vmem>>, vector<8x128xf32>
    tpu.vector_store %arg19[%c8, %c0_56], %165 {strides = array<i32>} : memref<64x128xf32, #tpu.memory_space<vmem>>, vector<8x128xf32>,
    %c0_57 = arith.constant 0 : index
    %c0_58 = arith.constant 0 : index
    %167 = vector.load %arg9[%c0_57, %c0_58] : memref<128x512xf32, #tpu.memory_space<vmem>>, vector<128x512xf32>
    %cst_59 = arith.constant dense<0.000000e+00> : vector<8x512xf32>
    %168 = tpu.matmul %136, %167, %cst_59 {dimension_numbers = #tpu.dot_dimension_numbers<[1], [0], [0], [1], [0, 0, 1, 1], [], []>} : vector<8x128xf32>, vector<128x512xf32>, vector<8x512xf32> -> vector<8x512xf32>
    %169 = arith.addf %46, %168 : vector<8x512xf32>
    %170 = vector.extract_strided_slice %169 {offsets = [0, 0], sizes = [8, 128], strides = [1, 1]} : vector<8x512xf32> to vector<8x128xf32>
    %171 = arith.negf %170 : vector<8x128xf32>
    %172 = math.exp %171 : vector<8x128xf32>
    %cst_60 = arith.constant 1.000000e+00 : f32
    %173 = vector.broadcast %cst_60 : f32 to vector<8x128xf32>
    %174 = arith.addf %173, %172 : vector<8x128xf32>
    %175 = arith.divf %173, %174 : vector<8x128xf32>
    %176 = vector.extract_strided_slice %169 {offsets = [0, 128], sizes = [8, 128], strides = [1, 1]} : vector<8x512xf32> to vector<8x128xf32>
    %177 = arith.negf %176 : vector<8x128xf32>
    %178 = math.exp %177 : vector<8x128xf32>
    %cst_61 = arith.constant 1.000000e+00 : f32
    %179 = vector.broadcast %cst_61 : f32 to vector<8x128xf32>
    %180 = arith.addf %179, %178 : vector<8x128xf32>
    %181 = arith.divf %179, %180 : vector<8x128xf32>
    %182 = vector.extract_strided_slice %169 {offsets = [0, 256], sizes = [8, 128], strides = [1, 1]} : vector<8x512xf32> to vector<8x128xf32>
    %183 = math.tanh %182 : vector<8x128xf32>
    %184 = vector.extract_strided_slice %169 {offsets = [0, 384], sizes = [8, 128], strides = [1, 1]} : vector<8x512xf32> to vector<8x128xf32>
    %185 = arith.negf %184 : vector<8x128xf32>
    %186 = math.exp %185 : vector<8x128xf32>
    %cst_62 = arith.constant 1.000000e+00 : f32
    %187 = vector.broadcast %cst_62 : f32 to vector<8x128xf32>
    %188 = arith.addf %187, %186 : vector<8x128xf32>
    %189 = arith.divf %187, %188 : vector<8x128xf32>
    %190 = arith.mulf %181, %134 : vector<8x128xf32>
    %191 = arith.mulf %175, %183 : vector<8x128xf32>
    %192 = arith.addf %190, %191 : vector<8x128xf32>
    %193 = math.tanh %192 : vector<8x128xf32>
    %194 = arith.mulf %189, %193 : vector<8x128xf32>
    %195 = tpu.concatenate %194, %165 in 1 : vector<8x128xf32>, vector<8x128xf32> -> vector<8x256xf32>
    %c0_63 = arith.constant 0 : index
    %c0_64 = arith.constant 0 : index
    %196 = vector.load %arg10[%c0_63, %c0_64] : memref<256x512xf32, #tpu.memory_space<vmem>>, vector<256x512xf32>
    %cst_65 = arith.constant dense<0.000000e+00> : vector<8x512xf32>
    %197 = tpu.matmul %195, %196, %cst_65 {dimension_numbers = #tpu.dot_dimension_numbers<[1], [0], [0], [1], [0, 0, 1, 1], [], []>} : vector<8x256xf32>, vector<256x512xf32>, vector<8x512xf32> -> vector<8x512xf32>
    %198 = arith.addf %197, %49 : vector<8x512xf32>
    %199 = vector.extract_strided_slice %198 {offsets = [0, 0], sizes = [8, 128], strides = [1, 1]} : vector<8x512xf32> to vector<8x128xf32>
    %200 = arith.negf %199 : vector<8x128xf32>
    %201 = math.exp %200 : vector<8x128xf32>
    %cst_66 = arith.constant 1.000000e+00 : f32
    %202 = vector.broadcast %cst_66 : f32 to vector<8x128xf32>
    %203 = arith.addf %202, %201 : vector<8x128xf32>
    %204 = arith.divf %202, %203 : vector<8x128xf32>
    %205 = vector.extract_strided_slice %198 {offsets = [0, 128], sizes = [8, 128], strides = [1, 1]} : vector<8x512xf32> to vector<8x128xf32>
    %206 = arith.negf %205 : vector<8x128xf32>
    %207 = math.exp %206 : vector<8x128xf32>
    %cst_67 = arith.constant 1.000000e+00 : f32
    %208 = vector.broadcast %cst_67 : f32 to vector<8x128xf32>
    %209 = arith.addf %208, %207 : vector<8x128xf32>
    %210 = arith.divf %208, %209 : vector<8x128xf32>
    %211 = vector.extract_strided_slice %198 {offsets = [0, 256], sizes = [8, 128], strides = [1, 1]} : vector<8x512xf32> to vector<8x128xf32>
    %212 = math.tanh %211 : vector<8x128xf32>
    %213 = vector.extract_strided_slice %198 {offsets = [0, 384], sizes = [8, 128], strides = [1, 1]} : vector<8x512xf32> to vector<8x128xf32>
    %214 = arith.negf %213 : vector<8x128xf32>
    %215 = math.exp %214 : vector<8x128xf32>
    %cst_68 = arith.constant 1.000000e+00 : f32
    %216 = vector.broadcast %cst_68 : f32 to vector<8x128xf32>
    %217 = arith.addf %216, %215 : vector<8x128xf32>
    %218 = arith.divf %216, %217 : vector<8x128xf32>
    %219 = arith.mulf %210, %163 : vector<8x128xf32>
    %220 = arith.mulf %204, %212 : vector<8x128xf32>
    %221 = arith.addf %219, %220 : vector<8x128xf32>
    %222 = math.tanh %221 : vector<8x128xf32>
    %223 = arith.mulf %218, %222 : vector<8x128xf32>
    %c16 = arith.constant 16 : index
    %c0_69 = arith.constant 0 : index
    %224 = vector.load %arg19[%c16, %c0_69] : memref<64x128xf32, #tpu.memory_space<vmem>>, vector<8x128xf32>
    tpu.vector_store %arg19[%c16, %c0_69], %223 {strides = array<i32>} : memref<64x128xf32, #tpu.memory_space<vmem>>, vector<8x128xf32>,
    %c0_70 = arith.constant 0 : index
    %c0_71 = arith.constant 0 : index
    %225 = vector.load %arg9[%c0_70, %c0_71] : memref<128x512xf32, #tpu.memory_space<vmem>>, vector<128x512xf32>
    %cst_72 = arith.constant dense<0.000000e+00> : vector<8x512xf32>
    %226 = tpu.matmul %194, %225, %cst_72 {dimension_numbers = #tpu.dot_dimension_numbers<[1], [0], [0], [1], [0, 0, 1, 1], [], []>} : vector<8x128xf32>, vector<128x512xf32>, vector<8x512xf32> -> vector<8x512xf32>
    %227 = arith.addf %46, %226 : vector<8x512xf32>
    %228 = vector.extract_strided_slice %227 {offsets = [0, 0], sizes = [8, 128], strides = [1, 1]} : vector<8x512xf32> to vector<8x128xf32>
    %229 = arith.negf %228 : vector<8x128xf32>
    %230 = math.exp %229 : vector<8x128xf32>
    %cst_73 = arith.constant 1.000000e+00 : f32
    %231 = vector.broadcast %cst_73 : f32 to vector<8x128xf32>
    %232 = arith.addf %231, %230 : vector<8x128xf32>
    %233 = arith.divf %231, %232 : vector<8x128xf32>
    %234 = vector.extract_strided_slice %227 {offsets = [0, 128], sizes = [8, 128], strides = [1, 1]} : vector<8x512xf32> to vector<8x128xf32>
    %235 = arith.negf %234 : vector<8x128xf32>
    %236 = math.exp %235 : vector<8x128xf32>
    %cst_74 = arith.constant 1.000000e+00 : f32
    %237 = vector.broadcast %cst_74 : f32 to vector<8x128xf32>
    %238 = arith.addf %237, %236 : vector<8x128xf32>
    %239 = arith.divf %237, %238 : vector<8x128xf32>
    %240 = vector.extract_strided_slice %227 {offsets = [0, 256], sizes = [8, 128], strides = [1, 1]} : vector<8x512xf32> to vector<8x128xf32>
    %241 = math.tanh %240 : vector<8x128xf32>
    %242 = vector.extract_strided_slice %227 {offsets = [0, 384], sizes = [8, 128], strides = [1, 1]} : vector<8x512xf32> to vector<8x128xf32>
    %243 = arith.negf %242 : vector<8x128xf32>
    %244 = math.exp %243 : vector<8x128xf32>
    %cst_75 = arith.constant 1.000000e+00 : f32
    %245 = vector.broadcast %cst_75 : f32 to vector<8x128xf32>
    %246 = arith.addf %245, %244 : vector<8x128xf32>
    %247 = arith.divf %245, %246 : vector<8x128xf32>
    %248 = arith.mulf %239, %192 : vector<8x128xf32>
    %249 = arith.mulf %233, %241 : vector<8x128xf32>
    %250 = arith.addf %248, %249 : vector<8x128xf32>
    %251 = math.tanh %250 : vector<8x128xf32>
    %252 = arith.mulf %247, %251 : vector<8x128xf32>
    %253 = tpu.concatenate %252, %223 in 1 : vector<8x128xf32>, vector<8x128xf32> -> vector<8x256xf32>
    %c0_76 = arith.constant 0 : index
    %c0_77 = arith.constant 0 : index
    %254 = vector.load %arg10[%c0_76, %c0_77] : memref<256x512xf32, #tpu.memory_space<vmem>>, vector<256x512xf32>
    %cst_78 = arith.constant dense<0.000000e+00> : vector<8x512xf32>
    %255 = tpu.matmul %253, %254, %cst_78 {dimension_numbers = #tpu.dot_dimension_numbers<[1], [0], [0], [1], [0, 0, 1, 1], [], []>} : vector<8x256xf32>, vector<256x512xf32>, vector<8x512xf32> -> vector<8x512xf32>
    %256 = arith.addf %255, %49 : vector<8x512xf32>
    %257 = vector.extract_strided_slice %256 {offsets = [0, 0], sizes = [8, 128], strides = [1, 1]} : vector<8x512xf32> to vector<8x128xf32>
    %258 = arith.negf %257 : vector<8x128xf32>
    %259 = math.exp %258 : vector<8x128xf32>
    %cst_79 = arith.constant 1.000000e+00 : f32
    %260 = vector.broadcast %cst_79 : f32 to vector<8x128xf32>
    %261 = arith.addf %260, %259 : vector<8x128xf32>
    %262 = arith.divf %260, %261 : vector<8x128xf32>
    %263 = vector.extract_strided_slice %256 {offsets = [0, 128], sizes = [8, 128], strides = [1, 1]} : vector<8x512xf32> to vector<8x128xf32>
    %264 = arith.negf %263 : vector<8x128xf32>
    %265 = math.exp %264 : vector<8x128xf32>
    %cst_80 = arith.constant 1.000000e+00 : f32
    %266 = vector.broadcast %cst_80 : f32 to vector<8x128xf32>
    %267 = arith.addf %266, %265 : vector<8x128xf32>
    %268 = arith.divf %266, %267 : vector<8x128xf32>
    %269 = vector.extract_strided_slice %256 {offsets = [0, 256], sizes = [8, 128], strides = [1, 1]} : vector<8x512xf32> to vector<8x128xf32>
    %270 = math.tanh %269 : vector<8x128xf32>
    %271 = vector.extract_strided_slice %256 {offsets = [0, 384], sizes = [8, 128], strides = [1, 1]} : vector<8x512xf32> to vector<8x128xf32>
    %272 = arith.negf %271 : vector<8x128xf32>
    %273 = math.exp %272 : vector<8x128xf32>
    %cst_81 = arith.constant 1.000000e+00 : f32
    %274 = vector.broadcast %cst_81 : f32 to vector<8x128xf32>
    %275 = arith.addf %274, %273 : vector<8x128xf32>
    %276 = arith.divf %274, %275 : vector<8x128xf32>
    %277 = arith.mulf %268, %221 : vector<8x128xf32>
    %278 = arith.mulf %262, %270 : vector<8x128xf32>
    %279 = arith.addf %277, %278 : vector<8x128xf32>
    %280 = math.tanh %279 : vector<8x128xf32>
    %281 = arith.mulf %276, %280 : vector<8x128xf32>
    %c24 = arith.constant 24 : index
    %c0_82 = arith.constant 0 : index
    %282 = vector.load %arg19[%c24, %c0_82] : memref<64x128xf32, #tpu.memory_space<vmem>>, vector<8x128xf32>
    tpu.vector_store %arg19[%c24, %c0_82], %281 {strides = array<i32>} : memref<64x128xf32, #tpu.memory_space<vmem>>, vector<8x128xf32>,
    %c0_83 = arith.constant 0 : index
    %c0_84 = arith.constant 0 : index
    %283 = vector.load %arg9[%c0_83, %c0_84] : memref<128x512xf32, #tpu.memory_space<vmem>>, vector<128x512xf32>
    %cst_85 = arith.constant dense<0.000000e+00> : vector<8x512xf32>
    %284 = tpu.matmul %252, %283, %cst_85 {dimension_numbers = #tpu.dot_dimension_numbers<[1], [0], [0], [1], [0, 0, 1, 1], [], []>} : vector<8x128xf32>, vector<128x512xf32>, vector<8x512xf32> -> vector<8x512xf32>
    %285 = arith.addf %46, %284 : vector<8x512xf32>
    %286 = vector.extract_strided_slice %285 {offsets = [0, 0], sizes = [8, 128], strides = [1, 1]} : vector<8x512xf32> to vector<8x128xf32>
    %287 = arith.negf %286 : vector<8x128xf32>
    %288 = math.exp %287 : vector<8x128xf32>
    %cst_86 = arith.constant 1.000000e+00 : f32
    %289 = vector.broadcast %cst_86 : f32 to vector<8x128xf32>
    %290 = arith.addf %289, %288 : vector<8x128xf32>
    %291 = arith.divf %289, %290 : vector<8x128xf32>
    %292 = vector.extract_strided_slice %285 {offsets = [0, 128], sizes = [8, 128], strides = [1, 1]} : vector<8x512xf32> to vector<8x128xf32>
    %293 = arith.negf %292 : vector<8x128xf32>
    %294 = math.exp %293 : vector<8x128xf32>
    %cst_87 = arith.constant 1.000000e+00 : f32
    %295 = vector.broadcast %cst_87 : f32 to vector<8x128xf32>
    %296 = arith.addf %295, %294 : vector<8x128xf32>
    %297 = arith.divf %295, %296 : vector<8x128xf32>
    %298 = vector.extract_strided_slice %285 {offsets = [0, 256], sizes = [8, 128], strides = [1, 1]} : vector<8x512xf32> to vector<8x128xf32>
    %299 = math.tanh %298 : vector<8x128xf32>
    %300 = vector.extract_strided_slice %285 {offsets = [0, 384], sizes = [8, 128], strides = [1, 1]} : vector<8x512xf32> to vector<8x128xf32>
    %301 = arith.negf %300 : vector<8x128xf32>
    %302 = math.exp %301 : vector<8x128xf32>
    %cst_88 = arith.constant 1.000000e+00 : f32
    %303 = vector.broadcast %cst_88 : f32 to vector<8x128xf32>
    %304 = arith.addf %303, %302 : vector<8x128xf32>
    %305 = arith.divf %303, %304 : vector<8x128xf32>
    %306 = arith.mulf %297, %250 : vector<8x128xf32>
    %307 = arith.mulf %291, %299 : vector<8x128xf32>
    %308 = arith.addf %306, %307 : vector<8x128xf32>
    %309 = math.tanh %308 : vector<8x128xf32>
    %310 = arith.mulf %305, %309 : vector<8x128xf32>
    %311 = tpu.concatenate %310, %281 in 1 : vector<8x128xf32>, vector<8x128xf32> -> vector<8x256xf32>
    %c0_89 = arith.constant 0 : index
    %c0_90 = arith.constant 0 : index
    %312 = vector.load %arg10[%c0_89, %c0_90] : memref<256x512xf32, #tpu.memory_space<vmem>>, vector<256x512xf32>
    %cst_91 = arith.constant dense<0.000000e+00> : vector<8x512xf32>
    %313 = tpu.matmul %311, %312, %cst_91 {dimension_numbers = #tpu.dot_dimension_numbers<[1], [0], [0], [1], [0, 0, 1, 1], [], []>} : vector<8x256xf32>, vector<256x512xf32>, vector<8x512xf32> -> vector<8x512xf32>
    %314 = arith.addf %313, %49 : vector<8x512xf32>
    %315 = vector.extract_strided_slice %314 {offsets = [0, 0], sizes = [8, 128], strides = [1, 1]} : vector<8x512xf32> to vector<8x128xf32>
    %316 = arith.negf %315 : vector<8x128xf32>
    %317 = math.exp %316 : vector<8x128xf32>
    %cst_92 = arith.constant 1.000000e+00 : f32
    %318 = vector.broadcast %cst_92 : f32 to vector<8x128xf32>
    %319 = arith.addf %318, %317 : vector<8x128xf32>
    %320 = arith.divf %318, %319 : vector<8x128xf32>
    %321 = vector.extract_strided_slice %314 {offsets = [0, 128], sizes = [8, 128], strides = [1, 1]} : vector<8x512xf32> to vector<8x128xf32>
    %322 = arith.negf %321 : vector<8x128xf32>
    %323 = math.exp %322 : vector<8x128xf32>
    %cst_93 = arith.constant 1.000000e+00 : f32
    %324 = vector.broadcast %cst_93 : f32 to vector<8x128xf32>
    %325 = arith.addf %324, %323 : vector<8x128xf32>
    %326 = arith.divf %324, %325 : vector<8x128xf32>
    %327 = vector.extract_strided_slice %314 {offsets = [0, 256], sizes = [8, 128], strides = [1, 1]} : vector<8x512xf32> to vector<8x128xf32>
    %328 = math.tanh %327 : vector<8x128xf32>
    %329 = vector.extract_strided_slice %314 {offsets = [0, 384], sizes = [8, 128], strides = [1, 1]} : vector<8x512xf32> to vector<8x128xf32>
    %330 = arith.negf %329 : vector<8x128xf32>
    %331 = math.exp %330 : vector<8x128xf32>
    %cst_94 = arith.constant 1.000000e+00 : f32
    %332 = vector.broadcast %cst_94 : f32 to vector<8x128xf32>
    %333 = arith.addf %332, %331 : vector<8x128xf32>
    %334 = arith.divf %332, %333 : vector<8x128xf32>
    %335 = arith.mulf %326, %279 : vector<8x128xf32>
    %336 = arith.mulf %320, %328 : vector<8x128xf32>
    %337 = arith.addf %335, %336 : vector<8x128xf32>
    %338 = math.tanh %337 : vector<8x128xf32>
    %339 = arith.mulf %334, %338 : vector<8x128xf32>
    %c32 = arith.constant 32 : index
    %c0_95 = arith.constant 0 : index
    %340 = vector.load %arg19[%c32, %c0_95] : memref<64x128xf32, #tpu.memory_space<vmem>>, vector<8x128xf32>
    tpu.vector_store %arg19[%c32, %c0_95], %339 {strides = array<i32>} : memref<64x128xf32, #tpu.memory_space<vmem>>, vector<8x128xf32>,
    %c0_96 = arith.constant 0 : index
    %c0_97 = arith.constant 0 : index
    %341 = vector.load %arg9[%c0_96, %c0_97] : memref<128x512xf32, #tpu.memory_space<vmem>>, vector<128x512xf32>
    %cst_98 = arith.constant dense<0.000000e+00> : vector<8x512xf32>
    %342 = tpu.matmul %310, %341, %cst_98 {dimension_numbers = #tpu.dot_dimension_numbers<[1], [0], [0], [1], [0, 0, 1, 1], [], []>} : vector<8x128xf32>, vector<128x512xf32>, vector<8x512xf32> -> vector<8x512xf32>
    %343 = arith.addf %46, %342 : vector<8x512xf32>
    %344 = vector.extract_strided_slice %343 {offsets = [0, 0], sizes = [8, 128], strides = [1, 1]} : vector<8x512xf32> to vector<8x128xf32>
    %345 = arith.negf %344 : vector<8x128xf32>
    %346 = math.exp %345 : vector<8x128xf32>
    %cst_99 = arith.constant 1.000000e+00 : f32
    %347 = vector.broadcast %cst_99 : f32 to vector<8x128xf32>
    %348 = arith.addf %347, %346 : vector<8x128xf32>
    %349 = arith.divf %347, %348 : vector<8x128xf32>
    %350 = vector.extract_strided_slice %343 {offsets = [0, 128], sizes = [8, 128], strides = [1, 1]} : vector<8x512xf32> to vector<8x128xf32>
    %351 = arith.negf %350 : vector<8x128xf32>
    %352 = math.exp %351 : vector<8x128xf32>
    %cst_100 = arith.constant 1.000000e+00 : f32
    %353 = vector.broadcast %cst_100 : f32 to vector<8x128xf32>
    %354 = arith.addf %353, %352 : vector<8x128xf32>
    %355 = arith.divf %353, %354 : vector<8x128xf32>
    %356 = vector.extract_strided_slice %343 {offsets = [0, 256], sizes = [8, 128], strides = [1, 1]} : vector<8x512xf32> to vector<8x128xf32>
    %357 = math.tanh %356 : vector<8x128xf32>
    %358 = vector.extract_strided_slice %343 {offsets = [0, 384], sizes = [8, 128], strides = [1, 1]} : vector<8x512xf32> to vector<8x128xf32>
    %359 = arith.negf %358 : vector<8x128xf32>
    %360 = math.exp %359 : vector<8x128xf32>
    %cst_101 = arith.constant 1.000000e+00 : f32
    %361 = vector.broadcast %cst_101 : f32 to vector<8x128xf32>
    %362 = arith.addf %361, %360 : vector<8x128xf32>
    %363 = arith.divf %361, %362 : vector<8x128xf32>
    %364 = arith.mulf %355, %308 : vector<8x128xf32>
    %365 = arith.mulf %349, %357 : vector<8x128xf32>
    %366 = arith.addf %364, %365 : vector<8x128xf32>
    %367 = math.tanh %366 : vector<8x128xf32>
    %368 = arith.mulf %363, %367 : vector<8x128xf32>
    %369 = tpu.concatenate %368, %339 in 1 : vector<8x128xf32>, vector<8x128xf32> -> vector<8x256xf32>
    %c0_102 = arith.constant 0 : index
    %c0_103 = arith.constant 0 : index
    %370 = vector.load %arg10[%c0_102, %c0_103] : memref<256x512xf32, #tpu.memory_space<vmem>>, vector<256x512xf32>
    %cst_104 = arith.constant dense<0.000000e+00> : vector<8x512xf32>
    %371 = tpu.matmul %369, %370, %cst_104 {dimension_numbers = #tpu.dot_dimension_numbers<[1], [0], [0], [1], [0, 0, 1, 1], [], []>} : vector<8x256xf32>, vector<256x512xf32>, vector<8x512xf32> -> vector<8x512xf32>
    %372 = arith.addf %371, %49 : vector<8x512xf32>
    %373 = vector.extract_strided_slice %372 {offsets = [0, 0], sizes = [8, 128], strides = [1, 1]} : vector<8x512xf32> to vector<8x128xf32>
    %374 = arith.negf %373 : vector<8x128xf32>
    %375 = math.exp %374 : vector<8x128xf32>
    %cst_105 = arith.constant 1.000000e+00 : f32
    %376 = vector.broadcast %cst_105 : f32 to vector<8x128xf32>
    %377 = arith.addf %376, %375 : vector<8x128xf32>
    %378 = arith.divf %376, %377 : vector<8x128xf32>
    %379 = vector.extract_strided_slice %372 {offsets = [0, 128], sizes = [8, 128], strides = [1, 1]} : vector<8x512xf32> to vector<8x128xf32>
    %380 = arith.negf %379 : vector<8x128xf32>
    %381 = math.exp %380 : vector<8x128xf32>
    %cst_106 = arith.constant 1.000000e+00 : f32
    %382 = vector.broadcast %cst_106 : f32 to vector<8x128xf32>
    %383 = arith.addf %382, %381 : vector<8x128xf32>
    %384 = arith.divf %382, %383 : vector<8x128xf32>
    %385 = vector.extract_strided_slice %372 {offsets = [0, 256], sizes = [8, 128], strides = [1, 1]} : vector<8x512xf32> to vector<8x128xf32>
    %386 = math.tanh %385 : vector<8x128xf32>
    %387 = vector.extract_strided_slice %372 {offsets = [0, 384], sizes = [8, 128], strides = [1, 1]} : vector<8x512xf32> to vector<8x128xf32>
    %388 = arith.negf %387 : vector<8x128xf32>
    %389 = math.exp %388 : vector<8x128xf32>
    %cst_107 = arith.constant 1.000000e+00 : f32
    %390 = vector.broadcast %cst_107 : f32 to vector<8x128xf32>
    %391 = arith.addf %390, %389 : vector<8x128xf32>
    %392 = arith.divf %390, %391 : vector<8x128xf32>
    %393 = arith.mulf %384, %337 : vector<8x128xf32>
    %394 = arith.mulf %378, %386 : vector<8x128xf32>
    %395 = arith.addf %393, %394 : vector<8x128xf32>
    %396 = math.tanh %395 : vector<8x128xf32>
    %397 = arith.mulf %392, %396 : vector<8x128xf32>
    %c40 = arith.constant 40 : index
    %c0_108 = arith.constant 0 : index
    %398 = vector.load %arg19[%c40, %c0_108] : memref<64x128xf32, #tpu.memory_space<vmem>>, vector<8x128xf32>
    tpu.vector_store %arg19[%c40, %c0_108], %397 {strides = array<i32>} : memref<64x128xf32, #tpu.memory_space<vmem>>, vector<8x128xf32>,
    %c0_109 = arith.constant 0 : index
    %c0_110 = arith.constant 0 : index
    %399 = vector.load %arg9[%c0_109, %c0_110] : memref<128x512xf32, #tpu.memory_space<vmem>>, vector<128x512xf32>
    %cst_111 = arith.constant dense<0.000000e+00> : vector<8x512xf32>
    %400 = tpu.matmul %368, %399, %cst_111 {dimension_numbers = #tpu.dot_dimension_numbers<[1], [0], [0], [1], [0, 0, 1, 1], [], []>} : vector<8x128xf32>, vector<128x512xf32>, vector<8x512xf32> -> vector<8x512xf32>
    %401 = arith.addf %46, %400 : vector<8x512xf32>
    %402 = vector.extract_strided_slice %401 {offsets = [0, 0], sizes = [8, 128], strides = [1, 1]} : vector<8x512xf32> to vector<8x128xf32>
    %403 = arith.negf %402 : vector<8x128xf32>
    %404 = math.exp %403 : vector<8x128xf32>
    %cst_112 = arith.constant 1.000000e+00 : f32
    %405 = vector.broadcast %cst_112 : f32 to vector<8x128xf32>
    %406 = arith.addf %405, %404 : vector<8x128xf32>
    %407 = arith.divf %405, %406 : vector<8x128xf32>
    %408 = vector.extract_strided_slice %401 {offsets = [0, 128], sizes = [8, 128], strides = [1, 1]} : vector<8x512xf32> to vector<8x128xf32>
    %409 = arith.negf %408 : vector<8x128xf32>
    %410 = math.exp %409 : vector<8x128xf32>
    %cst_113 = arith.constant 1.000000e+00 : f32
    %411 = vector.broadcast %cst_113 : f32 to vector<8x128xf32>
    %412 = arith.addf %411, %410 : vector<8x128xf32>
    %413 = arith.divf %411, %412 : vector<8x128xf32>
    %414 = vector.extract_strided_slice %401 {offsets = [0, 256], sizes = [8, 128], strides = [1, 1]} : vector<8x512xf32> to vector<8x128xf32>
    %415 = math.tanh %414 : vector<8x128xf32>
    %416 = vector.extract_strided_slice %401 {offsets = [0, 384], sizes = [8, 128], strides = [1, 1]} : vector<8x512xf32> to vector<8x128xf32>
    %417 = arith.negf %416 : vector<8x128xf32>
    %418 = math.exp %417 : vector<8x128xf32>
    %cst_114 = arith.constant 1.000000e+00 : f32
    %419 = vector.broadcast %cst_114 : f32 to vector<8x128xf32>
    %420 = arith.addf %419, %418 : vector<8x128xf32>
    %421 = arith.divf %419, %420 : vector<8x128xf32>
    %422 = arith.mulf %413, %366 : vector<8x128xf32>
    %423 = arith.mulf %407, %415 : vector<8x128xf32>
    %424 = arith.addf %422, %423 : vector<8x128xf32>
    %425 = math.tanh %424 : vector<8x128xf32>
    %426 = arith.mulf %421, %425 : vector<8x128xf32>
    %427 = tpu.concatenate %426, %397 in 1 : vector<8x128xf32>, vector<8x128xf32> -> vector<8x256xf32>
    %c0_115 = arith.constant 0 : index
    %c0_116 = arith.constant 0 : index
    %428 = vector.load %arg10[%c0_115, %c0_116] : memref<256x512xf32, #tpu.memory_space<vmem>>, vector<256x512xf32>
    %cst_117 = arith.constant dense<0.000000e+00> : vector<8x512xf32>
    %429 = tpu.matmul %427, %428, %cst_117 {dimension_numbers = #tpu.dot_dimension_numbers<[1], [0], [0], [1], [0, 0, 1, 1], [], []>} : vector<8x256xf32>, vector<256x512xf32>, vector<8x512xf32> -> vector<8x512xf32>
    %430 = arith.addf %429, %49 : vector<8x512xf32>
    %431 = vector.extract_strided_slice %430 {offsets = [0, 0], sizes = [8, 128], strides = [1, 1]} : vector<8x512xf32> to vector<8x128xf32>
    %432 = arith.negf %431 : vector<8x128xf32>
    %433 = math.exp %432 : vector<8x128xf32>
    %cst_118 = arith.constant 1.000000e+00 : f32
    %434 = vector.broadcast %cst_118 : f32 to vector<8x128xf32>
    %435 = arith.addf %434, %433 : vector<8x128xf32>
    %436 = arith.divf %434, %435 : vector<8x128xf32>
    %437 = vector.extract_strided_slice %430 {offsets = [0, 128], sizes = [8, 128], strides = [1, 1]} : vector<8x512xf32> to vector<8x128xf32>
    %438 = arith.negf %437 : vector<8x128xf32>
    %439 = math.exp %438 : vector<8x128xf32>
    %cst_119 = arith.constant 1.000000e+00 : f32
    %440 = vector.broadcast %cst_119 : f32 to vector<8x128xf32>
    %441 = arith.addf %440, %439 : vector<8x128xf32>
    %442 = arith.divf %440, %441 : vector<8x128xf32>
    %443 = vector.extract_strided_slice %430 {offsets = [0, 256], sizes = [8, 128], strides = [1, 1]} : vector<8x512xf32> to vector<8x128xf32>
    %444 = math.tanh %443 : vector<8x128xf32>
    %445 = vector.extract_strided_slice %430 {offsets = [0, 384], sizes = [8, 128], strides = [1, 1]} : vector<8x512xf32> to vector<8x128xf32>
    %446 = arith.negf %445 : vector<8x128xf32>
    %447 = math.exp %446 : vector<8x128xf32>
    %cst_120 = arith.constant 1.000000e+00 : f32
    %448 = vector.broadcast %cst_120 : f32 to vector<8x128xf32>
    %449 = arith.addf %448, %447 : vector<8x128xf32>
    %450 = arith.divf %448, %449 : vector<8x128xf32>
    %451 = arith.mulf %442, %395 : vector<8x128xf32>
    %452 = arith.mulf %436, %444 : vector<8x128xf32>
    %453 = arith.addf %451, %452 : vector<8x128xf32>
    %454 = math.tanh %453 : vector<8x128xf32>
    %455 = arith.mulf %450, %454 : vector<8x128xf32>
    %c48 = arith.constant 48 : index
    %c0_121 = arith.constant 0 : index
    %456 = vector.load %arg19[%c48, %c0_121] : memref<64x128xf32, #tpu.memory_space<vmem>>, vector<8x128xf32>
    tpu.vector_store %arg19[%c48, %c0_121], %455 {strides = array<i32>} : memref<64x128xf32, #tpu.memory_space<vmem>>, vector<8x128xf32>,
    %c0_122 = arith.constant 0 : index
    %c0_123 = arith.constant 0 : index
    %457 = vector.load %arg9[%c0_122, %c0_123] : memref<128x512xf32, #tpu.memory_space<vmem>>, vector<128x512xf32>
    %cst_124 = arith.constant dense<0.000000e+00> : vector<8x512xf32>
    %458 = tpu.matmul %426, %457, %cst_124 {dimension_numbers = #tpu.dot_dimension_numbers<[1], [0], [0], [1], [0, 0, 1, 1], [], []>} : vector<8x128xf32>, vector<128x512xf32>, vector<8x512xf32> -> vector<8x512xf32>
    %459 = arith.addf %46, %458 : vector<8x512xf32>
    %460 = vector.extract_strided_slice %459 {offsets = [0, 0], sizes = [8, 128], strides = [1, 1]} : vector<8x512xf32> to vector<8x128xf32>
    %461 = arith.negf %460 : vector<8x128xf32>
    %462 = math.exp %461 : vector<8x128xf32>
    %cst_125 = arith.constant 1.000000e+00 : f32
    %463 = vector.broadcast %cst_125 : f32 to vector<8x128xf32>
    %464 = arith.addf %463, %462 : vector<8x128xf32>
    %465 = arith.divf %463, %464 : vector<8x128xf32>
    %466 = vector.extract_strided_slice %459 {offsets = [0, 128], sizes = [8, 128], strides = [1, 1]} : vector<8x512xf32> to vector<8x128xf32>
    %467 = arith.negf %466 : vector<8x128xf32>
    %468 = math.exp %467 : vector<8x128xf32>
    %cst_126 = arith.constant 1.000000e+00 : f32
    %469 = vector.broadcast %cst_126 : f32 to vector<8x128xf32>
    %470 = arith.addf %469, %468 : vector<8x128xf32>
    %471 = arith.divf %469, %470 : vector<8x128xf32>
    %472 = vector.extract_strided_slice %459 {offsets = [0, 256], sizes = [8, 128], strides = [1, 1]} : vector<8x512xf32> to vector<8x128xf32>
    %473 = math.tanh %472 : vector<8x128xf32>
    %474 = vector.extract_strided_slice %459 {offsets = [0, 384], sizes = [8, 128], strides = [1, 1]} : vector<8x512xf32> to vector<8x128xf32>
    %475 = arith.negf %474 : vector<8x128xf32>
    %476 = math.exp %475 : vector<8x128xf32>
    %cst_127 = arith.constant 1.000000e+00 : f32
    %477 = vector.broadcast %cst_127 : f32 to vector<8x128xf32>
    %478 = arith.addf %477, %476 : vector<8x128xf32>
    %479 = arith.divf %477, %478 : vector<8x128xf32>
    %480 = arith.mulf %471, %424 : vector<8x128xf32>
    %481 = arith.mulf %465, %473 : vector<8x128xf32>
    %482 = arith.addf %480, %481 : vector<8x128xf32>
    %483 = math.tanh %482 : vector<8x128xf32>
    %484 = arith.mulf %479, %483 : vector<8x128xf32>
    %485 = tpu.concatenate %484, %455 in 1 : vector<8x128xf32>, vector<8x128xf32> -> vector<8x256xf32>
    %c0_128 = arith.constant 0 : index
    %c0_129 = arith.constant 0 : index
    %486 = vector.load %arg10[%c0_128, %c0_129] : memref<256x512xf32, #tpu.memory_space<vmem>>, vector<256x512xf32>
    %cst_130 = arith.constant dense<0.000000e+00> : vector<8x512xf32>
    %487 = tpu.matmul %485, %486, %cst_130 {dimension_numbers = #tpu.dot_dimension_numbers<[1], [0], [0], [1], [0, 0, 1, 1], [], []>} : vector<8x256xf32>, vector<256x512xf32>, vector<8x512xf32> -> vector<8x512xf32>
    %488 = arith.addf %487, %49 : vector<8x512xf32>
    %489 = vector.extract_strided_slice %488 {offsets = [0, 0], sizes = [8, 128], strides = [1, 1]} : vector<8x512xf32> to vector<8x128xf32>
    %490 = arith.negf %489 : vector<8x128xf32>
    %491 = math.exp %490 : vector<8x128xf32>
    %cst_131 = arith.constant 1.000000e+00 : f32
    %492 = vector.broadcast %cst_131 : f32 to vector<8x128xf32>
    %493 = arith.addf %492, %491 : vector<8x128xf32>
    %494 = arith.divf %492, %493 : vector<8x128xf32>
    %495 = vector.extract_strided_slice %488 {offsets = [0, 128], sizes = [8, 128], strides = [1, 1]} : vector<8x512xf32> to vector<8x128xf32>
    %496 = arith.negf %495 : vector<8x128xf32>
    %497 = math.exp %496 : vector<8x128xf32>
    %cst_132 = arith.constant 1.000000e+00 : f32
    %498 = vector.broadcast %cst_132 : f32 to vector<8x128xf32>
    %499 = arith.addf %498, %497 : vector<8x128xf32>
    %500 = arith.divf %498, %499 : vector<8x128xf32>
    %501 = vector.extract_strided_slice %488 {offsets = [0, 256], sizes = [8, 128], strides = [1, 1]} : vector<8x512xf32> to vector<8x128xf32>
    %502 = math.tanh %501 : vector<8x128xf32>
    %503 = vector.extract_strided_slice %488 {offsets = [0, 384], sizes = [8, 128], strides = [1, 1]} : vector<8x512xf32> to vector<8x128xf32>
    %504 = arith.negf %503 : vector<8x128xf32>
    %505 = math.exp %504 : vector<8x128xf32>
    %cst_133 = arith.constant 1.000000e+00 : f32
    %506 = vector.broadcast %cst_133 : f32 to vector<8x128xf32>
    %507 = arith.addf %506, %505 : vector<8x128xf32>
    %508 = arith.divf %506, %507 : vector<8x128xf32>
    %509 = arith.mulf %500, %453 : vector<8x128xf32>
    %510 = arith.mulf %494, %502 : vector<8x128xf32>
    %511 = arith.addf %509, %510 : vector<8x128xf32>
    %512 = math.tanh %511 : vector<8x128xf32>
    %513 = arith.mulf %508, %512 : vector<8x128xf32>
    %c56 = arith.constant 56 : index
    %c0_134 = arith.constant 0 : index
    %514 = vector.load %arg19[%c56, %c0_134] : memref<64x128xf32, #tpu.memory_space<vmem>>, vector<8x128xf32>
    tpu.vector_store %arg19[%c56, %c0_134], %513 {strides = array<i32>} : memref<64x128xf32, #tpu.memory_space<vmem>>, vector<8x128xf32>,
    %c0_135 = arith.constant 0 : index
    %c0_136 = arith.constant 0 : index
    %515 = vector.load %arg19[%c0_135, %c0_136] : memref<64x128xf32, #tpu.memory_space<vmem>>, vector<64x128xf32>
    %c0_137 = arith.constant 0 : index
    %c0_138 = arith.constant 0 : index
    %516 = vector.load %arg12[%c0_137, %c0_138] : memref<128x16xf32, #tpu.memory_space<vmem>>, vector<128x16xf32>
    %cst_139 = arith.constant dense<0.000000e+00> : vector<64x16xf32>
    %517 = tpu.matmul %515, %516, %cst_139 {dimension_numbers = #tpu.dot_dimension_numbers<[1], [0], [0], [1], [0, 0, 1, 1], [], []>} : vector<64x128xf32>, vector<128x16xf32>, vector<64x16xf32> -> vector<64x16xf32>
    %c0_140 = arith.constant 0 : index
    %c0_141 = arith.constant 0 : index
    %518 = vector.load %arg13[%c0_140, %c0_141] : memref<1x16xf32, #tpu.memory_space<vmem>>, vector<1x16xf32>
    %519 = vector.broadcast %518 : vector<1x16xf32> to vector<64x16xf32>
    %520 = arith.addf %517, %519 : vector<64x16xf32>
    %c0_142 = arith.constant 0 : index
    %c0_143 = arith.constant 0 : index
    %521 = vector.load %arg14[%c0_142, %c0_143] : memref<1x16xf32, #tpu.memory_space<vmem>>, vector<1x16xf32>
    %c0_144 = arith.constant 0 : index
    %c0_145 = arith.constant 0 : index
    %522 = vector.load %arg15[%c0_144, %c0_145] : memref<1x16xf32, #tpu.memory_space<vmem>>, vector<1x16xf32>
    %cst_146 = arith.constant dense<0.000000e+00> : vector<64xf32>
    %523 = vector.multi_reduction <add>, %520, %cst_146 [1] : vector<64x16xf32> to vector<64xf32>
    %524 = vector.shape_cast %523 : vector<64xf32> to vector<64x1xf32>
    %cst_147 = arith.constant 1.600000e+01 : f32
    %525 = vector.broadcast %cst_147 : f32 to vector<64x1xf32>
    %526 = arith.divf %524, %525 : vector<64x1xf32>
    %527 = vector.broadcast %526 : vector<64x1xf32> to vector<64x16xf32>
    %528 = arith.subf %520, %527 : vector<64x16xf32>
    %529 = arith.mulf %528, %528 : vector<64x16xf32>
    %cst_148 = arith.constant dense<0.000000e+00> : vector<64xf32>
    %530 = vector.multi_reduction <add>, %529, %cst_148 [1] : vector<64x16xf32> to vector<64xf32>
    %531 = vector.shape_cast %530 : vector<64xf32> to vector<64x1xf32>
    %cst_149 = arith.constant 1.600000e+01 : f32
    %532 = vector.broadcast %cst_149 : f32 to vector<64x1xf32>
    %533 = arith.divf %531, %532 : vector<64x1xf32>
    %534 = vector.broadcast %526 : vector<64x1xf32> to vector<64x16xf32>
    %535 = arith.subf %520, %534 : vector<64x16xf32>
    %cst_150 = arith.constant 9.99999974E-6 : f32
    %536 = vector.broadcast %cst_150 : f32 to vector<64x1xf32>
    %537 = arith.addf %533, %536 : vector<64x1xf32>
    %538 = math.rsqrt %537 : vector<64x1xf32>
    %539 = vector.broadcast %538 : vector<64x1xf32> to vector<64x16xf32>
    %540 = arith.mulf %535, %539 : vector<64x16xf32>
    %541 = vector.broadcast %521 : vector<1x16xf32> to vector<64x16xf32>
    %542 = arith.mulf %540, %541 : vector<64x16xf32>
    %543 = vector.broadcast %522 : vector<1x16xf32> to vector<64x16xf32>
    %544 = arith.addf %542, %543 : vector<64x16xf32>
    %cst_151 = arith.constant 5.000000e-01 : f32
    %545 = vector.broadcast %cst_151 : f32 to vector<64x16xf32>
    %546 = arith.mulf %545, %544 : vector<64x16xf32>
    %cst_152 = arith.constant 0.707106769 : f32
    %547 = vector.broadcast %cst_152 : f32 to vector<64x16xf32>
    %548 = arith.mulf %544, %547 : vector<64x16xf32>
    %549 = math.erf %548 : vector<64x16xf32>
    %cst_153 = arith.constant 1.000000e+00 : f32
    %550 = vector.broadcast %cst_153 : f32 to vector<64x16xf32>
    %551 = arith.addf %550, %549 : vector<64x16xf32>
    %552 = arith.mulf %546, %551 : vector<64x16xf32>
    %c0_154 = arith.constant 0 : index
    %c0_155 = arith.constant 0 : index
    %553 = vector.load %arg16[%c0_154, %c0_155] : memref<16x12xf32, #tpu.memory_space<vmem>>, vector<16x12xf32>
    %cst_156 = arith.constant dense<0.000000e+00> : vector<64x12xf32>
    %554 = tpu.matmul %552, %553, %cst_156 {dimension_numbers = #tpu.dot_dimension_numbers<[1], [0], [0], [1], [0, 0, 1, 1], [], []>} : vector<64x16xf32>, vector<16x12xf32>, vector<64x12xf32> -> vector<64x12xf32>
    %c0_157 = arith.constant 0 : index
    %c0_158 = arith.constant 0 : index
    %555 = vector.load %arg17[%c0_157, %c0_158] : memref<1x12xf32, #tpu.memory_space<vmem>>, vector<1x12xf32>
    %556 = vector.broadcast %555 : vector<1x12xf32> to vector<64x12xf32>
    %557 = arith.addf %554, %556 : vector<64x12xf32>
    %558 = math.tanh %557 : vector<64x12xf32>
    %c0_159 = arith.constant 0 : index
    %c0_160 = arith.constant 0 : index
    %559 = vector.load %arg18[%c0_159, %c0_160] : memref<64x12xf32, #tpu.memory_space<vmem>>, vector<64x12xf32>
    tpu.vector_store %arg18[%c0_159, %c0_160], %558 {strides = array<i32>} : memref<64x12xf32, #tpu.memory_space<vmem>>, vector<64x12xf32>,
    return
  }
}

</mosaic_0001>

<bundles_post_ra>
// kernel: _lambda_.1
= control target key start
LH: loop header
LB: loop body
LE: loop exit
PB: predicated region body
PF: predicated region fallthrough
CT: control target
= control target key end

     0   :  { %s9524_s0 = inlined_call_operand.vmem [shape: f32[8,16], index: 0, kind: input, shape index: {}]   ;;  %s9525_s1 = inlined_call_operand.vmem [shape: f32[8,8], index: 1, kind: input, shape index: {}]   ;;  %s9526_s2 = inlined_call_operand.vmem [shape: f32[16,32], index: 2, kind: input, shape index: {}]   ;;  %s9527_s3 = inlined_call_operand.vmem [shape: f32[8,32], index: 3, kind: input, shape index: {}]   ;;  %s9528_s4 = inlined_call_operand.vmem [shape: f32[1,32], index: 4, kind: input, shape index: {}]   ;;  %s9529_s5 = inlined_call_operand.vmem [shape: f32[1,32], index: 5, kind: input, shape index: {}]   ;;  %s9530_s6 = inlined_call_operand.vmem [shape: f32[1,32], index: 6, kind: input, shape index: {}]   ;;  %s9531_s7 = inlined_call_operand.hbm [shape: f32[32,512], index: 7, kind: input, shape index: {}]   ;;  %s9532_s8 = inlined_call_operand.vmem [shape: f32[1,512], index: 8, kind: input, shape index: {}]   ;;  %s9533_s9 = inlined_call_operand.hbm [shape: f32[128,512], index: 9, kind: input, shape index: {}]   ;;  %s9534_s10 = inlined_call_operand.hbm [shape: f32[256,512], index: 10, kind: input, shape index: {}]   ;;  %s9535_s11 = inlined_call_operand.vmem [shape: f32[1,512], index: 11, kind: input, shape index: {}]   ;;  %s9536_s12 = inlined_call_operand.hbm [shape: f32[128,16], index: 12, kind: input, shape index: {}]   ;;  %s9537_s13 = inlined_call_operand.vmem [shape: f32[1,16], index: 13, kind: input, shape index: {}]   ;;  %s9538_s14 = inlined_call_operand.vmem [shape: f32[1,16], index: 14, kind: input, shape index: {}]   ;;  %s9539_s15 = inlined_call_operand.vmem [shape: f32[1,16], index: 15, kind: input, shape index: {}]   ;;  %s9540_s16 = inlined_call_operand.vmem [shape: f32[16,12], index: 16, kind: input, shape index: {}]   ;;  %s9541_s17 = inlined_call_operand.vmem [shape: f32[1,12], index: 17, kind: input, shape index: {}]   ;;  %s9542_s18 = inlined_call_operand.vmem [shape: f32[64,12], index: 18, kind: output, shape index: {}]  }
   0x1   :  { %9748 = sst [smem:[#allocation67_spill]] %s9524_s0 }
   0x2   :  { %9749 = sst [smem:[#allocation68_spill]] %s9525_s1 }
   0x3   :  { %9750 = sst [smem:[#allocation69_spill]] %s9526_s2 }
   0x4   :  { %23 = vsyncpa [#allocation4], 0 }
   0x5   :  { %24 = vsyncpa [#allocation6], 0 }
   0x6   :  { %25 = vsyncpa [#allocation9], 0  ;;  %s7403_s27 = smov [#allocation5]   ;;  %s7404_s29 = smov [#allocation3]  }
   0x7   :  { %s59_s28 = sshll.u32 %s7403_s27, 4  ;;  %s45_s30 = sshll.u32 %s7404_s29, 4  ;;  %s60_s28 = int_to_ptr.vmem [resolvable:$true] %s59_s28  ;;  %s7509_s30 = int_to_ptr.vmem [resolvable:$true] %s45_s30 }
   0x8   :  { %s7309_s1 = scalar_lea.hbm %s9533_s9, 8192 }
   0x9   :  { %p7310_p0 = scmp.ne.s32.totalorder %s9533_s9, %s7309_s1  ;;  %p7313_p1 = scmp.lt.u32.totalorder %s7309_s1, %s9533_s9 }
   0xb   :  { %p7315_p2 = pnand %p7313_p1, %p7310_p0 }
   0xd   :  { %7318 = shalt.err (!%p7315_p2)
}
   0xe   :  { %s7319_s23 = scalar_lea.vmem %s60_s28, 8192  ;;  %p7324_p4 = scmp.lt.s32.totalorder %s60_s28, %s60_s28 }
   0xf   :  { %p7320_p3 = scmp.ne.s32.totalorder %s60_s28, %s7319_s23  ;;  %p7325_p5 = scmp.lt.s32.totalorder %s7319_s23, %s7319_s23 }
  0x11   :  { %p7326_p6 = por %p7325_p5, %p7324_p4 }
  0x13   :  { %p7327_p7 = pnand %p7326_p6, %p7320_p3 }
  0x15   :  { %7330 = shalt.err (!%p7327_p7)
}
  0x16   :  { %s7405_s24 = smov 512   ;;  %s7406_s25 = smov 32  }
  0x17   :  { %65 = dma.hbm_to_vmem [thread:$0]  %s9533_s9, 8192, %s60_s28, [#allocation6], %s7405_s24, %s7405_s24, %s7406_s25  }
  0x18   :  { %s7331_s19 = scalar_lea.hbm %s9531_s7, 2048 }
  0x19   :  { %p7332_p8 = scmp.ne.s32.totalorder %s9531_s7, %s7331_s19  ;;  %p7335_p9 = scmp.lt.u32.totalorder %s7331_s19, %s9531_s7 }
  0x1b   :  { %p7337_p10 = pnand %p7335_p9, %p7332_p8 }
  0x1d   :  { %7340 = shalt.err (!%p7337_p10)
}
  0x1e   :  { %s7341_s2 = scalar_lea.vmem %s7509_s30, 2048  ;;  %p7346_p12 = scmp.lt.s32.totalorder %s7509_s30, %s7509_s30 }
  0x1f   :  { %p7342_p11 = scmp.ne.s32.totalorder %s7509_s30, %s7341_s2  ;;  %p7347_p13 = scmp.lt.s32.totalorder %s7341_s2, %s7341_s2 }
  0x21   :  { %p7348_p0 = por %p7347_p13, %p7346_p12 }
  0x23   :  { %p7349_p1 = pnand %p7348_p0, %p7342_p11 }
  0x25   :  { %7352 = shalt.err (!%p7349_p1)
}
  0x26   :  { %51 = dma.hbm_to_vmem [thread:$0]  %s9531_s7, 2048, %s7509_s30, [#allocation4], %s7405_s24, %s7405_s24, %s7406_s25  }
  0x27   :  { %s7407_s23 = smov [#allocation7]   ;;  %s7408_s27 = smov [#allocation8]  }
  0x28   :  { %s71_s26 = sshll.u32 %s7407_s23, 4  ;;  %s85_s29 = sshll.u32 %s7408_s27, 4  ;;  %s72_s26 = int_to_ptr.vmem [resolvable:$true] %s71_s26  ;;  %s7546_s29 = int_to_ptr.vmem [resolvable:$true] %s85_s29 }
  0x29   :  { %s7353_s1 = scalar_lea.hbm %s9534_s10, 16384 }
  0x2a   :  { %p7354_p2 = scmp.ne.s32.totalorder %s9534_s10, %s7353_s1  ;;  %p7357_p3 = scmp.lt.u32.totalorder %s7353_s1, %s9534_s10 }
  0x2c   :  { %p7359_p4 = pnand %p7357_p3, %p7354_p2 }
  0x2e   :  { %7362 = shalt.err (!%p7359_p4)
}
  0x2f   :  { %s7363_s7 = scalar_lea.vmem %s72_s26, 16384  ;;  %p7368_p6 = scmp.lt.s32.totalorder %s72_s26, %s72_s26 }
  0x30   :  { %p7364_p5 = scmp.ne.s32.totalorder %s72_s26, %s7363_s7  ;;  %p7369_p7 = scmp.lt.s32.totalorder %s7363_s7, %s7363_s7 }
  0x32   :  { %p7370_p8 = por %p7369_p7, %p7368_p6 }
  0x34   :  { %p7371_p9 = pnand %p7370_p8, %p7364_p5 }
  0x36   :  { %7374 = shalt.err (!%p7371_p9)
}
  0x37   :  { %77 = dma.hbm_to_vmem [thread:$0]  %s9534_s10, 16384, %s72_s26, [#allocation6], %s7405_s24, %s7405_s24, %s7406_s25  }
  0x38   :  { %s7375_s27 = scalar_lea.hbm %s9536_s12, 2048 }
  0x39   :  { %p7376_p10 = scmp.ne.s32.totalorder %s9536_s12, %s7375_s27  ;;  %p7379_p11 = scmp.lt.u32.totalorder %s7375_s27, %s9536_s12 }
  0x3b   :  { %p7381_p12 = pnand %p7379_p11, %p7376_p10 }
  0x3d   :  { %7384 = shalt.err (!%p7381_p12)
}
  0x3e   :  { %s7385_s21 = scalar_lea.vmem %s7546_s29, 2048  ;;  %p7390_p0 = scmp.lt.s32.totalorder %s7546_s29, %s7546_s29 }
  0x3f   :  { %p7386_p13 = scmp.ne.s32.totalorder %s7546_s29, %s7385_s21  ;;  %p7391_p1 = scmp.lt.s32.totalorder %s7385_s21, %s7385_s21 }
  0x41   :  { %p7392_p2 = por %p7391_p1, %p7390_p0 }
  0x43   :  { %p7393_p3 = pnand %p7392_p2, %p7386_p13 }
  0x45   :  { %7396 = shalt.err (!%p7393_p3)
}
  0x46   :  { %s7409_s10 = smov 128   ;;  %s7410_s24 = smov 8  }
  0x47   :  { %91 = dma.hbm_to_vmem [thread:$0]  %s9536_s12, 2048, %s7546_s29, [#allocation9], %s7409_s10, %s7409_s10, %s7410_s24  }
  0x48   :  { %7397 = dma.done.wait [#allocation4], 2048  }
  0x49   :  { %7398 = vsyncadd [#allocation4], 4294965248 }
  0x4a   :  { %7399 = dma.done.wait [#allocation6], 24576  }
  0x4b   :  { %7400 = vsyncadd [#allocation6], 4294942720 }
  0x4c   :  { %7401 = dma.done.wait [#allocation9], 2048  }
  0x4d   :  { %7402 = vsyncadd [#allocation9], 4294965248  ;;  %v9544_v0 = vmov 0.0   ;;  %vm7412_vm0 = vmmov 0   ;;  %vm119_vm1 = vcmask 64512   ;;  %v118_v1 = vld [vmem:[%s9527_s3] sm:$0xff] }
  0x4e   :  { %5327 = vmatprep.subr.mxu1 %v9544_v0  ;;  %5329 = vmatprep.mubr.msk.f32.mxu1 %vm7412_vm0, %v9544_v0  ;;  %s9751_s7 = sld [smem:[#allocation68_spill]]  ;;  %s9752_s28 = sld [smem:[#allocation69_spill]]  ;;  %v7413_v5 = vmov 0.0|0.0   ;;  %vm193_vm2 = vcmask 130048   ;;  %v5223_v11 = vld [vmem:[%s9528_s4] ss:$0 sm:$0xff] }
  0x4f   :  { %644 = vmatprep.mubr.f32.mxu0 %v9544_v0  ;;  %5328 = vmatpush3.msra.mxu1 %v118_v1  ;;  %s9753_s19 = sld [smem:[#allocation67_spill]]  ;;  %vm277_vm3 = vcmask 261120   ;;  %v517_v21 = vld [vmem:[#allocation5 + $0x8] sm:$0xff]  ;;  %v516_v24 = vld [vmem:[#allocation5] sm:$0xff]  ;;  %vm5205_vm4 = vcmask 97280  }
  0x50   :  { %5399 = vmatprep.subr.bf16.mxu1 %v7413_v5  ;;  %v521_v22 = vld [vmem:[#allocation5 + $0x28] sm:$0xff]  ;;  %v520_v25 = vld [vmem:[#allocation5 + $0x20] sm:$0xff] }
  0x51   :  { %v7610_v23 = vpack.c.bf16 %v521_v22, %v517_v21  ;;  %v7612_v26 = vpack.c.bf16 %v520_v25, %v516_v24  ;;  %v525_v27 = vld [vmem:[#allocation5 + $0x48] sm:$0xff]  ;;  %v524_v30 = vld [vmem:[#allocation5 + $0x40] sm:$0xff] }
  0x52   :  { %v529_v28 = vld [vmem:[#allocation5 + $0x68] sm:$0xff]  ;;  %v528_v31 = vld [vmem:[#allocation5 + $0x60] sm:$0xff] }
  0x53   :  { %5419 = vmatprep.subr.bf16.mxu0 %v7610_v23  ;;  %v7616_v29 = vpack.c.bf16 %v529_v28, %v525_v27  ;;  %v7618_v32 = vpack.c.bf16 %v528_v31, %v524_v30  ;;  %v533_v33 = vld [vmem:[#allocation5 + $0x88] sm:$0xff]  ;;  %v532_v36 = vld [vmem:[#allocation5 + $0x80] sm:$0xff] }
  0x54   :  { %v117_v2 = vld [vmem:[%s9751_s7] sm:$0xff]  ;;  %v116_v4 = vld [vmem:[%s9752_s28 + $0x8] sm:$0xff]  ;;  %5421 = vmatpush1.bf16.msra.mxu0 %v7612_v26  ;;  %v536_v37 = vld [vmem:[#allocation5 + $0xa0] sm:$0xff] }
  0x55   :  { %v115_v3 = vld [vmem:[%s9752_s28] sm:$0xff]  ;;  %5330 = vmatmul.mubr.msk.f32.vlgmr.msra.gmra.mrb[0].mxu1 %vm119_vm1, %v117_v2  ;;  %5423 = vmatprep.subr.bf16.mxu0 %v7616_v29  ;;  %v7624_v38 = vpack.c.bf16 %v536_v37, %v532_v36  ;;  %v540_v41 = vld [vmem:[#allocation5 + $0xc0] sm:$0xff]  ;;  %v313_v37 = vld [vmem:[#allocation3 + $0x10] sm:$0xff] }
  0x56   :  { %v5400_v6 = vpack.c.bf16 %v116_v4, %v115_v3  ;;  %5336 = vmatprep.mubr.msk.f32.mxu1 %vm7412_vm0, %v9544_v0  ;;  %v114_v7 = vld [vmem:[%s9753_s19] sm:$0xff]  ;;  %v544_v43 = vld [vmem:[#allocation5 + $0xe0] sm:$0xff] }
  0x57   :  { %v537_v34 = vld [vmem:[#allocation5 + $0xa8] sm:$0xff]  ;;  %v5432_v46 = vpack.c.bf16 %v544_v43, %v540_v41  ;;  %v548_v48 = vld [vmem:[#allocation5 + $0x100] sm:$0xff]  ;;  %v322_v41 = vld [vmem:[#allocation3 + $0x58] sm:$0xff] }
  0x58   :  { %5401 = vmatpush3.bf16.msra.mxu1 %v5400_v6  ;;  %5425 = vmatpush1.bf16.msra.mxu0 %v7618_v32  ;;  %v7622_v35 = vpack.c.bf16 %v537_v34, %v533_v33  ;;  %v541_v39 = vld [vmem:[#allocation5 + $0xc8] sm:$0xff]  ;;  %v552_v49 = vld [vmem:[#allocation5 + $0x120] sm:$0xff]  ;;  %v326_v43 = vld [vmem:[#allocation3 + $0x78] sm:$0xff] }
  0x59   :  { %v545_v40 = vld [vmem:[#allocation5 + $0xe8] sm:$0xff]  ;;  %v5436_v54 = vpack.c.bf16 %v552_v49, %v548_v48  ;;  %v556_v56 = vld [vmem:[#allocation5 + $0x140] sm:$0xff]  ;;  %v5414_v48 = vpack.c.bf16 %v326_v43, %v322_v41  ;;  %v321_v49 = vld [vmem:[#allocation3 + $0x50] sm:$0xff] }
  0x5a   :  { %5427 = vmatprep.subr.bf16.mxu0 %v7622_v35  ;;  %v7628_v42 = vpack.c.bf16 %v545_v40, %v541_v39  ;;  %v549_v44 = vld [vmem:[#allocation5 + $0x108] sm:$0xff]  ;;  %v311_v57 = vld [vmem:[#allocation3] sm:$0xff]  ;;  %v317_v39 = vld [vmem:[#allocation3 + $0x30] sm:$0xff] }
  0x5b   :  { %5337 = vmatmul.mubr.msk.f32.vlgmr.msra.gmra.mrb[2].mxu1 %vm193_vm2, %v114_v7  ;;  %v553_v45 = vld [vmem:[#allocation5 + $0x128] sm:$0xff]  ;;  %v560_v59 = vld [vmem:[#allocation5 + $0x160] sm:$0xff]  ;;  %v578_v41 = vld [vmem:[#allocation5 + $0x1f0] sm:$0xff] }
  0x5c   :  { %416 = vmatprep.mubr.f32.mxu1 %v9544_v0  ;;  %5429 = vmatpush1.bf16.msra.mxu0 %v7624_v38  ;;  %v5434_v47 = vpack.c.bf16 %v553_v45, %v549_v44  ;;  %v557_v50 = vld [vmem:[#allocation5 + $0x148] sm:$0xff]  ;;  %v315_v60 = vld [vmem:[#allocation3 + $0x20] sm:$0xff]  ;;  %v5440_v6 = vpack.c.bf16 %v560_v59, %v556_v56  ;;  %v527_v56 = vld [vmem:[#allocation5 + $0x58] sm:$0xff] }
  0x5d   :  { %5431 = vmatprep.subr.bf16.mxu0 %v7628_v42  ;;  %v561_v51 = vld [vmem:[#allocation5 + $0x168] sm:$0xff]  ;;  %v5404_v62 = vpack.c.bf16 %v315_v60, %v311_v57  ;;  %v319_v4 = vld [vmem:[#allocation3 + $0x40] sm:$0xff]  ;;  %v531_v57 = vld [vmem:[#allocation5 + $0x78] sm:$0xff] }
  0x5e   :  { %v312_v52 = vld [vmem:[#allocation3 + $0x8] sm:$0xff]  ;;  %v5438_v58 = vpack.c.bf16 %v561_v51, %v557_v50  ;;  %v323_v5 = vld [vmem:[#allocation3 + $0x60] sm:$0xff]  ;;  %v519_v50 = vld [vmem:[#allocation5 + $0x18] sm:$0xff]  ;;  %v7647_v59 = vpack.c.bf16 %v531_v57, %v527_v56 }
  0x5f   :  { %v316_v53 = vld [vmem:[#allocation3 + $0x28] sm:$0xff]  ;;  %v5408_v7 = vpack.c.bf16 %v323_v5, %v319_v4  ;;  %v523_v51 = vld [vmem:[#allocation5 + $0x38] sm:$0xff]  ;;  %v526_v60 = vld [vmem:[#allocation5 + $0x50] sm:$0xff] }
  0x60   :  { %5433 = vmatpush1.bf16.msra.mxu0 %v5432_v46  ;;  %v5402_v55 = vpack.c.bf16 %v316_v53, %v312_v52  ;;  %v565_v61 = vld [vmem:[#allocation5 + $0x188] sm:$0xff]  ;;  %v5412_v46 = vpack.c.bf16 %v317_v39, %v313_v37  ;;  %v7642_v53 = vpack.c.bf16 %v523_v51, %v519_v50  ;;  %v538_v4 = vld [vmem:[#allocation5 + $0xb0] sm:$0xff]  ;;  %v543_v5 = vld [vmem:[#allocation5 + $0xd8] sm:$0xff] }
  0x61   :  { %5435 = vmatprep.subr.bf16.mxu0 %v5434_v47  ;;  %v569_v63 = vld [vmem:[#allocation5 + $0x1a8] sm:$0xff]  ;;  %v750_v50 = vld [vmem:[#allocation7] sm:$0xff]  ;;  %v756_v56 = vld [vmem:[#allocation7 + $0x30] sm:$0xff] }
  0x62   :  { %5403 = vmatprep.subr.bf16.mxu1 %v5402_v55  ;;  %v320_v1 = vld [vmem:[#allocation3 + $0x48] sm:$0xff]  ;;  %v522_v55 = vld [vmem:[#allocation5 + $0x30] sm:$0xff]  ;;  %v754_v51 = vld [vmem:[#allocation7 + $0x20] sm:$0xff] }
  0x63   :  { %v324_v2 = vld [vmem:[#allocation3 + $0x68] sm:$0xff]  ;;  %5405 = vmatpush1.bf16.msra.mxu1 %v5404_v62  ;;  %v535_v62 = vld [vmem:[#allocation5 + $0x98] sm:$0xff] }
  0x64   :  { %v5406_v3 = vpack.c.bf16 %v324_v2, %v320_v1  ;;  %5437 = vmatpush1.bf16.msra.mxu0 %v5436_v54  ;;  %v5224_v28 = vld [vmem:[%s9529_s5] ss:$0 sm:$0xff]  ;;  %v518_v54 = vld [vmem:[#allocation5 + $0x10] sm:$0xff] }
  0x65   :  { %5439 = vmatprep.subr.bf16.mxu0 %v5438_v58  ;;  %v5225_v31 = vld [vmem:[%s9530_s6] ss:$0 sm:$0xff]  ;;  %v7644_v58 = vpack.c.bf16 %v522_v55, %v518_v54  ;;  %v7702_v54 = vpack.c.bf16 %v754_v51, %v750_v50  ;;  %v752_v55 = vld [vmem:[#allocation7 + $0x10] sm:$0xff]  ;;  %v778_v50 = vld [vmem:[#allocation7 + $0xe0] sm:$0xff] }
  0x66   :  { %5407 = vmatprep.subr.bf16.mxu1 %v5406_v3  ;;  %v534_v3 = vld [vmem:[#allocation5 + $0x90] sm:$0xff]  ;;  %v7705_v57 = vpack.c.bf16 %v756_v56, %v752_v55 }
  0x67   :  { %5409 = vmatpush1.bf16.msra.mxu1 %v5408_v7  ;;  %v7658_v7 = vpack.c.bf16 %v538_v4, %v534_v3  ;;  %v765_v3 = vld [vmem:[#allocation7 + $0x78] sm:$0xff]  ;;  %v758_v4 = vld [vmem:[#allocation7 + $0x40] sm:$0xff]  ;;  %v776_v56 = vld [vmem:[#allocation7 + $0xd0] sm:$0xff] }
  0x68   :  { %5441 = vmatpush1.bf16.msra.mxu0 %v5440_v6  ;;  %v547_v6 = vld [vmem:[#allocation5 + $0xf8] sm:$0xff] }
 0x128   :  { %v189_v8 = vpop.f32.mrb[0].mxu1 }
 0x129   :  { %v5331_v9 = vpop.f32.mrb[1].mxu1 }
 0x12a   :  { %v5442_v9 = vpack.c.bf16 %v569_v63, %v565_v61  ;;  %v530_v61 = vld [vmem:[#allocation5 + $0x70] sm:$0xff]  ;;  %v539_v63 = vld [vmem:[#allocation5 + $0xb8] sm:$0xff] }
 0x12b   :  { %v7651_v1 = vpack.c.bf16 %v530_v61, %v526_v60  ;;  %v7655_v2 = vpack.c.bf16 %v539_v63, %v535_v62  ;;  %v759_v60 = vld [vmem:[#allocation7 + $0x48] sm:$0xff]  ;;  %v761_v62 = vld [vmem:[#allocation7 + $0x58] sm:$0xff] }
 0x12c   :  { %5443 = vmatprep.subr.bf16.mxu0 %v5442_v9  ;;  %v542_v9 = vld [vmem:[#allocation5 + $0xd0] sm:$0xff]  ;;  %v763_v61 = vld [vmem:[#allocation7 + $0x68] sm:$0xff] }
 0x12d   :  { %v7710_v63 = vpack.c.bf16 %v763_v61, %v759_v60  ;;  %v780_v60 = vld [vmem:[#allocation7 + $0xf0] sm:$0xff] }
 0x12e   :  { %v263_v10 = vpop.f32.mrb[2].mxu1  ;;  %v7741_v61 = vpack.c.bf16 %v780_v60, %v776_v56  ;;  %v792_v60 = vld [vmem:[#allocation7 + $0x150] sm:$0xff] }
 0x12f   :  { %v264_v12 = vadd.f32 %v263_v10, %v189_v8  ;;  %v5338_v13 = vpop.f32.mrb[3].mxu1  ;;  %v314_v8 = vld [vmem:[#allocation3 + $0x18] sm:$0xff]  ;;  %v564_v10 = vld [vmem:[#allocation5 + $0x180] sm:$0xff] }
 0x130   :  { %v573_v13 = vld [vmem:[#allocation5 + $0x1c8] sm:$0xff] }
 0x131   :  { %v274_v14 = vadd.f32 %v5223_v11, %v264_v12  ;;  %v568_v11 = vld [vmem:[#allocation5 + $0x1a0] sm:$0xff]  ;;  %v318_v12 = vld [vmem:[#allocation3 + $0x38] sm:$0xff] }
 0x133   :  { %v278_v15 = vsel %vm277_vm3, %v274_v14, 0.0 }
 0x134   :  { %279 = vadd.xlane.f32.xlu0 %v278_v15  ;;  %v5410_v15 = vpack.c.bf16 %v318_v12, %v314_v8  ;;  %v7661_v8 = vpack.c.bf16 %v547_v6, %v543_v5  ;;  %v555_v12 = vld [vmem:[#allocation5 + $0x138] sm:$0xff]  ;;  %v762_v5 = vld [vmem:[#allocation7 + $0x60] sm:$0xff]  ;;  %v7712_v6 = vpack.c.bf16 %v765_v3, %v761_v62  ;;  %v783_v62 = vld [vmem:[#allocation7 + $0x108] sm:$0xff] }
 0x135   :  { %v787_v3 = vld [vmem:[#allocation7 + $0x128] sm:$0xff] }
 0x136   :  { %5411 = vmatprep.subr.bf16.mxu1 %v5410_v15  ;;  %v550_v15 = vld [vmem:[#allocation5 + $0x110] sm:$0xff] }
 0x1c1   :  { %v280_v16 = vpop.xlane.xlu0 %279 }
 0x1c2   :  { %v282_v17 = vmul.f32 0.03125, %v280_v16  ;;  %v5444_v16 = vpack.c.bf16 %v568_v11, %v564_v10  ;;  %v546_v10 = vld [vmem:[#allocation5 + $0xf0] sm:$0xff]  ;;  %v551_v11 = vld [vmem:[#allocation5 + $0x118] sm:$0xff] }
 0x1c4   :  { %v7605_v18 = vsub.f32 %v274_v14, %v282_v17  ;;  %v577_v14 = vld [vmem:[#allocation5 + $0x1e8] sm:$0xff]  ;;  %5445 = vmatpush1.bf16.msra.mxu0 %v5444_v16  ;;  %v554_v16 = vld [vmem:[#allocation5 + $0x130] sm:$0xff] }
 0x1c5   :  { %v5446_v17 = vpack.c.bf16 %v577_v14, %v573_v13  ;;  %v7664_v13 = vpack.c.bf16 %v546_v10, %v542_v9  ;;  %v7667_v14 = vpack.c.bf16 %v555_v12, %v551_v11  ;;  %v7714_v9 = vpack.c.bf16 %v762_v5, %v758_v4  ;;  %v760_v10 = vld [vmem:[#allocation7 + $0x50] sm:$0xff]  ;;  %v785_v4 = vld [vmem:[#allocation7 + $0x118] sm:$0xff] }
 0x1c6   :  { %v284_v19 = vmul.f32 %v7605_v18, %v7605_v18  ;;  %v764_v11 = vld [vmem:[#allocation7 + $0x70] sm:$0xff]  ;;  %v7746_v5 = vpack.c.bf16 %v787_v3, %v783_v62 }
 0x1c7   :  { %5447 = vmatprep.subr.bf16.mxu0 %v5446_v17  ;;  %v559_v17 = vld [vmem:[#allocation5 + $0x158] sm:$0xff]  ;;  %v7717_v12 = vpack.c.bf16 %v764_v11, %v760_v10  ;;  %v782_v11 = vld [vmem:[#allocation7 + $0x100] sm:$0xff]  ;;  %v796_v62 = vld [vmem:[#allocation7 + $0x170] sm:$0xff] }
 0x1c8   :  { %v285_v20 = vsel %vm277_vm3, %v284_v19, 0.0  ;;  %v572_v19 = vld [vmem:[#allocation5 + $0x1c0] sm:$0xff]  ;;  %v789_v10 = vld [vmem:[#allocation7 + $0x138] sm:$0xff]  ;;  %v7765_v3 = vpack.c.bf16 %v796_v62, %v792_v60  ;;  %v807_v60 = vld [vmem:[#allocation7 + $0x1c8] sm:$0xff] }
 0x1c9   :  { %286 = vadd.xlane.f32.xlu0 %v285_v20  ;;  %v576_v20 = vld [vmem:[#allocation5 + $0x1e0] sm:$0xff]  ;;  %v811_v62 = vld [vmem:[#allocation7 + $0x1e8] sm:$0xff] }
 0x1ca   :  { %v5448_v21 = vpack.c.bf16 %v576_v20, %v572_v19  ;;  %v563_v19 = vld [vmem:[#allocation5 + $0x178] sm:$0xff]  ;;  %v7670_v20 = vpack.c.bf16 %v554_v16, %v550_v15  ;;  %v767_v15 = vld [vmem:[#allocation7 + $0x88] sm:$0xff]  ;;  %9755 = vst [vmem:[#allocation14_spill] sm:$0xff] %v7765_v3 }
 0x1cb   :  { %v771_v16 = vld [vmem:[#allocation7 + $0xa8] sm:$0xff] }
 0x1cc   :  { %5449 = vmatpush1.bf16.msra.mxu0 %v5448_v21  ;;  %v7673_v21 = vpack.c.bf16 %v563_v19, %v559_v17  ;;  %v769_v17 = vld [vmem:[#allocation7 + $0x98] sm:$0xff]  ;;  %v7722_v19 = vpack.c.bf16 %v771_v16, %v767_v15  ;;  %v786_v15 = vld [vmem:[#allocation7 + $0x120] sm:$0xff]  ;;  %v7748_v16 = vpack.c.bf16 %v789_v10, %v785_v4  ;;  %v799_v4 = vld [vmem:[#allocation7 + $0x188] sm:$0xff] }
 0x1cd   :  { %v803_v10 = vld [vmem:[#allocation7 + $0x1a8] sm:$0xff] }
 0x1cf   :  { %645 = vmatmul.mubr.f32.vlgmr.msra.gmra.mrb[0].mxu0 %v9544_v0 }
 0x1d0   :  { %942 = vmatprep.mubr.f32.mxu0 %v9544_v0 }
 0x256   :  { %v287_v22 = vpop.xlane.xlu0 %286 }
 0x257   :  { %v288_v24 = vmul.f32 0.03125, %v287_v22  ;;  %v558_v22 = vld [vmem:[#allocation5 + $0x150] sm:$0xff] }
 0x259   :  { %v289_v25 = vadd.f32 1e-05, %v288_v24  ;;  %v562_v24 = vld [vmem:[#allocation5 + $0x170] sm:$0xff] }
 0x25b   :  { %7001 = vrsqrt.f32 %v289_v25  ;;  %v567_v25 = vld [vmem:[#allocation5 + $0x198] sm:$0xff] }
 0x265   :  { %v7002_v27 = vpop.eup %7001 }
 0x266   :  { %v291_v30 = vmul.f32 %v7002_v27, %v7605_v18  ;;  %v325_v18 = vld [vmem:[#allocation3 + $0x70] sm:$0xff]  ;;  %v571_v27 = vld [vmem:[#allocation5 + $0x1b8] sm:$0xff] }
 0x267   :  { %v5416_v52 = vpack.c.bf16 %v325_v18, %v321_v49  ;;  %v757_v18 = vld [vmem:[#allocation7 + $0x38] sm:$0xff] }
 0x268   :  { %v298_v33 = vmul.f32 %v5224_v28, %v291_v30  ;;  %v7676_v28 = vpack.c.bf16 %v562_v24, %v558_v22  ;;  %v7679_v30 = vpack.c.bf16 %v571_v27, %v567_v25  ;;  %v773_v22 = vld [vmem:[#allocation7 + $0xb8] sm:$0xff]  ;;  %v766_v24 = vld [vmem:[#allocation7 + $0x80] sm:$0xff] }
 0x269   :  { %v770_v25 = vld [vmem:[#allocation7 + $0xa0] sm:$0xff]  ;;  %v7724_v27 = vpack.c.bf16 %v773_v22, %v769_v17  ;;  %v7750_v17 = vpack.c.bf16 %v786_v15, %v782_v11  ;;  %v784_v22 = vld [vmem:[#allocation7 + $0x110] sm:$0xff]  ;;  %v801_v11 = vld [vmem:[#allocation7 + $0x198] sm:$0xff]  ;;  %v7770_v15 = vpack.c.bf16 %v803_v10, %v799_v4  ;;  %v7782_v10 = vpack.c.bf16 %v811_v62, %v807_v60 }
 0x26a   :  { %v305_v34 = vadd.f32 %v5225_v31, %v298_v33  ;;  %v566_v31 = vld [vmem:[#allocation5 + $0x190] sm:$0xff]  ;;  %v809_v4 = vld [vmem:[#allocation7 + $0x1d8] sm:$0xff] }
 0x26b   :  { %v570_v33 = vld [vmem:[#allocation5 + $0x1b0] sm:$0xff]  ;;  %9756 = vst [vmem:[#allocation15_spill] sm:$0xff] %v7770_v15  ;;  %9760 = vst [vmem:[#allocation19_spill] sm:$0xff] %v7782_v10 }
 0x26c   :  { %v307_v36 = vmul.f32 0.70710677, %v305_v34  ;;  %v306_v44 = vmul.f32 0.5, %v305_v34  ;;  %v575_v34 = vld [vmem:[#allocation5 + $0x1d8] sm:$0xff]  ;;  %v7682_v37 = vpack.c.bf16 %v570_v33, %v566_v31  ;;  %v7726_v31 = vpack.c.bf16 %v770_v25, %v766_v24  ;;  %v768_v33 = vld [vmem:[#allocation7 + $0x90] sm:$0xff] }
 0x26d   :  { %v788_v24 = vld [vmem:[#allocation7 + $0x130] sm:$0xff] }
 0x26e   :  { %7003 = verf.f32 %v307_v36  ;;  %v579_v36 = vld [vmem:[#allocation5 + $0x1f8] sm:$0xff]  ;;  %v7753_v25 = vpack.c.bf16 %v788_v24, %v784_v22  ;;  %v798_v24 = vld [vmem:[#allocation7 + $0x180] sm:$0xff] }
 0x26f   :  { %v7685_v39 = vpack.c.bf16 %v579_v36, %v575_v34  ;;  %v772_v34 = vld [vmem:[#allocation7 + $0xb0] sm:$0xff]  ;;  %v805_v22 = vld [vmem:[#allocation7 + $0x1b8] sm:$0xff] }
 0x270   :  { %v7729_v36 = vpack.c.bf16 %v772_v34, %v768_v33  ;;  %v791_v33 = vld [vmem:[#allocation7 + $0x148] sm:$0xff] }
 0x271   :  { %v795_v34 = vld [vmem:[#allocation7 + $0x168] sm:$0xff] }
 0x278   :  { %v7004_v40 = vpop.eup %7003 }
 0x279   :  { %v309_v45 = vadd.f32 1.0, %v7004_v40  ;;  %v574_v40 = vld [vmem:[#allocation5 + $0x1d0] sm:$0xff] }
 0x27a   :  { %v7688_v43 = vpack.c.bf16 %v578_v41, %v574_v40  ;;  %v775_v40 = vld [vmem:[#allocation7 + $0xc8] sm:$0xff] }
 0x27b   :  { %v310_v47 = vmul.f32 %v309_v45, %v306_v44  ;;  %v779_v41 = vld [vmem:[#allocation7 + $0xe8] sm:$0xff] }
 0x27d   :  { %5226 = vmatmul.mubr.msk.f32.vlgmr.msra.gmra.mrb[4].mxu1 %vm277_vm3, %v310_v47 }
 0x27e   :  { %5413 = vmatpush1.bf16.msra.mxu1 %v5412_v46  ;;  %487 = vmatprep.mubr.f32.mxu1 %v9544_v0  ;;  %v751_v46 = vld [vmem:[#allocation7 + $0x8] sm:$0xff] }
 0x27f   :  { %5415 = vmatprep.subr.bf16.mxu1 %v5414_v48  ;;  %v753_v48 = vld [vmem:[#allocation7 + $0x18] sm:$0xff] }
 0x282   :  { %5417 = vmatpush1.bf16.msra.mxu1 %v5416_v52  ;;  %v7700_v52 = vpack.c.bf16 %v757_v18, %v753_v48  ;;  %v781_v48 = vld [vmem:[#allocation7 + $0xf8] sm:$0xff]  ;;  %v774_v18 = vld [vmem:[#allocation7 + $0xc0] sm:$0xff] }
 0x283   :  { %5451 = vmatprep.subr.bf16.mxu1 %v7642_v53  ;;  %v7738_v55 = vpack.c.bf16 %v778_v50, %v774_v18  ;;  %v794_v18 = vld [vmem:[#allocation7 + $0x160] sm:$0xff] }
 0x285   :  { %5227 = vmatmul.mubr.msk.f32.vlgmr.msra.gmra.mrb[6].mxu1 %vm277_vm3, %v310_v47  ;;  %v755_v47 = vld [vmem:[#allocation7 + $0x28] sm:$0xff] }
 0x286   :  { %5453 = vmatpush1.bf16.msra.mxu1 %v7644_v58  ;;  %715 = vmatprep.mubr.f32.mxu1 %v9544_v0  ;;  %v7698_v49 = vpack.c.bf16 %v755_v47, %v751_v46  ;;  %v777_v46 = vld [vmem:[#allocation7 + $0xd8] sm:$0xff]  ;;  %v7734_v47 = vpack.c.bf16 %v779_v41, %v775_v40  ;;  %v7758_v41 = vpack.c.bf16 %v795_v34, %v791_v33  ;;  %v802_v33 = vld [vmem:[#allocation7 + $0x1a0] sm:$0xff] }
 0x287   :  { %5455 = vmatprep.subr.bf16.mxu1 %v7647_v59  ;;  %v7736_v51 = vpack.c.bf16 %v781_v48, %v777_v46  ;;  %v793_v40 = vld [vmem:[#allocation7 + $0x158] sm:$0xff]  ;;  %v790_v48 = vld [vmem:[#allocation7 + $0x140] sm:$0xff]  ;;  %v7772_v34 = vpack.c.bf16 %v805_v22, %v801_v11 }
 0x288   :  { %5483 = vmatprep.subr.bf16.mxu0 %v7698_v49  ;;  %v797_v46 = vld [vmem:[#allocation7 + $0x178] sm:$0xff]  ;;  %v7762_v56 = vpack.c.bf16 %v794_v18, %v790_v48  ;;  %v804_v48 = vld [vmem:[#allocation7 + $0x1b0] sm:$0xff]  ;;  %v806_v22 = vld [vmem:[#allocation7 + $0x1c0] sm:$0xff] }
 0x289   :  { %5485 = vmatpush1.bf16.msra.mxu0 %v7702_v54  ;;  %v7760_v50 = vpack.c.bf16 %v797_v46, %v793_v40  ;;  %9757 = vst [vmem:[#allocation16_spill] sm:$0xff] %v7772_v34  ;;  %v7774_v40 = vpack.c.bf16 %v802_v33, %v798_v24  ;;  %v800_v46 = vld [vmem:[#allocation7 + $0x190] sm:$0xff]  ;;  %v813_v11 = vld [vmem:[#allocation7 + $0x1f8] sm:$0xff]  ;;  %v810_v24 = vld [vmem:[#allocation7 + $0x1e0] sm:$0xff] }
 0x28a   :  { %5457 = vmatpush1.bf16.msra.mxu1 %v7651_v1  ;;  %5487 = vmatprep.subr.bf16.mxu0 %v7710_v63  ;;  %9754 = vst [vmem:[#allocation13_spill] sm:$0xff] %v7762_v56  ;;  %v7777_v18 = vpack.c.bf16 %v804_v48, %v800_v46  ;;  %v7784_v33 = vpack.c.bf16 %v813_v11, %v809_v4  ;;  %v808_v46 = vld [vmem:[#allocation7 + $0x1d0] sm:$0xff]  ;;  %v814_v4 = vld [vmem:[#allocation7 + $0x200] sm:$0xff] }
 0x28b   :  { %5459 = vmatprep.subr.bf16.mxu1 %v7655_v2  ;;  %9758 = vst [vmem:[#allocation17_spill] sm:$0xff] %v7774_v40  ;;  %v812_v48 = vld [vmem:[#allocation7 + $0x1f0] sm:$0xff]  ;;  %v818_v11 = vld [vmem:[#allocation7 + $0x220] sm:$0xff] }
 0x28c   :  { %9759 = vst [vmem:[#allocation18_spill] sm:$0xff] %v7777_v18  ;;  %9761 = vst [vmem:[#allocation20_spill] sm:$0xff] %v7784_v33 }
 0x28d   :  { %5489 = vmatpush1.bf16.msra.mxu0 %v7714_v9 }
 0x28e   :  { %5461 = vmatpush1.bf16.msra.mxu1 %v7658_v7  ;;  %5491 = vmatprep.subr.bf16.mxu0 %v7722_v19 }
 0x28f   :  { %5463 = vmatprep.subr.bf16.mxu1 %v7661_v8 }
 0x291   :  { %5493 = vmatpush1.bf16.msra.mxu0 %v7726_v31 }
 0x292   :  { %5465 = vmatpush1.bf16.msra.mxu1 %v7664_v13  ;;  %5495 = vmatprep.subr.bf16.mxu0 %v7734_v47 }
 0x293   :  { %5467 = vmatprep.subr.bf16.mxu1 %v7667_v14 }
 0x295   :  { %5497 = vmatpush1.bf16.msra.mxu0 %v7738_v55 }
 0x296   :  { %5469 = vmatpush1.bf16.msra.mxu1 %v7670_v20  ;;  %5499 = vmatprep.subr.bf16.mxu0 %v7746_v5 }
 0x297   :  { %5471 = vmatprep.subr.bf16.mxu1 %v7673_v21 }
 0x299   :  { %5501 = vmatpush1.bf16.msra.mxu0 %v7750_v17 }
 0x29a   :  { %5473 = vmatpush1.bf16.msra.mxu1 %v7676_v28  ;;  %5503 = vmatprep.subr.bf16.mxu0 %v7758_v41 }
 0x29b   :  { %5475 = vmatprep.subr.bf16.mxu1 %v7679_v30 }
 0x29d   :  { %5505 = vmatpush1.bf16.msra.mxu0 %v7762_v56  ;;  %v821_v56 = vld [vmem:[#allocation7 + $0x238] sm:$0xff] }
 0x29e   :  { %5477 = vmatpush1.bf16.msra.mxu1 %v7682_v37  ;;  %5507 = vmatprep.subr.bf16.mxu0 %v7770_v15  ;;  %v815_v15 = vld [vmem:[#allocation7 + $0x208] sm:$0xff] }
 0x29f   :  { %5479 = vmatprep.subr.bf16.mxu1 %v7685_v39 }
 0x2a1   :  { %5509 = vmatpush1.bf16.msra.mxu0 %v7774_v40  ;;  %v7789_v40 = vpack.c.bf16 %v812_v48, %v808_v46  ;;  %v820_v46 = vld [vmem:[#allocation7 + $0x230] sm:$0xff] }
 0x2a2   :  { %5481 = vmatpush1.bf16.msra.mxu1 %v7688_v43  ;;  %v7694_v44 = vpop.f32.mrb[0].mxu0  ;;  %5511 = vmatprep.subr.bf16.mxu0 %v7782_v10  ;;  %v865_v10 = vld [vmem:[#allocation7 + $0x398] sm:$0xff] }
 0x2a3   :  { %v7696_v45 = vpop.f32.mrb[1].mxu0  ;;  %5547 = vmatprep.subr.bf16.mxu1 %v7700_v52  ;;  %9763 = vst [vmem:[#allocation22_spill] sm:$0xff] %v7789_v40 }
 0x2a5   :  { %716 = vmatmul.mubr.f32.vlgmr.msra.gmra.mrb[8].mxu1 %v9544_v0 }
 0x2a6   :  { %1013 = vmatprep.mubr.f32.mxu1 %v9544_v0  ;;  %5549 = vmatpush1.bf16.msra.mxu1 %v7705_v57  ;;  %v7786_v0 = vpack.c.bf16 %v810_v24, %v806_v22  ;;  %v816_v22 = vld [vmem:[#allocation7 + $0x210] sm:$0xff]  ;;  %v7800_v24 = vpack.c.bf16 %v818_v11, %v814_v4 }
 0x2a7   :  { %5551 = vmatprep.subr.bf16.mxu1 %v7712_v6  ;;  %v7802_v48 = vpack.c.bf16 %v820_v46, %v816_v22  ;;  %v824_v4 = vld [vmem:[#allocation7 + $0x250] sm:$0xff]  ;;  %v831_v46 = vld [vmem:[#allocation7 + $0x288] sm:$0xff] }
 0x2a8   :  { %9762 = vst [vmem:[#allocation21_spill] sm:$0xff] %v7786_v0  ;;  %5513 = vmatpush1.bf16.msra.mxu0 %v7786_v0  ;;  %9766 = vst [vmem:[#allocation25_spill] sm:$0xff] %v7800_v24  ;;  %v822_v0 = vld [vmem:[#allocation7 + $0x240] sm:$0xff]  ;;  %v828_v11 = vld [vmem:[#allocation7 + $0x270] sm:$0xff] }
 0x2a9   :  { %9767 = vst [vmem:[#allocation26_spill] sm:$0xff] %v7802_v48  ;;  %v7813_v22 = vpack.c.bf16 %v828_v11, %v824_v4  ;;  %v832_v4 = vld [vmem:[#allocation7 + $0x290] sm:$0xff] }
 0x2aa   :  { %5553 = vmatpush1.bf16.msra.mxu1 %v7717_v12  ;;  %v836_v11 = vld [vmem:[#allocation7 + $0x2b0] sm:$0xff] }
 0x2ab   :  { %5555 = vmatprep.subr.bf16.mxu1 %v7724_v27  ;;  %9771 = vst [vmem:[#allocation30_spill] sm:$0xff] %v7813_v22 }
 0x2ae   :  { %5557 = vmatpush1.bf16.msra.mxu1 %v7729_v36 }
 0x2af   :  { %5559 = vmatprep.subr.bf16.mxu1 %v7736_v51 }
 0x2b2   :  { %5561 = vmatpush1.bf16.msra.mxu1 %v7741_v61 }
 0x2b3   :  { %5563 = vmatprep.subr.bf16.mxu1 %v7748_v16 }
 0x2b6   :  { %5565 = vmatpush1.bf16.msra.mxu1 %v7753_v25 }
 0x2b7   :  { %5567 = vmatprep.subr.bf16.mxu1 %v7760_v50 }
 0x2ba   :  { %5569 = vmatpush1.bf16.msra.mxu1 %v7765_v3  ;;  %v817_v3 = vld [vmem:[#allocation7 + $0x218] sm:$0xff] }
 0x2bb   :  { %5571 = vmatprep.subr.bf16.mxu1 %v7772_v34  ;;  %v819_v34 = vld [vmem:[#allocation7 + $0x228] sm:$0xff]  ;;  %v7795_v62 = vpack.c.bf16 %v821_v56, %v817_v3  ;;  %v825_v56 = vld [vmem:[#allocation7 + $0x258] sm:$0xff] }
 0x2bc   :  { %v7793_v60 = vpack.c.bf16 %v819_v34, %v815_v15  ;;  %v823_v15 = vld [vmem:[#allocation7 + $0x248] sm:$0xff] }
 0x2bd   :  { %9765 = vst [vmem:[#allocation24_spill] sm:$0xff] %v7795_v62  ;;  %v827_v34 = vld [vmem:[#allocation7 + $0x268] sm:$0xff] }
 0x2be   :  { %5573 = vmatpush1.bf16.msra.mxu1 %v7777_v18  ;;  %9764 = vst [vmem:[#allocation23_spill] sm:$0xff] %v7793_v60  ;;  %5515 = vmatprep.subr.bf16.mxu0 %v7793_v60  ;;  %v7806_v3 = vpack.c.bf16 %v827_v34, %v823_v15  ;;  %v835_v15 = vld [vmem:[#allocation7 + $0x2a8] sm:$0xff]  ;;  %v833_v34 = vld [vmem:[#allocation7 + $0x298] sm:$0xff] }
 0x2bf   :  { %5575 = vmatprep.subr.bf16.mxu1 %v7784_v33  ;;  %5517 = vmatpush1.bf16.msra.mxu0 %v7800_v24  ;;  %v826_v33 = vld [vmem:[#allocation7 + $0x260] sm:$0xff] }
 0x2c0   :  { %9768 = vst [vmem:[#allocation27_spill] sm:$0xff] %v7806_v3  ;;  %5519 = vmatprep.subr.bf16.mxu0 %v7806_v3 }
 0x2c2   :  { %5577 = vmatpush1.bf16.msra.mxu1 %v7789_v40  ;;  %v829_v40 = vld [vmem:[#allocation7 + $0x278] sm:$0xff] }
 0x2c3   :  { %5579 = vmatprep.subr.bf16.mxu1 %v7795_v62  ;;  %v7808_v60 = vpack.c.bf16 %v829_v40, %v825_v56  ;;  %v7810_v62 = vpack.c.bf16 %v826_v33, %v822_v0  ;;  %v837_v40 = vld [vmem:[#allocation7 + $0x2b8] sm:$0xff]  ;;  %v830_v0 = vld [vmem:[#allocation7 + $0x280] sm:$0xff] }
 0x2c4   :  { %v834_v33 = vld [vmem:[#allocation7 + $0x2a0] sm:$0xff]  ;;  %v7820_v56 = vpack.c.bf16 %v837_v40, %v833_v34  ;;  %v845_v34 = vld [vmem:[#allocation7 + $0x2f8] sm:$0xff] }
 0x2c5   :  { %9769 = vst [vmem:[#allocation28_spill] sm:$0xff] %v7808_v60  ;;  %9770 = vst [vmem:[#allocation29_spill] sm:$0xff] %v7810_v62  ;;  %5521 = vmatpush1.bf16.msra.mxu0 %v7810_v62  ;;  %v7822_v24 = vpack.c.bf16 %v834_v33, %v830_v0  ;;  %v838_v40 = vld [vmem:[#allocation7 + $0x2c0] sm:$0xff] }
 0x2c6   :  { %5581 = vmatpush1.bf16.msra.mxu1 %v7802_v48  ;;  %v7818_v48 = vpack.c.bf16 %v835_v15, %v831_v46  ;;  %9773 = vst [vmem:[#allocation32_spill] sm:$0xff] %v7820_v56  ;;  %v843_v46 = vld [vmem:[#allocation7 + $0x2e8] sm:$0xff]  ;;  %v841_v15 = vld [vmem:[#allocation7 + $0x2d8] sm:$0xff]  ;;  %v842_v0 = vld [vmem:[#allocation7 + $0x2e0] sm:$0xff] }
 0x2c7   :  { %5583 = vmatprep.subr.bf16.mxu1 %v7808_v60  ;;  %9774 = vst [vmem:[#allocation33_spill] sm:$0xff] %v7822_v24  ;;  %v7825_v60 = vpack.c.bf16 %v836_v11, %v832_v4  ;;  %v7832_v33 = vpack.c.bf16 %v845_v34, %v841_v15  ;;  %v7834_v3 = vpack.c.bf16 %v842_v0, %v838_v40  ;;  %v840_v4 = vld [vmem:[#allocation7 + $0x2d0] sm:$0xff]  ;;  %v853_v15 = vld [vmem:[#allocation7 + $0x338] sm:$0xff]  ;;  %v846_v34 = vld [vmem:[#allocation7 + $0x300] sm:$0xff] }
 0x2c8   :  { %9772 = vst [vmem:[#allocation31_spill] sm:$0xff] %v7818_v48  ;;  %5523 = vmatprep.subr.bf16.mxu0 %v7818_v48  ;;  %v844_v11 = vld [vmem:[#allocation7 + $0x2f0] sm:$0xff]  ;;  %v850_v40 = vld [vmem:[#allocation7 + $0x320] sm:$0xff] }
 0x2c9   :  { %9775 = vst [vmem:[#allocation34_spill] sm:$0xff] %v7825_v60  ;;  %5525 = vmatpush1.bf16.msra.mxu0 %v7822_v24  ;;  %9777 = vst [vmem:[#allocation36_spill] sm:$0xff] %v7832_v33  ;;  %v7846_v48 = vpack.c.bf16 %v850_v40, %v846_v34  ;;  %v858_v34 = vld [vmem:[#allocation7 + $0x360] sm:$0xff] }
 0x2ca   :  { %5585 = vmatpush1.bf16.msra.mxu1 %v7813_v22  ;;  %v839_v22 = vld [vmem:[#allocation7 + $0x2c8] sm:$0xff]  ;;  %9778 = vst [vmem:[#allocation37_spill] sm:$0xff] %v7834_v3 }
 0x2cb   :  { %5587 = vmatprep.subr.bf16.mxu1 %v7820_v56  ;;  %v7830_v62 = vpack.c.bf16 %v843_v46, %v839_v22  ;;  %v7837_v56 = vpack.c.bf16 %v844_v11, %v840_v4  ;;  %v851_v22 = vld [vmem:[#allocation7 + $0x328] sm:$0xff]  ;;  %v849_v46 = vld [vmem:[#allocation7 + $0x318] sm:$0xff]  ;;  %9782 = vst [vmem:[#allocation41_spill] sm:$0xff] %v7846_v48  ;;  %v848_v4 = vld [vmem:[#allocation7 + $0x310] sm:$0xff] }
 0x2cc   :  { %v7844_v0 = vpack.c.bf16 %v853_v15, %v849_v46  ;;  %v852_v11 = vld [vmem:[#allocation7 + $0x330] sm:$0xff]  ;;  %v861_v46 = vld [vmem:[#allocation7 + $0x378] sm:$0xff]  ;;  %v854_v15 = vld [vmem:[#allocation7 + $0x340] sm:$0xff] }
 0x2cd   :  { %9776 = vst [vmem:[#allocation35_spill] sm:$0xff] %v7830_v62  ;;  %5527 = vmatprep.subr.bf16.mxu0 %v7830_v62  ;;  %9779 = vst [vmem:[#allocation38_spill] sm:$0xff] %v7837_v56  ;;  %v7858_v62 = vpack.c.bf16 %v858_v34, %v854_v15 }
 0x2ce   :  { %5589 = vmatpush1.bf16.msra.mxu1 %v7825_v60  ;;  %5529 = vmatpush1.bf16.msra.mxu0 %v7834_v3  ;;  %v847_v60 = vld [vmem:[#allocation7 + $0x308] sm:$0xff]  ;;  %9781 = vst [vmem:[#allocation40_spill] sm:$0xff] %v7844_v0 }
 0x2cf   :  { %5591 = vmatprep.subr.bf16.mxu1 %v7832_v33  ;;  %v7842_v24 = vpack.c.bf16 %v851_v22, %v847_v60  ;;  %v7849_v33 = vpack.c.bf16 %v852_v11, %v848_v4  ;;  %v859_v60 = vld [vmem:[#allocation7 + $0x368] sm:$0xff]  ;;  %v857_v22 = vld [vmem:[#allocation7 + $0x358] sm:$0xff]  ;;  %9786 = vst [vmem:[#allocation45_spill] sm:$0xff] %v7858_v62  ;;  %v856_v4 = vld [vmem:[#allocation7 + $0x350] sm:$0xff] }
 0x2d0   :  { %v7856_v40 = vpack.c.bf16 %v861_v46, %v857_v22  ;;  %v860_v11 = vld [vmem:[#allocation7 + $0x370] sm:$0xff]  ;;  %v862_v22 = vld [vmem:[#allocation7 + $0x380] sm:$0xff] }
 0x2d1   :  { %9780 = vst [vmem:[#allocation39_spill] sm:$0xff] %v7842_v24  ;;  %5531 = vmatprep.subr.bf16.mxu0 %v7842_v24  ;;  %9783 = vst [vmem:[#allocation42_spill] sm:$0xff] %v7849_v33  ;;  %v867_v24 = vld [vmem:[#allocation7 + $0x3a8] sm:$0xff]  ;;  %v866_v46 = vld [vmem:[#allocation7 + $0x3a0] sm:$0xff] }
 0x2d2   :  { %5593 = vmatpush1.bf16.msra.mxu1 %v7837_v56  ;;  %5533 = vmatpush1.bf16.msra.mxu0 %v7846_v48  ;;  %v855_v56 = vld [vmem:[#allocation7 + $0x348] sm:$0xff]  ;;  %9785 = vst [vmem:[#allocation44_spill] sm:$0xff] %v7856_v40  ;;  %v7870_v34 = vpack.c.bf16 %v866_v46, %v862_v22  ;;  %v872_v22 = vld [vmem:[#allocation7 + $0x3d0] sm:$0xff] }
 0x2d3   :  { %5595 = vmatprep.subr.bf16.mxu1 %v7844_v0  ;;  %v7854_v3 = vpack.c.bf16 %v859_v60, %v855_v56  ;;  %v7861_v0 = vpack.c.bf16 %v860_v11, %v856_v4  ;;  %v863_v48 = vld [vmem:[#allocation7 + $0x388] sm:$0xff]  ;;  %v869_v60 = vld [vmem:[#allocation7 + $0x3b8] sm:$0xff]  ;;  %v864_v4 = vld [vmem:[#allocation7 + $0x390] sm:$0xff] }
 0x2d4   :  { %v7865_v56 = vpack.c.bf16 %v867_v24, %v863_v48  ;;  %v7868_v15 = vpack.c.bf16 %v869_v60, %v865_v10  ;;  %9789 = vst [vmem:[#allocation48_spill] sm:$0xff] %v7870_v34  ;;  %v868_v11 = vld [vmem:[#allocation7 + $0x3b0] sm:$0xff]  ;;  %v877_v24 = vld [vmem:[#allocation7 + $0x3f8] sm:$0xff]  ;;  %v870_v10 = vld [vmem:[#allocation7 + $0x3c0] sm:$0xff] }
 0x2d5   :  { %9784 = vst [vmem:[#allocation43_spill] sm:$0xff] %v7854_v3  ;;  %5535 = vmatprep.subr.bf16.mxu0 %v7854_v3  ;;  %9787 = vst [vmem:[#allocation46_spill] sm:$0xff] %v7861_v0  ;;  %v871_v3 = vld [vmem:[#allocation7 + $0x3c8] sm:$0xff]  ;;  %v874_v60 = vld [vmem:[#allocation7 + $0x3e0] sm:$0xff] }
 0x2d6   :  { %5597 = vmatpush1.bf16.msra.mxu1 %v7849_v33  ;;  %5537 = vmatpush1.bf16.msra.mxu0 %v7858_v62  ;;  %9788 = vst [vmem:[#allocation47_spill] sm:$0xff] %v7868_v15  ;;  %v7873_v33 = vpack.c.bf16 %v868_v11, %v864_v4  ;;  %v873_v62 = vld [vmem:[#allocation7 + $0x3d8] sm:$0xff]  ;;  %v7881_v46 = vpack.c.bf16 %v874_v60, %v870_v10 }
 0x2d7   :  { %5599 = vmatprep.subr.bf16.mxu1 %v7856_v40  ;;  %5539 = vmatprep.subr.bf16.mxu0 %v7865_v56  ;;  %v875_v40 = vld [vmem:[#allocation7 + $0x3e8] sm:$0xff]  ;;  %v7878_v18 = vpack.c.bf16 %v877_v24, %v873_v62  ;;  %v329_v62 = vlaneseq }
 0x2d8   :  { %9790 = vst [vmem:[#allocation49_spill] sm:$0xff] %v7873_v33  ;;  %v7876_v48 = vpack.c.bf16 %v875_v40, %v871_v3  ;;  %9793 = vst [vmem:[#allocation52_spill] sm:$0xff] %v7881_v46 }
 0x2d9   :  { %9792 = vst [vmem:[#allocation51_spill] sm:$0xff] %v7878_v18  ;;  %v7892_v3 = vshrl.u32 %v329_v62, 7 }
 0x2da   :  { %5601 = vmatpush1.bf16.msra.mxu1 %v7861_v0  ;;  %9791 = vst [vmem:[#allocation50_spill] sm:$0xff] %v7876_v48  ;;  %5541 = vmatpush1.bf16.msra.mxu0 %v7870_v34  ;;  %v876_v0 = vld [vmem:[#allocation7 + $0x3f0] sm:$0xff] }
 0x2db   :  { %5603 = vmatprep.subr.bf16.mxu1 %v7868_v15  ;;  %5543 = vmatprep.subr.bf16.mxu0 %v7876_v48  ;;  %v7885_v4 = vpack.c.bf16 %v876_v0, %v872_v22  ;;  %v9585_v24 = vsub.s32 1, %v7892_v3  ;;  %v327_v0 = vld [vmem:[%s9532_s8] sm:$0xf]  ;;  %v9587_v10 = vsub.s32 0, %v7892_v3  ;;  %v343_v34 = vsub.s32 3, %v7892_v3 }
 0x2dd   :  { %9794 = vst [vmem:[#allocation53_spill] sm:$0xff] %v7885_v4  ;;  %v336_v60 = vrot.slane %v327_v0, %v9585_v24  ;;  %v9591_v24 = vsub.s32 2, %v7892_v3 }
 0x2de   :  { %5605 = vmatpush1.bf16.msra.mxu1 %v7873_v33  ;;  %5545 = vmatpush1.bf16.msra.mxu0 %v7881_v46 }
 0x2df   :  { %5607 = vmatprep.subr.bf16.mxu1 %v7878_v18  ;;  %5611 = vmatprep.subr.bf16.mxu0 %v7610_v23  ;;  %v332_v23 = vrot.slane %v327_v0, %v9587_v10 }
 0x2e2   :  { %5609 = vmatpush1.bf16.msra.mxu1 %v7885_v4 }
 0x2e3   :  { %5643 = vmatprep.subr.bf16.mxu1 %v7642_v53 }
 0x350   :  { %v418_v40 = vpop.f32.mrb[4].mxu1 }
 0x351   :  { %v420_v11 = vpop.f32.mrb[5].mxu1  ;;  %v7905_v4 = vadd.f32 %v418_v40, %v332_v23  ;;  %v340_v40 = vrot.slane %v327_v0, %v9591_v24 }
 0x352   :  { %v7903_v62 = vadd.f32 %v420_v11, %v336_v60  ;;  %v344_v11 = vrot.slane %v327_v0, %v343_v34 }
 0x353   :  { %9796 = vst [vmem:[#allocation55_spill] sm:$0xff] %v7905_v4  ;;  %v722_v18 = vadd.f32 %v7694_v44, %v7905_v4 }
 0x354   :  { %9795 = vst [vmem:[#allocation54_spill] sm:$0xff] %v7903_v62  ;;  %v723_v46 = vadd.f32 %v7696_v45, %v7903_v62 }
 0x355   :  { %v5228_v33 = vmul.f32 -1.442695, %v722_v18 }
 0x356   :  { %v5229_v48 = vmul.f32 -1.442695, %v723_v46 }
 0x358   :  { %v489_v22 = vpop.f32.mrb[6].mxu1  ;;  %7005 = vpow2.f32 %v5229_v48 }
 0x359   :  { %v491_v53 = vpop.f32.mrb[7].mxu1  ;;  %7007 = vpow2.f32 %v5228_v33  ;;  %v7917_v23 = vadd.f32 %v489_v22, %v340_v40 }
 0x35a   :  { %v7919_v44 = vadd.f32 %v491_v53, %v344_v11 }
 0x362   :  { %v7006_v10 = vpop.eup %7005 }
 0x363   :  { %v7008_v15 = vpop.eup %7007  ;;  %v735_v45 = vadd.f32 1.0, %v7006_v10 }
 0x364   :  { %v729_v60 = vadd.f32 1.0, %v7008_v15 }
 0x365   :  { %7009 = vrcp.f32 %v735_v45 }
 0x366   :  { %7011 = vrcp.f32 %v729_v60 }
 0x36f   :  { %v7010_v24 = vpop.eup %7009 }
 0x370   :  { %v7012_v4 = vpop.eup %7011  ;;  %v745_v10 = vmul.f32 0.0, %v7010_v24  ;;  %v1069_v24 = vld [vmem:[#allocation5 + $0xc0] sm:$0xff] }
 0x378   :  { %v717_v18 = vpop.f32.mrb[8].mxu1 }
 0x379   :  { %v724_v33 = vadd.f32 %v717_v18, %v7917_v23  ;;  %v719_v48 = vpop.f32.mrb[9].mxu1 }
 0x37a   :  { %v725_v46 = vadd.f32 %v719_v48, %v7919_v44 }
 0x37b   :  { %7013 = vtanh.f32 %v724_v33  ;;  %v1098_v33 = vld [vmem:[#allocation5 + $0x1a8] sm:$0xff] }
 0x37c   :  { %v5230_v62 = vmul.f32 -1.442695, %v725_v46  ;;  %v1093_v46 = vld [vmem:[#allocation5 + $0x180] sm:$0xff] }
 0x37e   :  { %7015 = vpow2.f32 %v5230_v62  ;;  %v1078_v62 = vld [vmem:[#allocation5 + $0x108] sm:$0xff] }
 0x385   :  { %v7014_v0 = vpop.eup %7013 }
 0x386   :  { %v746_v15 = vmul.f32 %v7014_v0, %v7012_v4  ;;  %v9797_v4 = vmov 0.0   ;;  %v1102_v0 = vld [vmem:[#allocation5 + $0x1c8] sm:$0xff] }
 0x388   :  { %v7016_v22 = vpop.eup %7015  ;;  %v7923_v40 = vadd.f32 %v746_v15, %v745_v10  ;;  %v1106_v10 = vld [vmem:[#allocation5 + $0x1e8] sm:$0xff] }
 0x389   :  { %v742_v53 = vadd.f32 1.0, %v7016_v22  ;;  %v1101_v22 = vld [vmem:[#allocation5 + $0x1c0] sm:$0xff] }
 0x38a   :  { %7017 = vtanh.f32 %v7923_v40 }
 0x38b   :  { %7019 = vrcp.f32 %v742_v53 }
 0x394   :  { %v7018_v11 = vpop.eup %7017 }
 0x395   :  { %v7020_v45 = vpop.eup %7019 }
 0x396   :  { %v7926_v60 = vmul.f32 %v7020_v45, %v7018_v11  ;;  %v9825_v11 = vld [vmem:[#allocation40_spill] sm:$0xff]  ;;  %v9826_v45 = vld [vmem:[#allocation41_spill] sm:$0xff] }
 0x398   :  { %943 = vmatmul.mubr.f32.vlgmr.msra.gmra.mrb[2].mxu0 %v7926_v60  ;;  %1014 = vmatmul.mubr.f32.vlgmr.msra.gmra.mrb[10].mxu1 %v7926_v60 }
 0x399   :  { %5613 = vmatpush1.bf16.msra.mxu0 %v7612_v26  ;;  %5645 = vmatpush1.bf16.msra.mxu1 %v7644_v58  ;;  %v1073_v26 = vld [vmem:[#allocation5 + $0xe0] sm:$0xff]  ;;  %v1082_v58 = vld [vmem:[#allocation5 + $0x128] sm:$0xff] }
 0x39a   :  { %5615 = vmatprep.subr.bf16.mxu0 %v7616_v29  ;;  %5647 = vmatprep.subr.bf16.mxu1 %v7647_v59  ;;  %v7942_v29 = vpack.c.bf16 %v1073_v26, %v1069_v24  ;;  %v1077_v59 = vld [vmem:[#allocation5 + $0x100] sm:$0xff]  ;;  %v9828_v24 = vld [vmem:[#allocation43_spill] sm:$0xff]  ;;  %v9829_v26 = vld [vmem:[#allocation44_spill] sm:$0xff] }
 0x39b   :  { %1173 = vmatprep.mubr.f32.mxu0 %v9797_v4  ;;  %1244 = vmatprep.mubr.f32.mxu1 %v9797_v4 }
 0x39d   :  { %5617 = vmatpush1.bf16.msra.mxu0 %v7618_v32  ;;  %5649 = vmatpush1.bf16.msra.mxu1 %v7651_v1  ;;  %v7946_v32 = vpack.c.bf16 %v1082_v58, %v1078_v62  ;;  %v1086_v1 = vld [vmem:[#allocation5 + $0x148] sm:$0xff]  ;;  %v9830_v62 = vld [vmem:[#allocation45_spill] sm:$0xff] }
 0x39e   :  { %5619 = vmatprep.subr.bf16.mxu0 %v7622_v35  ;;  %5651 = vmatprep.subr.bf16.mxu1 %v7655_v2  ;;  %v1081_v35 = vld [vmem:[#allocation5 + $0x120] sm:$0xff]  ;;  %v1090_v2 = vld [vmem:[#allocation5 + $0x168] sm:$0xff] }
 0x39f   :  { %v7950_v18 = vpack.c.bf16 %v1081_v35, %v1077_v59  ;;  %v9831_v58 = vld [vmem:[#allocation46_spill] sm:$0xff]  ;;  %v9832_v59 = vld [vmem:[#allocation47_spill] sm:$0xff]  ;;  %v9833_v35 = vld [vmem:[#allocation48_spill] sm:$0xff] }
 0x3a1   :  { %5621 = vmatpush1.bf16.msra.mxu0 %v7624_v38  ;;  %5653 = vmatpush1.bf16.msra.mxu1 %v7658_v7  ;;  %v7954_v38 = vpack.c.bf16 %v1090_v2, %v1086_v1  ;;  %v1089_v7 = vld [vmem:[#allocation5 + $0x160] sm:$0xff]  ;;  %v9835_v2 = vld [vmem:[#allocation50_spill] sm:$0xff] }
 0x3a2   :  { %5623 = vmatprep.subr.bf16.mxu0 %v7628_v42  ;;  %5655 = vmatprep.subr.bf16.mxu1 %v7661_v8  ;;  %v1085_v42 = vld [vmem:[#allocation5 + $0x140] sm:$0xff]  ;;  %v1094_v8 = vld [vmem:[#allocation5 + $0x188] sm:$0xff] }
 0x3a3   :  { %v7958_v48 = vpack.c.bf16 %v1089_v7, %v1085_v42  ;;  %v9834_v1 = vld [vmem:[#allocation49_spill] sm:$0xff]  ;;  %v9836_v42 = vld [vmem:[#allocation51_spill] sm:$0xff]  ;;  %v9837_v7 = vld [vmem:[#allocation52_spill] sm:$0xff] }
 0x3a5   :  { %5625 = vmatpush1.bf16.msra.mxu0 %v7942_v29  ;;  %5657 = vmatpush1.bf16.msra.mxu1 %v7664_v13  ;;  %v7962_v13 = vpack.c.bf16 %v1098_v33, %v1094_v8  ;;  %v9838_v8 = vld [vmem:[#allocation53_spill] sm:$0xff]  ;;  %v1575_v33 = vld [vmem:[#allocation5 + $0x8] sm:$0xff] }
 0x3a6   :  { %5627 = vmatprep.subr.bf16.mxu0 %v7946_v32  ;;  %5659 = vmatprep.subr.bf16.mxu1 %v7667_v14  ;;  %v1097_v14 = vld [vmem:[#allocation5 + $0x1a0] sm:$0xff] }
 0x3a7   :  { %v7966_v15 = vpack.c.bf16 %v1097_v14, %v1093_v46  ;;  %v1579_v46 = vld [vmem:[#allocation5 + $0x28] sm:$0xff]  ;;  %v1577_v14 = vld [vmem:[#allocation5 + $0x18] sm:$0xff] }
 0x3a9   :  { %5629 = vmatpush1.bf16.msra.mxu0 %v7950_v18  ;;  %5661 = vmatpush1.bf16.msra.mxu1 %v7670_v20  ;;  %v7970_v20 = vpack.c.bf16 %v1106_v10, %v1102_v0  ;;  %v8046_v0 = vpack.c.bf16 %v1579_v46, %v1575_v33 }
 0x3aa   :  { %5631 = vmatprep.subr.bf16.mxu0 %v7954_v38  ;;  %5663 = vmatprep.subr.bf16.mxu1 %v7673_v21  ;;  %v1105_v21 = vld [vmem:[#allocation5 + $0x1e0] sm:$0xff] }
 0x3ab   :  { %v7974_v53 = vpack.c.bf16 %v1105_v21, %v1101_v22  ;;  %v494_v22 = vld [vmem:[%s9535_s11] sm:$0xf]  ;;  %v9839_v21 = vsub.s32 0, %v7892_v3 }
 0x3ad   :  { %5633 = vmatpush1.bf16.msra.mxu0 %v7958_v48  ;;  %5665 = vmatpush1.bf16.msra.mxu1 %v7676_v28  ;;  %v9798_v28 = vld [vmem:[#allocation13_spill] sm:$0xff] }
 0x3ae   :  { %5635 = vmatprep.subr.bf16.mxu0 %v7962_v13  ;;  %5667 = vmatprep.subr.bf16.mxu1 %v7679_v30  ;;  %v9799_v30 = vld [vmem:[#allocation14_spill] sm:$0xff] }
 0x3b1   :  { %5637 = vmatpush1.bf16.msra.mxu0 %v7966_v15  ;;  %5669 = vmatpush1.bf16.msra.mxu1 %v7682_v37  ;;  %v9800_v37 = vld [vmem:[#allocation15_spill] sm:$0xff] }
 0x3b2   :  { %5639 = vmatprep.subr.bf16.mxu0 %v7970_v20  ;;  %5671 = vmatprep.subr.bf16.mxu1 %v7685_v39  ;;  %v9801_v39 = vld [vmem:[#allocation16_spill] sm:$0xff] }
 0x3b5   :  { %5641 = vmatpush1.bf16.msra.mxu0 %v7974_v53  ;;  %5673 = vmatpush1.bf16.msra.mxu1 %v7688_v43  ;;  %v9802_v43 = vld [vmem:[#allocation17_spill] sm:$0xff] }
 0x3b6   :  { %5675 = vmatprep.subr.bf16.mxu0 %v7698_v49  ;;  %5739 = vmatprep.subr.bf16.mxu1 %v7700_v52  ;;  %v9803_v49 = vld [vmem:[#allocation18_spill] sm:$0xff]  ;;  %v9804_v52 = vld [vmem:[#allocation19_spill] sm:$0xff] }
 0x3b8   :  { %1174 = vmatmul.mubr.f32.vlgmr.msra.gmra.mrb[4].mxu0 %v7926_v60  ;;  %1245 = vmatmul.mubr.f32.vlgmr.msra.gmra.mrb[12].mxu1 %v7926_v60  ;;  %v9827_v60 = vld [vmem:[#allocation42_spill] sm:$0xff] }
 0x3b9   :  { %5677 = vmatpush1.bf16.msra.mxu0 %v7702_v54  ;;  %5741 = vmatpush1.bf16.msra.mxu1 %v7705_v57  ;;  %v9805_v54 = vld [vmem:[#allocation20_spill] sm:$0xff]  ;;  %v9806_v57 = vld [vmem:[#allocation21_spill] sm:$0xff] }
 0x3ba   :  { %5679 = vmatprep.subr.bf16.mxu0 %v7710_v63  ;;  %5743 = vmatprep.subr.bf16.mxu1 %v7712_v6  ;;  %v9807_v63 = vld [vmem:[#allocation22_spill] sm:$0xff]  ;;  %v9808_v6 = vld [vmem:[#allocation23_spill] sm:$0xff] }
 0x3bd   :  { %5681 = vmatpush1.bf16.msra.mxu0 %v7714_v9  ;;  %5745 = vmatpush1.bf16.msra.mxu1 %v7717_v12  ;;  %v9809_v9 = vld [vmem:[#allocation24_spill] sm:$0xff]  ;;  %v9810_v12 = vld [vmem:[#allocation25_spill] sm:$0xff] }
 0x3be   :  { %5683 = vmatprep.subr.bf16.mxu0 %v7722_v19  ;;  %5747 = vmatprep.subr.bf16.mxu1 %v7724_v27  ;;  %v9811_v19 = vld [vmem:[#allocation26_spill] sm:$0xff]  ;;  %v9812_v27 = vld [vmem:[#allocation27_spill] sm:$0xff] }
 0x3c1   :  { %5685 = vmatpush1.bf16.msra.mxu0 %v7726_v31  ;;  %5749 = vmatpush1.bf16.msra.mxu1 %v7729_v36  ;;  %v9813_v31 = vld [vmem:[#allocation28_spill] sm:$0xff]  ;;  %v9814_v36 = vld [vmem:[#allocation29_spill] sm:$0xff] }
 0x3c2   :  { %5687 = vmatprep.subr.bf16.mxu0 %v7734_v47  ;;  %5751 = vmatprep.subr.bf16.mxu1 %v7736_v51  ;;  %v9815_v47 = vld [vmem:[#allocation30_spill] sm:$0xff]  ;;  %v9816_v51 = vld [vmem:[#allocation31_spill] sm:$0xff] }
 0x3c5   :  { %5689 = vmatpush1.bf16.msra.mxu0 %v7738_v55  ;;  %5753 = vmatpush1.bf16.msra.mxu1 %v7741_v61  ;;  %v9817_v55 = vld [vmem:[#allocation32_spill] sm:$0xff]  ;;  %v9818_v61 = vld [vmem:[#allocation33_spill] sm:$0xff] }
 0x3c6   :  { %5691 = vmatprep.subr.bf16.mxu0 %v7746_v5  ;;  %5755 = vmatprep.subr.bf16.mxu1 %v7748_v16  ;;  %v9819_v5 = vld [vmem:[#allocation34_spill] sm:$0xff]  ;;  %v9820_v16 = vld [vmem:[#allocation35_spill] sm:$0xff] }
 0x3c9   :  { %5693 = vmatpush1.bf16.msra.mxu0 %v7750_v17  ;;  %5757 = vmatpush1.bf16.msra.mxu1 %v7753_v25  ;;  %v9821_v17 = vld [vmem:[#allocation36_spill] sm:$0xff]  ;;  %v9822_v25 = vld [vmem:[#allocation37_spill] sm:$0xff] }
 0x3ca   :  { %5695 = vmatprep.subr.bf16.mxu0 %v7758_v41  ;;  %5759 = vmatprep.subr.bf16.mxu1 %v7760_v50  ;;  %v9823_v41 = vld [vmem:[#allocation38_spill] sm:$0xff]  ;;  %v9824_v50 = vld [vmem:[#allocation39_spill] sm:$0xff] }
 0x3cd   :  { %5697 = vmatpush1.bf16.msra.mxu0 %v9798_v28  ;;  %5761 = vmatpush1.bf16.msra.mxu1 %v9799_v30  ;;  %v8057_v28 = vrot.slane %v494_v22, %v9839_v21  ;;  %v9841_v30 = vsub.s32 1, %v7892_v3 }
 0x3ce   :  { %5699 = vmatprep.subr.bf16.mxu0 %v9800_v37  ;;  %5763 = vmatprep.subr.bf16.mxu1 %v9801_v39 }
 0x3cf   :  { %9840 = vst [vmem:[#allocation13_spill] sm:$0xff] %v8057_v28  ;;  %v8061_v37 = vrot.slane %v494_v22, %v9841_v30 }
 0x3d1   :  { %5701 = vmatpush1.bf16.msra.mxu0 %v9802_v43  ;;  %5765 = vmatpush1.bf16.msra.mxu1 %v9803_v49 }
 0x3d2   :  { %5703 = vmatprep.subr.bf16.mxu0 %v9804_v52  ;;  %5767 = vmatprep.subr.bf16.mxu1 %v9805_v54 }
 0x3d5   :  { %5705 = vmatpush1.bf16.msra.mxu0 %v9806_v57  ;;  %5769 = vmatpush1.bf16.msra.mxu1 %v9807_v63 }
 0x3d6   :  { %5707 = vmatprep.subr.bf16.mxu0 %v9808_v6  ;;  %5771 = vmatprep.subr.bf16.mxu1 %v9809_v9  ;;  %v8067_v6 = vrot.slane %v494_v22, %v343_v34 }
 0x3d8   :  { %9842 = vst [vmem:[#allocation14_spill] sm:$0xff] %v8067_v6 }
 0x3d9   :  { %5709 = vmatpush1.bf16.msra.mxu0 %v9810_v12  ;;  %5773 = vmatpush1.bf16.msra.mxu1 %v9811_v19  ;;  %v9843_v19 = vsub.s32 2, %v7892_v3 }
 0x3da   :  { %5711 = vmatprep.subr.bf16.mxu0 %v9812_v27  ;;  %5775 = vmatprep.subr.bf16.mxu1 %v9813_v31 }
 0x3db   :  { %v8072_v27 = vrot.slane %v494_v22, %v9843_v19  ;;  %v1576_v19 = vld [vmem:[#allocation5 + $0x10] sm:$0xff] }
 0x3dd   :  { %5713 = vmatpush1.bf16.msra.mxu0 %v9814_v36  ;;  %5777 = vmatpush1.bf16.msra.mxu1 %v9815_v47 }
 0x3de   :  { %5715 = vmatprep.subr.bf16.mxu0 %v9816_v51  ;;  %5779 = vmatprep.subr.bf16.mxu1 %v9817_v55 }
 0x3e1   :  { %5717 = vmatpush1.bf16.msra.mxu0 %v9818_v61  ;;  %5781 = vmatpush1.bf16.msra.mxu1 %v9819_v5 }
 0x3e2   :  { %5719 = vmatprep.subr.bf16.mxu0 %v9820_v16  ;;  %5783 = vmatprep.subr.bf16.mxu1 %v9821_v17 }
 0x3e5   :  { %5721 = vmatpush1.bf16.msra.mxu0 %v9822_v25  ;;  %5785 = vmatpush1.bf16.msra.mxu1 %v9823_v41 }
 0x3e6   :  { %5723 = vmatprep.subr.bf16.mxu0 %v9824_v50  ;;  %5787 = vmatprep.subr.bf16.mxu1 %v9825_v11 }
 0x3e9   :  { %5725 = vmatpush1.bf16.msra.mxu0 %v9826_v45  ;;  %5789 = vmatpush1.bf16.msra.mxu1 %v9827_v60  ;;  %v9844_v60 = vld [vmem:[#allocation55_spill] sm:$0xff] }
 0x3ea   :  { %5727 = vmatprep.subr.bf16.mxu0 %v9828_v24  ;;  %5791 = vmatprep.subr.bf16.mxu1 %v9829_v26 }
 0x3ed   :  { %5729 = vmatpush1.bf16.msra.mxu0 %v9830_v62  ;;  %5793 = vmatpush1.bf16.msra.mxu1 %v9831_v58  ;;  %v9845_v58 = vld [vmem:[#allocation54_spill] sm:$0xff] }
 0x3ee   :  { %5731 = vmatprep.subr.bf16.mxu0 %v7865_v56  ;;  %5795 = vmatprep.subr.bf16.mxu1 %v9832_v59  ;;  %v1581_v56 = vld [vmem:[#allocation5 + $0x38] sm:$0xff] }
 0x3ef   :  { %v8048_v10 = vpack.c.bf16 %v1581_v56, %v1577_v14 }
 0x3f1   :  { %5733 = vmatpush1.bf16.msra.mxu0 %v9833_v35  ;;  %5797 = vmatpush1.bf16.msra.mxu1 %v9834_v1 }
 0x3f2   :  { %5735 = vmatprep.subr.bf16.mxu0 %v9835_v2  ;;  %5799 = vmatprep.subr.bf16.mxu1 %v9836_v42 }
 0x3f5   :  { %5737 = vmatpush1.bf16.msra.mxu0 %v9837_v7  ;;  %5801 = vmatpush1.bf16.msra.mxu1 %v9838_v8 }
 0x3f6   :  { %5803 = vmatprep.subr.bf16.mxu0 %v8046_v0  ;;  %5835 = vmatprep.subr.bf16.mxu1 %v8048_v10 }
 0x46b   :  { %v944_v39 = vpop.f32.mrb[2].mxu0  ;;  %v1015_v43 = vpop.f32.mrb[10].mxu1 }
 0x46c   :  { %v945_v49 = vadd.f32 %v944_v39, %v8057_v28  ;;  %v946_v52 = vpop.f32.mrb[3].mxu0  ;;  %v1017_v54 = vpop.f32.mrb[11].mxu1  ;;  %v1016_v36 = vadd.f32 %v1015_v43, %v8072_v27 }
 0x46d   :  { %v947_v57 = vadd.f32 %v946_v52, %v8061_v37  ;;  %v1018_v12 = vadd.f32 %v1017_v54, %v8067_v6 }
 0x46e   :  { %v5231_v63 = vmul.f32 -1.442695, %v945_v49 }
 0x46f   :  { %v5232_v9 = vmul.f32 -1.442695, %v947_v57  ;;  %v5233_v31 = vmul.f32 -1.442695, %v1018_v12  ;;  %v1578_v12 = vld [vmem:[#allocation5 + $0x20] sm:$0xff] }
 0x470   :  { %7021 = vpow2.f32 %v5231_v63 }
 0x471   :  { %7023 = vpow2.f32 %v5232_v9  ;;  %v1574_v9 = vld [vmem:[#allocation5] sm:$0xff] }
 0x472   :  { %7025 = vpow2.f32 %v5233_v31  ;;  %v1580_v31 = vld [vmem:[#allocation5 + $0x30] sm:$0xff] }
 0x473   :  { %7027 = vtanh.f32 %v1016_v36  ;;  %v1583_v36 = vld [vmem:[#allocation5 + $0x48] sm:$0xff] }
 0x47a   :  { %v7022_v47 = vpop.eup %7021 }
 0x47b   :  { %v7024_v51 = vpop.eup %7023  ;;  %v1023_v55 = vadd.f32 1.0, %v7022_v47  ;;  %v1587_v47 = vld [vmem:[#allocation5 + $0x68] sm:$0xff] }
 0x47c   :  { %v1029_v61 = vadd.f32 1.0, %v7024_v51  ;;  %v7026_v34 = vpop.eup %7025  ;;  %v1585_v51 = vld [vmem:[#allocation5 + $0x58] sm:$0xff] }
 0x47d   :  { %7029 = vrcp.f32 %v1023_v55  ;;  %v7028_v5 = vpop.eup %7027  ;;  %v1036_v41 = vadd.f32 1.0, %v7026_v34  ;;  %v1589_v55 = vld [vmem:[#allocation5 + $0x78] sm:$0xff] }
 0x47e   :  { %7031 = vrcp.f32 %v1029_v61 }
 0x47f   :  { %7033 = vrcp.f32 %v1036_v41  ;;  %v8096_v41 = vpack.c.bf16 %v1587_v47, %v1583_v36  ;;  %v1608_v36 = vld [vmem:[#allocation5 + $0x110] sm:$0xff] }
 0x480   :  { %v1612_v47 = vld [vmem:[#allocation5 + $0x130] sm:$0xff] }
 0x487   :  { %v7030_v16 = vpop.eup %7029 }
 0x488   :  { %v7032_v17 = vpop.eup %7031  ;;  %v1040_v25 = vmul.f32 %v7030_v16, %v7028_v5  ;;  %v8090_v5 = vpack.c.bf16 %v1578_v12, %v1574_v9  ;;  %v8092_v16 = vpack.c.bf16 %v1580_v31, %v1576_v19  ;;  %v1609_v9 = vld [vmem:[#allocation5 + $0x118] sm:$0xff] }
 0x489   :  { %v1039_v3 = vmul.f32 0.0, %v7032_v17  ;;  %v7034_v42 = vpop.eup %7033  ;;  %v1586_v17 = vld [vmem:[#allocation5 + $0x60] sm:$0xff]  ;;  %v1613_v12 = vld [vmem:[#allocation5 + $0x138] sm:$0xff] }
 0x48a   :  { %v8134_v31 = vpack.c.bf16 %v1613_v12, %v1609_v9  ;;  %v1821_v9 = vld [vmem:[#allocation7 + $0x68] sm:$0xff]  ;;  %v1819_v12 = vld [vmem:[#allocation7 + $0x58] sm:$0xff] }
 0x48b   :  { %v8075_v50 = vadd.f32 %v1040_v25, %v1039_v3  ;;  %v1175_v11 = vpop.f32.mrb[4].mxu0  ;;  %v1246_v45 = vpop.f32.mrb[12].mxu1  ;;  %v8098_v3 = vpack.c.bf16 %v1589_v55, %v1585_v51  ;;  %v1617_v51 = vld [vmem:[#allocation5 + $0x158] sm:$0xff] }
 0x48c   :  { %v1251_v24 = vadd.f32 %v1175_v11, %v9844_v60  ;;  %v1177_v26 = vpop.f32.mrb[5].mxu0  ;;  %v1248_v62 = vpop.f32.mrb[13].mxu1  ;;  %v1253_v33 = vadd.f32 %v1246_v45, %v7917_v23  ;;  %v1584_v11 = vld [vmem:[#allocation5 + $0x50] sm:$0xff]  ;;  %v1621_v55 = vld [vmem:[#allocation5 + $0x178] sm:$0xff] }
 0x48d   :  { %7035 = vtanh.f32 %v8075_v50  ;;  %v1252_v59 = vadd.f32 %v1177_v26, %v9845_v58  ;;  %v1254_v2 = vadd.f32 %v1248_v62, %v7919_v44  ;;  %v1588_v45 = vld [vmem:[#allocation5 + $0x70] sm:$0xff]  ;;  %v1595_v26 = vld [vmem:[#allocation5 + $0xa8] sm:$0xff]  ;;  %v1593_v62 = vld [vmem:[#allocation5 + $0x98] sm:$0xff] }
 0x48e   :  { %v5234_v35 = vmul.f32 -1.442695, %v1251_v24  ;;  %v1591_v24 = vld [vmem:[#allocation5 + $0x88] sm:$0xff] }
 0x48f   :  { %v5235_v1 = vmul.f32 -1.442695, %v1252_v59  ;;  %v5236_v8 = vmul.f32 -1.442695, %v1254_v2  ;;  %v1597_v59 = vld [vmem:[#allocation5 + $0xb8] sm:$0xff]  ;;  %v1590_v2 = vld [vmem:[#allocation5 + $0x80] sm:$0xff] }
 0x490   :  { %7037 = vpow2.f32 %v5234_v35 }
 0x491   :  { %7039 = vpow2.f32 %v5235_v1  ;;  %v8106_v1 = vpack.c.bf16 %v1588_v45, %v1584_v11  ;;  %v1625_v11 = vld [vmem:[#allocation5 + $0x198] sm:$0xff] }
 0x492   :  { %7041 = vpow2.f32 %v5236_v8  ;;  %v8112_v8 = vpack.c.bf16 %v1597_v59, %v1593_v62  ;;  %v1629_v45 = vld [vmem:[#allocation5 + $0x1b8] sm:$0xff] }
 0x493   :  { %7043 = vtanh.f32 %v1253_v33  ;;  %v1592_v33 = vld [vmem:[#allocation5 + $0x90] sm:$0xff]  ;;  %v1633_v62 = vld [vmem:[#allocation5 + $0x1d8] sm:$0xff] }
 0x494   :  { %v1637_v59 = vld [vmem:[#allocation5 + $0x1f8] sm:$0xff] }
 0x497   :  { %v7036_v7 = vpop.eup %7035 }
 0x498   :  { %v8082_v46 = vmul.f32 %v7036_v7, %v7034_v42  ;;  %v1594_v42 = vld [vmem:[#allocation5 + $0xa0] sm:$0xff]  ;;  %v8110_v7 = vpack.c.bf16 %v1595_v26, %v1591_v24  ;;  %v1628_v26 = vld [vmem:[#allocation5 + $0x1b0] sm:$0xff] }
 0x49a   :  { %9846 = vst [vmem:[#allocation15_spill] sm:$0xff] %v8082_v46  ;;  %v7038_v14 = vpop.eup %7037  ;;  %1471 = vmatprep.mubr.f32.mxu0 %v8082_v46  ;;  %1542 = vmatprep.mubr.f32.mxu1 %v8082_v46 }
 0x49b   :  { %v7040_v56 = vpop.eup %7039  ;;  %v1258_v22 = vadd.f32 1.0, %v7038_v14  ;;  %v1596_v14 = vld [vmem:[#allocation5 + $0xb0] sm:$0xff] }
 0x49c   :  { %v1264_v21 = vadd.f32 1.0, %v7040_v56  ;;  %v7042_v30 = vpop.eup %7041  ;;  %v1599_v56 = vld [vmem:[#allocation5 + $0xc8] sm:$0xff] }
 0x49d   :  { %7045 = vrcp.f32 %v1258_v22  ;;  %v7044_v39 = vpop.eup %7043  ;;  %v1271_v54 = vadd.f32 1.0, %v7042_v30  ;;  %v1603_v22 = vld [vmem:[#allocation5 + $0xe8] sm:$0xff]  ;;  %v1605_v30 = vld [vmem:[#allocation5 + $0xf8] sm:$0xff] }
 0x49e   :  { %7047 = vrcp.f32 %v1264_v21  ;;  %v1601_v21 = vld [vmem:[#allocation5 + $0xd8] sm:$0xff] }
 0x49f   :  { %7049 = vrcp.f32 %v1271_v54  ;;  %v1600_v54 = vld [vmem:[#allocation5 + $0xd0] sm:$0xff] }
 0x4a7   :  { %v7046_v43 = vpop.eup %7045 }
 0x4a8   :  { %v7048_v49 = vpop.eup %7047  ;;  %v1275_v52 = vmul.f32 %v7046_v43, %v7044_v39  ;;  %v8118_v39 = vpack.c.bf16 %v1594_v42, %v1590_v2  ;;  %v8120_v43 = vpack.c.bf16 %v1596_v14, %v1592_v33  ;;  %v1636_v42 = vld [vmem:[#allocation5 + $0x1f0] sm:$0xff]  ;;  %v1811_v14 = vld [vmem:[#allocation7 + $0x18] sm:$0xff] }
 0x4a9   :  { %v1274_v57 = vmul.f32 %v7048_v49, %v7923_v40  ;;  %v7050_v61 = vpop.eup %7049  ;;  %v1582_v40 = vld [vmem:[#allocation5 + $0x40] sm:$0xff]  ;;  %v8124_v49 = vpack.c.bf16 %v1603_v22, %v1599_v56  ;;  %v1815_v56 = vld [vmem:[#allocation7 + $0x38] sm:$0xff] }
 0x4aa   :  { %v8104_v35 = vpack.c.bf16 %v1586_v17, %v1582_v40  ;;  %v1616_v40 = vld [vmem:[#allocation5 + $0x150] sm:$0xff]  ;;  %v1808_v22 = vld [vmem:[#allocation7] sm:$0xff] }
 0x4ab   :  { %v8087_v63 = vadd.f32 %v1275_v52, %v1274_v57  ;;  %v8126_v52 = vpack.c.bf16 %v1605_v30, %v1601_v21  ;;  %v1604_v57 = vld [vmem:[#allocation5 + $0xf0] sm:$0xff]  ;;  %v1812_v21 = vld [vmem:[#allocation7 + $0x20] sm:$0xff]  ;;  %v8172_v30 = vpack.c.bf16 %v1815_v56, %v1811_v14 }
 0x4ac   :  { %v8130_v19 = vpack.c.bf16 %v1604_v57, %v1600_v54  ;;  %v1620_v17 = vld [vmem:[#allocation5 + $0x170] sm:$0xff] }
 0x4ad   :  { %7051 = vtanh.f32 %v8087_v63  ;;  %v8146_v24 = vpack.c.bf16 %v1620_v17, %v1616_v40  ;;  %v1810_v54 = vld [vmem:[#allocation7 + $0x10] sm:$0xff] }
 0x4b7   :  { %v7052_v34 = vpop.eup %7051 }
 0x4b8   :  { %v8094_v25 = vmul.f32 %v7052_v34, %v7050_v61  ;;  %v8138_v61 = vpack.c.bf16 %v1612_v47, %v1608_v36  ;;  %v8142_v34 = vpack.c.bf16 %v1621_v55, %v1617_v51  ;;  %v1823_v47 = vld [vmem:[#allocation7 + $0x78] sm:$0xff]  ;;  %v1816_v51 = vld [vmem:[#allocation7 + $0x40] sm:$0xff] }
 0x4b9   :  { %v1820_v55 = vld [vmem:[#allocation7 + $0x60] sm:$0xff]  ;;  %v8184_v40 = vpack.c.bf16 %v1823_v47, %v1819_v12  ;;  %v1839_v47 = vld [vmem:[#allocation7 + $0xf8] sm:$0xff] }
 0x4ba   :  { %1472 = vmatmul.mubr.f32.vlgmr.msra.gmra.mrb[6].mxu0 %v8094_v25  ;;  %1543 = vmatmul.mubr.f32.vlgmr.msra.gmra.mrb[14].mxu1 %v8094_v25  ;;  %v8186_v17 = vpack.c.bf16 %v1820_v55, %v1816_v51  ;;  %v1832_v51 = vld [vmem:[#allocation7 + $0xc0] sm:$0xff] }
 0x4bb   :  { %5805 = vmatpush1.bf16.msra.mxu0 %v8090_v5  ;;  %5837 = vmatpush1.bf16.msra.mxu1 %v8092_v16  ;;  %v1836_v55 = vld [vmem:[#allocation7 + $0xe0] sm:$0xff] }
 0x4bc   :  { %5807 = vmatprep.subr.bf16.mxu0 %v8096_v41  ;;  %5839 = vmatprep.subr.bf16.mxu1 %v8098_v3 }
 0x4bd   :  { %1702 = vmatprep.mubr.f32.mxu0 %v9797_v4  ;;  %1773 = vmatprep.mubr.f32.mxu1 %v9797_v4 }
 0x4bf   :  { %5809 = vmatpush1.bf16.msra.mxu0 %v8104_v35  ;;  %5841 = vmatpush1.bf16.msra.mxu1 %v8106_v1 }
 0x4c0   :  { %5811 = vmatprep.subr.bf16.mxu0 %v8110_v7  ;;  %5843 = vmatprep.subr.bf16.mxu1 %v8112_v8 }
 0x4c3   :  { %5813 = vmatpush1.bf16.msra.mxu0 %v8118_v39  ;;  %5845 = vmatpush1.bf16.msra.mxu1 %v8120_v43 }
 0x4c4   :  { %5815 = vmatprep.subr.bf16.mxu0 %v8124_v49  ;;  %5847 = vmatprep.subr.bf16.mxu1 %v8126_v52 }
 0x4c7   :  { %5817 = vmatpush1.bf16.msra.mxu0 %v7942_v29  ;;  %5849 = vmatpush1.bf16.msra.mxu1 %v8130_v19  ;;  %v8150_v29 = vpack.c.bf16 %v1629_v45, %v1625_v11  ;;  %v1818_v11 = vld [vmem:[#allocation7 + $0x50] sm:$0xff] }
 0x4c8   :  { %5819 = vmatprep.subr.bf16.mxu0 %v7946_v32  ;;  %5851 = vmatprep.subr.bf16.mxu1 %v8134_v31  ;;  %v1624_v32 = vld [vmem:[#allocation5 + $0x190] sm:$0xff] }
 0x4c9   :  { %v8154_v2 = vpack.c.bf16 %v1628_v26, %v1624_v32  ;;  %v1822_v45 = vld [vmem:[#allocation7 + $0x70] sm:$0xff]  ;;  %v1825_v26 = vld [vmem:[#allocation7 + $0x88] sm:$0xff] }
 0x4ca   :  { %v8189_v32 = vpack.c.bf16 %v1822_v45, %v1818_v11  ;;  %v8210_v45 = vpack.c.bf16 %v1836_v55, %v1832_v51  ;;  %v1842_v51 = vld [vmem:[#allocation7 + $0x110] sm:$0xff] }
 0x4cb   :  { %5821 = vmatpush1.bf16.msra.mxu0 %v7950_v18  ;;  %5853 = vmatpush1.bf16.msra.mxu1 %v8138_v61  ;;  %v8158_v18 = vpack.c.bf16 %v1637_v59, %v1633_v62  ;;  %v1829_v62 = vld [vmem:[#allocation7 + $0xa8] sm:$0xff]  ;;  %v1827_v59 = vld [vmem:[#allocation7 + $0x98] sm:$0xff]  ;;  %v1846_v55 = vld [vmem:[#allocation7 + $0x130] sm:$0xff] }
 0x4cc   :  { %5823 = vmatprep.subr.bf16.mxu0 %v7954_v38  ;;  %5855 = vmatprep.subr.bf16.mxu1 %v8142_v34  ;;  %v1632_v38 = vld [vmem:[#allocation5 + $0x1d0] sm:$0xff]  ;;  %9848 = vst [vmem:[#allocation17_spill] sm:$0xff] %v8210_v45 }
 0x4cd   :  { %v8162_v33 = vpack.c.bf16 %v1636_v42, %v1632_v38  ;;  %v8194_v38 = vpack.c.bf16 %v1829_v62, %v1825_v26  ;;  %v1831_v42 = vld [vmem:[#allocation7 + $0xb8] sm:$0xff]  ;;  %v1834_v26 = vld [vmem:[#allocation7 + $0xd0] sm:$0xff] }
 0x4ce   :  { %v8196_v14 = vpack.c.bf16 %v1831_v42, %v1827_v59  ;;  %v1838_v62 = vld [vmem:[#allocation7 + $0xf0] sm:$0xff]  ;;  %v1841_v42 = vld [vmem:[#allocation7 + $0x108] sm:$0xff] }
 0x4cf   :  { %5825 = vmatpush1.bf16.msra.mxu0 %v7958_v48  ;;  %5857 = vmatpush1.bf16.msra.mxu1 %v8146_v24  ;;  %v1809_v48 = vld [vmem:[#allocation7 + $0x8] sm:$0xff]  ;;  %v8213_v59 = vpack.c.bf16 %v1838_v62, %v1834_v26  ;;  %v8225_v26 = vpack.c.bf16 %v1846_v55, %v1842_v51  ;;  %v1850_v51 = vld [vmem:[#allocation7 + $0x150] sm:$0xff] }
 0x4d0   :  { %5827 = vmatprep.subr.bf16.mxu0 %v7962_v13  ;;  %5859 = vmatprep.subr.bf16.mxu1 %v8150_v29  ;;  %v1813_v13 = vld [vmem:[#allocation7 + $0x28] sm:$0xff]  ;;  %v1854_v55 = vld [vmem:[#allocation7 + $0x170] sm:$0xff] }
 0x4d1   :  { %9849 = vst [vmem:[#allocation18_spill] sm:$0xff] %v8213_v59  ;;  %9853 = vst [vmem:[#allocation22_spill] sm:$0xff] %v8225_v26  ;;  %v1849_v62 = vld [vmem:[#allocation7 + $0x148] sm:$0xff] }
 0x4d3   :  { %5829 = vmatpush1.bf16.msra.mxu0 %v7966_v15  ;;  %5861 = vmatpush1.bf16.msra.mxu1 %v8154_v2  ;;  %v8170_v15 = vpack.c.bf16 %v1813_v13, %v1809_v48  ;;  %v1824_v48 = vld [vmem:[#allocation7 + $0x80] sm:$0xff] }
 0x4d4   :  { %5831 = vmatprep.subr.bf16.mxu0 %v7970_v20  ;;  %5863 = vmatprep.subr.bf16.mxu1 %v8158_v18  ;;  %v8174_v20 = vpack.c.bf16 %v1812_v21, %v1808_v22  ;;  %v1828_v13 = vld [vmem:[#allocation7 + $0xa0] sm:$0xff]  ;;  %v1826_v22 = vld [vmem:[#allocation7 + $0x90] sm:$0xff] }
 0x4d5   :  { %v8198_v56 = vpack.c.bf16 %v1828_v13, %v1824_v48  ;;  %v1830_v21 = vld [vmem:[#allocation7 + $0xb0] sm:$0xff]  ;;  %v1845_v48 = vld [vmem:[#allocation7 + $0x128] sm:$0xff]  ;;  %v1843_v13 = vld [vmem:[#allocation7 + $0x118] sm:$0xff] }
 0x4d7   :  { %5833 = vmatpush1.bf16.msra.mxu0 %v7974_v53  ;;  %5865 = vmatpush1.bf16.msra.mxu1 %v8162_v33  ;;  %v1814_v53 = vld [vmem:[#allocation7 + $0x30] sm:$0xff] }
 0x4d8   :  { %5867 = vmatprep.subr.bf16.mxu0 %v8170_v15  ;;  %v8177_v57 = vpack.c.bf16 %v1814_v53, %v1810_v54  ;;  %5931 = vmatprep.subr.bf16.mxu1 %v8172_v30  ;;  %v8201_v54 = vpack.c.bf16 %v1830_v21, %v1826_v22  ;;  %v1833_v53 = vld [vmem:[#allocation7 + $0xc8] sm:$0xff]  ;;  %v8218_v22 = vpack.c.bf16 %v1845_v48, %v1841_v42  ;;  %v1847_v21 = vld [vmem:[#allocation7 + $0x138] sm:$0xff] }
 0x4d9   :  { %v1853_v42 = vld [vmem:[#allocation7 + $0x168] sm:$0xff]  ;;  %v1851_v48 = vld [vmem:[#allocation7 + $0x158] sm:$0xff] }
 0x4da   :  { %1703 = vmatmul.mubr.f32.vlgmr.msra.gmra.mrb[8].mxu0 %v8094_v25  ;;  %1774 = vmatmul.mubr.f32.vlgmr.msra.gmra.mrb[16].mxu1 %v8094_v25  ;;  %v1817_v25 = vld [vmem:[#allocation7 + $0x48] sm:$0xff]  ;;  %9850 = vst [vmem:[#allocation19_spill] sm:$0xff] %v8218_v22  ;;  %v8230_v46 = vpack.c.bf16 %v1853_v42, %v1849_v62  ;;  %v1859_v42 = vld [vmem:[#allocation7 + $0x198] sm:$0xff] }
 0x4db   :  { %5869 = vmatpush1.bf16.msra.mxu0 %v8174_v20  ;;  %5933 = vmatpush1.bf16.msra.mxu1 %v8177_v57  ;;  %v8182_v36 = vpack.c.bf16 %v1821_v9, %v1817_v25  ;;  %v1837_v25 = vld [vmem:[#allocation7 + $0xe8] sm:$0xff]  ;;  %v1835_v9 = vld [vmem:[#allocation7 + $0xd8] sm:$0xff] }
 0x4dc   :  { %5935 = vmatprep.subr.bf16.mxu1 %v8184_v40  ;;  %v8206_v12 = vpack.c.bf16 %v1837_v25, %v1833_v53  ;;  %v8208_v11 = vpack.c.bf16 %v1839_v47, %v1835_v9  ;;  %v1840_v53 = vld [vmem:[#allocation7 + $0x100] sm:$0xff]  ;;  %v8220_v9 = vpack.c.bf16 %v1847_v21, %v1843_v13  ;;  %9854 = vst [vmem:[#allocation23_spill] sm:$0xff] %v8230_v46  ;;  %v1855_v13 = vld [vmem:[#allocation7 + $0x178] sm:$0xff]  ;;  %v1861_v62 = vld [vmem:[#allocation7 + $0x1a8] sm:$0xff] }
 0x4dd   :  { %5871 = vmatprep.subr.bf16.mxu0 %v8182_v36  ;;  %v1844_v25 = vld [vmem:[#allocation7 + $0x120] sm:$0xff] }
 0x4de   :  { %9847 = vst [vmem:[#allocation16_spill] sm:$0xff] %v8208_v11  ;;  %9851 = vst [vmem:[#allocation20_spill] sm:$0xff] %v8220_v9  ;;  %v8222_v47 = vpack.c.bf16 %v1844_v25, %v1840_v53  ;;  %v1848_v21 = vld [vmem:[#allocation7 + $0x140] sm:$0xff]  ;;  %v8232_v25 = vpack.c.bf16 %v1855_v13, %v1851_v48  ;;  %v1863_v48 = vld [vmem:[#allocation7 + $0x1b8] sm:$0xff] }
 0x4df   :  { %5873 = vmatpush1.bf16.msra.mxu0 %v8186_v17  ;;  %5937 = vmatpush1.bf16.msra.mxu1 %v8189_v32  ;;  %v1852_v53 = vld [vmem:[#allocation7 + $0x160] sm:$0xff] }
 0x4e0   :  { %5875 = vmatprep.subr.bf16.mxu0 %v8194_v38  ;;  %5939 = vmatprep.subr.bf16.mxu1 %v8196_v14  ;;  %9852 = vst [vmem:[#allocation21_spill] sm:$0xff] %v8222_v47  ;;  %9855 = vst [vmem:[#allocation24_spill] sm:$0xff] %v8232_v25  ;;  %v1856_v13 = vld [vmem:[#allocation7 + $0x180] sm:$0xff] }
 0x4e3   :  { %5877 = vmatpush1.bf16.msra.mxu0 %v8198_v56  ;;  %5941 = vmatpush1.bf16.msra.mxu1 %v8201_v54 }
 0x4e4   :  { %5879 = vmatprep.subr.bf16.mxu0 %v8206_v12  ;;  %5943 = vmatprep.subr.bf16.mxu1 %v8208_v11  ;;  %v1927_v11 = vld [vmem:[#allocation7 + $0x3b8] sm:$0xff] }
 0x4e7   :  { %5881 = vmatpush1.bf16.msra.mxu0 %v8210_v45  ;;  %5945 = vmatpush1.bf16.msra.mxu1 %v8213_v59  ;;  %v8234_v59 = vpack.c.bf16 %v1852_v53, %v1848_v21  ;;  %v1860_v21 = vld [vmem:[#allocation7 + $0x1a0] sm:$0xff]  ;;  %v8244_v53 = vpack.c.bf16 %v1863_v48, %v1859_v42  ;;  %v1871_v42 = vld [vmem:[#allocation7 + $0x1f8] sm:$0xff] }
 0x4e8   :  { %5883 = vmatprep.subr.bf16.mxu0 %v8218_v22  ;;  %5947 = vmatprep.subr.bf16.mxu1 %v8220_v9  ;;  %v8237_v9 = vpack.c.bf16 %v1854_v55, %v1850_v51  ;;  %v8246_v22 = vpack.c.bf16 %v1860_v21, %v1856_v13  ;;  %v1858_v51 = vld [vmem:[#allocation7 + $0x190] sm:$0xff]  ;;  %v1864_v48 = vld [vmem:[#allocation7 + $0x1c0] sm:$0xff]  ;;  %v1923_v45 = vld [vmem:[#allocation7 + $0x398] sm:$0xff] }
 0x4e9   :  { %9856 = vst [vmem:[#allocation25_spill] sm:$0xff] %v8234_v59  ;;  %9859 = vst [vmem:[#allocation28_spill] sm:$0xff] %v8244_v53  ;;  %v1862_v55 = vld [vmem:[#allocation7 + $0x1b0] sm:$0xff]  ;;  %v1868_v13 = vld [vmem:[#allocation7 + $0x1e0] sm:$0xff] }
 0x4ea   :  { %9857 = vst [vmem:[#allocation26_spill] sm:$0xff] %v8237_v9  ;;  %9860 = vst [vmem:[#allocation29_spill] sm:$0xff] %v8246_v22 }
 0x4eb   :  { %5885 = vmatpush1.bf16.msra.mxu0 %v8222_v47  ;;  %5949 = vmatpush1.bf16.msra.mxu1 %v8225_v26  ;;  %v1857_v26 = vld [vmem:[#allocation7 + $0x188] sm:$0xff] }
 0x4ec   :  { %5887 = vmatprep.subr.bf16.mxu0 %v8230_v46  ;;  %5951 = vmatprep.subr.bf16.mxu1 %v8232_v25  ;;  %v8242_v47 = vpack.c.bf16 %v1861_v62, %v1857_v26  ;;  %v8249_v25 = vpack.c.bf16 %v1862_v55, %v1858_v51  ;;  %v1869_v26 = vld [vmem:[#allocation7 + $0x1e8] sm:$0xff]  ;;  %v1867_v62 = vld [vmem:[#allocation7 + $0x1d8] sm:$0xff]  ;;  %v8258_v46 = vpack.c.bf16 %v1868_v13, %v1864_v48  ;;  %v1866_v51 = vld [vmem:[#allocation7 + $0x1d0] sm:$0xff] }
 0x4ed   :  { %v8256_v21 = vpack.c.bf16 %v1871_v42, %v1867_v62  ;;  %v1870_v55 = vld [vmem:[#allocation7 + $0x1f0] sm:$0xff]  ;;  %v1879_v62 = vld [vmem:[#allocation7 + $0x238] sm:$0xff]  ;;  %v1872_v42 = vld [vmem:[#allocation7 + $0x200] sm:$0xff] }
 0x4ee   :  { %9858 = vst [vmem:[#allocation27_spill] sm:$0xff] %v8242_v47  ;;  %9861 = vst [vmem:[#allocation30_spill] sm:$0xff] %v8249_v25  ;;  %v1876_v48 = vld [vmem:[#allocation7 + $0x220] sm:$0xff] }
 0x4ef   :  { %5889 = vmatpush1.bf16.msra.mxu0 %v8234_v59  ;;  %5953 = vmatpush1.bf16.msra.mxu1 %v8237_v9  ;;  %v1865_v9 = vld [vmem:[#allocation7 + $0x1c8] sm:$0xff]  ;;  %9863 = vst [vmem:[#allocation32_spill] sm:$0xff] %v8256_v21  ;;  %9864 = vst [vmem:[#allocation33_spill] sm:$0xff] %v8258_v46 }
 0x4f0   :  { %5891 = vmatprep.subr.bf16.mxu0 %v8242_v47  ;;  %5955 = vmatprep.subr.bf16.mxu1 %v8244_v53  ;;  %v8254_v59 = vpack.c.bf16 %v1869_v26, %v1865_v9  ;;  %v8261_v53 = vpack.c.bf16 %v1870_v55, %v1866_v51  ;;  %v1877_v9 = vld [vmem:[#allocation7 + $0x228] sm:$0xff]  ;;  %v1875_v26 = vld [vmem:[#allocation7 + $0x218] sm:$0xff]  ;;  %v8270_v47 = vpack.c.bf16 %v1876_v48, %v1872_v42  ;;  %v1874_v51 = vld [vmem:[#allocation7 + $0x210] sm:$0xff] }
 0x4f1   :  { %v8268_v13 = vpack.c.bf16 %v1879_v62, %v1875_v26  ;;  %v1878_v55 = vld [vmem:[#allocation7 + $0x230] sm:$0xff]  ;;  %v1887_v26 = vld [vmem:[#allocation7 + $0x278] sm:$0xff]  ;;  %v1880_v62 = vld [vmem:[#allocation7 + $0x240] sm:$0xff] }
 0x4f2   :  { %9862 = vst [vmem:[#allocation31_spill] sm:$0xff] %v8254_v59  ;;  %9865 = vst [vmem:[#allocation34_spill] sm:$0xff] %v8261_v53  ;;  %v1884_v42 = vld [vmem:[#allocation7 + $0x260] sm:$0xff] }
 0x4f3   :  { %5893 = vmatpush1.bf16.msra.mxu0 %v8246_v22  ;;  %5957 = vmatpush1.bf16.msra.mxu1 %v8249_v25  ;;  %v1873_v25 = vld [vmem:[#allocation7 + $0x208] sm:$0xff]  ;;  %9867 = vst [vmem:[#allocation36_spill] sm:$0xff] %v8268_v13  ;;  %9868 = vst [vmem:[#allocation37_spill] sm:$0xff] %v8270_v47 }
 0x4f4   :  { %5895 = vmatprep.subr.bf16.mxu0 %v8254_v59  ;;  %5959 = vmatprep.subr.bf16.mxu1 %v8256_v21  ;;  %v8266_v22 = vpack.c.bf16 %v1877_v9, %v1873_v25  ;;  %v8273_v21 = vpack.c.bf16 %v1878_v55, %v1874_v51  ;;  %v1885_v25 = vld [vmem:[#allocation7 + $0x268] sm:$0xff]  ;;  %v1883_v9 = vld [vmem:[#allocation7 + $0x258] sm:$0xff]  ;;  %v8282_v59 = vpack.c.bf16 %v1884_v42, %v1880_v62  ;;  %v1882_v51 = vld [vmem:[#allocation7 + $0x250] sm:$0xff] }
 0x4f5   :  { %v8280_v48 = vpack.c.bf16 %v1887_v26, %v1883_v9  ;;  %v1886_v55 = vld [vmem:[#allocation7 + $0x270] sm:$0xff]  ;;  %v1895_v9 = vld [vmem:[#allocation7 + $0x2b8] sm:$0xff]  ;;  %v1888_v26 = vld [vmem:[#allocation7 + $0x280] sm:$0xff] }
 0x4f6   :  { %9866 = vst [vmem:[#allocation35_spill] sm:$0xff] %v8266_v22  ;;  %9869 = vst [vmem:[#allocation38_spill] sm:$0xff] %v8273_v21  ;;  %v1892_v62 = vld [vmem:[#allocation7 + $0x2a0] sm:$0xff] }
 0x4f7   :  { %5897 = vmatpush1.bf16.msra.mxu0 %v8258_v46  ;;  %5961 = vmatpush1.bf16.msra.mxu1 %v8261_v53  ;;  %v1881_v53 = vld [vmem:[#allocation7 + $0x248] sm:$0xff]  ;;  %9871 = vst [vmem:[#allocation40_spill] sm:$0xff] %v8280_v48  ;;  %9872 = vst [vmem:[#allocation41_spill] sm:$0xff] %v8282_v59 }
 0x4f8   :  { %5899 = vmatprep.subr.bf16.mxu0 %v8266_v22  ;;  %5963 = vmatprep.subr.bf16.mxu1 %v8268_v13  ;;  %v8278_v46 = vpack.c.bf16 %v1885_v25, %v1881_v53  ;;  %v8285_v13 = vpack.c.bf16 %v1886_v55, %v1882_v51  ;;  %v1893_v53 = vld [vmem:[#allocation7 + $0x2a8] sm:$0xff]  ;;  %v1891_v25 = vld [vmem:[#allocation7 + $0x298] sm:$0xff]  ;;  %v8294_v22 = vpack.c.bf16 %v1892_v62, %v1888_v26  ;;  %v1890_v51 = vld [vmem:[#allocation7 + $0x290] sm:$0xff] }
 0x4f9   :  { %v8292_v42 = vpack.c.bf16 %v1895_v9, %v1891_v25  ;;  %v1894_v55 = vld [vmem:[#allocation7 + $0x2b0] sm:$0xff]  ;;  %v1903_v25 = vld [vmem:[#allocation7 + $0x2f8] sm:$0xff]  ;;  %v1896_v9 = vld [vmem:[#allocation7 + $0x2c0] sm:$0xff] }
 0x4fa   :  { %9870 = vst [vmem:[#allocation39_spill] sm:$0xff] %v8278_v46  ;;  %9873 = vst [vmem:[#allocation42_spill] sm:$0xff] %v8285_v13  ;;  %v1900_v26 = vld [vmem:[#allocation7 + $0x2e0] sm:$0xff] }
 0x4fb   :  { %5901 = vmatpush1.bf16.msra.mxu0 %v8270_v47  ;;  %5965 = vmatpush1.bf16.msra.mxu1 %v8273_v21  ;;  %v1889_v21 = vld [vmem:[#allocation7 + $0x288] sm:$0xff]  ;;  %9875 = vst [vmem:[#allocation44_spill] sm:$0xff] %v8292_v42  ;;  %9876 = vst [vmem:[#allocation45_spill] sm:$0xff] %v8294_v22 }
 0x4fc   :  { %5903 = vmatprep.subr.bf16.mxu0 %v8278_v46  ;;  %5967 = vmatprep.subr.bf16.mxu1 %v8280_v48  ;;  %v8290_v47 = vpack.c.bf16 %v1893_v53, %v1889_v21  ;;  %v8297_v48 = vpack.c.bf16 %v1894_v55, %v1890_v51  ;;  %v1901_v21 = vld [vmem:[#allocation7 + $0x2e8] sm:$0xff]  ;;  %v1899_v53 = vld [vmem:[#allocation7 + $0x2d8] sm:$0xff]  ;;  %v8306_v46 = vpack.c.bf16 %v1900_v26, %v1896_v9  ;;  %v1898_v51 = vld [vmem:[#allocation7 + $0x2d0] sm:$0xff] }
 0x4fd   :  { %v8304_v62 = vpack.c.bf16 %v1903_v25, %v1899_v53  ;;  %v1902_v55 = vld [vmem:[#allocation7 + $0x2f0] sm:$0xff]  ;;  %v1911_v53 = vld [vmem:[#allocation7 + $0x338] sm:$0xff]  ;;  %v1904_v25 = vld [vmem:[#allocation7 + $0x300] sm:$0xff] }
 0x4fe   :  { %9874 = vst [vmem:[#allocation43_spill] sm:$0xff] %v8290_v47  ;;  %9877 = vst [vmem:[#allocation46_spill] sm:$0xff] %v8297_v48  ;;  %v1908_v9 = vld [vmem:[#allocation7 + $0x320] sm:$0xff] }
 0x4ff   :  { %5905 = vmatpush1.bf16.msra.mxu0 %v8282_v59  ;;  %5969 = vmatpush1.bf16.msra.mxu1 %v8285_v13  ;;  %v1897_v13 = vld [vmem:[#allocation7 + $0x2c8] sm:$0xff]  ;;  %9879 = vst [vmem:[#allocation48_spill] sm:$0xff] %v8304_v62  ;;  %9880 = vst [vmem:[#allocation49_spill] sm:$0xff] %v8306_v46 }
 0x500   :  { %5907 = vmatprep.subr.bf16.mxu0 %v8290_v47  ;;  %5971 = vmatprep.subr.bf16.mxu1 %v8292_v42  ;;  %v8302_v59 = vpack.c.bf16 %v1901_v21, %v1897_v13  ;;  %v8309_v42 = vpack.c.bf16 %v1902_v55, %v1898_v51  ;;  %v1909_v13 = vld [vmem:[#allocation7 + $0x328] sm:$0xff]  ;;  %v1907_v21 = vld [vmem:[#allocation7 + $0x318] sm:$0xff]  ;;  %v8318_v47 = vpack.c.bf16 %v1908_v9, %v1904_v25  ;;  %v1906_v51 = vld [vmem:[#allocation7 + $0x310] sm:$0xff] }
 0x501   :  { %v8316_v26 = vpack.c.bf16 %v1911_v53, %v1907_v21  ;;  %v1910_v55 = vld [vmem:[#allocation7 + $0x330] sm:$0xff]  ;;  %v1919_v21 = vld [vmem:[#allocation7 + $0x378] sm:$0xff]  ;;  %v1912_v53 = vld [vmem:[#allocation7 + $0x340] sm:$0xff] }
 0x502   :  { %9878 = vst [vmem:[#allocation47_spill] sm:$0xff] %v8302_v59  ;;  %9881 = vst [vmem:[#allocation50_spill] sm:$0xff] %v8309_v42  ;;  %v1916_v25 = vld [vmem:[#allocation7 + $0x360] sm:$0xff] }
 0x503   :  { %5909 = vmatpush1.bf16.msra.mxu0 %v8294_v22  ;;  %5973 = vmatpush1.bf16.msra.mxu1 %v8297_v48  ;;  %v1905_v48 = vld [vmem:[#allocation7 + $0x308] sm:$0xff]  ;;  %9883 = vst [vmem:[#allocation52_spill] sm:$0xff] %v8316_v26  ;;  %9884 = vst [vmem:[#allocation53_spill] sm:$0xff] %v8318_v47 }
 0x504   :  { %5911 = vmatprep.subr.bf16.mxu0 %v8302_v59  ;;  %5975 = vmatprep.subr.bf16.mxu1 %v8304_v62  ;;  %v8314_v22 = vpack.c.bf16 %v1909_v13, %v1905_v48  ;;  %v8321_v62 = vpack.c.bf16 %v1910_v55, %v1906_v51  ;;  %v1917_v48 = vld [vmem:[#allocation7 + $0x368] sm:$0xff]  ;;  %v1915_v13 = vld [vmem:[#allocation7 + $0x358] sm:$0xff]  ;;  %v8330_v59 = vpack.c.bf16 %v1916_v25, %v1912_v53  ;;  %v1914_v51 = vld [vmem:[#allocation7 + $0x350] sm:$0xff] }
 0x505   :  { %v8328_v9 = vpack.c.bf16 %v1919_v21, %v1915_v13  ;;  %v1918_v55 = vld [vmem:[#allocation7 + $0x370] sm:$0xff]  ;;  %v1920_v13 = vld [vmem:[#allocation7 + $0x380] sm:$0xff] }
 0x506   :  { %9882 = vst [vmem:[#allocation51_spill] sm:$0xff] %v8314_v22  ;;  %9885 = vst [vmem:[#allocation55_spill] sm:$0xff] %v8321_v62  ;;  %v1924_v21 = vld [vmem:[#allocation7 + $0x3a0] sm:$0xff]  ;;  %v1922_v53 = vld [vmem:[#allocation7 + $0x390] sm:$0xff] }
 0x507   :  { %5913 = vmatpush1.bf16.msra.mxu0 %v8306_v46  ;;  %5977 = vmatpush1.bf16.msra.mxu1 %v8309_v42  ;;  %v1913_v42 = vld [vmem:[#allocation7 + $0x348] sm:$0xff]  ;;  %9887 = vst [vmem:[#allocation56_spill] sm:$0xff] %v8328_v9  ;;  %9888 = vst [vmem:[#allocation57_spill] sm:$0xff] %v8330_v59  ;;  %v8342_v25 = vpack.c.bf16 %v1924_v21, %v1920_v13  ;;  %v1934_v13 = vld [vmem:[#allocation7 + $0x3f0] sm:$0xff] }
 0x508   :  { %5915 = vmatprep.subr.bf16.mxu0 %v8314_v22  ;;  %5979 = vmatprep.subr.bf16.mxu1 %v8316_v26  ;;  %v8326_v46 = vpack.c.bf16 %v1917_v48, %v1913_v42  ;;  %v1921_v22 = vld [vmem:[#allocation7 + $0x388] sm:$0xff]  ;;  %v8339_v48 = vpack.c.bf16 %v1927_v11, %v1923_v45  ;;  %v1931_v11 = vld [vmem:[#allocation7 + $0x3d8] sm:$0xff] }
 0x509   :  { %v1925_v26 = vld [vmem:[#allocation7 + $0x3a8] sm:$0xff]  ;;  %v1935_v45 = vld [vmem:[#allocation7 + $0x3f8] sm:$0xff] }
 0x50a   :  { %9886 = vst [vmem:[#allocation54_spill] sm:$0xff] %v8326_v46  ;;  %v8337_v42 = vpack.c.bf16 %v1925_v26, %v1921_v22  ;;  %v1928_v26 = vld [vmem:[#allocation7 + $0x3c0] sm:$0xff] }
 0x50b   :  { %5917 = vmatpush1.bf16.msra.mxu0 %v8318_v47  ;;  %5981 = vmatpush1.bf16.msra.mxu1 %v8321_v62  ;;  %v8333_v47 = vpack.c.bf16 %v1918_v55, %v1914_v51  ;;  %v1926_v51 = vld [vmem:[#allocation7 + $0x3b0] sm:$0xff]  ;;  %v1929_v55 = vld [vmem:[#allocation7 + $0x3c8] sm:$0xff]  ;;  %v1932_v62 = vld [vmem:[#allocation7 + $0x3e0] sm:$0xff] }
 0x50c   :  { %5919 = vmatprep.subr.bf16.mxu0 %v8326_v46  ;;  %5983 = vmatprep.subr.bf16.mxu1 %v8328_v9  ;;  %v1933_v46 = vld [vmem:[#allocation7 + $0x3e8] sm:$0xff]  ;;  %v8346_v9 = vpack.c.bf16 %v1926_v51, %v1922_v53  ;;  %v8353_v21 = vpack.c.bf16 %v1932_v62, %v1928_v26 }
 0x50d   :  { %9889 = vst [vmem:[#allocation58_spill] sm:$0xff] %v8333_v47  ;;  %v8348_v22 = vpack.c.bf16 %v1933_v46, %v1929_v55 }
 0x50e   :  { %9892 = vst [vmem:[#allocation61_spill] sm:$0xff] %v8353_v21 }
 0x50f   :  { %5921 = vmatpush1.bf16.msra.mxu0 %v8330_v59  ;;  %5985 = vmatpush1.bf16.msra.mxu1 %v8333_v47  ;;  %9890 = vst [vmem:[#allocation59_spill] sm:$0xff] %v8348_v22  ;;  %v8350_v59 = vpack.c.bf16 %v1935_v45, %v1931_v11  ;;  %v1930_v47 = vld [vmem:[#allocation7 + $0x3d0] sm:$0xff] }
 0x510   :  { %5923 = vmatprep.subr.bf16.mxu0 %v8337_v42  ;;  %5987 = vmatprep.subr.bf16.mxu1 %v8339_v48  ;;  %v8357_v53 = vpack.c.bf16 %v1934_v13, %v1930_v47 }
 0x511   :  { %9891 = vst [vmem:[#allocation60_spill] sm:$0xff] %v8350_v59 }
 0x512   :  { %9893 = vst [vmem:[#allocation62_spill] sm:$0xff] %v8357_v53 }
 0x513   :  { %5925 = vmatpush1.bf16.msra.mxu0 %v8342_v25  ;;  %5989 = vmatpush1.bf16.msra.mxu1 %v8346_v9 }
 0x514   :  { %5927 = vmatprep.subr.bf16.mxu0 %v8348_v22  ;;  %5991 = vmatprep.subr.bf16.mxu1 %v8350_v59 }
 0x517   :  { %5929 = vmatpush1.bf16.msra.mxu0 %v8353_v21  ;;  %5993 = vmatpush1.bf16.msra.mxu1 %v8357_v53 }
 0x518   :  { %5995 = vmatprep.subr.bf16.mxu0 %v8046_v0  ;;  %6027 = vmatprep.subr.bf16.mxu1 %v8048_v10 }
 0x58d   :  { %v1473_v46 = vpop.f32.mrb[6].mxu0  ;;  %v1544_v51 = vpop.f32.mrb[14].mxu1 }
 0x58e   :  { %v1474_v62 = vadd.f32 %v1473_v46, %v8057_v28  ;;  %v1475_v55 = vpop.f32.mrb[7].mxu0  ;;  %v1546_v11 = vpop.f32.mrb[15].mxu1  ;;  %v1545_v53 = vadd.f32 %v1544_v51, %v8072_v27 }
 0x58f   :  { %v1476_v45 = vadd.f32 %v1475_v55, %v8061_v37  ;;  %v1547_v13 = vadd.f32 %v1546_v11, %v8067_v6 }
 0x590   :  { %v5237_v47 = vmul.f32 -1.442695, %v1474_v62 }
 0x591   :  { %v5238_v26 = vmul.f32 -1.442695, %v1476_v45  ;;  %v5239_v21 = vmul.f32 -1.442695, %v1547_v13 }
 0x592   :  { %7053 = vpow2.f32 %v5237_v47 }
 0x593   :  { %7055 = vpow2.f32 %v5238_v26 }
 0x594   :  { %7057 = vpow2.f32 %v5239_v21 }
 0x595   :  { %7059 = vtanh.f32 %v1545_v53 }
 0x59c   :  { %v7054_v0 = vpop.eup %7053 }
 0x59d   :  { %v7056_v59 = vpop.eup %7055  ;;  %v1552_v10 = vadd.f32 1.0, %v7054_v0 }
 0x59e   :  { %v1558_v22 = vadd.f32 1.0, %v7056_v59  ;;  %v7058_v46 = vpop.eup %7057 }
 0x59f   :  { %7061 = vrcp.f32 %v1552_v10  ;;  %v7060_v28 = vpop.eup %7059  ;;  %v1565_v47 = vadd.f32 1.0, %v7058_v46 }
 0x5a0   :  { %7063 = vrcp.f32 %v1558_v22 }
 0x5a1   :  { %7065 = vrcp.f32 %v1565_v47 }
 0x5a9   :  { %v7062_v55 = vpop.eup %7061 }
 0x5aa   :  { %v7064_v62 = vpop.eup %7063  ;;  %v1569_v45 = vmul.f32 %v7062_v55, %v7060_v28 }
 0x5ab   :  { %v1568_v26 = vmul.f32 %v7064_v62, %v8075_v50  ;;  %v7066_v50 = vpop.eup %7065 }
 0x5ad   :  { %v1704_v11 = vpop.f32.mrb[8].mxu0  ;;  %v1775_v13 = vpop.f32.mrb[16].mxu1  ;;  %v8369_v6 = vadd.f32 %v1569_v45, %v1568_v26 }
 0x5ae   :  { %v1780_v51 = vadd.f32 %v1704_v11, %v9844_v60  ;;  %v1706_v21 = vpop.f32.mrb[9].mxu0  ;;  %v1777_v53 = vpop.f32.mrb[17].mxu1  ;;  %v1782_v55 = vadd.f32 %v1775_v13, %v7917_v23 }
 0x5af   :  { %v1781_v59 = vadd.f32 %v1706_v21, %v9845_v58  ;;  %7067 = vtanh.f32 %v8369_v6  ;;  %v1783_v28 = vadd.f32 %v1777_v53, %v7919_v44 }
 0x5b0   :  { %v5240_v22 = vmul.f32 -1.442695, %v1780_v51 }
 0x5b1   :  { %v5241_v0 = vmul.f32 -1.442695, %v1781_v59  ;;  %v5242_v46 = vmul.f32 -1.442695, %v1783_v28 }
 0x5b2   :  { %7069 = vpow2.f32 %v5240_v22 }
 0x5b3   :  { %7071 = vpow2.f32 %v5241_v0 }
 0x5b4   :  { %7073 = vpow2.f32 %v5242_v46 }
 0x5b5   :  { %7075 = vtanh.f32 %v1782_v55  ;;  %v2136_v55 = vld [vmem:[#allocation5 + $0x108] sm:$0xff] }
 0x5b9   :  { %v7068_v10 = vpop.eup %7067 }
 0x5ba   :  { %v8376_v62 = vmul.f32 %v7068_v10, %v7066_v50 }
 0x5bc   :  { %9894 = vst [vmem:[#allocation63_spill] sm:$0xff] %v8376_v62  ;;  %v7070_v45 = vpop.eup %7069  ;;  %2000 = vmatprep.mubr.f32.mxu0 %v8376_v62  ;;  %2071 = vmatprep.mubr.f32.mxu1 %v8376_v62 }
 0x5bd   :  { %v7072_v47 = vpop.eup %7071  ;;  %v1787_v26 = vadd.f32 1.0, %v7070_v45 }
 0x5be   :  { %v1793_v11 = vadd.f32 1.0, %v7072_v47  ;;  %v7074_v51 = vpop.eup %7073  ;;  %v2156_v47 = vld [vmem:[#allocation5 + $0x1a8] sm:$0xff] }
 0x5bf   :  { %7077 = vrcp.f32 %v1787_v26  ;;  %v7076_v21 = vpop.eup %7075  ;;  %v1800_v13 = vadd.f32 1.0, %v7074_v51  ;;  %v2160_v51 = vld [vmem:[#allocation5 + $0x1c8] sm:$0xff] }
 0x5c0   :  { %7079 = vrcp.f32 %v1793_v11  ;;  %v2151_v11 = vld [vmem:[#allocation5 + $0x180] sm:$0xff] }
 0x5c1   :  { %7081 = vrcp.f32 %v1800_v13  ;;  %v9913_v13 = vld [vmem:[#allocation34_spill] sm:$0xff] }
 0x5c9   :  { %v7078_v53 = vpop.eup %7077 }
 0x5ca   :  { %v7080_v59 = vpop.eup %7079  ;;  %v1804_v22 = vmul.f32 %v7078_v53, %v7076_v21  ;;  %v2164_v21 = vld [vmem:[#allocation5 + $0x1e8] sm:$0xff] }
 0x5cb   :  { %v1803_v0 = vmul.f32 %v7080_v59, %v8087_v63  ;;  %v7082_v50 = vpop.eup %7081  ;;  %v2127_v63 = vld [vmem:[#allocation5 + $0xc0] sm:$0xff] }
 0x5cc   :  { %v2159_v59 = vld [vmem:[#allocation5 + $0x1c0] sm:$0xff] }
 0x5cd   :  { %v8381_v28 = vadd.f32 %v1804_v22, %v1803_v0  ;;  %v9914_v0 = vld [vmem:[#allocation35_spill] sm:$0xff] }
 0x5cf   :  { %7083 = vtanh.f32 %v8381_v28 }
 0x5d9   :  { %v7084_v10 = vpop.eup %7083 }
 0x5da   :  { %v8384_v46 = vmul.f32 %v7084_v10, %v7082_v50  ;;  %v9915_v50 = vld [vmem:[#allocation36_spill] sm:$0xff]  ;;  %v9916_v10 = vld [vmem:[#allocation37_spill] sm:$0xff] }
 0x5dc   :  { %2001 = vmatmul.mubr.f32.vlgmr.msra.gmra.mrb[10].mxu0 %v8384_v46  ;;  %2072 = vmatmul.mubr.f32.vlgmr.msra.gmra.mrb[18].mxu1 %v8384_v46 }
 0x5dd   :  { %5997 = vmatpush1.bf16.msra.mxu0 %v8090_v5  ;;  %6029 = vmatpush1.bf16.msra.mxu1 %v8092_v16  ;;  %v2131_v5 = vld [vmem:[#allocation5 + $0xe0] sm:$0xff]  ;;  %v2140_v16 = vld [vmem:[#allocation5 + $0x128] sm:$0xff] }
 0x5de   :  { %5999 = vmatprep.subr.bf16.mxu0 %v8096_v41  ;;  %6031 = vmatprep.subr.bf16.mxu1 %v8098_v3  ;;  %v8400_v41 = vpack.c.bf16 %v2131_v5, %v2127_v63  ;;  %v8404_v3 = vpack.c.bf16 %v2140_v16, %v2136_v55  ;;  %v9918_v63 = vld [vmem:[#allocation39_spill] sm:$0xff]  ;;  %v9919_v5 = vld [vmem:[#allocation40_spill] sm:$0xff]  ;;  %v9920_v55 = vld [vmem:[#allocation41_spill] sm:$0xff] }
 0x5df   :  { %2231 = vmatprep.mubr.f32.mxu0 %v9797_v4  ;;  %2302 = vmatprep.mubr.f32.mxu1 %v9797_v4  ;;  %v9921_v16 = vld [vmem:[#allocation42_spill] sm:$0xff] }
 0x5e1   :  { %6001 = vmatpush1.bf16.msra.mxu0 %v8104_v35  ;;  %6033 = vmatpush1.bf16.msra.mxu1 %v8106_v1  ;;  %v2135_v35 = vld [vmem:[#allocation5 + $0x100] sm:$0xff] }
 0x5e2   :  { %6003 = vmatprep.subr.bf16.mxu0 %v8110_v7  ;;  %6035 = vmatprep.subr.bf16.mxu1 %v8112_v8  ;;  %v2139_v1 = vld [vmem:[#allocation5 + $0x120] sm:$0xff]  ;;  %v2144_v7 = vld [vmem:[#allocation5 + $0x148] sm:$0xff] }
 0x5e3   :  { %v2148_v8 = vld [vmem:[#allocation5 + $0x168] sm:$0xff]  ;;  %v8408_v45 = vpack.c.bf16 %v2139_v1, %v2135_v35  ;;  %v9922_v35 = vld [vmem:[#allocation43_spill] sm:$0xff]  ;;  %v9923_v1 = vld [vmem:[#allocation44_spill] sm:$0xff] }
 0x5e5   :  { %6005 = vmatpush1.bf16.msra.mxu0 %v8118_v39  ;;  %6037 = vmatpush1.bf16.msra.mxu1 %v8120_v43  ;;  %v8412_v39 = vpack.c.bf16 %v2148_v8, %v2144_v7  ;;  %v2143_v43 = vld [vmem:[#allocation5 + $0x140] sm:$0xff]  ;;  %v9925_v8 = vld [vmem:[#allocation46_spill] sm:$0xff] }
 0x5e6   :  { %6007 = vmatprep.subr.bf16.mxu0 %v8124_v49  ;;  %6039 = vmatprep.subr.bf16.mxu1 %v8126_v52  ;;  %v2147_v49 = vld [vmem:[#allocation5 + $0x160] sm:$0xff]  ;;  %v2152_v52 = vld [vmem:[#allocation5 + $0x188] sm:$0xff] }
 0x5e7   :  { %v8416_v26 = vpack.c.bf16 %v2147_v49, %v2143_v43  ;;  %v9924_v7 = vld [vmem:[#allocation45_spill] sm:$0xff]  ;;  %v9926_v43 = vld [vmem:[#allocation47_spill] sm:$0xff]  ;;  %v9927_v49 = vld [vmem:[#allocation48_spill] sm:$0xff] }
 0x5e9   :  { %6009 = vmatpush1.bf16.msra.mxu0 %v8400_v41  ;;  %6041 = vmatpush1.bf16.msra.mxu1 %v8130_v19  ;;  %v8420_v19 = vpack.c.bf16 %v2156_v47, %v2152_v52  ;;  %v9928_v52 = vld [vmem:[#allocation49_spill] sm:$0xff]  ;;  %v9929_v47 = vld [vmem:[#allocation50_spill] sm:$0xff] }
 0x5ea   :  { %6011 = vmatprep.subr.bf16.mxu0 %v8404_v3  ;;  %6043 = vmatprep.subr.bf16.mxu1 %v8134_v31  ;;  %v2155_v31 = vld [vmem:[#allocation5 + $0x1a0] sm:$0xff] }
 0x5eb   :  { %v8424_v53 = vpack.c.bf16 %v2155_v31, %v2151_v11  ;;  %v9930_v11 = vld [vmem:[#allocation51_spill] sm:$0xff]  ;;  %v9931_v31 = vld [vmem:[#allocation52_spill] sm:$0xff] }
 0x5ed   :  { %6013 = vmatpush1.bf16.msra.mxu0 %v8408_v45  ;;  %6045 = vmatpush1.bf16.msra.mxu1 %v8138_v61  ;;  %v8428_v61 = vpack.c.bf16 %v2164_v21, %v2160_v51  ;;  %v9932_v51 = vld [vmem:[#allocation53_spill] sm:$0xff]  ;;  %v9933_v21 = vld [vmem:[#allocation55_spill] sm:$0xff] }
 0x5ee   :  { %6015 = vmatprep.subr.bf16.mxu0 %v8412_v39  ;;  %6047 = vmatprep.subr.bf16.mxu1 %v8142_v34  ;;  %v2163_v34 = vld [vmem:[#allocation5 + $0x1e0] sm:$0xff] }
 0x5ef   :  { %v8432_v22 = vpack.c.bf16 %v2163_v34, %v2159_v59  ;;  %v9934_v59 = vld [vmem:[#allocation54_spill] sm:$0xff]  ;;  %v9935_v34 = vld [vmem:[#allocation56_spill] sm:$0xff] }
 0x5f1   :  { %6017 = vmatpush1.bf16.msra.mxu0 %v8416_v26  ;;  %6049 = vmatpush1.bf16.msra.mxu1 %v8146_v24  ;;  %v9895_v24 = vld [vmem:[#allocation16_spill] sm:$0xff] }
 0x5f2   :  { %6019 = vmatprep.subr.bf16.mxu0 %v8420_v19  ;;  %6051 = vmatprep.subr.bf16.mxu1 %v8150_v29  ;;  %v9896_v29 = vld [vmem:[#allocation17_spill] sm:$0xff] }
 0x5f5   :  { %6021 = vmatpush1.bf16.msra.mxu0 %v8424_v53  ;;  %6053 = vmatpush1.bf16.msra.mxu1 %v8154_v2  ;;  %v9897_v2 = vld [vmem:[#allocation18_spill] sm:$0xff] }
 0x5f6   :  { %6023 = vmatprep.subr.bf16.mxu0 %v8428_v61  ;;  %6055 = vmatprep.subr.bf16.mxu1 %v8158_v18  ;;  %v9898_v18 = vld [vmem:[#allocation19_spill] sm:$0xff] }
 0x5f9   :  { %6025 = vmatpush1.bf16.msra.mxu0 %v8432_v22  ;;  %6057 = vmatpush1.bf16.msra.mxu1 %v8162_v33  ;;  %v9899_v33 = vld [vmem:[#allocation20_spill] sm:$0xff] }
 0x5fa   :  { %6059 = vmatprep.subr.bf16.mxu0 %v8170_v15  ;;  %6123 = vmatprep.subr.bf16.mxu1 %v8172_v30  ;;  %v9900_v15 = vld [vmem:[#allocation21_spill] sm:$0xff]  ;;  %v9901_v30 = vld [vmem:[#allocation22_spill] sm:$0xff] }
 0x5fc   :  { %2232 = vmatmul.mubr.f32.vlgmr.msra.gmra.mrb[12].mxu0 %v8384_v46  ;;  %2303 = vmatmul.mubr.f32.vlgmr.msra.gmra.mrb[20].mxu1 %v8384_v46  ;;  %v9917_v46 = vld [vmem:[#allocation38_spill] sm:$0xff] }
 0x5fd   :  { %6061 = vmatpush1.bf16.msra.mxu0 %v8174_v20  ;;  %6125 = vmatpush1.bf16.msra.mxu1 %v8177_v57  ;;  %v9902_v20 = vld [vmem:[#allocation23_spill] sm:$0xff]  ;;  %v9903_v57 = vld [vmem:[#allocation24_spill] sm:$0xff] }
 0x5fe   :  { %6063 = vmatprep.subr.bf16.mxu0 %v8182_v36  ;;  %6127 = vmatprep.subr.bf16.mxu1 %v8184_v40  ;;  %v9904_v36 = vld [vmem:[#allocation25_spill] sm:$0xff]  ;;  %v9905_v40 = vld [vmem:[#allocation26_spill] sm:$0xff] }
 0x601   :  { %6065 = vmatpush1.bf16.msra.mxu0 %v8186_v17  ;;  %6129 = vmatpush1.bf16.msra.mxu1 %v8189_v32  ;;  %v9906_v17 = vld [vmem:[#allocation27_spill] sm:$0xff]  ;;  %v9907_v32 = vld [vmem:[#allocation28_spill] sm:$0xff] }
 0x602   :  { %6067 = vmatprep.subr.bf16.mxu0 %v8194_v38  ;;  %6131 = vmatprep.subr.bf16.mxu1 %v8196_v14  ;;  %v9908_v38 = vld [vmem:[#allocation29_spill] sm:$0xff]  ;;  %v9909_v14 = vld [vmem:[#allocation30_spill] sm:$0xff] }
 0x605   :  { %6069 = vmatpush1.bf16.msra.mxu0 %v8198_v56  ;;  %6133 = vmatpush1.bf16.msra.mxu1 %v8201_v54  ;;  %v9910_v56 = vld [vmem:[#allocation31_spill] sm:$0xff]  ;;  %v9911_v54 = vld [vmem:[#allocation32_spill] sm:$0xff] }
 0x606   :  { %6071 = vmatprep.subr.bf16.mxu0 %v8206_v12  ;;  %6135 = vmatprep.subr.bf16.mxu1 %v9895_v24  ;;  %v9912_v12 = vld [vmem:[#allocation33_spill] sm:$0xff] }
 0x607   :  { %v9936_v24 = vld [vmem:[#allocation57_spill] sm:$0xff] }
 0x609   :  { %6073 = vmatpush1.bf16.msra.mxu0 %v9896_v29  ;;  %6137 = vmatpush1.bf16.msra.mxu1 %v9897_v2  ;;  %v9937_v29 = vld [vmem:[#allocation58_spill] sm:$0xff]  ;;  %v9938_v2 = vld [vmem:[#allocation59_spill] sm:$0xff] }
 0x60a   :  { %6075 = vmatprep.subr.bf16.mxu0 %v9898_v18  ;;  %6139 = vmatprep.subr.bf16.mxu1 %v9899_v33  ;;  %v9939_v18 = vld [vmem:[#allocation60_spill] sm:$0xff]  ;;  %v9940_v33 = vld [vmem:[#allocation61_spill] sm:$0xff] }
 0x60d   :  { %6077 = vmatpush1.bf16.msra.mxu0 %v9900_v15  ;;  %6141 = vmatpush1.bf16.msra.mxu1 %v9901_v30  ;;  %v9941_v15 = vld [vmem:[#allocation62_spill] sm:$0xff] }
 0x60e   :  { %6079 = vmatprep.subr.bf16.mxu0 %v9902_v20  ;;  %6143 = vmatprep.subr.bf16.mxu1 %v9903_v57  ;;  %v2633_v30 = vld [vmem:[#allocation5 + $0x8] sm:$0xff]  ;;  %v2635_v57 = vld [vmem:[#allocation5 + $0x18] sm:$0xff] }
 0x60f   :  { %v2637_v20 = vld [vmem:[#allocation5 + $0x28] sm:$0xff] }
 0x611   :  { %6081 = vmatpush1.bf16.msra.mxu0 %v9904_v36  ;;  %6145 = vmatpush1.bf16.msra.mxu1 %v9905_v40  ;;  %v8504_v36 = vpack.c.bf16 %v2637_v20, %v2633_v30 }
 0x612   :  { %6083 = vmatprep.subr.bf16.mxu0 %v9906_v17  ;;  %6147 = vmatprep.subr.bf16.mxu1 %v9907_v32 }
 0x615   :  { %6085 = vmatpush1.bf16.msra.mxu0 %v9908_v38  ;;  %6149 = vmatpush1.bf16.msra.mxu1 %v9909_v14 }
 0x616   :  { %6087 = vmatprep.subr.bf16.mxu0 %v9910_v56  ;;  %6151 = vmatprep.subr.bf16.mxu1 %v9911_v54 }
 0x619   :  { %6089 = vmatpush1.bf16.msra.mxu0 %v9912_v12  ;;  %6153 = vmatpush1.bf16.msra.mxu1 %v9913_v13  ;;  %v9943_v12 = vld [vmem:[#allocation14_spill] sm:$0xff] }
 0x61a   :  { %6091 = vmatprep.subr.bf16.mxu0 %v9914_v0  ;;  %6155 = vmatprep.subr.bf16.mxu1 %v9915_v50 }
 0x61d   :  { %6093 = vmatpush1.bf16.msra.mxu0 %v9916_v10  ;;  %6157 = vmatpush1.bf16.msra.mxu1 %v9917_v46 }
 0x61e   :  { %6095 = vmatprep.subr.bf16.mxu0 %v9918_v63  ;;  %6159 = vmatprep.subr.bf16.mxu1 %v9919_v5 }
 0x621   :  { %6097 = vmatpush1.bf16.msra.mxu0 %v9920_v55  ;;  %6161 = vmatpush1.bf16.msra.mxu1 %v9921_v16 }
 0x622   :  { %6099 = vmatprep.subr.bf16.mxu0 %v9922_v35  ;;  %6163 = vmatprep.subr.bf16.mxu1 %v9923_v1 }
 0x625   :  { %6101 = vmatpush1.bf16.msra.mxu0 %v9924_v7  ;;  %6165 = vmatpush1.bf16.msra.mxu1 %v9925_v8 }
 0x626   :  { %6103 = vmatprep.subr.bf16.mxu0 %v9926_v43  ;;  %6167 = vmatprep.subr.bf16.mxu1 %v9927_v49 }
 0x629   :  { %6105 = vmatpush1.bf16.msra.mxu0 %v9928_v52  ;;  %6169 = vmatpush1.bf16.msra.mxu1 %v9929_v47 }
 0x62a   :  { %6107 = vmatprep.subr.bf16.mxu0 %v9930_v11  ;;  %6171 = vmatprep.subr.bf16.mxu1 %v9931_v31 }
 0x62d   :  { %6109 = vmatpush1.bf16.msra.mxu0 %v9932_v51  ;;  %6173 = vmatpush1.bf16.msra.mxu1 %v9933_v21 }
 0x62e   :  { %6111 = vmatprep.subr.bf16.mxu0 %v9934_v59  ;;  %6175 = vmatprep.subr.bf16.mxu1 %v9935_v34 }
 0x631   :  { %6113 = vmatpush1.bf16.msra.mxu0 %v9936_v24  ;;  %6177 = vmatpush1.bf16.msra.mxu1 %v9937_v29 }
 0x632   :  { %6115 = vmatprep.subr.bf16.mxu0 %v8337_v42  ;;  %6179 = vmatprep.subr.bf16.mxu1 %v8339_v48  ;;  %v2639_v42 = vld [vmem:[#allocation5 + $0x38] sm:$0xff] }
 0x633   :  { %v8506_v40 = vpack.c.bf16 %v2639_v42, %v2635_v57 }
 0x635   :  { %6117 = vmatpush1.bf16.msra.mxu0 %v8342_v25  ;;  %6181 = vmatpush1.bf16.msra.mxu1 %v8346_v9  ;;  %v9942_v25 = vld [vmem:[#allocation13_spill] sm:$0xff] }
 0x636   :  { %6119 = vmatprep.subr.bf16.mxu0 %v9938_v2  ;;  %6183 = vmatprep.subr.bf16.mxu1 %v9939_v18 }
 0x639   :  { %6121 = vmatpush1.bf16.msra.mxu0 %v9940_v33  ;;  %6185 = vmatpush1.bf16.msra.mxu1 %v9941_v15 }
 0x63a   :  { %6187 = vmatprep.subr.bf16.mxu0 %v8504_v36  ;;  %6219 = vmatprep.subr.bf16.mxu1 %v8506_v40 }
 0x6af   :  { %v2002_v9 = vpop.f32.mrb[10].mxu0  ;;  %v2073_v48 = vpop.f32.mrb[18].mxu1 }
 0x6b0   :  { %v2003_v17 = vadd.f32 %v2002_v9, %v9942_v25  ;;  %v2004_v32 = vpop.f32.mrb[11].mxu0  ;;  %v2075_v38 = vpop.f32.mrb[19].mxu1  ;;  %v2074_v50 = vadd.f32 %v2073_v48, %v8072_v27 }
 0x6b1   :  { %v2005_v14 = vadd.f32 %v2004_v32, %v8061_v37  ;;  %v2076_v13 = vadd.f32 %v2075_v38, %v9943_v12 }
 0x6b2   :  { %v5243_v56 = vmul.f32 -1.442695, %v2003_v17 }
 0x6b3   :  { %v5244_v54 = vmul.f32 -1.442695, %v2005_v14  ;;  %v5245_v0 = vmul.f32 -1.442695, %v2076_v13  ;;  %v2636_v13 = vld [vmem:[#allocation5 + $0x20] sm:$0xff] }
 0x6b4   :  { %7085 = vpow2.f32 %v5243_v56 }
 0x6b5   :  { %7087 = vpow2.f32 %v5244_v54  ;;  %v2632_v54 = vld [vmem:[#allocation5] sm:$0xff] }
 0x6b6   :  { %7089 = vpow2.f32 %v5245_v0  ;;  %v2634_v0 = vld [vmem:[#allocation5 + $0x10] sm:$0xff] }
 0x6b7   :  { %7091 = vtanh.f32 %v2074_v50  ;;  %v2638_v50 = vld [vmem:[#allocation5 + $0x30] sm:$0xff] }
 0x6be   :  { %v7086_v10 = vpop.eup %7085 }
 0x6bf   :  { %v7088_v46 = vpop.eup %7087  ;;  %v2081_v63 = vadd.f32 1.0, %v7086_v10  ;;  %v2641_v10 = vld [vmem:[#allocation5 + $0x48] sm:$0xff] }
 0x6c0   :  { %v2087_v5 = vadd.f32 1.0, %v7088_v46  ;;  %v7090_v55 = vpop.eup %7089  ;;  %v2645_v46 = vld [vmem:[#allocation5 + $0x68] sm:$0xff] }
 0x6c1   :  { %7093 = vrcp.f32 %v2081_v63  ;;  %v7092_v16 = vpop.eup %7091  ;;  %v2094_v8 = vadd.f32 1.0, %v7090_v55  ;;  %v2643_v63 = vld [vmem:[#allocation5 + $0x58] sm:$0xff] }
 0x6c2   :  { %7095 = vrcp.f32 %v2087_v5  ;;  %v2647_v5 = vld [vmem:[#allocation5 + $0x78] sm:$0xff] }
 0x6c3   :  { %7097 = vrcp.f32 %v2094_v8 }
 0x6cb   :  { %v7094_v35 = vpop.eup %7093 }
 0x6cc   :  { %v7096_v1 = vpop.eup %7095  ;;  %v2098_v7 = vmul.f32 %v7094_v35, %v7092_v16  ;;  %v8530_v35 = vpack.c.bf16 %v2636_v13, %v2632_v54  ;;  %v2662_v54 = vld [vmem:[#allocation5 + $0xf0] sm:$0xff]  ;;  %v2667_v13 = vld [vmem:[#allocation5 + $0x118] sm:$0xff] }
 0x6cd   :  { %v2097_v43 = vmul.f32 %v7096_v1, %v8369_v6  ;;  %v7098_v6 = vpop.eup %7097  ;;  %v8532_v1 = vpack.c.bf16 %v2638_v50, %v2634_v0  ;;  %v2671_v0 = vld [vmem:[#allocation5 + $0x138] sm:$0xff] }
 0x6cf   :  { %v2233_v49 = vpop.f32.mrb[12].mxu0  ;;  %v2304_v52 = vpop.f32.mrb[20].mxu1  ;;  %v8515_v47 = vadd.f32 %v2098_v7, %v2097_v43  ;;  %v2644_v7 = vld [vmem:[#allocation5 + $0x60] sm:$0xff]  ;;  %v8536_v43 = vpack.c.bf16 %v2645_v46, %v2641_v10  ;;  %v8574_v10 = vpack.c.bf16 %v2671_v0, %v2667_v13  ;;  %v2666_v46 = vld [vmem:[#allocation5 + $0x110] sm:$0xff]  ;;  %v2879_v0 = vld [vmem:[#allocation7 + $0x68] sm:$0xff] }
 0x6d0   :  { %v2309_v11 = vadd.f32 %v2233_v49, %v9844_v60  ;;  %v2235_v31 = vpop.f32.mrb[13].mxu0  ;;  %v2306_v51 = vpop.f32.mrb[21].mxu1  ;;  %v2311_v18 = vadd.f32 %v2304_v52, %v7917_v23  ;;  %v8538_v49 = vpack.c.bf16 %v2647_v5, %v2643_v63  ;;  %v2642_v52 = vld [vmem:[#allocation5 + $0x50] sm:$0xff]  ;;  %v2675_v5 = vld [vmem:[#allocation5 + $0x158] sm:$0xff] }
 0x6d1   :  { %v2310_v21 = vadd.f32 %v2235_v31, %v9845_v58  ;;  %7099 = vtanh.f32 %v8515_v47  ;;  %v2312_v24 = vadd.f32 %v2306_v51, %v7919_v44  ;;  %v2649_v31 = vld [vmem:[#allocation5 + $0x88] sm:$0xff]  ;;  %v2670_v63 = vld [vmem:[#allocation5 + $0x130] sm:$0xff] }
 0x6d2   :  { %v5246_v59 = vmul.f32 -1.442695, %v2309_v11  ;;  %v2646_v11 = vld [vmem:[#allocation5 + $0x70] sm:$0xff]  ;;  %v2653_v51 = vld [vmem:[#allocation5 + $0xa8] sm:$0xff] }
 0x6d3   :  { %v5247_v34 = vmul.f32 -1.442695, %v2310_v21  ;;  %v5248_v2 = vmul.f32 -1.442695, %v2312_v24  ;;  %v2651_v21 = vld [vmem:[#allocation5 + $0x98] sm:$0xff]  ;;  %v8546_v24 = vpack.c.bf16 %v2646_v11, %v2642_v52  ;;  %v2678_v52 = vld [vmem:[#allocation5 + $0x170] sm:$0xff] }
 0x6d4   :  { %7101 = vpow2.f32 %v5246_v59  ;;  %v2655_v59 = vld [vmem:[#allocation5 + $0xb8] sm:$0xff] }
 0x6d5   :  { %7103 = vpow2.f32 %v5247_v34  ;;  %v2683_v11 = vld [vmem:[#allocation5 + $0x198] sm:$0xff] }
 0x6d6   :  { %7105 = vpow2.f32 %v5248_v2  ;;  %v8550_v2 = vpack.c.bf16 %v2653_v51, %v2649_v31  ;;  %v2687_v31 = vld [vmem:[#allocation5 + $0x1b8] sm:$0xff] }
 0x6d7   :  { %7107 = vtanh.f32 %v2311_v18  ;;  %v8552_v18 = vpack.c.bf16 %v2655_v59, %v2651_v21  ;;  %v2686_v21 = vld [vmem:[#allocation5 + $0x1b0] sm:$0xff]  ;;  %v2691_v59 = vld [vmem:[#allocation5 + $0x1d8] sm:$0xff] }
 0x6db   :  { %v7100_v29 = vpop.eup %7099 }
 0x6dc   :  { %v8522_v33 = vmul.f32 %v7100_v29, %v7098_v6  ;;  %v2648_v6 = vld [vmem:[#allocation5 + $0x80] sm:$0xff] }
 0x6dd   :  { %v2652_v29 = vld [vmem:[#allocation5 + $0xa0] sm:$0xff] }
 0x6de   :  { %9944 = vst [vmem:[#allocation16_spill] sm:$0xff] %v8522_v33  ;;  %v7102_v15 = vpop.eup %7101  ;;  %2529 = vmatprep.mubr.f32.mxu0 %v8522_v33  ;;  %2600 = vmatprep.mubr.f32.mxu1 %v8522_v33  ;;  %v2909_v33 = vld [vmem:[#allocation7 + $0x158] sm:$0xff] }
 0x6df   :  { %v7104_v30 = vpop.eup %7103  ;;  %v2316_v20 = vadd.f32 1.0, %v7102_v15  ;;  %v2650_v15 = vld [vmem:[#allocation5 + $0x90] sm:$0xff] }
 0x6e0   :  { %v2322_v57 = vadd.f32 1.0, %v7104_v30  ;;  %v7106_v42 = vpop.eup %7105  ;;  %v2654_v30 = vld [vmem:[#allocation5 + $0xb0] sm:$0xff] }
 0x6e1   :  { %7109 = vrcp.f32 %v2316_v20  ;;  %v7108_v9 = vpop.eup %7107  ;;  %v2329_v38 = vadd.f32 1.0, %v7106_v42  ;;  %v2657_v20 = vld [vmem:[#allocation5 + $0xc8] sm:$0xff]  ;;  %v2659_v42 = vld [vmem:[#allocation5 + $0xd8] sm:$0xff] }
 0x6e2   :  { %7111 = vrcp.f32 %v2322_v57  ;;  %v2661_v57 = vld [vmem:[#allocation5 + $0xe8] sm:$0xff] }
 0x6e3   :  { %7113 = vrcp.f32 %v2329_v38 }
 0x6eb   :  { %v7110_v48 = vpop.eup %7109 }
 0x6ec   :  { %v7112_v17 = vpop.eup %7111  ;;  %v2333_v32 = vmul.f32 %v7110_v48, %v7108_v9  ;;  %v2663_v9 = vld [vmem:[#allocation5 + $0xf8] sm:$0xff]  ;;  %v8558_v48 = vpack.c.bf16 %v2652_v29, %v2648_v6 }
 0x6ed   :  { %v2332_v14 = vmul.f32 %v7112_v17, %v8381_v28  ;;  %v7114_v55 = vpop.eup %7113  ;;  %v2640_v28 = vld [vmem:[#allocation5 + $0x40] sm:$0xff]  ;;  %v8560_v17 = vpack.c.bf16 %v2654_v30, %v2650_v15  ;;  %v8566_v38 = vpack.c.bf16 %v2663_v9, %v2659_v42  ;;  %v2695_v6 = vld [vmem:[#allocation5 + $0x1f8] sm:$0xff]  ;;  %v2694_v15 = vld [vmem:[#allocation5 + $0x1f0] sm:$0xff] }
 0x6ee   :  { %v8544_v34 = vpack.c.bf16 %v2644_v7, %v2640_v28  ;;  %v2674_v7 = vld [vmem:[#allocation5 + $0x150] sm:$0xff]  ;;  %v2866_v42 = vld [vmem:[#allocation7] sm:$0xff] }
 0x6ef   :  { %v8527_v56 = vadd.f32 %v2333_v32, %v2332_v14  ;;  %v8564_v32 = vpack.c.bf16 %v2661_v57, %v2657_v20  ;;  %v2658_v14 = vld [vmem:[#allocation5 + $0xd0] sm:$0xff]  ;;  %v8586_v51 = vpack.c.bf16 %v2678_v52, %v2674_v7  ;;  %v2869_v20 = vld [vmem:[#allocation7 + $0x18] sm:$0xff]  ;;  %v2870_v9 = vld [vmem:[#allocation7 + $0x20] sm:$0xff] }
 0x6f0   :  { %v8570_v50 = vpack.c.bf16 %v2662_v54, %v2658_v14  ;;  %v2873_v57 = vld [vmem:[#allocation7 + $0x38] sm:$0xff]  ;;  %v2868_v54 = vld [vmem:[#allocation7 + $0x10] sm:$0xff]  ;;  %v2878_v7 = vld [vmem:[#allocation7 + $0x60] sm:$0xff] }
 0x6f1   :  { %7115 = vtanh.f32 %v8527_v56  ;;  %v8612_v14 = vpack.c.bf16 %v2873_v57, %v2869_v20  ;;  %v2886_v20 = vld [vmem:[#allocation7 + $0xa0] sm:$0xff] }
 0x6fb   :  { %v7116_v16 = vpop.eup %7115 }
 0x6fc   :  { %v8534_v8 = vmul.f32 %v7116_v16, %v7114_v55  ;;  %v2679_v55 = vld [vmem:[#allocation5 + $0x178] sm:$0xff]  ;;  %v8578_v16 = vpack.c.bf16 %v2670_v63, %v2666_v46 }
 0x6fd   :  { %v8582_v28 = vpack.c.bf16 %v2679_v55, %v2675_v5  ;;  %v2877_v46 = vld [vmem:[#allocation7 + $0x58] sm:$0xff]  ;;  %v2874_v55 = vld [vmem:[#allocation7 + $0x40] sm:$0xff] }
 0x6fe   :  { %2530 = vmatmul.mubr.f32.vlgmr.msra.gmra.mrb[14].mxu0 %v8534_v8  ;;  %2601 = vmatmul.mubr.f32.vlgmr.msra.gmra.mrb[22].mxu1 %v8534_v8  ;;  %v2881_v5 = vld [vmem:[#allocation7 + $0x78] sm:$0xff] }
 0x6ff   :  { %6189 = vmatpush1.bf16.msra.mxu0 %v8530_v35  ;;  %6221 = vmatpush1.bf16.msra.mxu1 %v8532_v1  ;;  %v8624_v52 = vpack.c.bf16 %v2881_v5, %v2877_v46  ;;  %v2893_v46 = vld [vmem:[#allocation7 + $0xd8] sm:$0xff] }
 0x700   :  { %6191 = vmatprep.subr.bf16.mxu0 %v8536_v43  ;;  %6223 = vmatprep.subr.bf16.mxu1 %v8538_v49 }
 0x701   :  { %2760 = vmatprep.mubr.f32.mxu0 %v9797_v4  ;;  %2831 = vmatprep.mubr.f32.mxu1 %v9797_v4 }
 0x703   :  { %6193 = vmatpush1.bf16.msra.mxu0 %v8544_v34  ;;  %6225 = vmatpush1.bf16.msra.mxu1 %v8546_v24 }
 0x704   :  { %6195 = vmatprep.subr.bf16.mxu0 %v8550_v2  ;;  %6227 = vmatprep.subr.bf16.mxu1 %v8552_v18 }
 0x707   :  { %6197 = vmatpush1.bf16.msra.mxu0 %v8558_v48  ;;  %6229 = vmatpush1.bf16.msra.mxu1 %v8560_v17 }
 0x708   :  { %6199 = vmatprep.subr.bf16.mxu0 %v8564_v32  ;;  %6231 = vmatprep.subr.bf16.mxu1 %v8566_v38 }
 0x70b   :  { %6201 = vmatpush1.bf16.msra.mxu0 %v8400_v41  ;;  %6233 = vmatpush1.bf16.msra.mxu1 %v8570_v50  ;;  %v8590_v41 = vpack.c.bf16 %v2687_v31, %v2683_v11  ;;  %v8626_v11 = vpack.c.bf16 %v2878_v7, %v2874_v55  ;;  %v2876_v31 = vld [vmem:[#allocation7 + $0x50] sm:$0xff]  ;;  %v2897_v55 = vld [vmem:[#allocation7 + $0xf8] sm:$0xff]  ;;  %v2890_v7 = vld [vmem:[#allocation7 + $0xc0] sm:$0xff] }
 0x70c   :  { %6203 = vmatprep.subr.bf16.mxu0 %v8404_v3  ;;  %6235 = vmatprep.subr.bf16.mxu1 %v8574_v10  ;;  %v2682_v3 = vld [vmem:[#allocation5 + $0x190] sm:$0xff] }
 0x70d   :  { %v8594_v29 = vpack.c.bf16 %v2686_v21, %v2682_v3  ;;  %v2880_v3 = vld [vmem:[#allocation7 + $0x70] sm:$0xff] }
 0x70e   :  { %v8629_v21 = vpack.c.bf16 %v2880_v3, %v2876_v31  ;;  %v2894_v31 = vld [vmem:[#allocation7 + $0xe0] sm:$0xff]  ;;  %v8648_v3 = vpack.c.bf16 %v2897_v55, %v2893_v46 }
 0x70f   :  { %6205 = vmatpush1.bf16.msra.mxu0 %v8408_v45  ;;  %6237 = vmatpush1.bf16.msra.mxu1 %v8578_v16  ;;  %v8598_v45 = vpack.c.bf16 %v2695_v6, %v2691_v59  ;;  %v2883_v59 = vld [vmem:[#allocation7 + $0x88] sm:$0xff]  ;;  %v2902_v46 = vld [vmem:[#allocation7 + $0x120] sm:$0xff] }
 0x710   :  { %6207 = vmatprep.subr.bf16.mxu0 %v8412_v39  ;;  %6239 = vmatprep.subr.bf16.mxu1 %v8582_v28  ;;  %v2690_v39 = vld [vmem:[#allocation5 + $0x1d0] sm:$0xff]  ;;  %v2887_v6 = vld [vmem:[#allocation7 + $0xa8] sm:$0xff]  ;;  %9945 = vst [vmem:[#allocation17_spill] sm:$0xff] %v8648_v3 }
 0x711   :  { %v8602_v30 = vpack.c.bf16 %v2694_v15, %v2690_v39  ;;  %v2885_v39 = vld [vmem:[#allocation7 + $0x98] sm:$0xff]  ;;  %v8634_v15 = vpack.c.bf16 %v2887_v6, %v2883_v59  ;;  %v8650_v59 = vpack.c.bf16 %v2894_v31, %v2890_v7  ;;  %v2892_v6 = vld [vmem:[#allocation7 + $0xd0] sm:$0xff] }
 0x712   :  { %v2900_v31 = vld [vmem:[#allocation7 + $0x110] sm:$0xff] }
 0x713   :  { %6209 = vmatpush1.bf16.msra.mxu0 %v8416_v26  ;;  %6241 = vmatpush1.bf16.msra.mxu1 %v8586_v51  ;;  %v2867_v26 = vld [vmem:[#allocation7 + $0x8] sm:$0xff]  ;;  %9946 = vst [vmem:[#allocation18_spill] sm:$0xff] %v8650_v59 }
 0x714   :  { %6211 = vmatprep.subr.bf16.mxu0 %v8420_v19  ;;  %6243 = vmatprep.subr.bf16.mxu1 %v8590_v41  ;;  %v2871_v19 = vld [vmem:[#allocation7 + $0x28] sm:$0xff] }
 0x717   :  { %6213 = vmatpush1.bf16.msra.mxu0 %v8424_v53  ;;  %6245 = vmatpush1.bf16.msra.mxu1 %v8594_v29  ;;  %v8610_v53 = vpack.c.bf16 %v2871_v19, %v2867_v26  ;;  %v2889_v26 = vld [vmem:[#allocation7 + $0xb8] sm:$0xff]  ;;  %v2882_v19 = vld [vmem:[#allocation7 + $0x80] sm:$0xff] }
 0x718   :  { %6215 = vmatprep.subr.bf16.mxu0 %v8428_v61  ;;  %6247 = vmatprep.subr.bf16.mxu1 %v8598_v45  ;;  %v8614_v61 = vpack.c.bf16 %v2870_v9, %v2866_v42  ;;  %v8636_v57 = vpack.c.bf16 %v2889_v26, %v2885_v39  ;;  %v8638_v42 = vpack.c.bf16 %v2886_v20, %v2882_v19  ;;  %v2884_v9 = vld [vmem:[#allocation7 + $0x90] sm:$0xff]  ;;  %v2899_v19 = vld [vmem:[#allocation7 + $0x108] sm:$0xff] }
 0x719   :  { %v2896_v39 = vld [vmem:[#allocation7 + $0xf0] sm:$0xff]  ;;  %v2903_v20 = vld [vmem:[#allocation7 + $0x128] sm:$0xff] }
 0x71a   :  { %v8653_v26 = vpack.c.bf16 %v2896_v39, %v2892_v6  ;;  %v2904_v6 = vld [vmem:[#allocation7 + $0x130] sm:$0xff] }
 0x71b   :  { %6217 = vmatpush1.bf16.msra.mxu0 %v8432_v22  ;;  %6249 = vmatpush1.bf16.msra.mxu1 %v8602_v30  ;;  %v2872_v22 = vld [vmem:[#allocation7 + $0x30] sm:$0xff]  ;;  %v8665_v39 = vpack.c.bf16 %v2904_v6, %v2900_v31 }
 0x71c   :  { %6251 = vmatprep.subr.bf16.mxu0 %v8610_v53  ;;  %v8617_v13 = vpack.c.bf16 %v2872_v22, %v2868_v54  ;;  %6315 = vmatprep.subr.bf16.mxu1 %v8612_v14  ;;  %v2888_v54 = vld [vmem:[#allocation7 + $0xb0] sm:$0xff]  ;;  %9947 = vst [vmem:[#allocation19_spill] sm:$0xff] %v8653_v26 }
 0x71d   :  { %v8641_v22 = vpack.c.bf16 %v2888_v54, %v2884_v9  ;;  %v2901_v9 = vld [vmem:[#allocation7 + $0x118] sm:$0xff]  ;;  %v8658_v54 = vpack.c.bf16 %v2903_v20, %v2899_v19  ;;  %9951 = vst [vmem:[#allocation23_spill] sm:$0xff] %v8665_v39  ;;  %v2907_v19 = vld [vmem:[#allocation7 + $0x148] sm:$0xff]  ;;  %v2908_v31 = vld [vmem:[#allocation7 + $0x150] sm:$0xff] }
 0x71e   :  { %2761 = vmatmul.mubr.f32.vlgmr.msra.gmra.mrb[16].mxu0 %v8534_v8  ;;  %2832 = vmatmul.mubr.f32.vlgmr.msra.gmra.mrb[24].mxu1 %v8534_v8  ;;  %v2875_v8 = vld [vmem:[#allocation7 + $0x48] sm:$0xff]  ;;  %v2912_v6 = vld [vmem:[#allocation7 + $0x170] sm:$0xff] }
 0x71f   :  { %6253 = vmatpush1.bf16.msra.mxu0 %v8614_v61  ;;  %6317 = vmatpush1.bf16.msra.mxu1 %v8617_v13  ;;  %v8622_v63 = vpack.c.bf16 %v2879_v0, %v2875_v8  ;;  %v2891_v8 = vld [vmem:[#allocation7 + $0xc8] sm:$0xff]  ;;  %9948 = vst [vmem:[#allocation20_spill] sm:$0xff] %v8658_v54 }
 0x720   :  { %6319 = vmatprep.subr.bf16.mxu1 %v8624_v52  ;;  %v2895_v0 = vld [vmem:[#allocation7 + $0xe8] sm:$0xff] }
 0x721   :  { %6255 = vmatprep.subr.bf16.mxu0 %v8622_v63  ;;  %v8646_v5 = vpack.c.bf16 %v2895_v0, %v2891_v8  ;;  %v2905_v8 = vld [vmem:[#allocation7 + $0x138] sm:$0xff]  ;;  %v2898_v0 = vld [vmem:[#allocation7 + $0x100] sm:$0xff]  ;;  %v2911_v20 = vld [vmem:[#allocation7 + $0x168] sm:$0xff] }
 0x722   :  { %v8660_v55 = vpack.c.bf16 %v2905_v8, %v2901_v9  ;;  %v8662_v7 = vpack.c.bf16 %v2902_v46, %v2898_v0  ;;  %v8670_v62 = vpack.c.bf16 %v2911_v20, %v2907_v19  ;;  %v2913_v9 = vld [vmem:[#allocation7 + $0x178] sm:$0xff]  ;;  %v2906_v8 = vld [vmem:[#allocation7 + $0x140] sm:$0xff]  ;;  %v2919_v19 = vld [vmem:[#allocation7 + $0x1a8] sm:$0xff] }
 0x723   :  { %6257 = vmatpush1.bf16.msra.mxu0 %v8626_v11  ;;  %6321 = vmatpush1.bf16.msra.mxu1 %v8629_v21  ;;  %v2910_v0 = vld [vmem:[#allocation7 + $0x160] sm:$0xff]  ;;  %v8672_v46 = vpack.c.bf16 %v2913_v9, %v2909_v33  ;;  %v2917_v20 = vld [vmem:[#allocation7 + $0x198] sm:$0xff] }
 0x724   :  { %6259 = vmatprep.subr.bf16.mxu0 %v8634_v15  ;;  %6323 = vmatprep.subr.bf16.mxu1 %v8636_v57  ;;  %9949 = vst [vmem:[#allocation21_spill] sm:$0xff] %v8660_v55  ;;  %9950 = vst [vmem:[#allocation22_spill] sm:$0xff] %v8662_v7  ;;  %v2921_v33 = vld [vmem:[#allocation7 + $0x1b8] sm:$0xff]  ;;  %v2914_v9 = vld [vmem:[#allocation7 + $0x180] sm:$0xff] }
 0x725   :  { %9952 = vst [vmem:[#allocation24_spill] sm:$0xff] %v8670_v62  ;;  %9953 = vst [vmem:[#allocation25_spill] sm:$0xff] %v8672_v46 }
 0x727   :  { %6261 = vmatpush1.bf16.msra.mxu0 %v8638_v42  ;;  %6325 = vmatpush1.bf16.msra.mxu1 %v8641_v22 }
 0x728   :  { %6263 = vmatprep.subr.bf16.mxu0 %v8646_v5  ;;  %6327 = vmatprep.subr.bf16.mxu1 %v8648_v3  ;;  %v2985_v3 = vld [vmem:[#allocation7 + $0x3b8] sm:$0xff] }
 0x72b   :  { %6265 = vmatpush1.bf16.msra.mxu0 %v8650_v59  ;;  %6329 = vmatpush1.bf16.msra.mxu1 %v8653_v26  ;;  %v8674_v26 = vpack.c.bf16 %v2910_v0, %v2906_v8  ;;  %v2918_v8 = vld [vmem:[#allocation7 + $0x1a0] sm:$0xff]  ;;  %v8684_v0 = vpack.c.bf16 %v2921_v33, %v2917_v20  ;;  %v2929_v20 = vld [vmem:[#allocation7 + $0x1f8] sm:$0xff] }
 0x72c   :  { %6267 = vmatprep.subr.bf16.mxu0 %v8658_v54  ;;  %6331 = vmatprep.subr.bf16.mxu1 %v8660_v55  ;;  %v8677_v55 = vpack.c.bf16 %v2912_v6, %v2908_v31  ;;  %v8686_v54 = vpack.c.bf16 %v2918_v8, %v2914_v9  ;;  %v2916_v31 = vld [vmem:[#allocation7 + $0x190] sm:$0xff]  ;;  %v2922_v33 = vld [vmem:[#allocation7 + $0x1c0] sm:$0xff]  ;;  %v2981_v59 = vld [vmem:[#allocation7 + $0x398] sm:$0xff] }
 0x72d   :  { %9954 = vst [vmem:[#allocation26_spill] sm:$0xff] %v8674_v26  ;;  %9957 = vst [vmem:[#allocation29_spill] sm:$0xff] %v8684_v0  ;;  %v2920_v6 = vld [vmem:[#allocation7 + $0x1b0] sm:$0xff]  ;;  %v2926_v9 = vld [vmem:[#allocation7 + $0x1e0] sm:$0xff] }
 0x72e   :  { %9955 = vst [vmem:[#allocation27_spill] sm:$0xff] %v8677_v55  ;;  %9958 = vst [vmem:[#allocation30_spill] sm:$0xff] %v8686_v54 }
 0x72f   :  { %6269 = vmatpush1.bf16.msra.mxu0 %v8662_v7  ;;  %6333 = vmatpush1.bf16.msra.mxu1 %v8665_v39  ;;  %v2915_v39 = vld [vmem:[#allocation7 + $0x188] sm:$0xff] }
 0x730   :  { %6271 = vmatprep.subr.bf16.mxu0 %v8670_v62  ;;  %6335 = vmatprep.subr.bf16.mxu1 %v8672_v46  ;;  %v8682_v7 = vpack.c.bf16 %v2919_v19, %v2915_v39  ;;  %v8689_v46 = vpack.c.bf16 %v2920_v6, %v2916_v31  ;;  %v2927_v39 = vld [vmem:[#allocation7 + $0x1e8] sm:$0xff]  ;;  %v2925_v19 = vld [vmem:[#allocation7 + $0x1d8] sm:$0xff]  ;;  %v8698_v62 = vpack.c.bf16 %v2926_v9, %v2922_v33  ;;  %v2924_v31 = vld [vmem:[#allocation7 + $0x1d0] sm:$0xff] }
 0x731   :  { %v8696_v8 = vpack.c.bf16 %v2929_v20, %v2925_v19  ;;  %v2928_v6 = vld [vmem:[#allocation7 + $0x1f0] sm:$0xff]  ;;  %v2937_v19 = vld [vmem:[#allocation7 + $0x238] sm:$0xff]  ;;  %v2930_v20 = vld [vmem:[#allocation7 + $0x200] sm:$0xff] }
 0x732   :  { %9956 = vst [vmem:[#allocation28_spill] sm:$0xff] %v8682_v7  ;;  %9959 = vst [vmem:[#allocation31_spill] sm:$0xff] %v8689_v46  ;;  %v2934_v33 = vld [vmem:[#allocation7 + $0x220] sm:$0xff] }
 0x733   :  { %6273 = vmatpush1.bf16.msra.mxu0 %v8674_v26  ;;  %6337 = vmatpush1.bf16.msra.mxu1 %v8677_v55  ;;  %v2923_v55 = vld [vmem:[#allocation7 + $0x1c8] sm:$0xff]  ;;  %9961 = vst [vmem:[#allocation33_spill] sm:$0xff] %v8696_v8  ;;  %9962 = vst [vmem:[#allocation34_spill] sm:$0xff] %v8698_v62 }
 0x734   :  { %6275 = vmatprep.subr.bf16.mxu0 %v8682_v7  ;;  %6339 = vmatprep.subr.bf16.mxu1 %v8684_v0  ;;  %v8694_v26 = vpack.c.bf16 %v2927_v39, %v2923_v55  ;;  %v8701_v0 = vpack.c.bf16 %v2928_v6, %v2924_v31  ;;  %v2935_v55 = vld [vmem:[#allocation7 + $0x228] sm:$0xff]  ;;  %v2933_v39 = vld [vmem:[#allocation7 + $0x218] sm:$0xff]  ;;  %v8710_v7 = vpack.c.bf16 %v2934_v33, %v2930_v20  ;;  %v2932_v31 = vld [vmem:[#allocation7 + $0x210] sm:$0xff] }
 0x735   :  { %v8708_v9 = vpack.c.bf16 %v2937_v19, %v2933_v39  ;;  %v2936_v6 = vld [vmem:[#allocation7 + $0x230] sm:$0xff]  ;;  %v2945_v39 = vld [vmem:[#allocation7 + $0x278] sm:$0xff]  ;;  %v2938_v19 = vld [vmem:[#allocation7 + $0x240] sm:$0xff] }
 0x736   :  { %9960 = vst [vmem:[#allocation32_spill] sm:$0xff] %v8694_v26  ;;  %9963 = vst [vmem:[#allocation35_spill] sm:$0xff] %v8701_v0  ;;  %v2942_v20 = vld [vmem:[#allocation7 + $0x260] sm:$0xff] }
 0x737   :  { %6277 = vmatpush1.bf16.msra.mxu0 %v8686_v54  ;;  %6341 = vmatpush1.bf16.msra.mxu1 %v8689_v46  ;;  %v2931_v46 = vld [vmem:[#allocation7 + $0x208] sm:$0xff]  ;;  %9965 = vst [vmem:[#allocation37_spill] sm:$0xff] %v8708_v9  ;;  %9966 = vst [vmem:[#allocation38_spill] sm:$0xff] %v8710_v7 }
 0x738   :  { %6279 = vmatprep.subr.bf16.mxu0 %v8694_v26  ;;  %6343 = vmatprep.subr.bf16.mxu1 %v8696_v8  ;;  %v8706_v54 = vpack.c.bf16 %v2935_v55, %v2931_v46  ;;  %v8713_v8 = vpack.c.bf16 %v2936_v6, %v2932_v31  ;;  %v2943_v46 = vld [vmem:[#allocation7 + $0x268] sm:$0xff]  ;;  %v2941_v55 = vld [vmem:[#allocation7 + $0x258] sm:$0xff]  ;;  %v8722_v26 = vpack.c.bf16 %v2942_v20, %v2938_v19  ;;  %v2940_v31 = vld [vmem:[#allocation7 + $0x250] sm:$0xff] }
 0x739   :  { %v8720_v33 = vpack.c.bf16 %v2945_v39, %v2941_v55  ;;  %v2944_v6 = vld [vmem:[#allocation7 + $0x270] sm:$0xff]  ;;  %v2953_v55 = vld [vmem:[#allocation7 + $0x2b8] sm:$0xff]  ;;  %v2946_v39 = vld [vmem:[#allocation7 + $0x280] sm:$0xff] }
 0x73a   :  { %9964 = vst [vmem:[#allocation36_spill] sm:$0xff] %v8706_v54  ;;  %9967 = vst [vmem:[#allocation39_spill] sm:$0xff] %v8713_v8  ;;  %v2950_v19 = vld [vmem:[#allocation7 + $0x2a0] sm:$0xff] }
 0x73b   :  { %6281 = vmatpush1.bf16.msra.mxu0 %v8698_v62  ;;  %6345 = vmatpush1.bf16.msra.mxu1 %v8701_v0  ;;  %v2939_v0 = vld [vmem:[#allocation7 + $0x248] sm:$0xff]  ;;  %9969 = vst [vmem:[#allocation41_spill] sm:$0xff] %v8720_v33  ;;  %9970 = vst [vmem:[#allocation42_spill] sm:$0xff] %v8722_v26 }
 0x73c   :  { %6283 = vmatprep.subr.bf16.mxu0 %v8706_v54  ;;  %6347 = vmatprep.subr.bf16.mxu1 %v8708_v9  ;;  %v8718_v62 = vpack.c.bf16 %v2943_v46, %v2939_v0  ;;  %v8725_v9 = vpack.c.bf16 %v2944_v6, %v2940_v31  ;;  %v2951_v0 = vld [vmem:[#allocation7 + $0x2a8] sm:$0xff]  ;;  %v2949_v46 = vld [vmem:[#allocation7 + $0x298] sm:$0xff]  ;;  %v8734_v54 = vpack.c.bf16 %v2950_v19, %v2946_v39  ;;  %v2948_v31 = vld [vmem:[#allocation7 + $0x290] sm:$0xff] }
 0x73d   :  { %v8732_v20 = vpack.c.bf16 %v2953_v55, %v2949_v46  ;;  %v2952_v6 = vld [vmem:[#allocation7 + $0x2b0] sm:$0xff]  ;;  %v2961_v46 = vld [vmem:[#allocation7 + $0x2f8] sm:$0xff]  ;;  %v2954_v55 = vld [vmem:[#allocation7 + $0x2c0] sm:$0xff] }
 0x73e   :  { %9968 = vst [vmem:[#allocation40_spill] sm:$0xff] %v8718_v62  ;;  %9971 = vst [vmem:[#allocation43_spill] sm:$0xff] %v8725_v9  ;;  %v2958_v39 = vld [vmem:[#allocation7 + $0x2e0] sm:$0xff] }
 0x73f   :  { %6285 = vmatpush1.bf16.msra.mxu0 %v8710_v7  ;;  %6349 = vmatpush1.bf16.msra.mxu1 %v8713_v8  ;;  %v2947_v8 = vld [vmem:[#allocation7 + $0x288] sm:$0xff]  ;;  %9973 = vst [vmem:[#allocation45_spill] sm:$0xff] %v8732_v20  ;;  %9974 = vst [vmem:[#allocation46_spill] sm:$0xff] %v8734_v54 }
 0x740   :  { %6287 = vmatprep.subr.bf16.mxu0 %v8718_v62  ;;  %6351 = vmatprep.subr.bf16.mxu1 %v8720_v33  ;;  %v8730_v7 = vpack.c.bf16 %v2951_v0, %v2947_v8  ;;  %v8737_v33 = vpack.c.bf16 %v2952_v6, %v2948_v31  ;;  %v2959_v8 = vld [vmem:[#allocation7 + $0x2e8] sm:$0xff]  ;;  %v2957_v0 = vld [vmem:[#allocation7 + $0x2d8] sm:$0xff]  ;;  %v8746_v62 = vpack.c.bf16 %v2958_v39, %v2954_v55  ;;  %v2956_v31 = vld [vmem:[#allocation7 + $0x2d0] sm:$0xff] }
 0x741   :  { %v8744_v19 = vpack.c.bf16 %v2961_v46, %v2957_v0  ;;  %v2960_v6 = vld [vmem:[#allocation7 + $0x2f0] sm:$0xff]  ;;  %v2969_v0 = vld [vmem:[#allocation7 + $0x338] sm:$0xff]  ;;  %v2962_v46 = vld [vmem:[#allocation7 + $0x300] sm:$0xff] }
 0x742   :  { %9972 = vst [vmem:[#allocation44_spill] sm:$0xff] %v8730_v7  ;;  %9975 = vst [vmem:[#allocation47_spill] sm:$0xff] %v8737_v33  ;;  %v2966_v55 = vld [vmem:[#allocation7 + $0x320] sm:$0xff] }
 0x743   :  { %6289 = vmatpush1.bf16.msra.mxu0 %v8722_v26  ;;  %6353 = vmatpush1.bf16.msra.mxu1 %v8725_v9  ;;  %v2955_v9 = vld [vmem:[#allocation7 + $0x2c8] sm:$0xff]  ;;  %9977 = vst [vmem:[#allocation49_spill] sm:$0xff] %v8744_v19  ;;  %9978 = vst [vmem:[#allocation50_spill] sm:$0xff] %v8746_v62 }
 0x744   :  { %6291 = vmatprep.subr.bf16.mxu0 %v8730_v7  ;;  %6355 = vmatprep.subr.bf16.mxu1 %v8732_v20  ;;  %v8742_v26 = vpack.c.bf16 %v2959_v8, %v2955_v9  ;;  %v8749_v20 = vpack.c.bf16 %v2960_v6, %v2956_v31  ;;  %v2967_v9 = vld [vmem:[#allocation7 + $0x328] sm:$0xff]  ;;  %v2965_v8 = vld [vmem:[#allocation7 + $0x318] sm:$0xff]  ;;  %v8758_v7 = vpack.c.bf16 %v2966_v55, %v2962_v46  ;;  %v2964_v31 = vld [vmem:[#allocation7 + $0x310] sm:$0xff] }
 0x745   :  { %v8756_v39 = vpack.c.bf16 %v2969_v0, %v2965_v8  ;;  %v2968_v6 = vld [vmem:[#allocation7 + $0x330] sm:$0xff]  ;;  %v2977_v8 = vld [vmem:[#allocation7 + $0x378] sm:$0xff]  ;;  %v2970_v0 = vld [vmem:[#allocation7 + $0x340] sm:$0xff] }
 0x746   :  { %9976 = vst [vmem:[#allocation48_spill] sm:$0xff] %v8742_v26  ;;  %9979 = vst [vmem:[#allocation51_spill] sm:$0xff] %v8749_v20  ;;  %v2974_v46 = vld [vmem:[#allocation7 + $0x360] sm:$0xff] }
 0x747   :  { %6293 = vmatpush1.bf16.msra.mxu0 %v8734_v54  ;;  %6357 = vmatpush1.bf16.msra.mxu1 %v8737_v33  ;;  %v2963_v33 = vld [vmem:[#allocation7 + $0x308] sm:$0xff]  ;;  %9981 = vst [vmem:[#allocation53_spill] sm:$0xff] %v8756_v39  ;;  %9982 = vst [vmem:[#allocation55_spill] sm:$0xff] %v8758_v7 }
 0x748   :  { %6295 = vmatprep.subr.bf16.mxu0 %v8742_v26  ;;  %6359 = vmatprep.subr.bf16.mxu1 %v8744_v19  ;;  %v8754_v54 = vpack.c.bf16 %v2967_v9, %v2963_v33  ;;  %v8761_v19 = vpack.c.bf16 %v2968_v6, %v2964_v31  ;;  %v2975_v33 = vld [vmem:[#allocation7 + $0x368] sm:$0xff]  ;;  %v2973_v9 = vld [vmem:[#allocation7 + $0x358] sm:$0xff]  ;;  %v8770_v26 = vpack.c.bf16 %v2974_v46, %v2970_v0  ;;  %v2972_v31 = vld [vmem:[#allocation7 + $0x350] sm:$0xff] }
 0x749   :  { %v8768_v55 = vpack.c.bf16 %v2977_v8, %v2973_v9  ;;  %v2976_v6 = vld [vmem:[#allocation7 + $0x370] sm:$0xff]  ;;  %v2978_v9 = vld [vmem:[#allocation7 + $0x380] sm:$0xff] }
 0x74a   :  { %9980 = vst [vmem:[#allocation52_spill] sm:$0xff] %v8754_v54  ;;  %9983 = vst [vmem:[#allocation54_spill] sm:$0xff] %v8761_v19  ;;  %v2982_v8 = vld [vmem:[#allocation7 + $0x3a0] sm:$0xff]  ;;  %v2980_v0 = vld [vmem:[#allocation7 + $0x390] sm:$0xff] }
 0x74b   :  { %6297 = vmatpush1.bf16.msra.mxu0 %v8746_v62  ;;  %6361 = vmatpush1.bf16.msra.mxu1 %v8749_v20  ;;  %v2971_v20 = vld [vmem:[#allocation7 + $0x348] sm:$0xff]  ;;  %9985 = vst [vmem:[#allocation57_spill] sm:$0xff] %v8768_v55  ;;  %9986 = vst [vmem:[#allocation58_spill] sm:$0xff] %v8770_v26  ;;  %v8782_v46 = vpack.c.bf16 %v2982_v8, %v2978_v9  ;;  %v2992_v9 = vld [vmem:[#allocation7 + $0x3f0] sm:$0xff] }
 0x74c   :  { %6299 = vmatprep.subr.bf16.mxu0 %v8754_v54  ;;  %6363 = vmatprep.subr.bf16.mxu1 %v8756_v39  ;;  %v8766_v62 = vpack.c.bf16 %v2975_v33, %v2971_v20  ;;  %v2979_v54 = vld [vmem:[#allocation7 + $0x388] sm:$0xff]  ;;  %v8779_v33 = vpack.c.bf16 %v2985_v3, %v2981_v59  ;;  %v2989_v3 = vld [vmem:[#allocation7 + $0x3d8] sm:$0xff] }
 0x74d   :  { %v2983_v39 = vld [vmem:[#allocation7 + $0x3a8] sm:$0xff]  ;;  %v2993_v59 = vld [vmem:[#allocation7 + $0x3f8] sm:$0xff] }
 0x74e   :  { %9984 = vst [vmem:[#allocation56_spill] sm:$0xff] %v8766_v62  ;;  %v8777_v20 = vpack.c.bf16 %v2983_v39, %v2979_v54  ;;  %v2986_v39 = vld [vmem:[#allocation7 + $0x3c0] sm:$0xff] }
 0x74f   :  { %6301 = vmatpush1.bf16.msra.mxu0 %v8758_v7  ;;  %6365 = vmatpush1.bf16.msra.mxu1 %v8761_v19  ;;  %v8773_v7 = vpack.c.bf16 %v2976_v6, %v2972_v31  ;;  %v2984_v31 = vld [vmem:[#allocation7 + $0x3b0] sm:$0xff]  ;;  %v2987_v6 = vld [vmem:[#allocation7 + $0x3c8] sm:$0xff]  ;;  %v2990_v19 = vld [vmem:[#allocation7 + $0x3e0] sm:$0xff] }
 0x750   :  { %6303 = vmatprep.subr.bf16.mxu0 %v8766_v62  ;;  %6367 = vmatprep.subr.bf16.mxu1 %v8768_v55  ;;  %v2991_v62 = vld [vmem:[#allocation7 + $0x3e8] sm:$0xff]  ;;  %v8786_v55 = vpack.c.bf16 %v2984_v31, %v2980_v0  ;;  %v8793_v8 = vpack.c.bf16 %v2990_v19, %v2986_v39 }
 0x751   :  { %9987 = vst [vmem:[#allocation59_spill] sm:$0xff] %v8773_v7  ;;  %v8788_v54 = vpack.c.bf16 %v2991_v62, %v2987_v6 }
 0x752   :  { %9990 = vst [vmem:[#allocation62_spill] sm:$0xff] %v8793_v8 }
 0x753   :  { %6305 = vmatpush1.bf16.msra.mxu0 %v8770_v26  ;;  %6369 = vmatpush1.bf16.msra.mxu1 %v8773_v7  ;;  %9988 = vst [vmem:[#allocation60_spill] sm:$0xff] %v8788_v54  ;;  %v8790_v26 = vpack.c.bf16 %v2993_v59, %v2989_v3  ;;  %v2988_v7 = vld [vmem:[#allocation7 + $0x3d0] sm:$0xff] }
 0x754   :  { %6307 = vmatprep.subr.bf16.mxu0 %v8777_v20  ;;  %6371 = vmatprep.subr.bf16.mxu1 %v8779_v33  ;;  %v8797_v0 = vpack.c.bf16 %v2992_v9, %v2988_v7 }
 0x755   :  { %9989 = vst [vmem:[#allocation61_spill] sm:$0xff] %v8790_v26 }
 0x756   :  { %9991 = vst [vmem:[#allocation64_spill] sm:$0xff] %v8797_v0 }
 0x757   :  { %6309 = vmatpush1.bf16.msra.mxu0 %v8782_v46  ;;  %6373 = vmatpush1.bf16.msra.mxu1 %v8786_v55 }
 0x758   :  { %6311 = vmatprep.subr.bf16.mxu0 %v8788_v54  ;;  %6375 = vmatprep.subr.bf16.mxu1 %v8790_v26 }
 0x75b   :  { %6313 = vmatpush1.bf16.msra.mxu0 %v8793_v8  ;;  %6377 = vmatpush1.bf16.msra.mxu1 %v8797_v0 }
 0x75c   :  { %6379 = vmatprep.subr.bf16.mxu0 %v8504_v36  ;;  %6411 = vmatprep.subr.bf16.mxu1 %v8506_v40 }
 0x7d1   :  { %v2531_v62 = vpop.f32.mrb[14].mxu0  ;;  %v2602_v31 = vpop.f32.mrb[22].mxu1 }
 0x7d2   :  { %v2532_v19 = vadd.f32 %v2531_v62, %v9942_v25  ;;  %v2533_v6 = vpop.f32.mrb[15].mxu0  ;;  %v2604_v3 = vpop.f32.mrb[23].mxu1  ;;  %v2603_v0 = vadd.f32 %v2602_v31, %v8072_v27 }
 0x7d3   :  { %v2534_v59 = vadd.f32 %v2533_v6, %v8061_v37  ;;  %v2605_v9 = vadd.f32 %v2604_v3, %v9943_v12 }
 0x7d4   :  { %v5249_v7 = vmul.f32 -1.442695, %v2532_v19 }
 0x7d5   :  { %v5250_v39 = vmul.f32 -1.442695, %v2534_v59  ;;  %v5251_v8 = vmul.f32 -1.442695, %v2605_v9 }
 0x7d6   :  { %7117 = vpow2.f32 %v5249_v7 }
 0x7d7   :  { %7119 = vpow2.f32 %v5250_v39 }
 0x7d8   :  { %7121 = vpow2.f32 %v5251_v8 }
 0x7d9   :  { %7123 = vtanh.f32 %v2603_v0 }
 0x7e0   :  { %v7118_v36 = vpop.eup %7117 }
 0x7e1   :  { %v7120_v26 = vpop.eup %7119  ;;  %v2610_v40 = vadd.f32 1.0, %v7118_v36 }
 0x7e2   :  { %v2616_v54 = vadd.f32 1.0, %v7120_v26  ;;  %v7122_v62 = vpop.eup %7121 }
 0x7e3   :  { %7125 = vrcp.f32 %v2610_v40  ;;  %v7124_v25 = vpop.eup %7123  ;;  %v2623_v7 = vadd.f32 1.0, %v7122_v62 }
 0x7e4   :  { %7127 = vrcp.f32 %v2616_v54 }
 0x7e5   :  { %7129 = vrcp.f32 %v2623_v7 }
 0x7ed   :  { %v7126_v6 = vpop.eup %7125 }
 0x7ee   :  { %v7128_v19 = vpop.eup %7127  ;;  %v2627_v59 = vmul.f32 %v7126_v6, %v7124_v25 }
 0x7ef   :  { %v2626_v39 = vmul.f32 %v7128_v19, %v8515_v47  ;;  %v7130_v47 = vpop.eup %7129 }
 0x7f1   :  { %v2762_v3 = vpop.f32.mrb[16].mxu0  ;;  %v2833_v9 = vpop.f32.mrb[24].mxu1  ;;  %v8809_v12 = vadd.f32 %v2627_v59, %v2626_v39 }
 0x7f2   :  { %v2838_v31 = vadd.f32 %v2762_v3, %v9844_v60  ;;  %v2764_v8 = vpop.f32.mrb[17].mxu0  ;;  %v2835_v0 = vpop.f32.mrb[25].mxu1  ;;  %v2840_v6 = vadd.f32 %v2833_v9, %v7917_v23 }
 0x7f3   :  { %v2839_v26 = vadd.f32 %v2764_v8, %v9845_v58  ;;  %7131 = vtanh.f32 %v8809_v12  ;;  %v2841_v25 = vadd.f32 %v2835_v0, %v7919_v44 }
 0x7f4   :  { %v5252_v54 = vmul.f32 -1.442695, %v2838_v31 }
 0x7f5   :  { %v5253_v36 = vmul.f32 -1.442695, %v2839_v26  ;;  %v5254_v62 = vmul.f32 -1.442695, %v2841_v25 }
 0x7f6   :  { %7133 = vpow2.f32 %v5252_v54 }
 0x7f7   :  { %7135 = vpow2.f32 %v5253_v36 }
 0x7f8   :  { %7137 = vpow2.f32 %v5254_v62 }
 0x7f9   :  { %7139 = vtanh.f32 %v2840_v6  ;;  %v3194_v6 = vld [vmem:[#allocation5 + $0x108] sm:$0xff] }
 0x7fd   :  { %v7132_v40 = vpop.eup %7131 }
 0x7fe   :  { %v8816_v19 = vmul.f32 %v7132_v40, %v7130_v47 }
 0x800   :  { %9992 = vst [vmem:[#allocation65_spill] sm:$0xff] %v8816_v19  ;;  %v7134_v59 = vpop.eup %7133  ;;  %3058 = vmatprep.mubr.f32.mxu0 %v8816_v19  ;;  %3129 = vmatprep.mubr.f32.mxu1 %v8816_v19 }
 0x801   :  { %v7136_v7 = vpop.eup %7135  ;;  %v2845_v39 = vadd.f32 1.0, %v7134_v59 }
 0x802   :  { %v2851_v3 = vadd.f32 1.0, %v7136_v7  ;;  %v7138_v31 = vpop.eup %7137  ;;  %v3214_v7 = vld [vmem:[#allocation5 + $0x1a8] sm:$0xff] }
 0x803   :  { %7141 = vrcp.f32 %v2845_v39  ;;  %v7140_v8 = vpop.eup %7139  ;;  %v2858_v9 = vadd.f32 1.0, %v7138_v31  ;;  %v3218_v31 = vld [vmem:[#allocation5 + $0x1c8] sm:$0xff] }
 0x804   :  { %7143 = vrcp.f32 %v2851_v3  ;;  %v3209_v3 = vld [vmem:[#allocation5 + $0x180] sm:$0xff] }
 0x805   :  { %7145 = vrcp.f32 %v2858_v9  ;;  %v10011_v9 = vld [vmem:[#allocation35_spill] sm:$0xff] }
 0x80d   :  { %v7142_v0 = vpop.eup %7141 }
 0x80e   :  { %v7144_v26 = vpop.eup %7143  ;;  %v2862_v54 = vmul.f32 %v7142_v0, %v7140_v8  ;;  %v3222_v8 = vld [vmem:[#allocation5 + $0x1e8] sm:$0xff] }
 0x80f   :  { %v2861_v36 = vmul.f32 %v7144_v26, %v8527_v56  ;;  %v7146_v47 = vpop.eup %7145  ;;  %v3185_v56 = vld [vmem:[#allocation5 + $0xc0] sm:$0xff] }
 0x810   :  { %v3217_v26 = vld [vmem:[#allocation5 + $0x1c0] sm:$0xff] }
 0x811   :  { %v8821_v25 = vadd.f32 %v2862_v54, %v2861_v36  ;;  %v10012_v36 = vld [vmem:[#allocation36_spill] sm:$0xff] }
 0x813   :  { %7147 = vtanh.f32 %v8821_v25 }
 0x81d   :  { %v7148_v40 = vpop.eup %7147 }
 0x81e   :  { %v8824_v62 = vmul.f32 %v7148_v40, %v7146_v47  ;;  %v10013_v47 = vld [vmem:[#allocation37_spill] sm:$0xff]  ;;  %v10014_v40 = vld [vmem:[#allocation38_spill] sm:$0xff] }
 0x820   :  { %3059 = vmatmul.mubr.f32.vlgmr.msra.gmra.mrb[18].mxu0 %v8824_v62  ;;  %3130 = vmatmul.mubr.f32.vlgmr.msra.gmra.mrb[26].mxu1 %v8824_v62 }
 0x821   :  { %6381 = vmatpush1.bf16.msra.mxu0 %v8530_v35  ;;  %6413 = vmatpush1.bf16.msra.mxu1 %v8532_v1  ;;  %v3189_v35 = vld [vmem:[#allocation5 + $0xe0] sm:$0xff]  ;;  %v3198_v1 = vld [vmem:[#allocation5 + $0x128] sm:$0xff] }
 0x822   :  { %6383 = vmatprep.subr.bf16.mxu0 %v8536_v43  ;;  %6415 = vmatprep.subr.bf16.mxu1 %v8538_v49  ;;  %v8840_v43 = vpack.c.bf16 %v3189_v35, %v3185_v56  ;;  %v8844_v49 = vpack.c.bf16 %v3198_v1, %v3194_v6  ;;  %v10016_v56 = vld [vmem:[#allocation40_spill] sm:$0xff]  ;;  %v10017_v35 = vld [vmem:[#allocation41_spill] sm:$0xff]  ;;  %v10018_v6 = vld [vmem:[#allocation42_spill] sm:$0xff] }
 0x823   :  { %3289 = vmatprep.mubr.f32.mxu0 %v9797_v4  ;;  %3360 = vmatprep.mubr.f32.mxu1 %v9797_v4  ;;  %v10019_v1 = vld [vmem:[#allocation43_spill] sm:$0xff] }
 0x825   :  { %6385 = vmatpush1.bf16.msra.mxu0 %v8544_v34  ;;  %6417 = vmatpush1.bf16.msra.mxu1 %v8546_v24  ;;  %v3193_v34 = vld [vmem:[#allocation5 + $0x100] sm:$0xff] }
 0x826   :  { %6387 = vmatprep.subr.bf16.mxu0 %v8550_v2  ;;  %6419 = vmatprep.subr.bf16.mxu1 %v8552_v18  ;;  %v3197_v24 = vld [vmem:[#allocation5 + $0x120] sm:$0xff]  ;;  %v3202_v2 = vld [vmem:[#allocation5 + $0x148] sm:$0xff] }
 0x827   :  { %v3206_v18 = vld [vmem:[#allocation5 + $0x168] sm:$0xff]  ;;  %v8848_v59 = vpack.c.bf16 %v3197_v24, %v3193_v34  ;;  %v10020_v34 = vld [vmem:[#allocation44_spill] sm:$0xff]  ;;  %v10021_v24 = vld [vmem:[#allocation45_spill] sm:$0xff] }
 0x829   :  { %6389 = vmatpush1.bf16.msra.mxu0 %v8558_v48  ;;  %6421 = vmatpush1.bf16.msra.mxu1 %v8560_v17  ;;  %v8852_v48 = vpack.c.bf16 %v3206_v18, %v3202_v2  ;;  %v3201_v17 = vld [vmem:[#allocation5 + $0x140] sm:$0xff]  ;;  %v10022_v2 = vld [vmem:[#allocation46_spill] sm:$0xff]  ;;  %v10023_v18 = vld [vmem:[#allocation47_spill] sm:$0xff] }
 0x82a   :  { %6391 = vmatprep.subr.bf16.mxu0 %v8564_v32  ;;  %6423 = vmatprep.subr.bf16.mxu1 %v8566_v38  ;;  %v3205_v32 = vld [vmem:[#allocation5 + $0x160] sm:$0xff]  ;;  %v3210_v38 = vld [vmem:[#allocation5 + $0x188] sm:$0xff] }
 0x82b   :  { %v8856_v39 = vpack.c.bf16 %v3205_v32, %v3201_v17  ;;  %v10024_v17 = vld [vmem:[#allocation48_spill] sm:$0xff]  ;;  %v10025_v32 = vld [vmem:[#allocation49_spill] sm:$0xff] }
 0x82d   :  { %6393 = vmatpush1.bf16.msra.mxu0 %v8840_v43  ;;  %6425 = vmatpush1.bf16.msra.mxu1 %v8570_v50  ;;  %v8860_v50 = vpack.c.bf16 %v3214_v7, %v3210_v38  ;;  %v10026_v38 = vld [vmem:[#allocation50_spill] sm:$0xff]  ;;  %v10027_v7 = vld [vmem:[#allocation51_spill] sm:$0xff] }
 0x82e   :  { %6395 = vmatprep.subr.bf16.mxu0 %v8844_v49  ;;  %6427 = vmatprep.subr.bf16.mxu1 %v8574_v10  ;;  %v3213_v10 = vld [vmem:[#allocation5 + $0x1a0] sm:$0xff] }
 0x82f   :  { %v8864_v0 = vpack.c.bf16 %v3213_v10, %v3209_v3  ;;  %v10028_v3 = vld [vmem:[#allocation52_spill] sm:$0xff]  ;;  %v10029_v10 = vld [vmem:[#allocation53_spill] sm:$0xff] }
 0x831   :  { %6397 = vmatpush1.bf16.msra.mxu0 %v8848_v59  ;;  %6429 = vmatpush1.bf16.msra.mxu1 %v8578_v16  ;;  %v8868_v16 = vpack.c.bf16 %v3222_v8, %v3218_v31  ;;  %v10030_v31 = vld [vmem:[#allocation55_spill] sm:$0xff]  ;;  %v10031_v8 = vld [vmem:[#allocation54_spill] sm:$0xff] }
 0x832   :  { %6399 = vmatprep.subr.bf16.mxu0 %v8852_v48  ;;  %6431 = vmatprep.subr.bf16.mxu1 %v8582_v28  ;;  %v3221_v28 = vld [vmem:[#allocation5 + $0x1e0] sm:$0xff] }
 0x833   :  { %v8872_v54 = vpack.c.bf16 %v3221_v28, %v3217_v26  ;;  %v10032_v26 = vld [vmem:[#allocation56_spill] sm:$0xff]  ;;  %v10033_v28 = vld [vmem:[#allocation57_spill] sm:$0xff] }
 0x835   :  { %6401 = vmatpush1.bf16.msra.mxu0 %v8856_v39  ;;  %6433 = vmatpush1.bf16.msra.mxu1 %v8586_v51  ;;  %v9993_v51 = vld [vmem:[#allocation17_spill] sm:$0xff] }
 0x836   :  { %6403 = vmatprep.subr.bf16.mxu0 %v8860_v50  ;;  %6435 = vmatprep.subr.bf16.mxu1 %v8590_v41  ;;  %v9994_v41 = vld [vmem:[#allocation18_spill] sm:$0xff] }
 0x839   :  { %6405 = vmatpush1.bf16.msra.mxu0 %v8864_v0  ;;  %6437 = vmatpush1.bf16.msra.mxu1 %v8594_v29  ;;  %v9995_v29 = vld [vmem:[#allocation19_spill] sm:$0xff] }
 0x83a   :  { %6407 = vmatprep.subr.bf16.mxu0 %v8868_v16  ;;  %6439 = vmatprep.subr.bf16.mxu1 %v8598_v45  ;;  %v9996_v45 = vld [vmem:[#allocation20_spill] sm:$0xff] }
 0x83d   :  { %6409 = vmatpush1.bf16.msra.mxu0 %v8872_v54  ;;  %6441 = vmatpush1.bf16.msra.mxu1 %v8602_v30  ;;  %v9997_v30 = vld [vmem:[#allocation21_spill] sm:$0xff] }
 0x83e   :  { %6443 = vmatprep.subr.bf16.mxu0 %v8610_v53  ;;  %6507 = vmatprep.subr.bf16.mxu1 %v8612_v14  ;;  %v9998_v53 = vld [vmem:[#allocation22_spill] sm:$0xff]  ;;  %v9999_v14 = vld [vmem:[#allocation23_spill] sm:$0xff] }
 0x840   :  { %3290 = vmatmul.mubr.f32.vlgmr.msra.gmra.mrb[20].mxu0 %v8824_v62  ;;  %3361 = vmatmul.mubr.f32.vlgmr.msra.gmra.mrb[28].mxu1 %v8824_v62  ;;  %v10015_v62 = vld [vmem:[#allocation39_spill] sm:$0xff] }
 0x841   :  { %6445 = vmatpush1.bf16.msra.mxu0 %v8614_v61  ;;  %6509 = vmatpush1.bf16.msra.mxu1 %v8617_v13  ;;  %v10000_v61 = vld [vmem:[#allocation24_spill] sm:$0xff]  ;;  %v10001_v13 = vld [vmem:[#allocation25_spill] sm:$0xff] }
 0x842   :  { %6447 = vmatprep.subr.bf16.mxu0 %v8622_v63  ;;  %6511 = vmatprep.subr.bf16.mxu1 %v8624_v52  ;;  %v10002_v63 = vld [vmem:[#allocation26_spill] sm:$0xff]  ;;  %v10003_v52 = vld [vmem:[#allocation27_spill] sm:$0xff] }
 0x845   :  { %6449 = vmatpush1.bf16.msra.mxu0 %v8626_v11  ;;  %6513 = vmatpush1.bf16.msra.mxu1 %v8629_v21  ;;  %v10004_v11 = vld [vmem:[#allocation28_spill] sm:$0xff]  ;;  %v10005_v21 = vld [vmem:[#allocation29_spill] sm:$0xff] }
 0x846   :  { %6451 = vmatprep.subr.bf16.mxu0 %v8634_v15  ;;  %6515 = vmatprep.subr.bf16.mxu1 %v8636_v57  ;;  %v10006_v15 = vld [vmem:[#allocation30_spill] sm:$0xff]  ;;  %v10007_v57 = vld [vmem:[#allocation31_spill] sm:$0xff] }
 0x849   :  { %6453 = vmatpush1.bf16.msra.mxu0 %v8638_v42  ;;  %6517 = vmatpush1.bf16.msra.mxu1 %v8641_v22  ;;  %v10008_v42 = vld [vmem:[#allocation32_spill] sm:$0xff]  ;;  %v10009_v22 = vld [vmem:[#allocation33_spill] sm:$0xff] }
 0x84a   :  { %6455 = vmatprep.subr.bf16.mxu0 %v8646_v5  ;;  %6519 = vmatprep.subr.bf16.mxu1 %v9993_v51  ;;  %v10010_v5 = vld [vmem:[#allocation34_spill] sm:$0xff] }
 0x84b   :  { %v10034_v51 = vld [vmem:[#allocation58_spill] sm:$0xff] }
 0x84d   :  { %6457 = vmatpush1.bf16.msra.mxu0 %v9994_v41  ;;  %6521 = vmatpush1.bf16.msra.mxu1 %v9995_v29  ;;  %v10035_v41 = vld [vmem:[#allocation59_spill] sm:$0xff]  ;;  %v10036_v29 = vld [vmem:[#allocation60_spill] sm:$0xff] }
 0x84e   :  { %6459 = vmatprep.subr.bf16.mxu0 %v9996_v45  ;;  %6523 = vmatprep.subr.bf16.mxu1 %v9997_v30  ;;  %v10037_v45 = vld [vmem:[#allocation61_spill] sm:$0xff]  ;;  %v10038_v30 = vld [vmem:[#allocation62_spill] sm:$0xff] }
 0x851   :  { %6461 = vmatpush1.bf16.msra.mxu0 %v9998_v53  ;;  %6525 = vmatpush1.bf16.msra.mxu1 %v9999_v14  ;;  %v10039_v53 = vld [vmem:[#allocation64_spill] sm:$0xff]  ;;  %v3691_v14 = vld [vmem:[#allocation5 + $0x8] sm:$0xff] }
 0x852   :  { %6463 = vmatprep.subr.bf16.mxu0 %v10000_v61  ;;  %6527 = vmatprep.subr.bf16.mxu1 %v10001_v13  ;;  %v3695_v61 = vld [vmem:[#allocation5 + $0x28] sm:$0xff]  ;;  %v3693_v13 = vld [vmem:[#allocation5 + $0x18] sm:$0xff] }
 0x855   :  { %6465 = vmatpush1.bf16.msra.mxu0 %v10002_v63  ;;  %6529 = vmatpush1.bf16.msra.mxu1 %v10003_v52  ;;  %v8944_v63 = vpack.c.bf16 %v3695_v61, %v3691_v14 }
 0x856   :  { %6467 = vmatprep.subr.bf16.mxu0 %v10004_v11  ;;  %6531 = vmatprep.subr.bf16.mxu1 %v10005_v21 }
 0x859   :  { %6469 = vmatpush1.bf16.msra.mxu0 %v10006_v15  ;;  %6533 = vmatpush1.bf16.msra.mxu1 %v10007_v57 }
 0x85a   :  { %6471 = vmatprep.subr.bf16.mxu0 %v10008_v42  ;;  %6535 = vmatprep.subr.bf16.mxu1 %v10009_v22 }
 0x85d   :  { %6473 = vmatpush1.bf16.msra.mxu0 %v10010_v5  ;;  %6537 = vmatpush1.bf16.msra.mxu1 %v10011_v9  ;;  %v10041_v5 = vld [vmem:[#allocation14_spill] sm:$0xff] }
 0x85e   :  { %6475 = vmatprep.subr.bf16.mxu0 %v10012_v36  ;;  %6539 = vmatprep.subr.bf16.mxu1 %v10013_v47 }
 0x861   :  { %6477 = vmatpush1.bf16.msra.mxu0 %v10014_v40  ;;  %6541 = vmatpush1.bf16.msra.mxu1 %v10015_v62 }
 0x862   :  { %6479 = vmatprep.subr.bf16.mxu0 %v10016_v56  ;;  %6543 = vmatprep.subr.bf16.mxu1 %v10017_v35 }
 0x865   :  { %6481 = vmatpush1.bf16.msra.mxu0 %v10018_v6  ;;  %6545 = vmatpush1.bf16.msra.mxu1 %v10019_v1 }
 0x866   :  { %6483 = vmatprep.subr.bf16.mxu0 %v10020_v34  ;;  %6547 = vmatprep.subr.bf16.mxu1 %v10021_v24 }
 0x869   :  { %6485 = vmatpush1.bf16.msra.mxu0 %v10022_v2  ;;  %6549 = vmatpush1.bf16.msra.mxu1 %v10023_v18 }
 0x86a   :  { %6487 = vmatprep.subr.bf16.mxu0 %v10024_v17  ;;  %6551 = vmatprep.subr.bf16.mxu1 %v10025_v32 }
 0x86d   :  { %6489 = vmatpush1.bf16.msra.mxu0 %v10026_v38  ;;  %6553 = vmatpush1.bf16.msra.mxu1 %v10027_v7 }
 0x86e   :  { %6491 = vmatprep.subr.bf16.mxu0 %v10028_v3  ;;  %6555 = vmatprep.subr.bf16.mxu1 %v10029_v10 }
 0x871   :  { %6493 = vmatpush1.bf16.msra.mxu0 %v10030_v31  ;;  %6557 = vmatpush1.bf16.msra.mxu1 %v10031_v8 }
 0x872   :  { %6495 = vmatprep.subr.bf16.mxu0 %v10032_v26  ;;  %6559 = vmatprep.subr.bf16.mxu1 %v10033_v28 }
 0x875   :  { %6497 = vmatpush1.bf16.msra.mxu0 %v10034_v51  ;;  %6561 = vmatpush1.bf16.msra.mxu1 %v10035_v41 }
 0x876   :  { %6499 = vmatprep.subr.bf16.mxu0 %v8777_v20  ;;  %6563 = vmatprep.subr.bf16.mxu1 %v8779_v33  ;;  %v3697_v20 = vld [vmem:[#allocation5 + $0x38] sm:$0xff] }
 0x877   :  { %v8946_v52 = vpack.c.bf16 %v3697_v20, %v3693_v13 }
 0x879   :  { %6501 = vmatpush1.bf16.msra.mxu0 %v8782_v46  ;;  %6565 = vmatpush1.bf16.msra.mxu1 %v8786_v55  ;;  %v10040_v46 = vld [vmem:[#allocation13_spill] sm:$0xff] }
 0x87a   :  { %6503 = vmatprep.subr.bf16.mxu0 %v10036_v29  ;;  %6567 = vmatprep.subr.bf16.mxu1 %v10037_v45 }
 0x87d   :  { %6505 = vmatpush1.bf16.msra.mxu0 %v10038_v30  ;;  %6569 = vmatpush1.bf16.msra.mxu1 %v10039_v53 }
 0x87e   :  { %6571 = vmatprep.subr.bf16.mxu0 %v8944_v63  ;;  %6603 = vmatprep.subr.bf16.mxu1 %v8946_v52 }
 0x8f3   :  { %v3060_v55 = vpop.f32.mrb[18].mxu0  ;;  %v3131_v33 = vpop.f32.mrb[26].mxu1 }
 0x8f4   :  { %v3061_v11 = vadd.f32 %v3060_v55, %v10040_v46  ;;  %v3062_v21 = vpop.f32.mrb[19].mxu0  ;;  %v3133_v15 = vpop.f32.mrb[27].mxu1  ;;  %v3132_v47 = vadd.f32 %v3131_v33, %v8072_v27 }
 0x8f5   :  { %v3063_v57 = vadd.f32 %v3062_v21, %v8061_v37  ;;  %v3134_v9 = vadd.f32 %v3133_v15, %v10041_v5 }
 0x8f6   :  { %v5255_v42 = vmul.f32 -1.442695, %v3061_v11 }
 0x8f7   :  { %v5256_v22 = vmul.f32 -1.442695, %v3063_v57  ;;  %v5257_v36 = vmul.f32 -1.442695, %v3134_v9  ;;  %v3694_v9 = vld [vmem:[#allocation5 + $0x20] sm:$0xff] }
 0x8f8   :  { %7149 = vpow2.f32 %v5255_v42 }
 0x8f9   :  { %7151 = vpow2.f32 %v5256_v22  ;;  %v3690_v22 = vld [vmem:[#allocation5] sm:$0xff] }
 0x8fa   :  { %7153 = vpow2.f32 %v5257_v36  ;;  %v3692_v36 = vld [vmem:[#allocation5 + $0x10] sm:$0xff] }
 0x8fb   :  { %7155 = vtanh.f32 %v3132_v47  ;;  %v3696_v47 = vld [vmem:[#allocation5 + $0x30] sm:$0xff] }
 0x902   :  { %v7150_v40 = vpop.eup %7149 }
 0x903   :  { %v7152_v62 = vpop.eup %7151  ;;  %v3139_v56 = vadd.f32 1.0, %v7150_v40  ;;  %v3699_v40 = vld [vmem:[#allocation5 + $0x48] sm:$0xff] }
 0x904   :  { %v3145_v35 = vadd.f32 1.0, %v7152_v62  ;;  %v7154_v6 = vpop.eup %7153  ;;  %v3703_v62 = vld [vmem:[#allocation5 + $0x68] sm:$0xff] }
 0x905   :  { %7157 = vrcp.f32 %v3139_v56  ;;  %v7156_v1 = vpop.eup %7155  ;;  %v3152_v18 = vadd.f32 1.0, %v7154_v6  ;;  %v3701_v56 = vld [vmem:[#allocation5 + $0x58] sm:$0xff] }
 0x906   :  { %7159 = vrcp.f32 %v3145_v35  ;;  %v3705_v35 = vld [vmem:[#allocation5 + $0x78] sm:$0xff] }
 0x907   :  { %7161 = vrcp.f32 %v3152_v18 }
 0x90f   :  { %v7158_v34 = vpop.eup %7157 }
 0x910   :  { %v7160_v24 = vpop.eup %7159  ;;  %v3156_v2 = vmul.f32 %v7158_v34, %v7156_v1  ;;  %v8970_v34 = vpack.c.bf16 %v3694_v9, %v3690_v22  ;;  %v3720_v22 = vld [vmem:[#allocation5 + $0xf0] sm:$0xff]  ;;  %v3725_v9 = vld [vmem:[#allocation5 + $0x118] sm:$0xff] }
 0x911   :  { %v3155_v17 = vmul.f32 %v7160_v24, %v8809_v12  ;;  %v7162_v12 = vpop.eup %7161  ;;  %v8972_v24 = vpack.c.bf16 %v3696_v47, %v3692_v36  ;;  %v3729_v36 = vld [vmem:[#allocation5 + $0x138] sm:$0xff] }
 0x913   :  { %v3291_v32 = vpop.f32.mrb[20].mxu0  ;;  %v3362_v38 = vpop.f32.mrb[28].mxu1  ;;  %v8955_v7 = vadd.f32 %v3156_v2, %v3155_v17  ;;  %v3702_v2 = vld [vmem:[#allocation5 + $0x60] sm:$0xff]  ;;  %v8976_v17 = vpack.c.bf16 %v3703_v62, %v3699_v40  ;;  %v9014_v40 = vpack.c.bf16 %v3729_v36, %v3725_v9  ;;  %v3724_v62 = vld [vmem:[#allocation5 + $0x110] sm:$0xff]  ;;  %v3937_v36 = vld [vmem:[#allocation7 + $0x68] sm:$0xff] }
 0x914   :  { %v3367_v3 = vadd.f32 %v3291_v32, %v9844_v60  ;;  %v3293_v10 = vpop.f32.mrb[21].mxu0  ;;  %v3364_v31 = vpop.f32.mrb[29].mxu1  ;;  %v3369_v45 = vadd.f32 %v3362_v38, %v7917_v23  ;;  %v8978_v32 = vpack.c.bf16 %v3705_v35, %v3701_v56  ;;  %v3700_v38 = vld [vmem:[#allocation5 + $0x50] sm:$0xff]  ;;  %v3733_v35 = vld [vmem:[#allocation5 + $0x158] sm:$0xff] }
 0x915   :  { %v3368_v8 = vadd.f32 %v3293_v10, %v9845_v58  ;;  %7163 = vtanh.f32 %v8955_v7  ;;  %v3370_v51 = vadd.f32 %v3364_v31, %v7919_v44  ;;  %v3707_v10 = vld [vmem:[#allocation5 + $0x88] sm:$0xff]  ;;  %v3728_v56 = vld [vmem:[#allocation5 + $0x130] sm:$0xff] }
 0x916   :  { %v5258_v26 = vmul.f32 -1.442695, %v3367_v3  ;;  %v3704_v3 = vld [vmem:[#allocation5 + $0x70] sm:$0xff]  ;;  %v3711_v31 = vld [vmem:[#allocation5 + $0xa8] sm:$0xff] }
 0x917   :  { %v5259_v28 = vmul.f32 -1.442695, %v3368_v8  ;;  %v5260_v29 = vmul.f32 -1.442695, %v3370_v51  ;;  %v3709_v8 = vld [vmem:[#allocation5 + $0x98] sm:$0xff]  ;;  %v8986_v51 = vpack.c.bf16 %v3704_v3, %v3700_v38  ;;  %v3736_v38 = vld [vmem:[#allocation5 + $0x170] sm:$0xff] }
 0x918   :  { %7165 = vpow2.f32 %v5258_v26  ;;  %v3713_v26 = vld [vmem:[#allocation5 + $0xb8] sm:$0xff] }
 0x919   :  { %7167 = vpow2.f32 %v5259_v28  ;;  %v3741_v3 = vld [vmem:[#allocation5 + $0x198] sm:$0xff] }
 0x91a   :  { %7169 = vpow2.f32 %v5260_v29  ;;  %v8990_v29 = vpack.c.bf16 %v3711_v31, %v3707_v10  ;;  %v3745_v10 = vld [vmem:[#allocation5 + $0x1b8] sm:$0xff] }
 0x91b   :  { %7171 = vtanh.f32 %v3369_v45  ;;  %v8992_v45 = vpack.c.bf16 %v3713_v26, %v3709_v8  ;;  %v3744_v8 = vld [vmem:[#allocation5 + $0x1b0] sm:$0xff]  ;;  %v3749_v26 = vld [vmem:[#allocation5 + $0x1d8] sm:$0xff] }
 0x91f   :  { %v7164_v41 = vpop.eup %7163 }
 0x920   :  { %v8962_v30 = vmul.f32 %v7164_v41, %v7162_v12  ;;  %v3706_v12 = vld [vmem:[#allocation5 + $0x80] sm:$0xff] }
 0x921   :  { %v3710_v41 = vld [vmem:[#allocation5 + $0xa0] sm:$0xff] }
 0x922   :  { %10042 = vst [vmem:[#allocation17_spill] sm:$0xff] %v8962_v30  ;;  %v7166_v53 = vpop.eup %7165  ;;  %3587 = vmatprep.mubr.f32.mxu0 %v8962_v30  ;;  %3658 = vmatprep.mubr.f32.mxu1 %v8962_v30  ;;  %v3967_v30 = vld [vmem:[#allocation7 + $0x158] sm:$0xff] }
 0x923   :  { %v7168_v14 = vpop.eup %7167  ;;  %v3374_v61 = vadd.f32 1.0, %v7166_v53  ;;  %v3708_v53 = vld [vmem:[#allocation5 + $0x90] sm:$0xff] }
 0x924   :  { %v3380_v13 = vadd.f32 1.0, %v7168_v14  ;;  %v7170_v20 = vpop.eup %7169  ;;  %v3712_v14 = vld [vmem:[#allocation5 + $0xb0] sm:$0xff] }
 0x925   :  { %7173 = vrcp.f32 %v3374_v61  ;;  %v7172_v55 = vpop.eup %7171  ;;  %v3387_v15 = vadd.f32 1.0, %v7170_v20  ;;  %v3715_v61 = vld [vmem:[#allocation5 + $0xc8] sm:$0xff]  ;;  %v3717_v20 = vld [vmem:[#allocation5 + $0xd8] sm:$0xff] }
 0x926   :  { %7175 = vrcp.f32 %v3380_v13  ;;  %v3719_v13 = vld [vmem:[#allocation5 + $0xe8] sm:$0xff] }
 0x927   :  { %7177 = vrcp.f32 %v3387_v15 }
 0x92f   :  { %v7174_v33 = vpop.eup %7173 }
 0x930   :  { %v7176_v11 = vpop.eup %7175  ;;  %v3391_v21 = vmul.f32 %v7174_v33, %v7172_v55  ;;  %v3721_v55 = vld [vmem:[#allocation5 + $0xf8] sm:$0xff]  ;;  %v8998_v33 = vpack.c.bf16 %v3710_v41, %v3706_v12 }
 0x931   :  { %v3390_v57 = vmul.f32 %v7176_v11, %v8821_v25  ;;  %v7178_v6 = vpop.eup %7177  ;;  %v3698_v25 = vld [vmem:[#allocation5 + $0x40] sm:$0xff]  ;;  %v9000_v11 = vpack.c.bf16 %v3712_v14, %v3708_v53  ;;  %v9006_v15 = vpack.c.bf16 %v3721_v55, %v3717_v20  ;;  %v3753_v12 = vld [vmem:[#allocation5 + $0x1f8] sm:$0xff]  ;;  %v3752_v53 = vld [vmem:[#allocation5 + $0x1f0] sm:$0xff] }
 0x932   :  { %v8984_v28 = vpack.c.bf16 %v3702_v2, %v3698_v25  ;;  %v3732_v2 = vld [vmem:[#allocation5 + $0x150] sm:$0xff]  ;;  %v3924_v20 = vld [vmem:[#allocation7] sm:$0xff] }
 0x933   :  { %v8967_v42 = vadd.f32 %v3391_v21, %v3390_v57  ;;  %v9004_v21 = vpack.c.bf16 %v3719_v13, %v3715_v61  ;;  %v3716_v57 = vld [vmem:[#allocation5 + $0xd0] sm:$0xff]  ;;  %v9026_v31 = vpack.c.bf16 %v3736_v38, %v3732_v2  ;;  %v3927_v61 = vld [vmem:[#allocation7 + $0x18] sm:$0xff]  ;;  %v3928_v55 = vld [vmem:[#allocation7 + $0x20] sm:$0xff] }
 0x934   :  { %v9010_v47 = vpack.c.bf16 %v3720_v22, %v3716_v57  ;;  %v3931_v13 = vld [vmem:[#allocation7 + $0x38] sm:$0xff]  ;;  %v3926_v22 = vld [vmem:[#allocation7 + $0x10] sm:$0xff]  ;;  %v3936_v2 = vld [vmem:[#allocation7 + $0x60] sm:$0xff] }
 0x935   :  { %7179 = vtanh.f32 %v8967_v42  ;;  %v9052_v57 = vpack.c.bf16 %v3931_v13, %v3927_v61  ;;  %v3944_v61 = vld [vmem:[#allocation7 + $0xa0] sm:$0xff] }
 0x93f   :  { %v7180_v1 = vpop.eup %7179 }
 0x940   :  { %v8974_v18 = vmul.f32 %v7180_v1, %v7178_v6  ;;  %v3737_v6 = vld [vmem:[#allocation5 + $0x178] sm:$0xff]  ;;  %v9018_v1 = vpack.c.bf16 %v3728_v56, %v3724_v62 }
 0x941   :  { %v9022_v25 = vpack.c.bf16 %v3737_v6, %v3733_v35  ;;  %v3935_v62 = vld [vmem:[#allocation7 + $0x58] sm:$0xff]  ;;  %v3932_v6 = vld [vmem:[#allocation7 + $0x40] sm:$0xff] }
 0x942   :  { %3588 = vmatmul.mubr.f32.vlgmr.msra.gmra.mrb[22].mxu0 %v8974_v18  ;;  %3659 = vmatmul.mubr.f32.vlgmr.msra.gmra.mrb[30].mxu1 %v8974_v18  ;;  %v3939_v35 = vld [vmem:[#allocation7 + $0x78] sm:$0xff] }
 0x943   :  { %6573 = vmatpush1.bf16.msra.mxu0 %v8970_v34  ;;  %6605 = vmatpush1.bf16.msra.mxu1 %v8972_v24  ;;  %v9064_v38 = vpack.c.bf16 %v3939_v35, %v3935_v62  ;;  %v3951_v62 = vld [vmem:[#allocation7 + $0xd8] sm:$0xff] }
 0x944   :  { %6575 = vmatprep.subr.bf16.mxu0 %v8976_v17  ;;  %6607 = vmatprep.subr.bf16.mxu1 %v8978_v32 }
 0x945   :  { %3818 = vmatprep.mubr.f32.mxu0 %v9797_v4  ;;  %3889 = vmatprep.mubr.f32.mxu1 %v9797_v4 }
 0x947   :  { %6577 = vmatpush1.bf16.msra.mxu0 %v8984_v28  ;;  %6609 = vmatpush1.bf16.msra.mxu1 %v8986_v51 }
 0x948   :  { %6579 = vmatprep.subr.bf16.mxu0 %v8990_v29  ;;  %6611 = vmatprep.subr.bf16.mxu1 %v8992_v45 }
 0x94b   :  { %6581 = vmatpush1.bf16.msra.mxu0 %v8998_v33  ;;  %6613 = vmatpush1.bf16.msra.mxu1 %v9000_v11 }
 0x94c   :  { %6583 = vmatprep.subr.bf16.mxu0 %v9004_v21  ;;  %6615 = vmatprep.subr.bf16.mxu1 %v9006_v15 }
 0x94f   :  { %6585 = vmatpush1.bf16.msra.mxu0 %v8840_v43  ;;  %6617 = vmatpush1.bf16.msra.mxu1 %v9010_v47  ;;  %v9030_v43 = vpack.c.bf16 %v3745_v10, %v3741_v3  ;;  %v9066_v3 = vpack.c.bf16 %v3936_v2, %v3932_v6  ;;  %v3934_v10 = vld [vmem:[#allocation7 + $0x50] sm:$0xff]  ;;  %v3955_v6 = vld [vmem:[#allocation7 + $0xf8] sm:$0xff]  ;;  %v3948_v2 = vld [vmem:[#allocation7 + $0xc0] sm:$0xff] }
 0x950   :  { %6587 = vmatprep.subr.bf16.mxu0 %v8844_v49  ;;  %6619 = vmatprep.subr.bf16.mxu1 %v9014_v40  ;;  %v3740_v49 = vld [vmem:[#allocation5 + $0x190] sm:$0xff] }
 0x951   :  { %v9034_v41 = vpack.c.bf16 %v3744_v8, %v3740_v49  ;;  %v3938_v49 = vld [vmem:[#allocation7 + $0x70] sm:$0xff] }
 0x952   :  { %v9069_v8 = vpack.c.bf16 %v3938_v49, %v3934_v10  ;;  %v3952_v10 = vld [vmem:[#allocation7 + $0xe0] sm:$0xff]  ;;  %v9088_v49 = vpack.c.bf16 %v3955_v6, %v3951_v62 }
 0x953   :  { %6589 = vmatpush1.bf16.msra.mxu0 %v8848_v59  ;;  %6621 = vmatpush1.bf16.msra.mxu1 %v9018_v1  ;;  %v9038_v59 = vpack.c.bf16 %v3753_v12, %v3749_v26  ;;  %v3941_v26 = vld [vmem:[#allocation7 + $0x88] sm:$0xff]  ;;  %v3960_v62 = vld [vmem:[#allocation7 + $0x120] sm:$0xff] }
 0x954   :  { %6591 = vmatprep.subr.bf16.mxu0 %v8852_v48  ;;  %6623 = vmatprep.subr.bf16.mxu1 %v9022_v25  ;;  %v3748_v48 = vld [vmem:[#allocation5 + $0x1d0] sm:$0xff]  ;;  %v3945_v12 = vld [vmem:[#allocation7 + $0xa8] sm:$0xff]  ;;  %10043 = vst [vmem:[#allocation18_spill] sm:$0xff] %v9088_v49 }
 0x955   :  { %v9042_v14 = vpack.c.bf16 %v3752_v53, %v3748_v48  ;;  %v3943_v48 = vld [vmem:[#allocation7 + $0x98] sm:$0xff]  ;;  %v9074_v53 = vpack.c.bf16 %v3945_v12, %v3941_v26  ;;  %v9090_v26 = vpack.c.bf16 %v3952_v10, %v3948_v2  ;;  %v3950_v12 = vld [vmem:[#allocation7 + $0xd0] sm:$0xff] }
 0x956   :  { %v3958_v10 = vld [vmem:[#allocation7 + $0x110] sm:$0xff] }
 0x957   :  { %6593 = vmatpush1.bf16.msra.mxu0 %v8856_v39  ;;  %6625 = vmatpush1.bf16.msra.mxu1 %v9026_v31  ;;  %v3925_v39 = vld [vmem:[#allocation7 + $0x8] sm:$0xff]  ;;  %10044 = vst [vmem:[#allocation19_spill] sm:$0xff] %v9090_v26 }
 0x958   :  { %6595 = vmatprep.subr.bf16.mxu0 %v8860_v50  ;;  %6627 = vmatprep.subr.bf16.mxu1 %v9030_v43  ;;  %v3929_v50 = vld [vmem:[#allocation7 + $0x28] sm:$0xff] }
 0x95b   :  { %6597 = vmatpush1.bf16.msra.mxu0 %v8864_v0  ;;  %6629 = vmatpush1.bf16.msra.mxu1 %v9034_v41  ;;  %v9050_v0 = vpack.c.bf16 %v3929_v50, %v3925_v39  ;;  %v3947_v39 = vld [vmem:[#allocation7 + $0xb8] sm:$0xff]  ;;  %v3940_v50 = vld [vmem:[#allocation7 + $0x80] sm:$0xff] }
 0x95c   :  { %6599 = vmatprep.subr.bf16.mxu0 %v8868_v16  ;;  %6631 = vmatprep.subr.bf16.mxu1 %v9038_v59  ;;  %v9054_v16 = vpack.c.bf16 %v3928_v55, %v3924_v20  ;;  %v9076_v13 = vpack.c.bf16 %v3947_v39, %v3943_v48  ;;  %v9078_v20 = vpack.c.bf16 %v3944_v61, %v3940_v50  ;;  %v3942_v55 = vld [vmem:[#allocation7 + $0x90] sm:$0xff]  ;;  %v3957_v50 = vld [vmem:[#allocation7 + $0x108] sm:$0xff] }
 0x95d   :  { %v3954_v48 = vld [vmem:[#allocation7 + $0xf0] sm:$0xff]  ;;  %v3961_v61 = vld [vmem:[#allocation7 + $0x128] sm:$0xff] }
 0x95e   :  { %v9093_v39 = vpack.c.bf16 %v3954_v48, %v3950_v12  ;;  %v3962_v12 = vld [vmem:[#allocation7 + $0x130] sm:$0xff] }
 0x95f   :  { %6601 = vmatpush1.bf16.msra.mxu0 %v8872_v54  ;;  %6633 = vmatpush1.bf16.msra.mxu1 %v9042_v14  ;;  %v3930_v54 = vld [vmem:[#allocation7 + $0x30] sm:$0xff]  ;;  %v9105_v48 = vpack.c.bf16 %v3962_v12, %v3958_v10 }
 0x960   :  { %6635 = vmatprep.subr.bf16.mxu0 %v9050_v0  ;;  %v9057_v9 = vpack.c.bf16 %v3930_v54, %v3926_v22  ;;  %6699 = vmatprep.subr.bf16.mxu1 %v9052_v57  ;;  %v3946_v22 = vld [vmem:[#allocation7 + $0xb0] sm:$0xff]  ;;  %10045 = vst [vmem:[#allocation20_spill] sm:$0xff] %v9093_v39 }
 0x961   :  { %v9081_v54 = vpack.c.bf16 %v3946_v22, %v3942_v55  ;;  %v3959_v55 = vld [vmem:[#allocation7 + $0x118] sm:$0xff]  ;;  %v9098_v22 = vpack.c.bf16 %v3961_v61, %v3957_v50  ;;  %10049 = vst [vmem:[#allocation24_spill] sm:$0xff] %v9105_v48  ;;  %v3965_v50 = vld [vmem:[#allocation7 + $0x148] sm:$0xff]  ;;  %v3966_v10 = vld [vmem:[#allocation7 + $0x150] sm:$0xff] }
 0x962   :  { %3819 = vmatmul.mubr.f32.vlgmr.msra.gmra.mrb[24].mxu0 %v8974_v18  ;;  %3890 = vmatmul.mubr.f32.vlgmr.msra.gmra.mrb[32].mxu1 %v8974_v18  ;;  %v3933_v18 = vld [vmem:[#allocation7 + $0x48] sm:$0xff]  ;;  %v3970_v12 = vld [vmem:[#allocation7 + $0x170] sm:$0xff] }
 0x963   :  { %6637 = vmatpush1.bf16.msra.mxu0 %v9054_v16  ;;  %6701 = vmatpush1.bf16.msra.mxu1 %v9057_v9  ;;  %v9062_v56 = vpack.c.bf16 %v3937_v36, %v3933_v18  ;;  %v3949_v18 = vld [vmem:[#allocation7 + $0xc8] sm:$0xff]  ;;  %10046 = vst [vmem:[#allocation21_spill] sm:$0xff] %v9098_v22 }
 0x964   :  { %6703 = vmatprep.subr.bf16.mxu1 %v9064_v38  ;;  %v3953_v36 = vld [vmem:[#allocation7 + $0xe8] sm:$0xff] }
 0x965   :  { %6639 = vmatprep.subr.bf16.mxu0 %v9062_v56  ;;  %v9086_v35 = vpack.c.bf16 %v3953_v36, %v3949_v18  ;;  %v3963_v18 = vld [vmem:[#allocation7 + $0x138] sm:$0xff]  ;;  %v3956_v36 = vld [vmem:[#allocation7 + $0x100] sm:$0xff]  ;;  %v3969_v61 = vld [vmem:[#allocation7 + $0x168] sm:$0xff] }
 0x966   :  { %v9100_v6 = vpack.c.bf16 %v3963_v18, %v3959_v55  ;;  %v9102_v2 = vpack.c.bf16 %v3960_v62, %v3956_v36  ;;  %v9110_v19 = vpack.c.bf16 %v3969_v61, %v3965_v50  ;;  %v3971_v55 = vld [vmem:[#allocation7 + $0x178] sm:$0xff]  ;;  %v3964_v18 = vld [vmem:[#allocation7 + $0x140] sm:$0xff]  ;;  %v3977_v50 = vld [vmem:[#allocation7 + $0x1a8] sm:$0xff] }
 0x967   :  { %6641 = vmatpush1.bf16.msra.mxu0 %v9066_v3  ;;  %6705 = vmatpush1.bf16.msra.mxu1 %v9069_v8  ;;  %v3968_v36 = vld [vmem:[#allocation7 + $0x160] sm:$0xff]  ;;  %v9112_v62 = vpack.c.bf16 %v3971_v55, %v3967_v30  ;;  %v3975_v61 = vld [vmem:[#allocation7 + $0x198] sm:$0xff] }
 0x968   :  { %6643 = vmatprep.subr.bf16.mxu0 %v9074_v53  ;;  %6707 = vmatprep.subr.bf16.mxu1 %v9076_v13  ;;  %10047 = vst [vmem:[#allocation22_spill] sm:$0xff] %v9100_v6  ;;  %10048 = vst [vmem:[#allocation23_spill] sm:$0xff] %v9102_v2  ;;  %v3979_v30 = vld [vmem:[#allocation7 + $0x1b8] sm:$0xff]  ;;  %v3972_v55 = vld [vmem:[#allocation7 + $0x180] sm:$0xff] }
 0x969   :  { %10050 = vst [vmem:[#allocation25_spill] sm:$0xff] %v9110_v19  ;;  %10051 = vst [vmem:[#allocation26_spill] sm:$0xff] %v9112_v62 }
 0x96b   :  { %6645 = vmatpush1.bf16.msra.mxu0 %v9078_v20  ;;  %6709 = vmatpush1.bf16.msra.mxu1 %v9081_v54 }
 0x96c   :  { %6647 = vmatprep.subr.bf16.mxu0 %v9086_v35  ;;  %6711 = vmatprep.subr.bf16.mxu1 %v9088_v49  ;;  %v4043_v49 = vld [vmem:[#allocation7 + $0x3b8] sm:$0xff] }
 0x96f   :  { %6649 = vmatpush1.bf16.msra.mxu0 %v9090_v26  ;;  %6713 = vmatpush1.bf16.msra.mxu1 %v9093_v39  ;;  %v9114_v39 = vpack.c.bf16 %v3968_v36, %v3964_v18  ;;  %v3976_v18 = vld [vmem:[#allocation7 + $0x1a0] sm:$0xff]  ;;  %v9124_v36 = vpack.c.bf16 %v3979_v30, %v3975_v61  ;;  %v3987_v61 = vld [vmem:[#allocation7 + $0x1f8] sm:$0xff] }
 0x970   :  { %6651 = vmatprep.subr.bf16.mxu0 %v9098_v22  ;;  %6715 = vmatprep.subr.bf16.mxu1 %v9100_v6  ;;  %v9117_v6 = vpack.c.bf16 %v3970_v12, %v3966_v10  ;;  %v9126_v22 = vpack.c.bf16 %v3976_v18, %v3972_v55  ;;  %v3974_v10 = vld [vmem:[#allocation7 + $0x190] sm:$0xff]  ;;  %v3980_v30 = vld [vmem:[#allocation7 + $0x1c0] sm:$0xff]  ;;  %v4039_v26 = vld [vmem:[#allocation7 + $0x398] sm:$0xff] }
 0x971   :  { %10052 = vst [vmem:[#allocation27_spill] sm:$0xff] %v9114_v39  ;;  %10055 = vst [vmem:[#allocation30_spill] sm:$0xff] %v9124_v36  ;;  %v3978_v12 = vld [vmem:[#allocation7 + $0x1b0] sm:$0xff]  ;;  %v3984_v55 = vld [vmem:[#allocation7 + $0x1e0] sm:$0xff] }
 0x972   :  { %10053 = vst [vmem:[#allocation28_spill] sm:$0xff] %v9117_v6  ;;  %10056 = vst [vmem:[#allocation31_spill] sm:$0xff] %v9126_v22 }
 0x973   :  { %6653 = vmatpush1.bf16.msra.mxu0 %v9102_v2  ;;  %6717 = vmatpush1.bf16.msra.mxu1 %v9105_v48  ;;  %v3973_v48 = vld [vmem:[#allocation7 + $0x188] sm:$0xff] }
 0x974   :  { %6655 = vmatprep.subr.bf16.mxu0 %v9110_v19  ;;  %6719 = vmatprep.subr.bf16.mxu1 %v9112_v62  ;;  %v9122_v2 = vpack.c.bf16 %v3977_v50, %v3973_v48  ;;  %v9129_v62 = vpack.c.bf16 %v3978_v12, %v3974_v10  ;;  %v3985_v48 = vld [vmem:[#allocation7 + $0x1e8] sm:$0xff]  ;;  %v3983_v50 = vld [vmem:[#allocation7 + $0x1d8] sm:$0xff]  ;;  %v9138_v19 = vpack.c.bf16 %v3984_v55, %v3980_v30  ;;  %v3982_v10 = vld [vmem:[#allocation7 + $0x1d0] sm:$0xff] }
 0x975   :  { %v9136_v18 = vpack.c.bf16 %v3987_v61, %v3983_v50  ;;  %v3986_v12 = vld [vmem:[#allocation7 + $0x1f0] sm:$0xff]  ;;  %v3995_v50 = vld [vmem:[#allocation7 + $0x238] sm:$0xff]  ;;  %v3988_v61 = vld [vmem:[#allocation7 + $0x200] sm:$0xff] }
 0x976   :  { %10054 = vst [vmem:[#allocation29_spill] sm:$0xff] %v9122_v2  ;;  %10057 = vst [vmem:[#allocation32_spill] sm:$0xff] %v9129_v62  ;;  %v3992_v30 = vld [vmem:[#allocation7 + $0x220] sm:$0xff] }
 0x977   :  { %6657 = vmatpush1.bf16.msra.mxu0 %v9114_v39  ;;  %6721 = vmatpush1.bf16.msra.mxu1 %v9117_v6  ;;  %v3981_v6 = vld [vmem:[#allocation7 + $0x1c8] sm:$0xff]  ;;  %10059 = vst [vmem:[#allocation34_spill] sm:$0xff] %v9136_v18  ;;  %10060 = vst [vmem:[#allocation35_spill] sm:$0xff] %v9138_v19 }
 0x978   :  { %6659 = vmatprep.subr.bf16.mxu0 %v9122_v2  ;;  %6723 = vmatprep.subr.bf16.mxu1 %v9124_v36  ;;  %v9134_v39 = vpack.c.bf16 %v3985_v48, %v3981_v6  ;;  %v9141_v36 = vpack.c.bf16 %v3986_v12, %v3982_v10  ;;  %v3993_v6 = vld [vmem:[#allocation7 + $0x228] sm:$0xff]  ;;  %v3991_v48 = vld [vmem:[#allocation7 + $0x218] sm:$0xff]  ;;  %v9150_v2 = vpack.c.bf16 %v3992_v30, %v3988_v61  ;;  %v3990_v10 = vld [vmem:[#allocation7 + $0x210] sm:$0xff] }
 0x979   :  { %v9148_v55 = vpack.c.bf16 %v3995_v50, %v3991_v48  ;;  %v3994_v12 = vld [vmem:[#allocation7 + $0x230] sm:$0xff]  ;;  %v4003_v48 = vld [vmem:[#allocation7 + $0x278] sm:$0xff]  ;;  %v3996_v50 = vld [vmem:[#allocation7 + $0x240] sm:$0xff] }
 0x97a   :  { %10058 = vst [vmem:[#allocation33_spill] sm:$0xff] %v9134_v39  ;;  %10061 = vst [vmem:[#allocation36_spill] sm:$0xff] %v9141_v36  ;;  %v4000_v61 = vld [vmem:[#allocation7 + $0x260] sm:$0xff] }
 0x97b   :  { %6661 = vmatpush1.bf16.msra.mxu0 %v9126_v22  ;;  %6725 = vmatpush1.bf16.msra.mxu1 %v9129_v62  ;;  %v3989_v62 = vld [vmem:[#allocation7 + $0x208] sm:$0xff]  ;;  %10063 = vst [vmem:[#allocation38_spill] sm:$0xff] %v9148_v55  ;;  %10064 = vst [vmem:[#allocation39_spill] sm:$0xff] %v9150_v2 }
 0x97c   :  { %6663 = vmatprep.subr.bf16.mxu0 %v9134_v39  ;;  %6727 = vmatprep.subr.bf16.mxu1 %v9136_v18  ;;  %v9146_v22 = vpack.c.bf16 %v3993_v6, %v3989_v62  ;;  %v9153_v18 = vpack.c.bf16 %v3994_v12, %v3990_v10  ;;  %v4001_v62 = vld [vmem:[#allocation7 + $0x268] sm:$0xff]  ;;  %v3999_v6 = vld [vmem:[#allocation7 + $0x258] sm:$0xff]  ;;  %v9162_v39 = vpack.c.bf16 %v4000_v61, %v3996_v50  ;;  %v3998_v10 = vld [vmem:[#allocation7 + $0x250] sm:$0xff] }
 0x97d   :  { %v9160_v30 = vpack.c.bf16 %v4003_v48, %v3999_v6  ;;  %v4002_v12 = vld [vmem:[#allocation7 + $0x270] sm:$0xff]  ;;  %v4011_v6 = vld [vmem:[#allocation7 + $0x2b8] sm:$0xff]  ;;  %v4004_v48 = vld [vmem:[#allocation7 + $0x280] sm:$0xff] }
 0x97e   :  { %10062 = vst [vmem:[#allocation37_spill] sm:$0xff] %v9146_v22  ;;  %10065 = vst [vmem:[#allocation40_spill] sm:$0xff] %v9153_v18  ;;  %v4008_v50 = vld [vmem:[#allocation7 + $0x2a0] sm:$0xff] }
 0x97f   :  { %6665 = vmatpush1.bf16.msra.mxu0 %v9138_v19  ;;  %6729 = vmatpush1.bf16.msra.mxu1 %v9141_v36  ;;  %v3997_v36 = vld [vmem:[#allocation7 + $0x248] sm:$0xff]  ;;  %10067 = vst [vmem:[#allocation42_spill] sm:$0xff] %v9160_v30  ;;  %10068 = vst [vmem:[#allocation43_spill] sm:$0xff] %v9162_v39 }
 0x980   :  { %6667 = vmatprep.subr.bf16.mxu0 %v9146_v22  ;;  %6731 = vmatprep.subr.bf16.mxu1 %v9148_v55  ;;  %v9158_v19 = vpack.c.bf16 %v4001_v62, %v3997_v36  ;;  %v9165_v55 = vpack.c.bf16 %v4002_v12, %v3998_v10  ;;  %v4009_v36 = vld [vmem:[#allocation7 + $0x2a8] sm:$0xff]  ;;  %v4007_v62 = vld [vmem:[#allocation7 + $0x298] sm:$0xff]  ;;  %v9174_v22 = vpack.c.bf16 %v4008_v50, %v4004_v48  ;;  %v4006_v10 = vld [vmem:[#allocation7 + $0x290] sm:$0xff] }
 0x981   :  { %v9172_v61 = vpack.c.bf16 %v4011_v6, %v4007_v62  ;;  %v4010_v12 = vld [vmem:[#allocation7 + $0x2b0] sm:$0xff]  ;;  %v4019_v62 = vld [vmem:[#allocation7 + $0x2f8] sm:$0xff]  ;;  %v4012_v6 = vld [vmem:[#allocation7 + $0x2c0] sm:$0xff] }
 0x982   :  { %10066 = vst [vmem:[#allocation41_spill] sm:$0xff] %v9158_v19  ;;  %10069 = vst [vmem:[#allocation44_spill] sm:$0xff] %v9165_v55  ;;  %v4016_v48 = vld [vmem:[#allocation7 + $0x2e0] sm:$0xff] }
 0x983   :  { %6669 = vmatpush1.bf16.msra.mxu0 %v9150_v2  ;;  %6733 = vmatpush1.bf16.msra.mxu1 %v9153_v18  ;;  %v4005_v18 = vld [vmem:[#allocation7 + $0x288] sm:$0xff]  ;;  %10071 = vst [vmem:[#allocation46_spill] sm:$0xff] %v9172_v61  ;;  %10072 = vst [vmem:[#allocation47_spill] sm:$0xff] %v9174_v22 }
 0x984   :  { %6671 = vmatprep.subr.bf16.mxu0 %v9158_v19  ;;  %6735 = vmatprep.subr.bf16.mxu1 %v9160_v30  ;;  %v9170_v2 = vpack.c.bf16 %v4009_v36, %v4005_v18  ;;  %v9177_v30 = vpack.c.bf16 %v4010_v12, %v4006_v10  ;;  %v4017_v18 = vld [vmem:[#allocation7 + $0x2e8] sm:$0xff]  ;;  %v4015_v36 = vld [vmem:[#allocation7 + $0x2d8] sm:$0xff]  ;;  %v9186_v19 = vpack.c.bf16 %v4016_v48, %v4012_v6  ;;  %v4014_v10 = vld [vmem:[#allocation7 + $0x2d0] sm:$0xff] }
 0x985   :  { %v9184_v50 = vpack.c.bf16 %v4019_v62, %v4015_v36  ;;  %v4018_v12 = vld [vmem:[#allocation7 + $0x2f0] sm:$0xff]  ;;  %v4027_v36 = vld [vmem:[#allocation7 + $0x338] sm:$0xff]  ;;  %v4020_v62 = vld [vmem:[#allocation7 + $0x300] sm:$0xff] }
 0x986   :  { %10070 = vst [vmem:[#allocation45_spill] sm:$0xff] %v9170_v2  ;;  %10073 = vst [vmem:[#allocation48_spill] sm:$0xff] %v9177_v30  ;;  %v4024_v6 = vld [vmem:[#allocation7 + $0x320] sm:$0xff] }
 0x987   :  { %6673 = vmatpush1.bf16.msra.mxu0 %v9162_v39  ;;  %6737 = vmatpush1.bf16.msra.mxu1 %v9165_v55  ;;  %v4013_v55 = vld [vmem:[#allocation7 + $0x2c8] sm:$0xff]  ;;  %10075 = vst [vmem:[#allocation50_spill] sm:$0xff] %v9184_v50  ;;  %10076 = vst [vmem:[#allocation51_spill] sm:$0xff] %v9186_v19 }
 0x988   :  { %6675 = vmatprep.subr.bf16.mxu0 %v9170_v2  ;;  %6739 = vmatprep.subr.bf16.mxu1 %v9172_v61  ;;  %v9182_v39 = vpack.c.bf16 %v4017_v18, %v4013_v55  ;;  %v9189_v61 = vpack.c.bf16 %v4018_v12, %v4014_v10  ;;  %v4025_v55 = vld [vmem:[#allocation7 + $0x328] sm:$0xff]  ;;  %v4023_v18 = vld [vmem:[#allocation7 + $0x318] sm:$0xff]  ;;  %v9198_v2 = vpack.c.bf16 %v4024_v6, %v4020_v62  ;;  %v4022_v10 = vld [vmem:[#allocation7 + $0x310] sm:$0xff] }
 0x989   :  { %v9196_v48 = vpack.c.bf16 %v4027_v36, %v4023_v18  ;;  %v4026_v12 = vld [vmem:[#allocation7 + $0x330] sm:$0xff]  ;;  %v4035_v18 = vld [vmem:[#allocation7 + $0x378] sm:$0xff]  ;;  %v4028_v36 = vld [vmem:[#allocation7 + $0x340] sm:$0xff] }
 0x98a   :  { %10074 = vst [vmem:[#allocation49_spill] sm:$0xff] %v9182_v39  ;;  %10077 = vst [vmem:[#allocation52_spill] sm:$0xff] %v9189_v61  ;;  %v4032_v62 = vld [vmem:[#allocation7 + $0x360] sm:$0xff] }
 0x98b   :  { %6677 = vmatpush1.bf16.msra.mxu0 %v9174_v22  ;;  %6741 = vmatpush1.bf16.msra.mxu1 %v9177_v30  ;;  %v4021_v30 = vld [vmem:[#allocation7 + $0x308] sm:$0xff]  ;;  %10079 = vst [vmem:[#allocation55_spill] sm:$0xff] %v9196_v48  ;;  %10080 = vst [vmem:[#allocation54_spill] sm:$0xff] %v9198_v2 }
 0x98c   :  { %6679 = vmatprep.subr.bf16.mxu0 %v9182_v39  ;;  %6743 = vmatprep.subr.bf16.mxu1 %v9184_v50  ;;  %v9194_v22 = vpack.c.bf16 %v4025_v55, %v4021_v30  ;;  %v9201_v50 = vpack.c.bf16 %v4026_v12, %v4022_v10  ;;  %v4033_v30 = vld [vmem:[#allocation7 + $0x368] sm:$0xff]  ;;  %v4031_v55 = vld [vmem:[#allocation7 + $0x358] sm:$0xff]  ;;  %v9210_v39 = vpack.c.bf16 %v4032_v62, %v4028_v36  ;;  %v4030_v10 = vld [vmem:[#allocation7 + $0x350] sm:$0xff] }
 0x98d   :  { %v9208_v6 = vpack.c.bf16 %v4035_v18, %v4031_v55  ;;  %v4034_v12 = vld [vmem:[#allocation7 + $0x370] sm:$0xff]  ;;  %v4036_v55 = vld [vmem:[#allocation7 + $0x380] sm:$0xff] }
 0x98e   :  { %10078 = vst [vmem:[#allocation53_spill] sm:$0xff] %v9194_v22  ;;  %10081 = vst [vmem:[#allocation56_spill] sm:$0xff] %v9201_v50  ;;  %v4040_v18 = vld [vmem:[#allocation7 + $0x3a0] sm:$0xff]  ;;  %v4038_v36 = vld [vmem:[#allocation7 + $0x390] sm:$0xff] }
 0x98f   :  { %6681 = vmatpush1.bf16.msra.mxu0 %v9186_v19  ;;  %6745 = vmatpush1.bf16.msra.mxu1 %v9189_v61  ;;  %v4029_v61 = vld [vmem:[#allocation7 + $0x348] sm:$0xff]  ;;  %10083 = vst [vmem:[#allocation58_spill] sm:$0xff] %v9208_v6  ;;  %10084 = vst [vmem:[#allocation59_spill] sm:$0xff] %v9210_v39  ;;  %v9222_v62 = vpack.c.bf16 %v4040_v18, %v4036_v55  ;;  %v4050_v55 = vld [vmem:[#allocation7 + $0x3f0] sm:$0xff] }
 0x990   :  { %6683 = vmatprep.subr.bf16.mxu0 %v9194_v22  ;;  %6747 = vmatprep.subr.bf16.mxu1 %v9196_v48  ;;  %v9206_v19 = vpack.c.bf16 %v4033_v30, %v4029_v61  ;;  %v4037_v22 = vld [vmem:[#allocation7 + $0x388] sm:$0xff]  ;;  %v9219_v30 = vpack.c.bf16 %v4043_v49, %v4039_v26  ;;  %v4047_v49 = vld [vmem:[#allocation7 + $0x3d8] sm:$0xff] }
 0x991   :  { %v4041_v48 = vld [vmem:[#allocation7 + $0x3a8] sm:$0xff]  ;;  %v4051_v26 = vld [vmem:[#allocation7 + $0x3f8] sm:$0xff] }
 0x992   :  { %10082 = vst [vmem:[#allocation57_spill] sm:$0xff] %v9206_v19  ;;  %v9217_v61 = vpack.c.bf16 %v4041_v48, %v4037_v22  ;;  %v4044_v48 = vld [vmem:[#allocation7 + $0x3c0] sm:$0xff] }
 0x993   :  { %6685 = vmatpush1.bf16.msra.mxu0 %v9198_v2  ;;  %6749 = vmatpush1.bf16.msra.mxu1 %v9201_v50  ;;  %v9213_v2 = vpack.c.bf16 %v4034_v12, %v4030_v10  ;;  %v4042_v10 = vld [vmem:[#allocation7 + $0x3b0] sm:$0xff]  ;;  %v4045_v12 = vld [vmem:[#allocation7 + $0x3c8] sm:$0xff]  ;;  %v4048_v50 = vld [vmem:[#allocation7 + $0x3e0] sm:$0xff] }
 0x994   :  { %6687 = vmatprep.subr.bf16.mxu0 %v9206_v19  ;;  %6751 = vmatprep.subr.bf16.mxu1 %v9208_v6  ;;  %v4049_v19 = vld [vmem:[#allocation7 + $0x3e8] sm:$0xff]  ;;  %v9226_v6 = vpack.c.bf16 %v4042_v10, %v4038_v36  ;;  %v9233_v18 = vpack.c.bf16 %v4048_v50, %v4044_v48 }
 0x995   :  { %10085 = vst [vmem:[#allocation60_spill] sm:$0xff] %v9213_v2  ;;  %v9228_v22 = vpack.c.bf16 %v4049_v19, %v4045_v12 }
 0x996   :  { %10088 = vst [vmem:[#allocation64_spill] sm:$0xff] %v9233_v18 }
 0x997   :  { %6689 = vmatpush1.bf16.msra.mxu0 %v9210_v39  ;;  %6753 = vmatpush1.bf16.msra.mxu1 %v9213_v2  ;;  %10086 = vst [vmem:[#allocation61_spill] sm:$0xff] %v9228_v22  ;;  %v9230_v39 = vpack.c.bf16 %v4051_v26, %v4047_v49  ;;  %v4046_v2 = vld [vmem:[#allocation7 + $0x3d0] sm:$0xff] }
 0x998   :  { %6691 = vmatprep.subr.bf16.mxu0 %v9217_v61  ;;  %6755 = vmatprep.subr.bf16.mxu1 %v9219_v30  ;;  %v9237_v36 = vpack.c.bf16 %v4050_v55, %v4046_v2 }
 0x999   :  { %10087 = vst [vmem:[#allocation62_spill] sm:$0xff] %v9230_v39 }
 0x99a   :  { %10089 = vst [vmem:[#allocation66_spill] sm:$0xff] %v9237_v36 }
 0x99b   :  { %6693 = vmatpush1.bf16.msra.mxu0 %v9222_v62  ;;  %6757 = vmatpush1.bf16.msra.mxu1 %v9226_v6 }
 0x99c   :  { %6695 = vmatprep.subr.bf16.mxu0 %v9228_v22  ;;  %6759 = vmatprep.subr.bf16.mxu1 %v9230_v39 }
 0x99f   :  { %6697 = vmatpush1.bf16.msra.mxu0 %v9233_v18  ;;  %6761 = vmatpush1.bf16.msra.mxu1 %v9237_v36 }
 0x9a0   :  { %6763 = vmatprep.subr.bf16.mxu0 %v8944_v63  ;;  %6795 = vmatprep.subr.bf16.mxu1 %v8946_v52 }
 0xa15   :  { %v3589_v19 = vpop.f32.mrb[22].mxu0  ;;  %v3660_v10 = vpop.f32.mrb[30].mxu1 }
 0xa16   :  { %v3590_v50 = vadd.f32 %v3589_v19, %v10040_v46  ;;  %v3591_v12 = vpop.f32.mrb[23].mxu0  ;;  %v3662_v49 = vpop.f32.mrb[31].mxu1  ;;  %v3661_v36 = vadd.f32 %v3660_v10, %v8072_v27 }
 0xa17   :  { %v3592_v26 = vadd.f32 %v3591_v12, %v8061_v37  ;;  %v3663_v55 = vadd.f32 %v3662_v49, %v10041_v5 }
 0xa18   :  { %v5261_v2 = vmul.f32 -1.442695, %v3590_v50 }
 0xa19   :  { %v5262_v48 = vmul.f32 -1.442695, %v3592_v26  ;;  %v5263_v18 = vmul.f32 -1.442695, %v3663_v55 }
 0xa1a   :  { %7181 = vpow2.f32 %v5261_v2 }
 0xa1b   :  { %7183 = vpow2.f32 %v5262_v48 }
 0xa1c   :  { %7185 = vpow2.f32 %v5263_v18 }
 0xa1d   :  { %7187 = vtanh.f32 %v3661_v36 }
 0xa24   :  { %v7182_v63 = vpop.eup %7181 }
 0xa25   :  { %v7184_v39 = vpop.eup %7183  ;;  %v3668_v52 = vadd.f32 1.0, %v7182_v63 }
 0xa26   :  { %v3674_v22 = vadd.f32 1.0, %v7184_v39  ;;  %v7186_v19 = vpop.eup %7185 }
 0xa27   :  { %7189 = vrcp.f32 %v3668_v52  ;;  %v7188_v46 = vpop.eup %7187  ;;  %v3681_v2 = vadd.f32 1.0, %v7186_v19 }
 0xa28   :  { %7191 = vrcp.f32 %v3674_v22 }
 0xa29   :  { %7193 = vrcp.f32 %v3681_v2 }
 0xa31   :  { %v7190_v12 = vpop.eup %7189 }
 0xa32   :  { %v7192_v50 = vpop.eup %7191  ;;  %v3685_v26 = vmul.f32 %v7190_v12, %v7188_v46 }
 0xa33   :  { %v3684_v48 = vmul.f32 %v7192_v50, %v8955_v7  ;;  %v7194_v7 = vpop.eup %7193 }
 0xa35   :  { %v3820_v49 = vpop.f32.mrb[24].mxu0  ;;  %v3891_v55 = vpop.f32.mrb[32].mxu1  ;;  %v9249_v5 = vadd.f32 %v3685_v26, %v3684_v48 }
 0xa36   :  { %v3896_v10 = vadd.f32 %v3820_v49, %v9844_v60  ;;  %v3822_v18 = vpop.f32.mrb[25].mxu0  ;;  %v3893_v36 = vpop.f32.mrb[33].mxu1  ;;  %v3898_v12 = vadd.f32 %v3891_v55, %v7917_v23 }
 0xa37   :  { %v3897_v39 = vadd.f32 %v3822_v18, %v9845_v58  ;;  %7195 = vtanh.f32 %v9249_v5  ;;  %v3899_v46 = vadd.f32 %v3893_v36, %v7919_v44 }
 0xa38   :  { %v5264_v22 = vmul.f32 -1.442695, %v3896_v10 }
 0xa39   :  { %v5265_v63 = vmul.f32 -1.442695, %v3897_v39  ;;  %v5266_v19 = vmul.f32 -1.442695, %v3899_v46 }
 0xa3a   :  { %7197 = vpow2.f32 %v5264_v22 }
 0xa3b   :  { %7199 = vpow2.f32 %v5265_v63 }
 0xa3c   :  { %7201 = vpow2.f32 %v5266_v19 }
 0xa3d   :  { %7203 = vtanh.f32 %v3898_v12  ;;  %v4252_v12 = vld [vmem:[#allocation5 + $0x108] sm:$0xff] }
 0xa41   :  { %v7196_v52 = vpop.eup %7195 }
 0xa42   :  { %v9256_v50 = vmul.f32 %v7196_v52, %v7194_v7 }
 0xa44   :  { %v7198_v26 = vpop.eup %7197  ;;  %4116 = vmatprep.mubr.f32.mxu0 %v9256_v50  ;;  %4187 = vmatprep.mubr.f32.mxu1 %v9256_v50 }
 0xa45   :  { %v7200_v2 = vpop.eup %7199  ;;  %v3903_v48 = vadd.f32 1.0, %v7198_v26  ;;  %v4259_v26 = vld [vmem:[#allocation5 + $0x140] sm:$0xff] }
 0xa46   :  { %v3909_v49 = vadd.f32 1.0, %v7200_v2  ;;  %v7202_v10 = vpop.eup %7201  ;;  %v4268_v2 = vld [vmem:[#allocation5 + $0x188] sm:$0xff] }
 0xa47   :  { %7205 = vrcp.f32 %v3903_v48  ;;  %v7204_v18 = vpop.eup %7203  ;;  %v3916_v55 = vadd.f32 1.0, %v7202_v10  ;;  %v4272_v48 = vld [vmem:[#allocation5 + $0x1a8] sm:$0xff]  ;;  %v4271_v10 = vld [vmem:[#allocation5 + $0x1a0] sm:$0xff] }
 0xa48   :  { %7207 = vrcp.f32 %v3909_v49  ;;  %v4267_v49 = vld [vmem:[#allocation5 + $0x180] sm:$0xff] }
 0xa49   :  { %7209 = vrcp.f32 %v3916_v55  ;;  %v10109_v55 = vld [vmem:[#allocation37_spill] sm:$0xff] }
 0xa51   :  { %v7206_v36 = vpop.eup %7205 }
 0xa52   :  { %v7208_v39 = vpop.eup %7207  ;;  %v3920_v22 = vmul.f32 %v7206_v36, %v7204_v18  ;;  %v4280_v18 = vld [vmem:[#allocation5 + $0x1e8] sm:$0xff] }
 0xa53   :  { %v3919_v63 = vmul.f32 %v7208_v39, %v8967_v42  ;;  %v7210_v7 = vpop.eup %7209  ;;  %v4243_v42 = vld [vmem:[#allocation5 + $0xc0] sm:$0xff] }
 0xa54   :  { %v4275_v39 = vld [vmem:[#allocation5 + $0x1c0] sm:$0xff] }
 0xa55   :  { %v9261_v46 = vadd.f32 %v3920_v22, %v3919_v63  ;;  %v4279_v22 = vld [vmem:[#allocation5 + $0x1e0] sm:$0xff]  ;;  %v10110_v63 = vld [vmem:[#allocation38_spill] sm:$0xff] }
 0xa57   :  { %7211 = vtanh.f32 %v9261_v46 }
 0xa61   :  { %v7212_v52 = vpop.eup %7211 }
 0xa62   :  { %v9264_v19 = vmul.f32 %v7212_v52, %v7210_v7  ;;  %v10111_v7 = vld [vmem:[#allocation39_spill] sm:$0xff]  ;;  %v10112_v52 = vld [vmem:[#allocation40_spill] sm:$0xff] }
 0xa64   :  { %4117 = vmatmul.mubr.f32.vlgmr.msra.gmra.mrb[26].mxu0 %v9264_v19  ;;  %4188 = vmatmul.mubr.f32.vlgmr.msra.gmra.mrb[34].mxu1 %v9264_v19 }
 0xa65   :  { %6765 = vmatpush1.bf16.msra.mxu0 %v8970_v34  ;;  %6797 = vmatpush1.bf16.msra.mxu1 %v8972_v24  ;;  %v4247_v34 = vld [vmem:[#allocation5 + $0xe0] sm:$0xff]  ;;  %v4256_v24 = vld [vmem:[#allocation5 + $0x128] sm:$0xff] }
 0xa66   :  { %6767 = vmatprep.subr.bf16.mxu0 %v8976_v17  ;;  %6799 = vmatprep.subr.bf16.mxu1 %v8978_v32  ;;  %v6776_v17 = vpack.c.bf16 %v4247_v34, %v4243_v42  ;;  %v4251_v32 = vld [vmem:[#allocation5 + $0x100] sm:$0xff]  ;;  %v10114_v42 = vld [vmem:[#allocation42_spill] sm:$0xff]  ;;  %v10115_v34 = vld [vmem:[#allocation43_spill] sm:$0xff] }
 0xa67   :  { %4347 = vmatprep.mubr.f32.mxu0 %v9797_v4  ;;  %4418 = vmatprep.mubr.f32.mxu1 %v9797_v4  ;;  %v6778_v4 = vpack.c.bf16 %v4256_v24, %v4252_v12  ;;  %v10116_v12 = vld [vmem:[#allocation44_spill] sm:$0xff]  ;;  %v10117_v24 = vld [vmem:[#allocation45_spill] sm:$0xff] }
 0xa69   :  { %6769 = vmatpush1.bf16.msra.mxu0 %v8984_v28  ;;  %6801 = vmatpush1.bf16.msra.mxu1 %v8986_v51  ;;  %v4255_v28 = vld [vmem:[#allocation5 + $0x120] sm:$0xff]  ;;  %v4260_v51 = vld [vmem:[#allocation5 + $0x148] sm:$0xff] }
 0xa6a   :  { %6771 = vmatprep.subr.bf16.mxu0 %v8990_v29  ;;  %6803 = vmatprep.subr.bf16.mxu1 %v8992_v45  ;;  %v4264_v29 = vld [vmem:[#allocation5 + $0x168] sm:$0xff]  ;;  %v6780_v45 = vpack.c.bf16 %v4255_v28, %v4251_v32  ;;  %v10120_v32 = vld [vmem:[#allocation48_spill] sm:$0xff]  ;;  %v10121_v28 = vld [vmem:[#allocation49_spill] sm:$0xff] }
 0xa6d   :  { %6773 = vmatpush1.bf16.msra.mxu0 %v8998_v33  ;;  %6805 = vmatpush1.bf16.msra.mxu1 %v9000_v11  ;;  %v6782_v33 = vpack.c.bf16 %v4264_v29, %v4260_v51  ;;  %v4263_v11 = vld [vmem:[#allocation5 + $0x160] sm:$0xff]  ;;  %v10122_v51 = vld [vmem:[#allocation50_spill] sm:$0xff]  ;;  %v10123_v29 = vld [vmem:[#allocation51_spill] sm:$0xff] }
 0xa6e   :  { %6775 = vmatprep.subr.bf16.mxu0 %v9004_v21  ;;  %6807 = vmatprep.subr.bf16.mxu1 %v9006_v15  ;;  %v6784_v21 = vpack.c.bf16 %v4263_v11, %v4259_v26  ;;  %v6786_v15 = vpack.c.bf16 %v4272_v48, %v4268_v2  ;;  %v10126_v26 = vld [vmem:[#allocation55_spill] sm:$0xff]  ;;  %v10127_v11 = vld [vmem:[#allocation54_spill] sm:$0xff]  ;;  %v10128_v2 = vld [vmem:[#allocation56_spill] sm:$0xff] }
 0xa6f   :  { %v10129_v48 = vld [vmem:[#allocation57_spill] sm:$0xff] }
 0xa71   :  { %6777 = vmatpush1.bf16.msra.mxu0 %v6776_v17  ;;  %6809 = vmatpush1.bf16.msra.mxu1 %v9010_v47  ;;  %v4276_v47 = vld [vmem:[#allocation5 + $0x1c8] sm:$0xff] }
 0xa72   :  { %6779 = vmatprep.subr.bf16.mxu0 %v6778_v4  ;;  %6811 = vmatprep.subr.bf16.mxu1 %v9014_v40  ;;  %v6788_v40 = vpack.c.bf16 %v4271_v10, %v4267_v49  ;;  %v6790_v36 = vpack.c.bf16 %v4280_v18, %v4276_v47  ;;  %v10118_v17 = vld [vmem:[#allocation46_spill] sm:$0xff]  ;;  %v10119_v4 = vld [vmem:[#allocation47_spill] sm:$0xff]  ;;  %v10132_v49 = vld [vmem:[#allocation60_spill] sm:$0xff] }
 0xa73   :  { %v10133_v10 = vld [vmem:[#allocation61_spill] sm:$0xff]  ;;  %v10134_v47 = vld [vmem:[#allocation62_spill] sm:$0xff]  ;;  %v10135_v18 = vld [vmem:[#allocation64_spill] sm:$0xff] }
 0xa75   :  { %6781 = vmatpush1.bf16.msra.mxu0 %v6780_v45  ;;  %6813 = vmatpush1.bf16.msra.mxu1 %v9018_v1  ;;  %v6792_v1 = vpack.c.bf16 %v4279_v22, %v4275_v39  ;;  %v10124_v45 = vld [vmem:[#allocation52_spill] sm:$0xff]  ;;  %v4757_v39 = vld [vmem:[#allocation8 + $0x8] sm:$0xff] }
 0xa76   :  { %6783 = vmatprep.subr.bf16.mxu0 %v6782_v33  ;;  %6815 = vmatprep.subr.bf16.mxu1 %v9022_v25  ;;  %v10090_v25 = vld [vmem:[#allocation18_spill] sm:$0xff]  ;;  %v10125_v33 = vld [vmem:[#allocation53_spill] sm:$0xff] }
 0xa79   :  { %6785 = vmatpush1.bf16.msra.mxu0 %v6784_v21  ;;  %6817 = vmatpush1.bf16.msra.mxu1 %v9026_v31  ;;  %v10091_v31 = vld [vmem:[#allocation19_spill] sm:$0xff]  ;;  %v10130_v21 = vld [vmem:[#allocation58_spill] sm:$0xff] }
 0xa7a   :  { %6787 = vmatprep.subr.bf16.mxu0 %v6786_v15  ;;  %6819 = vmatprep.subr.bf16.mxu1 %v9030_v43  ;;  %v10092_v43 = vld [vmem:[#allocation20_spill] sm:$0xff]  ;;  %v10131_v15 = vld [vmem:[#allocation59_spill] sm:$0xff] }
 0xa7d   :  { %6789 = vmatpush1.bf16.msra.mxu0 %v6788_v40  ;;  %6821 = vmatpush1.bf16.msra.mxu1 %v9034_v41  ;;  %v10093_v41 = vld [vmem:[#allocation21_spill] sm:$0xff]  ;;  %v10136_v40 = vld [vmem:[#allocation66_spill] sm:$0xff] }
 0xa7e   :  { %6791 = vmatprep.subr.bf16.mxu0 %v6790_v36  ;;  %6823 = vmatprep.subr.bf16.mxu1 %v9038_v59  ;;  %v10094_v59 = vld [vmem:[#allocation22_spill] sm:$0xff]  ;;  %v4756_v36 = vld [vmem:[#allocation8] sm:$0xff] }
 0xa7f   :  { %v9357_v22 = vpack.c.bf16 %v4757_v39, %v4756_v36  ;;  %v4760_v36 = vld [vmem:[#allocation8 + $0x20] sm:$0xff]  ;;  %v4761_v39 = vld [vmem:[#allocation8 + $0x28] sm:$0xff] }
 0xa81   :  { %6793 = vmatpush1.bf16.msra.mxu0 %v6792_v1  ;;  %6825 = vmatpush1.bf16.msra.mxu1 %v9042_v14  ;;  %v10095_v14 = vld [vmem:[#allocation23_spill] sm:$0xff]  ;;  %v10137_v1 = vld [vmem:[#allocation13_spill] sm:$0xff] }
 0xa82   :  { %6827 = vmatprep.subr.bf16.mxu0 %v9050_v0  ;;  %6891 = vmatprep.subr.bf16.mxu1 %v9052_v57  ;;  %v10096_v0 = vld [vmem:[#allocation24_spill] sm:$0xff]  ;;  %v10097_v57 = vld [vmem:[#allocation25_spill] sm:$0xff] }
 0xa84   :  { %4348 = vmatmul.mubr.f32.vlgmr.msra.gmra.mrb[28].mxu0 %v9264_v19  ;;  %4419 = vmatmul.mubr.f32.vlgmr.msra.gmra.mrb[36].mxu1 %v9264_v19  ;;  %v10113_v19 = vld [vmem:[#allocation41_spill] sm:$0xff] }
 0xa85   :  { %6829 = vmatpush1.bf16.msra.mxu0 %v9054_v16  ;;  %6893 = vmatpush1.bf16.msra.mxu1 %v9057_v9  ;;  %v10098_v16 = vld [vmem:[#allocation26_spill] sm:$0xff]  ;;  %v10099_v9 = vld [vmem:[#allocation27_spill] sm:$0xff] }
 0xa86   :  { %6831 = vmatprep.subr.bf16.mxu0 %v9062_v56  ;;  %6895 = vmatprep.subr.bf16.mxu1 %v9064_v38  ;;  %v10100_v56 = vld [vmem:[#allocation28_spill] sm:$0xff]  ;;  %v10101_v38 = vld [vmem:[#allocation29_spill] sm:$0xff] }
 0xa89   :  { %6833 = vmatpush1.bf16.msra.mxu0 %v9066_v3  ;;  %6897 = vmatpush1.bf16.msra.mxu1 %v9069_v8  ;;  %v10102_v3 = vld [vmem:[#allocation30_spill] sm:$0xff]  ;;  %v10103_v8 = vld [vmem:[#allocation31_spill] sm:$0xff] }
 0xa8a   :  { %6835 = vmatprep.subr.bf16.mxu0 %v9074_v53  ;;  %6899 = vmatprep.subr.bf16.mxu1 %v9076_v13  ;;  %v10104_v53 = vld [vmem:[#allocation32_spill] sm:$0xff]  ;;  %v10105_v13 = vld [vmem:[#allocation33_spill] sm:$0xff] }
 0xa8d   :  { %6837 = vmatpush1.bf16.msra.mxu0 %v9078_v20  ;;  %6901 = vmatpush1.bf16.msra.mxu1 %v9081_v54  ;;  %v10106_v20 = vld [vmem:[#allocation34_spill] sm:$0xff]  ;;  %v10107_v54 = vld [vmem:[#allocation35_spill] sm:$0xff] }
 0xa8e   :  { %6839 = vmatprep.subr.bf16.mxu0 %v9086_v35  ;;  %6903 = vmatprep.subr.bf16.mxu1 %v10090_v25  ;;  %v10108_v35 = vld [vmem:[#allocation36_spill] sm:$0xff] }
 0xa91   :  { %6841 = vmatpush1.bf16.msra.mxu0 %v10091_v31  ;;  %6905 = vmatpush1.bf16.msra.mxu1 %v10092_v43 }
 0xa92   :  { %6843 = vmatprep.subr.bf16.mxu0 %v10093_v41  ;;  %6907 = vmatprep.subr.bf16.mxu1 %v10094_v59  ;;  %v10138_v59 = vld [vmem:[#allocation14_spill] sm:$0xff] }
 0xa95   :  { %6845 = vmatpush1.bf16.msra.mxu0 %v10095_v14  ;;  %6909 = vmatpush1.bf16.msra.mxu1 %v10096_v0 }
 0xa96   :  { %6847 = vmatprep.subr.bf16.mxu0 %v10097_v57  ;;  %6911 = vmatprep.subr.bf16.mxu1 %v10098_v16 }
 0xa99   :  { %6849 = vmatpush1.bf16.msra.mxu0 %v10099_v9  ;;  %6913 = vmatpush1.bf16.msra.mxu1 %v10100_v56 }
 0xa9a   :  { %6851 = vmatprep.subr.bf16.mxu0 %v10101_v38  ;;  %6915 = vmatprep.subr.bf16.mxu1 %v10102_v3 }
 0xa9d   :  { %6853 = vmatpush1.bf16.msra.mxu0 %v10103_v8  ;;  %6917 = vmatpush1.bf16.msra.mxu1 %v10104_v53 }
 0xa9e   :  { %6855 = vmatprep.subr.bf16.mxu0 %v10105_v13  ;;  %6919 = vmatprep.subr.bf16.mxu1 %v10106_v20 }
 0xaa1   :  { %6857 = vmatpush1.bf16.msra.mxu0 %v10107_v54  ;;  %6921 = vmatpush1.bf16.msra.mxu1 %v10108_v35 }
 0xaa2   :  { %6859 = vmatprep.subr.bf16.mxu0 %v10109_v55  ;;  %6923 = vmatprep.subr.bf16.mxu1 %v10110_v63 }
 0xaa5   :  { %6861 = vmatpush1.bf16.msra.mxu0 %v10111_v7  ;;  %6925 = vmatpush1.bf16.msra.mxu1 %v10112_v52 }
 0xaa6   :  { %6863 = vmatprep.subr.bf16.mxu0 %v10113_v19  ;;  %6927 = vmatprep.subr.bf16.mxu1 %v10114_v42 }
 0xaa9   :  { %6865 = vmatpush1.bf16.msra.mxu0 %v10115_v34  ;;  %6929 = vmatpush1.bf16.msra.mxu1 %v10116_v12 }
 0xaaa   :  { %6867 = vmatprep.subr.bf16.mxu0 %v10117_v24  ;;  %6931 = vmatprep.subr.bf16.mxu1 %v10118_v17 }
 0xaad   :  { %6869 = vmatpush1.bf16.msra.mxu0 %v10119_v4  ;;  %6933 = vmatpush1.bf16.msra.mxu1 %v10120_v32 }
 0xaae   :  { %6871 = vmatprep.subr.bf16.mxu0 %v10121_v28  ;;  %6935 = vmatprep.subr.bf16.mxu1 %v10122_v51 }
 0xab1   :  { %6873 = vmatpush1.bf16.msra.mxu0 %v10123_v29  ;;  %6937 = vmatpush1.bf16.msra.mxu1 %v10124_v45 }
 0xab2   :  { %6875 = vmatprep.subr.bf16.mxu0 %v10125_v33  ;;  %6939 = vmatprep.subr.bf16.mxu1 %v10126_v26 }
 0xab5   :  { %6877 = vmatpush1.bf16.msra.mxu0 %v10127_v11  ;;  %6941 = vmatpush1.bf16.msra.mxu1 %v10128_v2 }
 0xab6   :  { %6879 = vmatprep.subr.bf16.mxu0 %v10129_v48  ;;  %6943 = vmatprep.subr.bf16.mxu1 %v10130_v21 }
 0xab9   :  { %6881 = vmatpush1.bf16.msra.mxu0 %v10131_v15  ;;  %6945 = vmatpush1.bf16.msra.mxu1 %v10132_v49  ;;  %v4758_v15 = vld [vmem:[#allocation8 + $0x10] sm:$0xff]  ;;  %v4759_v49 = vld [vmem:[#allocation8 + $0x18] sm:$0xff] }
 0xaba   :  { %6883 = vmatprep.subr.bf16.mxu0 %v9217_v61  ;;  %6947 = vmatprep.subr.bf16.mxu1 %v9219_v30 }
 0xabd   :  { %6885 = vmatpush1.bf16.msra.mxu0 %v9222_v62  ;;  %6949 = vmatpush1.bf16.msra.mxu1 %v9226_v6 }
 0xabe   :  { %6887 = vmatprep.subr.bf16.mxu0 %v10133_v10  ;;  %6951 = vmatprep.subr.bf16.mxu1 %v10134_v47 }
 0xac1   :  { %6889 = vmatpush1.bf16.msra.mxu0 %v10135_v18  ;;  %6953 = vmatpush1.bf16.msra.mxu1 %v10136_v40  ;;  %v6958_v40 = vpack.c.bf16 %v4759_v49, %v4758_v15 }
 0xac2   :  { %6955 = vmatprep.subr.bf16.mxu0 %v9357_v22 }
 0xb37   :  { %v4118_v61 = vpop.f32.mrb[26].mxu0  ;;  %v4189_v30 = vpop.f32.mrb[34].mxu1 }
 0xb38   :  { %v4119_v62 = vadd.f32 %v4118_v61, %v10137_v1  ;;  %v4120_v25 = vpop.f32.mrb[27].mxu0  ;;  %v4191_v6 = vpop.f32.mrb[35].mxu1  ;;  %v4190_v57 = vadd.f32 %v4189_v30, %v8072_v27  ;;  %v10139_v61 = vld [vmem:[#allocation15_spill] sm:$0xff]  ;;  %v6962_v30 = vpack.c.bf16 %v4761_v39, %v4760_v36 }
 0xb39   :  { %v4121_v31 = vadd.f32 %v4120_v25, %v8061_v37  ;;  %v4192_v14 = vadd.f32 %v4191_v6, %v10138_v59  ;;  %v4764_v6 = vld [vmem:[#allocation8 + $0x40] sm:$0xff] }
 0xb3a   :  { %v5267_v43 = vmul.f32 -1.442695, %v4119_v62  ;;  %v4763_v62 = vld [vmem:[#allocation8 + $0x38] sm:$0xff] }
 0xb3b   :  { %v5268_v41 = vmul.f32 -1.442695, %v4121_v31  ;;  %v5269_v0 = vmul.f32 -1.442695, %v4192_v14  ;;  %v4765_v31 = vld [vmem:[#allocation8 + $0x48] sm:$0xff]  ;;  %v4767_v14 = vld [vmem:[#allocation8 + $0x58] sm:$0xff] }
 0xb3c   :  { %7213 = vpow2.f32 %v5267_v43  ;;  %v6970_v43 = vpack.c.bf16 %v4765_v31, %v4764_v6 }
 0xb3d   :  { %7215 = vpow2.f32 %v5268_v41  ;;  %v4766_v41 = vld [vmem:[#allocation8 + $0x50] sm:$0xff] }
 0xb3e   :  { %7217 = vpow2.f32 %v5269_v0  ;;  %v6974_v0 = vpack.c.bf16 %v4767_v14, %v4766_v41 }
 0xb3f   :  { %7219 = vtanh.f32 %v4190_v57  ;;  %v4769_v57 = vld [vmem:[#allocation8 + $0x68] sm:$0xff] }
 0xb46   :  { %v7214_v16 = vpop.eup %7213 }
 0xb47   :  { %v7216_v9 = vpop.eup %7215  ;;  %v4197_v56 = vadd.f32 1.0, %v7214_v16 }
 0xb48   :  { %v4203_v38 = vadd.f32 1.0, %v7216_v9  ;;  %v7218_v3 = vpop.eup %7217  ;;  %v4770_v9 = vld [vmem:[#allocation8 + $0x70] sm:$0xff] }
 0xb49   :  { %7221 = vrcp.f32 %v4197_v56  ;;  %v7220_v8 = vpop.eup %7219  ;;  %v4210_v54 = vadd.f32 1.0, %v7218_v3  ;;  %v4771_v56 = vld [vmem:[#allocation8 + $0x78] sm:$0xff]  ;;  %v10140_v3 = vld [vmem:[#allocation63_spill] sm:$0xff] }
 0xb4a   :  { %7223 = vrcp.f32 %v4203_v38  ;;  %v6982_v38 = vpack.c.bf16 %v4771_v56, %v4770_v9 }
 0xb4b   :  { %7225 = vrcp.f32 %v4210_v54 }
 0xb53   :  { %v7222_v53 = vpop.eup %7221 }
 0xb54   :  { %v7224_v13 = vpop.eup %7223  ;;  %v4214_v20 = vmul.f32 %v7222_v53, %v7220_v8  ;;  %v10141_v8 = vld [vmem:[#allocation16_spill] sm:$0xff]  ;;  %v10142_v53 = vld [vmem:[#allocation65_spill] sm:$0xff] }
 0xb55   :  { %v4213_v35 = vmul.f32 %v7224_v13, %v9249_v5  ;;  %v7226_v5 = vpop.eup %7225  ;;  %v10143_v13 = vld [vmem:[#allocation17_spill] sm:$0xff] }
 0xb57   :  { %v4349_v55 = vpop.f32.mrb[28].mxu0  ;;  %v4420_v63 = vpop.f32.mrb[36].mxu1  ;;  %v9365_v7 = vadd.f32 %v4214_v20, %v4213_v35 }
 0xb58   :  { %v4425_v52 = vadd.f32 %v4349_v55, %v9844_v60  ;;  %v4351_v19 = vpop.f32.mrb[29].mxu0  ;;  %v4422_v42 = vpop.f32.mrb[37].mxu1  ;;  %v4427_v28 = vadd.f32 %v4420_v63, %v7917_v23 }
 0xb59   :  { %v4426_v34 = vadd.f32 %v4351_v19, %v9845_v58  ;;  %7227 = vtanh.f32 %v9365_v7  ;;  %v4428_v17 = vadd.f32 %v4422_v42, %v7919_v44 }
 0xb5a   :  { %v5270_v12 = vmul.f32 -1.442695, %v4425_v52 }
 0xb5b   :  { %v5271_v24 = vmul.f32 -1.442695, %v4426_v34  ;;  %v5272_v32 = vmul.f32 -1.442695, %v4428_v17 }
 0xb5c   :  { %7229 = vpow2.f32 %v5270_v12 }
 0xb5d   :  { %7231 = vpow2.f32 %v5271_v24 }
 0xb5e   :  { %7233 = vpow2.f32 %v5272_v32 }
 0xb5f   :  { %7235 = vtanh.f32 %v4427_v28 }
 0xb63   :  { %v7228_v4 = vpop.eup %7227 }
 0xb64   :  { %v9372_v51 = vmul.f32 %v7228_v4, %v7226_v5 }
 0xb66   :  { %v7230_v60 = vpop.eup %7229  ;;  %4645 = vmatprep.mubr.f32.mxu0 %v9372_v51  ;;  %4716 = vmatprep.mubr.f32.mxu1 %v9372_v51 }
 0xb67   :  { %v7232_v58 = vpop.eup %7231  ;;  %v4432_v29 = vadd.f32 1.0, %v7230_v60 }
 0xb68   :  { %v4438_v45 = vadd.f32 1.0, %v7232_v58  ;;  %v7234_v44 = vpop.eup %7233 }
 0xb69   :  { %7237 = vrcp.f32 %v4432_v29  ;;  %v7236_v33 = vpop.eup %7235  ;;  %v4445_v23 = vadd.f32 1.0, %v7234_v44 }
 0xb6a   :  { %7239 = vrcp.f32 %v4438_v45 }
 0xb6b   :  { %7241 = vrcp.f32 %v4445_v23 }
 0xb73   :  { %v7238_v26 = vpop.eup %7237 }
 0xb74   :  { %v7240_v11 = vpop.eup %7239  ;;  %v4449_v2 = vmul.f32 %v7238_v26, %v7236_v33 }
 0xb75   :  { %v4448_v48 = vmul.f32 %v7240_v11, %v9261_v46  ;;  %v7242_v10 = vpop.eup %7241  ;;  %v4762_v46 = vld [vmem:[#allocation8 + $0x30] sm:$0xff] }
 0xb76   :  { %v6966_v25 = vpack.c.bf16 %v4763_v62, %v4762_v46 }
 0xb77   :  { %v4450_v21 = vadd.f32 %v4449_v2, %v4448_v48 }
 0xb79   :  { %7243 = vtanh.f32 %v4450_v21 }
 0xb83   :  { %v7244_v47 = vpop.eup %7243 }
 0xb84   :  { %v4452_v18 = vmul.f32 %v7244_v47, %v7242_v10 }
 0xb86   :  { %4646 = vmatmul.mubr.f32.vlgmr.msra.gmra.mrb[30].mxu0 %v4452_v18  ;;  %4717 = vmatmul.mubr.f32.vlgmr.msra.gmra.mrb[38].mxu1 %v4452_v18 }
 0xb87   :  { %6957 = vmatpush3.bf16.msra.mxu0 %v9357_v22  ;;  %5371 = vmatprep.mubr.f32.mxu0 %v10139_v61  ;;  %v4768_v22 = vld [vmem:[#allocation8 + $0x60] sm:$0xff] }
 0xb88   :  { %6959 = vmatprep.subr.bf16.mxu0 %v6958_v40  ;;  %v6978_v16 = vpack.c.bf16 %v4769_v57, %v4768_v22 }
 0xb8b   :  { %6961 = vmatpush3.bf16.msra.mxu0 %v6958_v40 }
 0xb8c   :  { %6963 = vmatprep.subr.bf16.mxu0 %v6962_v30 }
 0xb8f   :  { %6965 = vmatpush3.bf16.msra.mxu0 %v6962_v30 }
 0xb90   :  { %6967 = vmatprep.subr.bf16.mxu0 %v6966_v25 }
 0xb93   :  { %6969 = vmatpush3.bf16.msra.mxu0 %v6966_v25 }
 0xb94   :  { %6971 = vmatprep.subr.bf16.mxu0 %v6970_v43 }
 0xb97   :  { %6973 = vmatpush3.bf16.msra.mxu0 %v6970_v43 }
 0xb98   :  { %6975 = vmatprep.subr.bf16.mxu0 %v6974_v0 }
 0xb9b   :  { %6977 = vmatpush3.bf16.msra.mxu0 %v6974_v0 }
 0xb9c   :  { %6979 = vmatprep.subr.bf16.mxu0 %v6978_v16 }
 0xb9f   :  { %6981 = vmatpush3.bf16.msra.mxu0 %v6978_v16 }
 0xba0   :  { %6983 = vmatprep.subr.bf16.mxu0 %v6982_v38 }
 0xba3   :  { %6985 = vmatpush3.bf16.msra.mxu0 %v6982_v38 }
 0xba6   :  { %5372 = vmatmul.mubr.f32.vlgmr.msra.gmra.mrb[32].mxu0 %v10140_v3 }
 0xba7   :  { %5374 = vmatprep.mubr.f32.mxu0 %v10141_v8 }
 0xbaa   :  { %5375 = vmatmul.mubr.f32.gmra.mrb[34].mxu0 %v10142_v53 }
 0xbab   :  { %5377 = vmatprep.mubr.f32.mxu0 %v10143_v13 }
 0xbae   :  { %5378 = vmatmul.mubr.f32.gmra.mrb[36].mxu0 %v9256_v50 }
 0xbaf   :  { %5380 = vmatprep.mubr.f32.mxu0 %v9372_v51 }
 0xc59   :  { %v4647_v20 = vpop.f32.mrb[30].mxu0  ;;  %v4718_v54 = vpop.f32.mrb[38].mxu1 }
 0xc5a   :  { %v4648_v35 = vadd.f32 %v4647_v20, %v10137_v1  ;;  %v4649_v55 = vpop.f32.mrb[31].mxu0  ;;  %v4720_v63 = vpop.f32.mrb[39].mxu1  ;;  %v4719_v24 = vadd.f32 %v4718_v54, %v8072_v27  ;;  %v5276_v27 = vld [vmem:[%s9537_s13] ss:$0 sm:$0xff] }
 0xc5b   :  { %v4650_v52 = vadd.f32 %v4649_v55, %v8061_v37  ;;  %v4721_v34 = vadd.f32 %v4720_v63, %v10138_v59 }
 0xc5c   :  { %v5273_v19 = vmul.f32 -1.442695, %v4648_v35 }
 0xc5d   :  { %v5274_v42 = vmul.f32 -1.442695, %v4650_v52  ;;  %v5275_v12 = vmul.f32 -1.442695, %v4721_v34 }
 0xc5e   :  { %7245 = vpow2.f32 %v5273_v19 }
 0xc5f   :  { %7247 = vpow2.f32 %v5274_v42 }
 0xc60   :  { %7249 = vpow2.f32 %v5275_v12 }
 0xc61   :  { %7251 = vtanh.f32 %v4719_v24 }
 0xc68   :  { %v7246_v50 = vpop.eup %7245 }
 0xc69   :  { %v7248_v17 = vpop.eup %7247  ;;  %v4726_v5 = vadd.f32 1.0, %v7246_v50 }
 0xc6a   :  { %v4732_v4 = vadd.f32 1.0, %v7248_v17  ;;  %v7250_v1 = vpop.eup %7249 }
 0xc6b   :  { %7253 = vrcp.f32 %v4726_v5  ;;  %v7252_v32 = vpop.eup %7251  ;;  %v4739_v60 = vadd.f32 1.0, %v7250_v1 }
 0xc6c   :  { %7255 = vrcp.f32 %v4732_v4 }
 0xc6d   :  { %7257 = vrcp.f32 %v4739_v60 }
 0xc75   :  { %v7254_v37 = vpop.eup %7253 }
 0xc76   :  { %v7256_v28 = vpop.eup %7255  ;;  %v4743_v51 = vmul.f32 %v7254_v37, %v7252_v32  ;;  %v5059_v37 = vld [vmem:[%s9540_s16] sm:$0xff] }
 0xc77   :  { %v4742_v58 = vmul.f32 %v7256_v28, %v9365_v7  ;;  %v7258_v47 = vpop.eup %7257  ;;  %v5060_v28 = vld [vmem:[%s9540_s16 + $0x8] sm:$0xff] }
 0xc79   :  { %v5373_v59 = vpop.f32.mrb[32].mxu0  ;;  %v4744_v29 = vadd.f32 %v4743_v51, %v4742_v58  ;;  %v6986_v51 = vpack.c.bf16 %v5060_v28, %v5059_v37 }
 0xc7a   :  { %v4845_v45 = vpop.f32.mrb[33].mxu0  ;;  %v4851_v33 = vadd.f32 %v5373_v59, %v5276_v27 }
 0xc7b   :  { %v4846_v44 = vadd.f32 %v5276_v27, %v4845_v45  ;;  %7259 = vtanh.f32 %v4744_v29  ;;  %6987 = vmatprep.subr.bf16.mxu1 %v6986_v51 }
 0xc7c   :  { %v4889_v15 = vsel %vm193_vm2, %v4851_v33, 0.0  ;;  %6989 = vmatpush3.bf16.msra.mxu1 %v6986_v51 }
 0xc7d   :  { %v5376_v26 = vpop.f32.mrb[34].mxu0  ;;  %v4886_v11 = vsel %vm193_vm2, %v4846_v44, 0.0 }
 0xc7e   :  { %v4855_v2 = vpop.f32.mrb[35].mxu0  ;;  %4887 = vadd.xlane.f32.xlu1 %v4886_v11  ;;  %v4861_v48 = vadd.f32 %v5376_v26, %v5276_v27 }
 0xc7f   :  { %v4856_v23 = vadd.f32 %v5276_v27, %v4855_v2 }
 0xc80   :  { %v4895_v39 = vsel %vm193_vm2, %v4861_v48, 0.0 }
 0xc81   :  { %v5379_v21 = vpop.f32.mrb[36].mxu0  ;;  %v4892_v7 = vsel %vm193_vm2, %v4856_v23, 0.0 }
 0xc82   :  { %v4865_v49 = vpop.f32.mrb[37].mxu0  ;;  %4893 = vadd.xlane.f32.xlu0 %v4892_v7  ;;  %4890 = vadd.xlane.f32.xlu1 %v4889_v15  ;;  %v4871_v40 = vadd.f32 %v5379_v21, %v5276_v27 }
 0xc83   :  { %v4866_v10 = vadd.f32 %v5276_v27, %v4865_v49 }
 0xc84   :  { %v4901_v30 = vsel %vm193_vm2, %v4871_v40, 0.0 }
 0xc85   :  { %v7260_v18 = vpop.eup %7259  ;;  %v4898_v36 = vsel %vm193_vm2, %v4866_v10, 0.0 }
 0xc86   :  { %4899 = vadd.xlane.f32.xlu0 %v4898_v36  ;;  %4896 = vadd.xlane.f32.xlu1 %v4895_v39  ;;  %v4746_v61 = vmul.f32 %v7260_v18, %v7258_v47 }
 0xc88   :  { %5381 = vmatmul.mubr.f32.gmra.mrb[38].mxu0 %v4746_v61 }
 0xc8a   :  { %4902 = vadd.xlane.f32.xlu1 %v4901_v30 }
 0xd0b   :  { %v4888_v46 = vpop.xlane.xlu1 %4887 }
 0xd0c   :  { %v4911_v43 = vmul.f32 0.0625, %v4888_v46 }
 0xd0e   :  { %v9401_v0 = vsub.f32 %v4846_v44, %v4911_v43 }
 0xd0f   :  { %v4891_v62 = vpop.xlane.xlu1 %4890  ;;  %v4894_v6 = vpop.xlane.xlu0 %4893 }
 0xd10   :  { %v4912_v31 = vmul.f32 0.0625, %v4891_v62  ;;  %v4913_v22 = vmul.f32 0.0625, %v4894_v6  ;;  %v4927_v63 = vmul.f32 %v9401_v0, %v9401_v0 }
 0xd12   :  { %v9399_v41 = vsub.f32 %v4851_v33, %v4912_v31  ;;  %v9408_v54 = vsub.f32 %v4856_v23, %v4913_v22  ;;  %v4935_v12 = vsel %vm193_vm2, %v4927_v63, 0.0  ;;  %v9450_v31 = vld [vmem:[%s9538_s14] ss:$0 sm:$0xff] }
 0xd13   :  { %v4897_v25 = vpop.xlane.xlu1 %4896  ;;  %v4900_v9 = vpop.xlane.xlu0 %4899 }
 0xd14   :  { %v4914_v14 = vmul.f32 0.0625, %v4897_v25  ;;  %v4928_v20 = vmul.f32 %v9399_v41, %v9399_v41  ;;  %v4915_v35 = vmul.f32 0.0625, %v4900_v9  ;;  %v4929_v24 = vmul.f32 %v9408_v54, %v9408_v54 }
 0xd16   :  { %v9403_v8 = vsub.f32 %v4861_v48, %v4914_v14  ;;  %v4938_v19 = vsel %vm193_vm2, %v4928_v20, 0.0  ;;  %v9418_v34 = vsub.f32 %v4866_v10, %v4915_v35  ;;  %v4941_v5 = vsel %vm193_vm2, %v4929_v24, 0.0 }
 0xd17   :  { %v4903_v57 = vpop.xlane.xlu1 %4902 }
 0xd18   :  { %v4916_v53 = vmul.f32 0.0625, %v4903_v57  ;;  %v4930_v42 = vmul.f32 %v9403_v8, %v9403_v8  ;;  %v4931_v4 = vmul.f32 %v9418_v34, %v9418_v34  ;;  %v9457_v57 = vld [vmem:[%s9539_s15] ss:$0 sm:$0xff] }
 0xd1a   :  { %v9413_v52 = vsub.f32 %v4871_v40, %v4916_v53  ;;  %v4944_v50 = vsel %vm193_vm2, %v4930_v42, 0.0  ;;  %v4947_v32 = vsel %vm193_vm2, %v4931_v4, 0.0 }
 0xd1c   :  { %v4932_v17 = vmul.f32 %v9413_v52, %v9413_v52 }
 0xd1e   :  { %v4950_v1 = vsel %vm193_vm2, %v4932_v17, 0.0 }
 0xd5b   :  { %v5382_v16 = vpop.f32.mrb[38].mxu0 }
 0xd5c   :  { %v4881_v56 = vadd.f32 %v5382_v16, %v5276_v27  ;;  %v4875_v38 = vpop.f32.mrb[39].mxu0 }
 0xd5d   :  { %v4876_v3 = vadd.f32 %v5276_v27, %v4875_v38 }
 0xd5e   :  { %v4907_v13 = vsel %vm193_vm2, %v4881_v56, 0.0 }
 0xd5f   :  { %4908 = vadd.xlane.f32.xlu1 %v4907_v13  ;;  %v4904_v55 = vsel %vm193_vm2, %v4876_v3, 0.0 }
 0xd60   :  { %4905 = vadd.xlane.f32.xlu0 %v4904_v55 }
 0xd63   :  { %4939 = vadd.xlane.f32.xlu1 %v4938_v19 }
 0xd64   :  { %4936 = vadd.xlane.f32.xlu0 %v4935_v12 }
 0xd67   :  { %4945 = vadd.xlane.f32.xlu1 %v4944_v50 }
 0xd68   :  { %4942 = vadd.xlane.f32.xlu0 %v4941_v5 }
 0xd6b   :  { %4951 = vadd.xlane.f32.xlu1 %v4950_v1 }
 0xd6c   :  { %4948 = vadd.xlane.f32.xlu0 %v4947_v32 }
 0xdec   :  { %v4909_v60 = vpop.xlane.xlu1 %4908 }
 0xded   :  { %v4918_v58 = vmul.f32 0.0625, %v4909_v60  ;;  %v4906_v27 = vpop.xlane.xlu0 %4905 }
 0xdee   :  { %v4917_v59 = vmul.f32 0.0625, %v4906_v27 }
 0xdef   :  { %v9437_v29 = vsub.f32 %v4881_v56, %v4918_v58 }
 0xdf0   :  { %v9439_v45 = vsub.f32 %v4876_v3, %v4917_v59  ;;  %v4940_v44 = vpop.xlane.xlu1 %4939 }
 0xdf1   :  { %v4960_v33 = vmul.f32 0.0625, %v4940_v44  ;;  %v4937_v26 = vpop.xlane.xlu0 %4936  ;;  %v4934_v11 = vmul.f32 %v9437_v29, %v9437_v29 }
 0xdf2   :  { %v4959_v2 = vmul.f32 0.0625, %v4937_v26  ;;  %v4933_v23 = vmul.f32 %v9439_v45, %v9439_v45 }
 0xdf3   :  { %v4968_v48 = vadd.f32 1e-05, %v4960_v33  ;;  %v4956_v21 = vsel %vm193_vm2, %v4934_v11, 0.0 }
 0xdf4   :  { %v4967_v7 = vadd.f32 1e-05, %v4959_v2  ;;  %4957 = vadd.xlane.f32.xlu1 %v4956_v21  ;;  %v4946_v15 = vpop.xlane.xlu1 %4945  ;;  %v4953_v49 = vsel %vm193_vm2, %v4933_v23, 0.0 }
 0xdf5   :  { %7261 = vrsqrt.f32 %v4968_v48  ;;  %v4962_v10 = vmul.f32 0.0625, %v4946_v15  ;;  %4954 = vadd.xlane.f32.xlu0 %v4953_v49  ;;  %v4943_v47 = vpop.xlane.xlu0 %4942 }
 0xdf6   :  { %7263 = vrsqrt.f32 %v4967_v7  ;;  %v4961_v18 = vmul.f32 0.0625, %v4943_v47 }
 0xdf7   :  { %v4970_v40 = vadd.f32 1e-05, %v4962_v10 }
 0xdf8   :  { %v4969_v36 = vadd.f32 1e-05, %v4961_v18  ;;  %v4952_v39 = vpop.xlane.xlu1 %4951 }
 0xdf9   :  { %7265 = vrsqrt.f32 %v4970_v40  ;;  %v4964_v61 = vmul.f32 0.0625, %v4952_v39  ;;  %v4949_v30 = vpop.xlane.xlu0 %4948 }
 0xdfa   :  { %7267 = vrsqrt.f32 %v4969_v36  ;;  %v4963_v46 = vmul.f32 0.0625, %v4949_v30 }
 0xdfb   :  { %v4972_v62 = vadd.f32 1e-05, %v4964_v61 }
 0xdfc   :  { %v4971_v25 = vadd.f32 1e-05, %v4963_v46 }
 0xdfd   :  { %7269 = vrsqrt.f32 %v4972_v62 }
 0xdfe   :  { %7271 = vrsqrt.f32 %v4971_v25 }
 0xdff   :  { %v7262_v6 = vpop.eup %7261 }
 0xe00   :  { %v7264_v43 = vpop.eup %7263  ;;  %v4984_v14 = vmul.f32 %v7262_v6, %v9399_v41 }
 0xe01   :  { %v4983_v22 = vmul.f32 %v7264_v43, %v9401_v0 }
 0xe02   :  { %v4998_v16 = vmul.f32 %v9450_v31, %v4984_v14 }
 0xe03   :  { %v7266_v9 = vpop.eup %7265  ;;  %v4997_v56 = vmul.f32 %v9450_v31, %v4983_v22 }
 0xe04   :  { %v7268_v38 = vpop.eup %7267  ;;  %v4986_v3 = vmul.f32 %v7266_v9, %v9403_v8  ;;  %v5012_v53 = vadd.f32 %v9457_v57, %v4998_v16 }
 0xe05   :  { %v4985_v13 = vmul.f32 %v7268_v38, %v9408_v54  ;;  %v5011_v41 = vadd.f32 %v9457_v57, %v4997_v56 }
 0xe06   :  { %v5028_v0 = vmul.f32 0.70710677, %v5012_v53  ;;  %v5000_v20 = vmul.f32 %v9450_v31, %v4986_v3  ;;  %v5020_v58 = vmul.f32 0.5, %v5012_v53 }
 0xe07   :  { %v7270_v35 = vpop.eup %7269  ;;  %v5027_v55 = vmul.f32 0.70710677, %v5011_v41  ;;  %v4999_v63 = vmul.f32 %v9450_v31, %v4985_v13  ;;  %v5019_v51 = vmul.f32 0.5, %v5011_v41 }
 0xe08   :  { %v7272_v19 = vpop.eup %7271  ;;  %v4988_v42 = vmul.f32 %v7270_v35, %v9413_v52  ;;  %7273 = verf.f32 %v5028_v0  ;;  %v5014_v12 = vadd.f32 %v9457_v57, %v5000_v20 }
 0xe09   :  { %v4987_v8 = vmul.f32 %v7272_v19, %v9418_v34  ;;  %7275 = verf.f32 %v5027_v55  ;;  %v5013_v54 = vadd.f32 %v9457_v57, %v4999_v63 }
 0xe0a   :  { %v5030_v24 = vmul.f32 0.70710677, %v5014_v12  ;;  %v5002_v50 = vmul.f32 %v9450_v31, %v4988_v42  ;;  %v5022_v23 = vmul.f32 0.5, %v5014_v12 }
 0xe0b   :  { %v5029_v17 = vmul.f32 0.70710677, %v5013_v54  ;;  %v5001_v5 = vmul.f32 %v9450_v31, %v4987_v8  ;;  %v5021_v11 = vmul.f32 0.5, %v5013_v54 }
 0xe0c   :  { %7277 = verf.f32 %v5030_v24  ;;  %v5016_v4 = vadd.f32 %v9457_v57, %v5002_v50 }
 0xe0d   :  { %7279 = verf.f32 %v5029_v17  ;;  %v5015_v52 = vadd.f32 %v9457_v57, %v5001_v5 }
 0xe0e   :  { %v5032_v1 = vmul.f32 0.70710677, %v5016_v4  ;;  %v5024_v18 = vmul.f32 0.5, %v5016_v4 }
 0xe0f   :  { %v5031_v32 = vmul.f32 0.70710677, %v5015_v52  ;;  %v5023_v10 = vmul.f32 0.5, %v5015_v52 }
 0xe10   :  { %7281 = verf.f32 %v5032_v1 }
 0xe11   :  { %7283 = verf.f32 %v5031_v32 }
 0xe12   :  { %v7274_v34 = vpop.eup %7273 }
 0xe13   :  { %v7276_v37 = vpop.eup %7275  ;;  %v5044_v28 = vadd.f32 1.0, %v7274_v34 }
 0xe14   :  { %v5043_v60 = vadd.f32 1.0, %v7276_v37 }
 0xe15   :  { %v5052_v33 = vmul.f32 %v5044_v28, %v5020_v58 }
 0xe16   :  { %v7278_v27 = vpop.eup %7277  ;;  %v5051_v59 = vmul.f32 %v5043_v60, %v5019_v51 }
 0xe17   :  { %v7280_v44 = vpop.eup %7279  ;;  %v5046_v26 = vadd.f32 1.0, %v7278_v27 }
 0xe18   :  { %5387 = vmatprep.mubr.msk.f32.mxu1 %vm193_vm2, %v5051_v59  ;;  %v5045_v2 = vadd.f32 1.0, %v7280_v44 }
 0xe19   :  { %5388 = vmatmul.mubr.msk.f32.vlgmr.msra.gmra.mrb[40].mxu1 %vm193_vm2, %v5052_v33  ;;  %v5054_v15 = vmul.f32 %v5046_v26, %v5022_v23 }
 0xe1a   :  { %v7282_v48 = vpop.eup %7281  ;;  %v5053_v21 = vmul.f32 %v5045_v2, %v5021_v11 }
 0xe1b   :  { %v7284_v7 = vpop.eup %7283  ;;  %v5048_v49 = vadd.f32 1.0, %v7282_v48 }
 0xe1c   :  { %5390 = vmatprep.mubr.msk.f32.mxu1 %vm193_vm2, %v5053_v21  ;;  %v5047_v47 = vadd.f32 1.0, %v7284_v7 }
 0xe1d   :  { %5391 = vmatmul.mubr.msk.f32.gmra.mrb[42].mxu1 %vm193_vm2, %v5054_v15  ;;  %v5056_v36 = vmul.f32 %v5048_v49, %v5024_v18 }
 0xe1e   :  { %v5055_v40 = vmul.f32 %v5047_v47, %v5023_v10 }
 0xe20   :  { %5393 = vmatprep.mubr.msk.f32.mxu1 %vm193_vm2, %v5055_v40 }
 0xe21   :  { %5394 = vmatmul.mubr.msk.f32.gmra.mrb[44].mxu1 %vm193_vm2, %v5056_v36 }
 0xe81   :  { %v4958_v39 = vpop.xlane.xlu1 %4957 }
 0xe82   :  { %v4966_v61 = vmul.f32 0.0625, %v4958_v39  ;;  %v4955_v30 = vpop.xlane.xlu0 %4954 }
 0xe83   :  { %v4965_v46 = vmul.f32 0.0625, %v4955_v30 }
 0xe84   :  { %v4974_v62 = vadd.f32 1e-05, %v4966_v61 }
 0xe85   :  { %v4973_v25 = vadd.f32 1e-05, %v4965_v46 }
 0xe86   :  { %7285 = vrsqrt.f32 %v4974_v62 }
 0xe87   :  { %7287 = vrsqrt.f32 %v4973_v25 }
 0xe90   :  { %v7286_v6 = vpop.eup %7285 }
 0xe91   :  { %v7288_v43 = vpop.eup %7287  ;;  %v4990_v14 = vmul.f32 %v7286_v6, %v9437_v29 }
 0xe92   :  { %v4989_v22 = vmul.f32 %v7288_v43, %v9439_v45 }
 0xe93   :  { %v5004_v16 = vmul.f32 %v9450_v31, %v4990_v14 }
 0xe94   :  { %v5003_v9 = vmul.f32 %v9450_v31, %v4989_v22  ;;  %v5279_v31 = vld [vmem:[%s9541_s17] ss:$0 sm:$0xff] }
 0xe95   :  { %v5018_v56 = vadd.f32 %v9457_v57, %v5004_v16 }
 0xe96   :  { %v5017_v38 = vadd.f32 %v9457_v57, %v5003_v9 }
 0xe97   :  { %v5034_v3 = vmul.f32 0.70710677, %v5018_v56  ;;  %v5026_v29 = vmul.f32 0.5, %v5018_v56 }
 0xe98   :  { %v5033_v53 = vmul.f32 0.70710677, %v5017_v38  ;;  %v5025_v20 = vmul.f32 0.5, %v5017_v38 }
 0xe99   :  { %7289 = verf.f32 %v5034_v3 }
 0xe9a   :  { %7291 = verf.f32 %v5033_v53 }
 0xea3   :  { %v7290_v13 = vpop.eup %7289 }
 0xea4   :  { %v7292_v41 = vpop.eup %7291  ;;  %v5050_v0 = vadd.f32 1.0, %v7290_v13 }
 0xea5   :  { %v5049_v35 = vadd.f32 1.0, %v7292_v41 }
 0xea6   :  { %v5058_v45 = vmul.f32 %v5050_v0, %v5026_v29 }
 0xea7   :  { %v5057_v55 = vmul.f32 %v5049_v35, %v5025_v20 }
 0xea9   :  { %5396 = vmatprep.mubr.msk.f32.mxu1 %vm193_vm2, %v5057_v55 }
 0xeaa   :  { %5397 = vmatmul.mubr.msk.f32.gmra.mrb[46].mxu1 %vm193_vm2, %v5058_v45 }
 0xeec   :  { %v5389_v57 = vpop.f32.mrb[40].mxu1 }
 0xeed   :  { %v5164_v63 = vadd.f32 %v5389_v57, %v5279_v31  ;;  %v5158_v19 = vpop.f32.mrb[41].mxu1 }
 0xeee   :  { %v5159_v42 = vadd.f32 %v5279_v31, %v5158_v19 }
 0xeef   :  { %7293 = vtanh.f32 %v5164_v63 }
 0xef0   :  { %7295 = vtanh.f32 %v5159_v42  ;;  %v5392_v12 = vpop.f32.mrb[42].mxu1 }
 0xef1   :  { %v5174_v8 = vadd.f32 %v5392_v12, %v5279_v31  ;;  %v5168_v54 = vpop.f32.mrb[43].mxu1 }
 0xef2   :  { %v5169_v24 = vadd.f32 %v5279_v31, %v5168_v54 }
 0xef3   :  { %7297 = vtanh.f32 %v5174_v8 }
 0xef4   :  { %7299 = vtanh.f32 %v5169_v24  ;;  %v5395_v50 = vpop.f32.mrb[44].mxu1 }
 0xef5   :  { %v5184_v17 = vadd.f32 %v5395_v50, %v5279_v31  ;;  %v5178_v5 = vpop.f32.mrb[45].mxu1 }
 0xef6   :  { %v5179_v4 = vadd.f32 %v5279_v31, %v5178_v5 }
 0xef7   :  { %7301 = vtanh.f32 %v5184_v17 }
 0xef8   :  { %7303 = vtanh.f32 %v5179_v4 }
 0xef9   :  { %v7294_v52 = vpop.eup %7293 }
 0xefa   :  { %v7296_v1 = vpop.eup %7295  ;;  %5207 = vst.msk [vmem:[%s9542_s18 + $0x8] sm:$0xff] %vm5205_vm4, %v7294_v52 }
 0xefb   :  { %5206 = vst.msk [vmem:[%s9542_s18] sm:$0xff] %vm5205_vm4, %v7296_v1 }
 0xefd   :  { %v7298_v32 = vpop.eup %7297 }
 0xefe   :  { %v7300_v34 = vpop.eup %7299  ;;  %5209 = vst.msk [vmem:[%s9542_s18 + $0x18] sm:$0xff] %vm5205_vm4, %v7298_v32 }
 0xeff   :  { %5208 = vst.msk [vmem:[%s9542_s18 + $0x10] sm:$0xff] %vm5205_vm4, %v7300_v34 }
 0xf01   :  { %v7302_v37 = vpop.eup %7301 }
 0xf02   :  { %v7304_v28 = vpop.eup %7303  ;;  %5211 = vst.msk [vmem:[%s9542_s18 + $0x28] sm:$0xff] %vm5205_vm4, %v7302_v37 }
 0xf03   :  { %5210 = vst.msk [vmem:[%s9542_s18 + $0x20] sm:$0xff] %vm5205_vm4, %v7304_v28 }
 0xf7d   :  { %v5398_v51 = vpop.f32.mrb[46].mxu1 }
 0xf7e   :  { %v5194_v60 = vadd.f32 %v5398_v51, %v5279_v31  ;;  %v5188_v58 = vpop.f32.mrb[47].mxu1 }
 0xf7f   :  { %v5189_v27 = vadd.f32 %v5279_v31, %v5188_v58 }
 0xf80   :  { %7305 = vtanh.f32 %v5194_v60 }
 0xf81   :  { %7307 = vtanh.f32 %v5189_v27 }
 0xf8a   :  { %v7306_v59 = vpop.eup %7305 }
 0xf8b   :  { %v7308_v44 = vpop.eup %7307  ;;  %5213 = vst.msk [vmem:[%s9542_s18 + $0x38] sm:$0xff] %vm5205_vm4, %v7306_v59 }
 0xf8c   :  { %5212 = vst.msk [vmem:[%s9542_s18 + $0x30] sm:$0xff] %vm5205_vm4, %v7308_v44 }
 0xf8d   :  { %5218 = vsyncpa [#allocation4], 1 }
 0xf8e   :  { %5219 = vsyncpa [#allocation6], 1 }
 0xf8f   :  { %5220 = vsyncpa [#allocation9], 1 }

</bundles_post_ra>
